<compile_context>
chip_gen: v7x
topology: tpu7x:2x2x1
jax: 0.10.0
libtpu: 0.0.40
codegen_flags: <defaults>
</compile_context>

<pallas_src>
import functools

import jax
import jax.numpy as jnp
import numpy as np
from jax.experimental import pallas as pl
from jax.experimental.pallas import tpu as pltpu


def _round_up(x, m):
    return ((x + m - 1) // m) * m


# ----------------------------------------------------------------------------
# Pallas kernels
# ----------------------------------------------------------------------------
def _nin_block_kernel(x_ref, w1_ref, b1_ref, w2_ref, b2_ref, w3_ref, b3_ref,
                      o_ref, acc_ref):
    """Fused NiN block: (im2col @ W1) accumulated over K tiles, then
    bias1+ReLU -> @W2 + bias2 + ReLU -> @W3 + bias3 + ReLU, single HBM write."""
    k = pl.program_id(1)

    @pl.when(k == 0)
    def _init():
        acc_ref[...] = jnp.zeros_like(acc_ref)

    acc_ref[...] += jnp.dot(x_ref[...], w1_ref[...],
                            preferred_element_type=jnp.float32)

    @pl.when(k == pl.num_programs(1) - 1)
    def _epilogue():
        h = jnp.maximum(acc_ref[...] + b1_ref[...], 0.0)              # conv1 bias+ReLU
        h = jnp.dot(h.astype(w2_ref.dtype), w2_ref[...],
                    preferred_element_type=jnp.float32)
        h = jnp.maximum(h + b2_ref[...], 0.0)                         # 1x1 conv2
        h = jnp.dot(h.astype(w3_ref.dtype), w3_ref[...],
                    preferred_element_type=jnp.float32)
        h = jnp.maximum(h + b3_ref[...], 0.0)                         # 1x1 conv3
        o_ref[...] = h.astype(o_ref.dtype)


def _maxpool3x3_dense_kernel(x_ref, o_ref):
    # Dense (stride-1) 3x3 max via a tree reduction on static contiguous
    # slices of a single VMEM load; the stride-2 decimation is done by the
    # caller with a free strided slice (fuses with the next pad/im2col).
    _, hd, wd, _ = o_ref.shape
    x = x_ref[...]
    taps = [x[:, i:i + hd, j:j + wd, :] for i in range(3) for j in range(3)]
    while len(taps) > 1:
        nxt = [jnp.maximum(taps[t], taps[t + 1])
               for t in range(0, len(taps) - 1, 2)]
        if len(taps) % 2:
            nxt.append(taps[-1])
        taps = nxt
    o_ref[...] = taps[0]


def _global_avg_kernel(x_ref, o_ref):
    # (N, H*W, C) -> (N, C): vector reduction over the spatial axis, f32 accum.
    o_ref[...] = jnp.mean(x_ref[...].astype(jnp.float32), axis=1).astype(o_ref.dtype)


# ----------------------------------------------------------------------------
# Glue + wrappers
# ----------------------------------------------------------------------------
def _im2col(x, kh, kw, stride, pad):
    """NHWC -> (N*Ho*Wo, kh*kw*C) patches (plain-JAX glue; fused under jit)."""
    # TODO(synk): stream the kh*kw taps inside the block kernel (shifted window
    # reads of the padded activation) to avoid materializing im2col in HBM.
    n, _, _, c = x.shape
    if pad:
        x = jnp.pad(x, ((0, 0), (pad, pad), (pad, pad), (0, 0)))
    hp, wp = x.shape[1], x.shape[2]
    ho = (hp - kh) // stride + 1
    wo = (wp - kw) // stride + 1
    cols = []
    for i in range(kh):
        for j in range(kw):
            cols.append(x[:, i:i + stride * (ho - 1) + 1:stride,
                          j:j + stride * (wo - 1) + 1:stride, :])
    patches = jnp.stack(cols, axis=3).reshape(n * ho * wo, kh * kw * c)
    return patches, ho, wo


def nin_block(x, p, cfg):
    """One fused NiN block: conv(kxk,s,pad)+ReLU -> 1x1 conv+ReLU -> 1x1 conv+ReLU."""
    n = x.shape[0]
    patches, ho, wo = _im2col(x, cfg["kh"], cfg["kw"], cfg["stride"], cfg["pad"])
    m, k = patches.shape
    kp, np_ = p["w1"].shape
    tk = cfg["tk"]
    tm = min(256, _round_up(m, 16))            # multiple of 16 (bf16 sublane pack)
    mp = _round_up(m, tm)
    patches = jnp.pad(patches, ((0, mp - m), (0, kp - k))).astype(jnp.bfloat16)

    out = pl.pallas_call(
        _nin_block_kernel,
        out_shape=jax.ShapeDtypeStruct((mp, np_), jnp.bfloat16),
        grid_spec=pltpu.PrefetchScalarGridSpec(
            num_scalar_prefetch=0,
            grid=(mp // tm, kp // tk),
            in_specs=[
                pl.BlockSpec((tm, tk), lambda i, kk: (i, kk)),      # patches tile
                pl.BlockSpec((tk, np_), lambda i, kk: (kk, 0)),     # W1 K-slice
                pl.BlockSpec((1, np_), lambda i, kk: (0, 0)),       # b1
                pl.BlockSpec((np_, np_), lambda i, kk: (0, 0)),     # W2 (1x1)
                pl.BlockSpec((1, np_), lambda i, kk: (0, 0)),       # b2
                pl.BlockSpec((np_, np_), lambda i, kk: (0, 0)),     # W3 (1x1)
                pl.BlockSpec((1, np_), lambda i, kk: (0, 0)),       # b3
            ],
            out_specs=pl.BlockSpec((tm, np_), lambda i, kk: (i, 0)),
            scratch_shapes=[pltpu.VMEM((tm, np_), jnp.float32)],
        ),
        compiler_params=pltpu.CompilerParams(
            dimension_semantics=("parallel", "arbitrary")),
    )(patches, p["w1"], p["b1"], p["w2"], p["b2"], p["w3"], p["b3"])

    return out[:m, :cfg["cout"]].reshape(n, ho, wo, cfg["cout"])


def maxpool_3x3_s2(x):
    """MaxPool2d(kernel_size=3, stride=2), NHWC, PyTorch floor mode."""
    n, h, w, c = x.shape
    dense = pl.pallas_call(
        _maxpool3x3_dense_kernel,
        out_shape=jax.ShapeDtypeStruct((n, h - 2, w - 2, c), x.dtype),
    )(x)
    return dense[:, ::2, ::2, :]       # stride-2 decimation (fuses with next pad)


def global_avg_pool_flatten(x):
    """AdaptiveAvgPool2d((1,1)) + Flatten: NHWC -> (N, C)."""
    n, h, w, c = x.shape
    xr = x.reshape(n, h * w, c)
    return pl.pallas_call(
        _global_avg_kernel,
        out_shape=jax.ShapeDtypeStruct((n, c), jnp.float32),
    )(xr)


# ----------------------------------------------------------------------------
# Static configs + one-time weight preparation (transpose / pad / bf16 cast)
# ----------------------------------------------------------------------------
def make_configs(input_channels, output_size):
    def cfg(cin, cout, kh, kw, stride, pad):
        k = kh * kw * cin
        tk = min(512, _round_up(k, 128))
        return dict(cin=cin, cout=cout, kh=kh, kw=kw, stride=stride, pad=pad,
                    k=k, kp=_round_up(k, tk), tk=tk, np=_round_up(cout, 128))
    return dict(
        b1=cfg(input_channels, 96, 11, 11, 4, 0),
        b2=cfg(96, 256, 5, 5, 1, 2),
        b3=cfg(256, 384, 3, 3, 1, 1),
        b4=cfg(384, output_size, 3, 3, 1, 1),
    )


def prepare_params(raw_params, cfgs):
    """Pre-transpose / pre-pad / pre-cast weights once (bf16 MXU operands, f32 biases)."""
    prepared = {}
    for name, cfg in cfgs.items():
        (w1, b1), (w2, b2), (w3, b3) = raw_params[name]
        np_ = cfg["np"]

        def mat(w, rows, rows_padded):
            m = jnp.transpose(w, (2, 3, 1, 0)).reshape(rows, w.shape[0])
            m = jnp.pad(m, ((0, rows_padded - rows), (0, np_ - w.shape[0])))
            return m.astype(jnp.bfloat16)

        def vec(b):
            return jnp.pad(b, (0, np_ - b.shape[0])).reshape(1, np_).astype(jnp.float32)

        prepared[name] = dict(
            w1=mat(w1, cfg["k"], cfg["kp"]), b1=vec(b1),
            w2=mat(w2, cfg["cout"], np_), b2=vec(b2),
            w3=mat(w3, cfg["cout"], np_), b3=vec(b3),
        )
    return prepared


# ----------------------------------------------------------------------------
# Model forward
# ----------------------------------------------------------------------------
def nin_forward(x_nchw, params, cfgs):
    x = jnp.transpose(x_nchw, (0, 2, 3, 1)).astype(jnp.float32)    # NCHW -> NHWC
    x = nin_block(x, params["b1"], cfgs["b1"])
    x = maxpool_3x3_s2(x)
    x = nin_block(x, params["b2"], cfgs["b2"])
    x = maxpool_3x3_s2(x)
    x = nin_block(x, params["b3"], cfgs["b3"])
    x = maxpool_3x3_s2(x)
    # Dropout(p=0.5): identity at inference time.
    # TODO(synk): training-mode dropout (random mask + 2x scaling) not implemented.
    x = nin_block(x, params["b4"], cfgs["b4"])
    # TODO(synk): the b4 block + global average pool could be fused into one
    # kernel writing only the (N, num_classes) logits.
    return global_avg_pool_flatten(x)       # AdaptiveAvgPool2d((1,1)) + Flatten


# ----------------------------------------------------------------------------
# Deterministic parameter init (PyTorch Conv2d default-ish uniform bounds)
# ----------------------------------------------------------------------------
def init_conv(key, cout, cin, kh, kw):
    wkey, bkey = jax.random.split(key)
    fan_in = cin * kh * kw
    bound = 1.0 / np.sqrt(fan_in)
    w = jax.random.uniform(wkey, (cout, cin, kh, kw), jnp.float32, -bound, bound)
    b = jax.random.uniform(bkey, (cout,), jnp.float32, -bound, bound)
    return w, b


if __name__ == "__main__":
    input_channels, output_size = 3, 10
    key = jax.random.PRNGKey(0)
    keys = jax.random.split(key, 13)

    raw_params = {
        "b1": (init_conv(keys[0], 96, input_channels, 11, 11),
               init_conv(keys[1], 96, 96, 1, 1),
               init_conv(keys[2], 96, 96, 1, 1)),
        "b2": (init_conv(keys[3], 256, 96, 5, 5),
               init_conv(keys[4], 256, 256, 1, 1),
               init_conv(keys[5], 256, 256, 1, 1)),
        "b3": (init_conv(keys[6], 384, 256, 3, 3),
               init_conv(keys[7], 384, 384, 1, 1),
               init_conv(keys[8], 384, 384, 1, 1)),
        "b4": (init_conv(keys[9], output_size, 384, 3, 3),
               init_conv(keys[10], output_size, output_size, 1, 1),
               init_conv(keys[11], output_size, output_size, 1, 1)),
    }

    cfgs = make_configs(input_channels, output_size)
    params = prepare_params(raw_params, cfgs)

    # Smallest spatial size that survives the 11x11/s4 conv and three 3x3/s2 pools.
    x = jax.random.normal(keys[12], (2, input_channels, 67, 67), jnp.float32)

    fwd = jax.jit(functools.partial(nin_forward, cfgs=cfgs))
    out = jax.block_until_ready(fwd(x, params))
    assert out.shape == (2, output_size), out.shape
    assert bool(jnp.all(jnp.isfinite(out)))
    print("KERNEL_OK")
</pallas_src>

<mosaic_0001>
module attributes {stable_mosaic.version = 11 : i64} {
  func.func @_nin_block_kernel(%arg0: i32, %arg1: i32, %arg2: memref<256x384xbf16, #tpu.memory_space<vmem>>, %arg3: memref<384x128xbf16, #tpu.memory_space<vmem>>, %arg4: memref<1x128xf32, #tpu.memory_space<vmem>>, %arg5: memref<128x128xbf16, #tpu.memory_space<vmem>>, %arg6: memref<1x128xf32, #tpu.memory_space<vmem>>, %arg7: memref<128x128xbf16, #tpu.memory_space<vmem>>, %arg8: memref<1x128xf32, #tpu.memory_space<vmem>>, %arg9: memref<256x128xbf16, #tpu.memory_space<vmem>>, %arg10: memref<256x128xf32, #tpu.memory_space<vmem>>) attributes {dimension_semantics = [#tpu.dimension_semantics<parallel>, #tpu.dimension_semantics<arbitrary>], iteration_bounds = array<i64: 2, 1>, scalar_prefetch = 0 : i64, scratch_operands = 1 : i64, tpu.core_type = #tpu.core_type<tc>, window_params = [{transform_indices = @transform_0, window_bounds = array<i64: 256, 384>}, {transform_indices = @transform_1, window_bounds = array<i64: 384, 128>}, {pipeline_mode = #tpu.pipeline_mode<synchronous>, transform_indices = @transform_2, window_bounds = array<i64: 1, 128>}, {pipeline_mode = #tpu.pipeline_mode<synchronous>, transform_indices = @transform_3, window_bounds = array<i64: 128, 128>}, {pipeline_mode = #tpu.pipeline_mode<synchronous>, transform_indices = @transform_4, window_bounds = array<i64: 1, 128>}, {pipeline_mode = #tpu.pipeline_mode<synchronous>, transform_indices = @transform_5, window_bounds = array<i64: 128, 128>}, {pipeline_mode = #tpu.pipeline_mode<synchronous>, transform_indices = @transform_6, window_bounds = array<i64: 1, 128>}, {transform_indices = @transform_7, window_bounds = array<i64: 256, 128>}]} {
    %c0_i32 = arith.constant 0 : i32
    %0 = arith.cmpi eq, %arg1, %c0_i32 : i32
    %1 = arith.extui %0 : i1 to i32
    %c0_i32_0 = arith.constant 0 : i32
    %2 = arith.cmpi ne, %1, %c0_i32_0 : i32
    scf.if %2 {
      %cst_10 = arith.constant 0.000000e+00 : f32
      %12 = vector.broadcast %cst_10 : f32 to vector<256x128xf32>
      %c0_11 = arith.constant 0 : index
      %c0_12 = arith.constant 0 : index
      %13 = vector.load %arg10[%c0_11, %c0_12] : memref<256x128xf32, #tpu.memory_space<vmem>>, vector<256x128xf32>
      tpu.vector_store %arg10[%c0_11, %c0_12], %12 {strides = array<i32>} : memref<256x128xf32, #tpu.memory_space<vmem>>, vector<256x128xf32>,
    } else {
    }
    %c0 = arith.constant 0 : index
    %c0_1 = arith.constant 0 : index
    %3 = vector.load %arg10[%c0, %c0_1] : memref<256x128xf32, #tpu.memory_space<vmem>>, vector<256x128xf32>
    %c0_2 = arith.constant 0 : index
    %c0_3 = arith.constant 0 : index
    %4 = vector.load %arg2[%c0_2, %c0_3] : memref<256x384xbf16, #tpu.memory_space<vmem>>, vector<256x384xbf16>
    %c0_4 = arith.constant 0 : index
    %c0_5 = arith.constant 0 : index
    %5 = vector.load %arg3[%c0_4, %c0_5] : memref<384x128xbf16, #tpu.memory_space<vmem>>, vector<384x128xbf16>
    %cst = arith.constant dense<0.000000e+00> : vector<256x128xf32>
    %6 = tpu.matmul %4, %5, %cst {dimension_numbers = #tpu.dot_dimension_numbers<[1], [0], [0], [1], [0, 0, 1, 1], [], []>} : vector<256x384xbf16>, vector<384x128xbf16>, vector<256x128xf32> -> vector<256x128xf32>
    %7 = arith.addf %3, %6 : vector<256x128xf32>
    %c0_6 = arith.constant 0 : index
    %c0_7 = arith.constant 0 : index
    %8 = vector.load %arg10[%c0_6, %c0_7] : memref<256x128xf32, #tpu.memory_space<vmem>>, vector<256x128xf32>
    tpu.vector_store %arg10[%c0_6, %c0_7], %7 {strides = array<i32>} : memref<256x128xf32, #tpu.memory_space<vmem>>, vector<256x128xf32>,
    %c0_i32_8 = arith.constant 0 : i32
    %9 = arith.cmpi eq, %arg1, %c0_i32_8 : i32
    %10 = arith.extui %9 : i1 to i32
    %c0_i32_9 = arith.constant 0 : i32
    %11 = arith.cmpi ne, %10, %c0_i32_9 : i32
    scf.if %11 {
      %c0_10 = arith.constant 0 : index
      %c0_11 = arith.constant 0 : index
      %12 = vector.load %arg10[%c0_10, %c0_11] : memref<256x128xf32, #tpu.memory_space<vmem>>, vector<256x128xf32>
      %c0_12 = arith.constant 0 : index
      %c0_13 = arith.constant 0 : index
      %13 = vector.load %arg4[%c0_12, %c0_13] : memref<1x128xf32, #tpu.memory_space<vmem>>, vector<1x128xf32>
      %14 = vector.broadcast %13 : vector<1x128xf32> to vector<256x128xf32>
      %15 = arith.addf %12, %14 : vector<256x128xf32>
      %cst_14 = arith.constant 0.000000e+00 : f32
      %16 = vector.broadcast %cst_14 : f32 to vector<256x128xf32>
      %17 = arith.maximumf %15, %16 : vector<256x128xf32>
      %18 = arith.truncf %17 : vector<256x128xf32> to vector<256x128xbf16>
      %c0_15 = arith.constant 0 : index
      %c0_16 = arith.constant 0 : index
      %19 = vector.load %arg5[%c0_15, %c0_16] : memref<128x128xbf16, #tpu.memory_space<vmem>>, vector<128x128xbf16>
      %cst_17 = arith.constant dense<0.000000e+00> : vector<256x128xf32>
      %20 = tpu.matmul %18, %19, %cst_17 {dimension_numbers = #tpu.dot_dimension_numbers<[1], [0], [0], [1], [0, 0, 1, 1], [], []>} : vector<256x128xbf16>, vector<128x128xbf16>, vector<256x128xf32> -> vector<256x128xf32>
      %c0_18 = arith.constant 0 : index
      %c0_19 = arith.constant 0 : index
      %21 = vector.load %arg6[%c0_18, %c0_19] : memref<1x128xf32, #tpu.memory_space<vmem>>, vector<1x128xf32>
      %22 = vector.broadcast %21 : vector<1x128xf32> to vector<256x128xf32>
      %23 = arith.addf %20, %22 : vector<256x128xf32>
      %cst_20 = arith.constant 0.000000e+00 : f32
      %24 = vector.broadcast %cst_20 : f32 to vector<256x128xf32>
      %25 = arith.maximumf %23, %24 : vector<256x128xf32>
      %26 = arith.truncf %25 : vector<256x128xf32> to vector<256x128xbf16>
      %c0_21 = arith.constant 0 : index
      %c0_22 = arith.constant 0 : index
      %27 = vector.load %arg7[%c0_21, %c0_22] : memref<128x128xbf16, #tpu.memory_space<vmem>>, vector<128x128xbf16>
      %cst_23 = arith.constant dense<0.000000e+00> : vector<256x128xf32>
      %28 = tpu.matmul %26, %27, %cst_23 {dimension_numbers = #tpu.dot_dimension_numbers<[1], [0], [0], [1], [0, 0, 1, 1], [], []>} : vector<256x128xbf16>, vector<128x128xbf16>, vector<256x128xf32> -> vector<256x128xf32>
      %c0_24 = arith.constant 0 : index
      %c0_25 = arith.constant 0 : index
      %29 = vector.load %arg8[%c0_24, %c0_25] : memref<1x128xf32, #tpu.memory_space<vmem>>, vector<1x128xf32>
      %30 = vector.broadcast %29 : vector<1x128xf32> to vector<256x128xf32>
      %31 = arith.addf %28, %30 : vector<256x128xf32>
      %cst_26 = arith.constant 0.000000e+00 : f32
      %32 = vector.broadcast %cst_26 : f32 to vector<256x128xf32>
      %33 = arith.maximumf %31, %32 : vector<256x128xf32>
      %34 = arith.truncf %33 : vector<256x128xf32> to vector<256x128xbf16>
      %c0_27 = arith.constant 0 : index
      %c0_28 = arith.constant 0 : index
      %35 = vector.load %arg9[%c0_27, %c0_28] : memref<256x128xbf16, #tpu.memory_space<vmem>>, vector<256x128xbf16>
      tpu.vector_store %arg9[%c0_27, %c0_28], %34 {strides = array<i32>} : memref<256x128xbf16, #tpu.memory_space<vmem>>, vector<256x128xbf16>,
    } else {
    }
    return
  }
  func.func @transform_0(%arg0: i32, %arg1: i32) -> (i32, i32) {
    %c0_i32 = arith.constant 0 : i32
    return %arg0, %arg1 : i32, i32
  }
  func.func @transform_1(%arg0: i32, %arg1: i32) -> (i32, i32) {
    %c0_i32 = arith.constant 0 : i32
    %c0_i32_0 = arith.constant 0 : i32
    return %arg1, %c0_i32 : i32, i32
  }
  func.func @transform_2(%arg0: i32, %arg1: i32) -> (i32, i32) {
    %c0_i32 = arith.constant 0 : i32
    %c0_i32_0 = arith.constant 0 : i32
    %c0_i32_1 = arith.constant 0 : i32
    return %c0_i32, %c0_i32_0 : i32, i32
  }
  func.func @transform_3(%arg0: i32, %arg1: i32) -> (i32, i32) {
    %c0_i32 = arith.constant 0 : i32
    %c0_i32_0 = arith.constant 0 : i32
    %c0_i32_1 = arith.constant 0 : i32
    return %c0_i32, %c0_i32_0 : i32, i32
  }
  func.func @transform_4(%arg0: i32, %arg1: i32) -> (i32, i32) {
    %c0_i32 = arith.constant 0 : i32
    %c0_i32_0 = arith.constant 0 : i32
    %c0_i32_1 = arith.constant 0 : i32
    return %c0_i32, %c0_i32_0 : i32, i32
  }
  func.func @transform_5(%arg0: i32, %arg1: i32) -> (i32, i32) {
    %c0_i32 = arith.constant 0 : i32
    %c0_i32_0 = arith.constant 0 : i32
    %c0_i32_1 = arith.constant 0 : i32
    return %c0_i32, %c0_i32_0 : i32, i32
  }
  func.func @transform_6(%arg0: i32, %arg1: i32) -> (i32, i32) {
    %c0_i32 = arith.constant 0 : i32
    %c0_i32_0 = arith.constant 0 : i32
    %c0_i32_1 = arith.constant 0 : i32
    return %c0_i32, %c0_i32_0 : i32, i32
  }
  func.func @transform_7(%arg0: i32, %arg1: i32) -> (i32, i32) {
    %c0_i32 = arith.constant 0 : i32
    %c0_i32_0 = arith.constant 0 : i32
    return %arg0, %c0_i32 : i32, i32
  }
}

module attributes {stable_mosaic.version = 11 : i64} {
  func.func @_maxpool3x3_dense_kernel(%arg0: memref<2x15x15x96xbf16, #tpu.memory_space<vmem>>, %arg1: memref<2x13x13x96xbf16, #tpu.memory_space<vmem>>) attributes {dimension_semantics = [], scalar_prefetch = 0 : i64, scratch_operands = 0 : i64, tpu.core_type = #tpu.core_type<tc>} {
    %c0 = arith.constant 0 : index
    %c0_0 = arith.constant 0 : index
    %c0_1 = arith.constant 0 : index
    %c0_2 = arith.constant 0 : index
    %0 = vector.load %arg0[%c0, %c0_0, %c0_1, %c0_2] : memref<2x15x15x96xbf16, #tpu.memory_space<vmem>>, vector<2x15x15x96xbf16>
    %1 = vector.extract_strided_slice %0 {offsets = [0, 0, 0, 0], sizes = [2, 13, 13, 96], strides = [1, 1, 1, 1]} : vector<2x15x15x96xbf16> to vector<2x13x13x96xbf16>
    %2 = vector.extract_strided_slice %0 {offsets = [0, 0, 1, 0], sizes = [2, 13, 13, 96], strides = [1, 1, 1, 1]} : vector<2x15x15x96xbf16> to vector<2x13x13x96xbf16>
    %3 = vector.extract_strided_slice %0 {offsets = [0, 0, 2, 0], sizes = [2, 13, 13, 96], strides = [1, 1, 1, 1]} : vector<2x15x15x96xbf16> to vector<2x13x13x96xbf16>
    %4 = vector.extract_strided_slice %0 {offsets = [0, 1, 0, 0], sizes = [2, 13, 13, 96], strides = [1, 1, 1, 1]} : vector<2x15x15x96xbf16> to vector<2x13x13x96xbf16>
    %5 = vector.extract_strided_slice %0 {offsets = [0, 1, 1, 0], sizes = [2, 13, 13, 96], strides = [1, 1, 1, 1]} : vector<2x15x15x96xbf16> to vector<2x13x13x96xbf16>
    %6 = vector.extract_strided_slice %0 {offsets = [0, 1, 2, 0], sizes = [2, 13, 13, 96], strides = [1, 1, 1, 1]} : vector<2x15x15x96xbf16> to vector<2x13x13x96xbf16>
    %7 = vector.extract_strided_slice %0 {offsets = [0, 2, 0, 0], sizes = [2, 13, 13, 96], strides = [1, 1, 1, 1]} : vector<2x15x15x96xbf16> to vector<2x13x13x96xbf16>
    %8 = vector.extract_strided_slice %0 {offsets = [0, 2, 1, 0], sizes = [2, 13, 13, 96], strides = [1, 1, 1, 1]} : vector<2x15x15x96xbf16> to vector<2x13x13x96xbf16>
    %9 = vector.extract_strided_slice %0 {offsets = [0, 2, 2, 0], sizes = [2, 13, 13, 96], strides = [1, 1, 1, 1]} : vector<2x15x15x96xbf16> to vector<2x13x13x96xbf16>
    %10 = arith.maximumf %1, %2 : vector<2x13x13x96xbf16>
    %11 = arith.maximumf %3, %4 : vector<2x13x13x96xbf16>
    %12 = arith.maximumf %5, %6 : vector<2x13x13x96xbf16>
    %13 = arith.maximumf %7, %8 : vector<2x13x13x96xbf16>
    %14 = arith.maximumf %10, %11 : vector<2x13x13x96xbf16>
    %15 = arith.maximumf %12, %13 : vector<2x13x13x96xbf16>
    %16 = arith.maximumf %14, %15 : vector<2x13x13x96xbf16>
    %17 = arith.maximumf %16, %9 : vector<2x13x13x96xbf16>
    %c0_3 = arith.constant 0 : index
    %c0_4 = arith.constant 0 : index
    %c0_5 = arith.constant 0 : index
    %c0_6 = arith.constant 0 : index
    %18 = vector.load %arg1[%c0_3, %c0_4, %c0_5, %c0_6] : memref<2x13x13x96xbf16, #tpu.memory_space<vmem>>, vector<2x13x13x96xbf16>
    tpu.vector_store %arg1[%c0_3, %c0_4, %c0_5, %c0_6], %17 {strides = array<i32>} : memref<2x13x13x96xbf16, #tpu.memory_space<vmem>>, vector<2x13x13x96xbf16>,
    return
  }
}

module attributes {stable_mosaic.version = 11 : i64} {
  func.func @_nin_block_kernel(%arg0: i32, %arg1: i32, %arg2: memref<112x512xbf16, #tpu.memory_space<vmem>>, %arg3: memref<512x256xbf16, #tpu.memory_space<vmem>>, %arg4: memref<1x256xf32, #tpu.memory_space<vmem>>, %arg5: memref<256x256xbf16, #tpu.memory_space<vmem>>, %arg6: memref<1x256xf32, #tpu.memory_space<vmem>>, %arg7: memref<256x256xbf16, #tpu.memory_space<vmem>>, %arg8: memref<1x256xf32, #tpu.memory_space<vmem>>, %arg9: memref<112x256xbf16, #tpu.memory_space<vmem>>, %arg10: memref<112x256xf32, #tpu.memory_space<vmem>>) attributes {dimension_semantics = [#tpu.dimension_semantics<parallel>, #tpu.dimension_semantics<arbitrary>], iteration_bounds = array<i64: 1, 5>, scalar_prefetch = 0 : i64, scratch_operands = 1 : i64, tpu.core_type = #tpu.core_type<tc>, window_params = [{transform_indices = @transform_0, window_bounds = array<i64: 112, 512>}, {transform_indices = @transform_1, window_bounds = array<i64: 512, 256>}, {pipeline_mode = #tpu.pipeline_mode<synchronous>, transform_indices = @transform_2, window_bounds = array<i64: 1, 256>}, {pipeline_mode = #tpu.pipeline_mode<synchronous>, transform_indices = @transform_3, window_bounds = array<i64: 256, 256>}, {pipeline_mode = #tpu.pipeline_mode<synchronous>, transform_indices = @transform_4, window_bounds = array<i64: 1, 256>}, {pipeline_mode = #tpu.pipeline_mode<synchronous>, transform_indices = @transform_5, window_bounds = array<i64: 256, 256>}, {pipeline_mode = #tpu.pipeline_mode<synchronous>, transform_indices = @transform_6, window_bounds = array<i64: 1, 256>}, {transform_indices = @transform_7, window_bounds = array<i64: 112, 256>}]} {
    %c0_i32 = arith.constant 0 : i32
    %0 = arith.cmpi eq, %arg1, %c0_i32 : i32
    %1 = arith.extui %0 : i1 to i32
    %c0_i32_0 = arith.constant 0 : i32
    %2 = arith.cmpi ne, %1, %c0_i32_0 : i32
    scf.if %2 {
      %cst_9 = arith.constant 0.000000e+00 : f32
      %12 = vector.broadcast %cst_9 : f32 to vector<112x256xf32>
      %c0_10 = arith.constant 0 : index
      %c0_11 = arith.constant 0 : index
      %13 = vector.load %arg10[%c0_10, %c0_11] : memref<112x256xf32, #tpu.memory_space<vmem>>, vector<112x256xf32>
      tpu.vector_store %arg10[%c0_10, %c0_11], %12 {strides = array<i32>} : memref<112x256xf32, #tpu.memory_space<vmem>>, vector<112x256xf32>,
    } else {
    }
    %c0 = arith.constant 0 : index
    %c0_1 = arith.constant 0 : index
    %3 = vector.load %arg10[%c0, %c0_1] : memref<112x256xf32, #tpu.memory_space<vmem>>, vector<112x256xf32>
    %c0_2 = arith.constant 0 : index
    %c0_3 = arith.constant 0 : index
    %4 = vector.load %arg2[%c0_2, %c0_3] : memref<112x512xbf16, #tpu.memory_space<vmem>>, vector<112x512xbf16>
    %c0_4 = arith.constant 0 : index
    %c0_5 = arith.constant 0 : index
    %5 = vector.load %arg3[%c0_4, %c0_5] : memref<512x256xbf16, #tpu.memory_space<vmem>>, vector<512x256xbf16>
    %cst = arith.constant dense<0.000000e+00> : vector<112x256xf32>
    %6 = tpu.matmul %4, %5, %cst {dimension_numbers = #tpu.dot_dimension_numbers<[1], [0], [0], [1], [0, 0, 1, 1], [], []>} : vector<112x512xbf16>, vector<512x256xbf16>, vector<112x256xf32> -> vector<112x256xf32>
    %7 = arith.addf %3, %6 : vector<112x256xf32>
    %c0_6 = arith.constant 0 : index
    %c0_7 = arith.constant 0 : index
    %8 = vector.load %arg10[%c0_6, %c0_7] : memref<112x256xf32, #tpu.memory_space<vmem>>, vector<112x256xf32>
    tpu.vector_store %arg10[%c0_6, %c0_7], %7 {strides = array<i32>} : memref<112x256xf32, #tpu.memory_space<vmem>>, vector<112x256xf32>,
    %c4_i32 = arith.constant 4 : i32
    %9 = arith.cmpi eq, %arg1, %c4_i32 : i32
    %10 = arith.extui %9 : i1 to i32
    %c0_i32_8 = arith.constant 0 : i32
    %11 = arith.cmpi ne, %10, %c0_i32_8 : i32
    scf.if %11 {
      %c0_9 = arith.constant 0 : index
      %c0_10 = arith.constant 0 : index
      %12 = vector.load %arg10[%c0_9, %c0_10] : memref<112x256xf32, #tpu.memory_space<vmem>>, vector<112x256xf32>
      %c0_11 = arith.constant 0 : index
      %c0_12 = arith.constant 0 : index
      %13 = vector.load %arg4[%c0_11, %c0_12] : memref<1x256xf32, #tpu.memory_space<vmem>>, vector<1x256xf32>
      %14 = vector.broadcast %13 : vector<1x256xf32> to vector<112x256xf32>
      %15 = arith.addf %12, %14 : vector<112x256xf32>
      %cst_13 = arith.constant 0.000000e+00 : f32
      %16 = vector.broadcast %cst_13 : f32 to vector<112x256xf32>
      %17 = arith.maximumf %15, %16 : vector<112x256xf32>
      %18 = arith.truncf %17 : vector<112x256xf32> to vector<112x256xbf16>
      %c0_14 = arith.constant 0 : index
      %c0_15 = arith.constant 0 : index
      %19 = vector.load %arg5[%c0_14, %c0_15] : memref<256x256xbf16, #tpu.memory_space<vmem>>, vector<256x256xbf16>
      %cst_16 = arith.constant dense<0.000000e+00> : vector<112x256xf32>
      %20 = tpu.matmul %18, %19, %cst_16 {dimension_numbers = #tpu.dot_dimension_numbers<[1], [0], [0], [1], [0, 0, 1, 1], [], []>} : vector<112x256xbf16>, vector<256x256xbf16>, vector<112x256xf32> -> vector<112x256xf32>
      %c0_17 = arith.constant 0 : index
      %c0_18 = arith.constant 0 : index
      %21 = vector.load %arg6[%c0_17, %c0_18] : memref<1x256xf32, #tpu.memory_space<vmem>>, vector<1x256xf32>
      %22 = vector.broadcast %21 : vector<1x256xf32> to vector<112x256xf32>
      %23 = arith.addf %20, %22 : vector<112x256xf32>
      %cst_19 = arith.constant 0.000000e+00 : f32
      %24 = vector.broadcast %cst_19 : f32 to vector<112x256xf32>
      %25 = arith.maximumf %23, %24 : vector<112x256xf32>
      %26 = arith.truncf %25 : vector<112x256xf32> to vector<112x256xbf16>
      %c0_20 = arith.constant 0 : index
      %c0_21 = arith.constant 0 : index
      %27 = vector.load %arg7[%c0_20, %c0_21] : memref<256x256xbf16, #tpu.memory_space<vmem>>, vector<256x256xbf16>
      %cst_22 = arith.constant dense<0.000000e+00> : vector<112x256xf32>
      %28 = tpu.matmul %26, %27, %cst_22 {dimension_numbers = #tpu.dot_dimension_numbers<[1], [0], [0], [1], [0, 0, 1, 1], [], []>} : vector<112x256xbf16>, vector<256x256xbf16>, vector<112x256xf32> -> vector<112x256xf32>
      %c0_23 = arith.constant 0 : index
      %c0_24 = arith.constant 0 : index
      %29 = vector.load %arg8[%c0_23, %c0_24] : memref<1x256xf32, #tpu.memory_space<vmem>>, vector<1x256xf32>
      %30 = vector.broadcast %29 : vector<1x256xf32> to vector<112x256xf32>
      %31 = arith.addf %28, %30 : vector<112x256xf32>
      %cst_25 = arith.constant 0.000000e+00 : f32
      %32 = vector.broadcast %cst_25 : f32 to vector<112x256xf32>
      %33 = arith.maximumf %31, %32 : vector<112x256xf32>
      %34 = arith.truncf %33 : vector<112x256xf32> to vector<112x256xbf16>
      %c0_26 = arith.constant 0 : index
      %c0_27 = arith.constant 0 : index
      %35 = vector.load %arg9[%c0_26, %c0_27] : memref<112x256xbf16, #tpu.memory_space<vmem>>, vector<112x256xbf16>
      tpu.vector_store %arg9[%c0_26, %c0_27], %34 {strides = array<i32>} : memref<112x256xbf16, #tpu.memory_space<vmem>>, vector<112x256xbf16>,
    } else {
    }
    return
  }
  func.func @transform_0(%arg0: i32, %arg1: i32) -> (i32, i32) {
    %c0_i32 = arith.constant 0 : i32
    return %arg0, %arg1 : i32, i32
  }
  func.func @transform_1(%arg0: i32, %arg1: i32) -> (i32, i32) {
    %c0_i32 = arith.constant 0 : i32
    %c0_i32_0 = arith.constant 0 : i32
    return %arg1, %c0_i32 : i32, i32
  }
  func.func @transform_2(%arg0: i32, %arg1: i32) -> (i32, i32) {
    %c0_i32 = arith.constant 0 : i32
    %c0_i32_0 = arith.constant 0 : i32
    %c0_i32_1 = arith.constant 0 : i32
    return %c0_i32, %c0_i32_0 : i32, i32
  }
  func.func @transform_3(%arg0: i32, %arg1: i32) -> (i32, i32) {
    %c0_i32 = arith.constant 0 : i32
    %c0_i32_0 = arith.constant 0 : i32
    %c0_i32_1 = arith.constant 0 : i32
    return %c0_i32, %c0_i32_0 : i32, i32
  }
  func.func @transform_4(%arg0: i32, %arg1: i32) -> (i32, i32) {
    %c0_i32 = arith.constant 0 : i32
    %c0_i32_0 = arith.constant 0 : i32
    %c0_i32_1 = arith.constant 0 : i32
    return %c0_i32, %c0_i32_0 : i32, i32
  }
  func.func @transform_5(%arg0: i32, %arg1: i32) -> (i32, i32) {
    %c0_i32 = arith.constant 0 : i32
    %c0_i32_0 = arith.constant 0 : i32
    %c0_i32_1 = arith.constant 0 : i32
    return %c0_i32, %c0_i32_0 : i32, i32
  }
  func.func @transform_6(%arg0: i32, %arg1: i32) -> (i32, i32) {
    %c0_i32 = arith.constant 0 : i32
    %c0_i32_0 = arith.constant 0 : i32
    %c0_i32_1 = arith.constant 0 : i32
    return %c0_i32, %c0_i32_0 : i32, i32
  }
  func.func @transform_7(%arg0: i32, %arg1: i32) -> (i32, i32) {
    %c0_i32 = arith.constant 0 : i32
    %c0_i32_0 = arith.constant 0 : i32
    return %arg0, %c0_i32 : i32, i32
  }
}

module attributes {stable_mosaic.version = 11 : i64} {
  func.func @_maxpool3x3_dense_kernel(%arg0: memref<2x7x7x256xbf16, #tpu.memory_space<vmem>>, %arg1: memref<2x5x5x256xbf16, #tpu.memory_space<vmem>>) attributes {dimension_semantics = [], scalar_prefetch = 0 : i64, scratch_operands = 0 : i64, tpu.core_type = #tpu.core_type<tc>} {
    %c0 = arith.constant 0 : index
    %c0_0 = arith.constant 0 : index
    %c0_1 = arith.constant 0 : index
    %c0_2 = arith.constant 0 : index
    %0 = vector.load %arg0[%c0, %c0_0, %c0_1, %c0_2] : memref<2x7x7x256xbf16, #tpu.memory_space<vmem>>, vector<2x7x7x256xbf16>
    %1 = vector.extract_strided_slice %0 {offsets = [0, 0, 0, 0], sizes = [2, 5, 5, 256], strides = [1, 1, 1, 1]} : vector<2x7x7x256xbf16> to vector<2x5x5x256xbf16>
    %2 = vector.extract_strided_slice %0 {offsets = [0, 0, 1, 0], sizes = [2, 5, 5, 256], strides = [1, 1, 1, 1]} : vector<2x7x7x256xbf16> to vector<2x5x5x256xbf16>
    %3 = vector.extract_strided_slice %0 {offsets = [0, 0, 2, 0], sizes = [2, 5, 5, 256], strides = [1, 1, 1, 1]} : vector<2x7x7x256xbf16> to vector<2x5x5x256xbf16>
    %4 = vector.extract_strided_slice %0 {offsets = [0, 1, 0, 0], sizes = [2, 5, 5, 256], strides = [1, 1, 1, 1]} : vector<2x7x7x256xbf16> to vector<2x5x5x256xbf16>
    %5 = vector.extract_strided_slice %0 {offsets = [0, 1, 1, 0], sizes = [2, 5, 5, 256], strides = [1, 1, 1, 1]} : vector<2x7x7x256xbf16> to vector<2x5x5x256xbf16>
    %6 = vector.extract_strided_slice %0 {offsets = [0, 1, 2, 0], sizes = [2, 5, 5, 256], strides = [1, 1, 1, 1]} : vector<2x7x7x256xbf16> to vector<2x5x5x256xbf16>
    %7 = vector.extract_strided_slice %0 {offsets = [0, 2, 0, 0], sizes = [2, 5, 5, 256], strides = [1, 1, 1, 1]} : vector<2x7x7x256xbf16> to vector<2x5x5x256xbf16>
    %8 = vector.extract_strided_slice %0 {offsets = [0, 2, 1, 0], sizes = [2, 5, 5, 256], strides = [1, 1, 1, 1]} : vector<2x7x7x256xbf16> to vector<2x5x5x256xbf16>
    %9 = vector.extract_strided_slice %0 {offsets = [0, 2, 2, 0], sizes = [2, 5, 5, 256], strides = [1, 1, 1, 1]} : vector<2x7x7x256xbf16> to vector<2x5x5x256xbf16>
    %10 = arith.maximumf %1, %2 : vector<2x5x5x256xbf16>
    %11 = arith.maximumf %3, %4 : vector<2x5x5x256xbf16>
    %12 = arith.maximumf %5, %6 : vector<2x5x5x256xbf16>
    %13 = arith.maximumf %7, %8 : vector<2x5x5x256xbf16>
    %14 = arith.maximumf %10, %11 : vector<2x5x5x256xbf16>
    %15 = arith.maximumf %12, %13 : vector<2x5x5x256xbf16>
    %16 = arith.maximumf %14, %15 : vector<2x5x5x256xbf16>
    %17 = arith.maximumf %16, %9 : vector<2x5x5x256xbf16>
    %c0_3 = arith.constant 0 : index
    %c0_4 = arith.constant 0 : index
    %c0_5 = arith.constant 0 : index
    %c0_6 = arith.constant 0 : index
    %18 = vector.load %arg1[%c0_3, %c0_4, %c0_5, %c0_6] : memref<2x5x5x256xbf16, #tpu.memory_space<vmem>>, vector<2x5x5x256xbf16>
    tpu.vector_store %arg1[%c0_3, %c0_4, %c0_5, %c0_6], %17 {strides = array<i32>} : memref<2x5x5x256xbf16, #tpu.memory_space<vmem>>, vector<2x5x5x256xbf16>,
    return
  }
}

module attributes {stable_mosaic.version = 11 : i64} {
  func.func @_nin_block_kernel(%arg0: i32, %arg1: i32, %arg2: memref<32x512xbf16, #tpu.memory_space<vmem>>, %arg3: memref<512x384xbf16, #tpu.memory_space<vmem>>, %arg4: memref<1x384xf32, #tpu.memory_space<vmem>>, %arg5: memref<384x384xbf16, #tpu.memory_space<vmem>>, %arg6: memref<1x384xf32, #tpu.memory_space<vmem>>, %arg7: memref<384x384xbf16, #tpu.memory_space<vmem>>, %arg8: memref<1x384xf32, #tpu.memory_space<vmem>>, %arg9: memref<32x384xbf16, #tpu.memory_space<vmem>>, %arg10: memref<32x384xf32, #tpu.memory_space<vmem>>) attributes {dimension_semantics = [#tpu.dimension_semantics<parallel>, #tpu.dimension_semantics<arbitrary>], iteration_bounds = array<i64: 1, 5>, scalar_prefetch = 0 : i64, scratch_operands = 1 : i64, tpu.core_type = #tpu.core_type<tc>, window_params = [{transform_indices = @transform_0, window_bounds = array<i64: 32, 512>}, {transform_indices = @transform_1, window_bounds = array<i64: 512, 384>}, {pipeline_mode = #tpu.pipeline_mode<synchronous>, transform_indices = @transform_2, window_bounds = array<i64: 1, 384>}, {pipeline_mode = #tpu.pipeline_mode<synchronous>, transform_indices = @transform_3, window_bounds = array<i64: 384, 384>}, {pipeline_mode = #tpu.pipeline_mode<synchronous>, transform_indices = @transform_4, window_bounds = array<i64: 1, 384>}, {pipeline_mode = #tpu.pipeline_mode<synchronous>, transform_indices = @transform_5, window_bounds = array<i64: 384, 384>}, {pipeline_mode = #tpu.pipeline_mode<synchronous>, transform_indices = @transform_6, window_bounds = array<i64: 1, 384>}, {transform_indices = @transform_7, window_bounds = array<i64: 32, 384>}]} {
    %c0_i32 = arith.constant 0 : i32
    %0 = arith.cmpi eq, %arg1, %c0_i32 : i32
    %1 = arith.extui %0 : i1 to i32
    %c0_i32_0 = arith.constant 0 : i32
    %2 = arith.cmpi ne, %1, %c0_i32_0 : i32
    scf.if %2 {
      %cst_9 = arith.constant 0.000000e+00 : f32
      %12 = vector.broadcast %cst_9 : f32 to vector<32x384xf32>
      %c0_10 = arith.constant 0 : index
      %c0_11 = arith.constant 0 : index
      %13 = vector.load %arg10[%c0_10, %c0_11] : memref<32x384xf32, #tpu.memory_space<vmem>>, vector<32x384xf32>
      tpu.vector_store %arg10[%c0_10, %c0_11], %12 {strides = array<i32>} : memref<32x384xf32, #tpu.memory_space<vmem>>, vector<32x384xf32>,
    } else {
    }
    %c0 = arith.constant 0 : index
    %c0_1 = arith.constant 0 : index
    %3 = vector.load %arg10[%c0, %c0_1] : memref<32x384xf32, #tpu.memory_space<vmem>>, vector<32x384xf32>
    %c0_2 = arith.constant 0 : index
    %c0_3 = arith.constant 0 : index
    %4 = vector.load %arg2[%c0_2, %c0_3] : memref<32x512xbf16, #tpu.memory_space<vmem>>, vector<32x512xbf16>
    %c0_4 = arith.constant 0 : index
    %c0_5 = arith.constant 0 : index
    %5 = vector.load %arg3[%c0_4, %c0_5] : memref<512x384xbf16, #tpu.memory_space<vmem>>, vector<512x384xbf16>
    %cst = arith.constant dense<0.000000e+00> : vector<32x384xf32>
    %6 = tpu.matmul %4, %5, %cst {dimension_numbers = #tpu.dot_dimension_numbers<[1], [0], [0], [1], [0, 0, 1, 1], [], []>} : vector<32x512xbf16>, vector<512x384xbf16>, vector<32x384xf32> -> vector<32x384xf32>
    %7 = arith.addf %3, %6 : vector<32x384xf32>
    %c0_6 = arith.constant 0 : index
    %c0_7 = arith.constant 0 : index
    %8 = vector.load %arg10[%c0_6, %c0_7] : memref<32x384xf32, #tpu.memory_space<vmem>>, vector<32x384xf32>
    tpu.vector_store %arg10[%c0_6, %c0_7], %7 {strides = array<i32>} : memref<32x384xf32, #tpu.memory_space<vmem>>, vector<32x384xf32>,
    %c4_i32 = arith.constant 4 : i32
    %9 = arith.cmpi eq, %arg1, %c4_i32 : i32
    %10 = arith.extui %9 : i1 to i32
    %c0_i32_8 = arith.constant 0 : i32
    %11 = arith.cmpi ne, %10, %c0_i32_8 : i32
    scf.if %11 {
      %c0_9 = arith.constant 0 : index
      %c0_10 = arith.constant 0 : index
      %12 = vector.load %arg10[%c0_9, %c0_10] : memref<32x384xf32, #tpu.memory_space<vmem>>, vector<32x384xf32>
      %c0_11 = arith.constant 0 : index
      %c0_12 = arith.constant 0 : index
      %13 = vector.load %arg4[%c0_11, %c0_12] : memref<1x384xf32, #tpu.memory_space<vmem>>, vector<1x384xf32>
      %14 = vector.broadcast %13 : vector<1x384xf32> to vector<32x384xf32>
      %15 = arith.addf %12, %14 : vector<32x384xf32>
      %cst_13 = arith.constant 0.000000e+00 : f32
      %16 = vector.broadcast %cst_13 : f32 to vector<32x384xf32>
      %17 = arith.maximumf %15, %16 : vector<32x384xf32>
      %18 = arith.truncf %17 : vector<32x384xf32> to vector<32x384xbf16>
      %c0_14 = arith.constant 0 : index
      %c0_15 = arith.constant 0 : index
      %19 = vector.load %arg5[%c0_14, %c0_15] : memref<384x384xbf16, #tpu.memory_space<vmem>>, vector<384x384xbf16>
      %cst_16 = arith.constant dense<0.000000e+00> : vector<32x384xf32>
      %20 = tpu.matmul %18, %19, %cst_16 {dimension_numbers = #tpu.dot_dimension_numbers<[1], [0], [0], [1], [0, 0, 1, 1], [], []>} : vector<32x384xbf16>, vector<384x384xbf16>, vector<32x384xf32> -> vector<32x384xf32>
      %c0_17 = arith.constant 0 : index
      %c0_18 = arith.constant 0 : index
      %21 = vector.load %arg6[%c0_17, %c0_18] : memref<1x384xf32, #tpu.memory_space<vmem>>, vector<1x384xf32>
      %22 = vector.broadcast %21 : vector<1x384xf32> to vector<32x384xf32>
      %23 = arith.addf %20, %22 : vector<32x384xf32>
      %cst_19 = arith.constant 0.000000e+00 : f32
      %24 = vector.broadcast %cst_19 : f32 to vector<32x384xf32>
      %25 = arith.maximumf %23, %24 : vector<32x384xf32>
      %26 = arith.truncf %25 : vector<32x384xf32> to vector<32x384xbf16>
      %c0_20 = arith.constant 0 : index
      %c0_21 = arith.constant 0 : index
      %27 = vector.load %arg7[%c0_20, %c0_21] : memref<384x384xbf16, #tpu.memory_space<vmem>>, vector<384x384xbf16>
      %cst_22 = arith.constant dense<0.000000e+00> : vector<32x384xf32>
      %28 = tpu.matmul %26, %27, %cst_22 {dimension_numbers = #tpu.dot_dimension_numbers<[1], [0], [0], [1], [0, 0, 1, 1], [], []>} : vector<32x384xbf16>, vector<384x384xbf16>, vector<32x384xf32> -> vector<32x384xf32>
      %c0_23 = arith.constant 0 : index
      %c0_24 = arith.constant 0 : index
      %29 = vector.load %arg8[%c0_23, %c0_24] : memref<1x384xf32, #tpu.memory_space<vmem>>, vector<1x384xf32>
      %30 = vector.broadcast %29 : vector<1x384xf32> to vector<32x384xf32>
      %31 = arith.addf %28, %30 : vector<32x384xf32>
      %cst_25 = arith.constant 0.000000e+00 : f32
      %32 = vector.broadcast %cst_25 : f32 to vector<32x384xf32>
      %33 = arith.maximumf %31, %32 : vector<32x384xf32>
      %34 = arith.truncf %33 : vector<32x384xf32> to vector<32x384xbf16>
      %c0_26 = arith.constant 0 : index
      %c0_27 = arith.constant 0 : index
      %35 = vector.load %arg9[%c0_26, %c0_27] : memref<32x384xbf16, #tpu.memory_space<vmem>>, vector<32x384xbf16>
      tpu.vector_store %arg9[%c0_26, %c0_27], %34 {strides = array<i32>} : memref<32x384xbf16, #tpu.memory_space<vmem>>, vector<32x384xbf16>,
    } else {
    }
    return
  }
  func.func @transform_0(%arg0: i32, %arg1: i32) -> (i32, i32) {
    %c0_i32 = arith.constant 0 : i32
    return %arg0, %arg1 : i32, i32
  }
  func.func @transform_1(%arg0: i32, %arg1: i32) -> (i32, i32) {
    %c0_i32 = arith.constant 0 : i32
    %c0_i32_0 = arith.constant 0 : i32
    return %arg1, %c0_i32 : i32, i32
  }
  func.func @transform_2(%arg0: i32, %arg1: i32) -> (i32, i32) {
    %c0_i32 = arith.constant 0 : i32
    %c0_i32_0 = arith.constant 0 : i32
    %c0_i32_1 = arith.constant 0 : i32
    return %c0_i32, %c0_i32_0 : i32, i32
  }
  func.func @transform_3(%arg0: i32, %arg1: i32) -> (i32, i32) {
    %c0_i32 = arith.constant 0 : i32
    %c0_i32_0 = arith.constant 0 : i32
    %c0_i32_1 = arith.constant 0 : i32
    return %c0_i32, %c0_i32_0 : i32, i32
  }
  func.func @transform_4(%arg0: i32, %arg1: i32) -> (i32, i32) {
    %c0_i32 = arith.constant 0 : i32
    %c0_i32_0 = arith.constant 0 : i32
    %c0_i32_1 = arith.constant 0 : i32
    return %c0_i32, %c0_i32_0 : i32, i32
  }
  func.func @transform_5(%arg0: i32, %arg1: i32) -> (i32, i32) {
    %c0_i32 = arith.constant 0 : i32
    %c0_i32_0 = arith.constant 0 : i32
    %c0_i32_1 = arith.constant 0 : i32
    return %c0_i32, %c0_i32_0 : i32, i32
  }
  func.func @transform_6(%arg0: i32, %arg1: i32) -> (i32, i32) {
    %c0_i32 = arith.constant 0 : i32
    %c0_i32_0 = arith.constant 0 : i32
    %c0_i32_1 = arith.constant 0 : i32
    return %c0_i32, %c0_i32_0 : i32, i32
  }
  func.func @transform_7(%arg0: i32, %arg1: i32) -> (i32, i32) {
    %c0_i32 = arith.constant 0 : i32
    %c0_i32_0 = arith.constant 0 : i32
    return %arg0, %c0_i32 : i32, i32
  }
}

module attributes {stable_mosaic.version = 11 : i64} {
  func.func @_maxpool3x3_dense_kernel(%arg0: memref<2x3x3x384xbf16, #tpu.memory_space<vmem>>, %arg1: memref<2x1x1x384xbf16, #tpu.memory_space<vmem>>) attributes {dimension_semantics = [], scalar_prefetch = 0 : i64, scratch_operands = 0 : i64, tpu.core_type = #tpu.core_type<tc>} {
    %c0 = arith.constant 0 : index
    %c0_0 = arith.constant 0 : index
    %c0_1 = arith.constant 0 : index
    %c0_2 = arith.constant 0 : index
    %0 = vector.load %arg0[%c0, %c0_0, %c0_1, %c0_2] : memref<2x3x3x384xbf16, #tpu.memory_space<vmem>>, vector<2x3x3x384xbf16>
    %1 = vector.extract_strided_slice %0 {offsets = [0, 0, 0, 0], sizes = [2, 1, 1, 384], strides = [1, 1, 1, 1]} : vector<2x3x3x384xbf16> to vector<2x1x1x384xbf16>
    %2 = vector.extract_strided_slice %0 {offsets = [0, 0, 1, 0], sizes = [2, 1, 1, 384], strides = [1, 1, 1, 1]} : vector<2x3x3x384xbf16> to vector<2x1x1x384xbf16>
    %3 = vector.extract_strided_slice %0 {offsets = [0, 0, 2, 0], sizes = [2, 1, 1, 384], strides = [1, 1, 1, 1]} : vector<2x3x3x384xbf16> to vector<2x1x1x384xbf16>
    %4 = vector.extract_strided_slice %0 {offsets = [0, 1, 0, 0], sizes = [2, 1, 1, 384], strides = [1, 1, 1, 1]} : vector<2x3x3x384xbf16> to vector<2x1x1x384xbf16>
    %5 = vector.extract_strided_slice %0 {offsets = [0, 1, 1, 0], sizes = [2, 1, 1, 384], strides = [1, 1, 1, 1]} : vector<2x3x3x384xbf16> to vector<2x1x1x384xbf16>
    %6 = vector.extract_strided_slice %0 {offsets = [0, 1, 2, 0], sizes = [2, 1, 1, 384], strides = [1, 1, 1, 1]} : vector<2x3x3x384xbf16> to vector<2x1x1x384xbf16>
    %7 = vector.extract_strided_slice %0 {offsets = [0, 2, 0, 0], sizes = [2, 1, 1, 384], strides = [1, 1, 1, 1]} : vector<2x3x3x384xbf16> to vector<2x1x1x384xbf16>
    %8 = vector.extract_strided_slice %0 {offsets = [0, 2, 1, 0], sizes = [2, 1, 1, 384], strides = [1, 1, 1, 1]} : vector<2x3x3x384xbf16> to vector<2x1x1x384xbf16>
    %9 = vector.extract_strided_slice %0 {offsets = [0, 2, 2, 0], sizes = [2, 1, 1, 384], strides = [1, 1, 1, 1]} : vector<2x3x3x384xbf16> to vector<2x1x1x384xbf16>
    %10 = arith.maximumf %1, %2 : vector<2x1x1x384xbf16>
    %11 = arith.maximumf %3, %4 : vector<2x1x1x384xbf16>
    %12 = arith.maximumf %5, %6 : vector<2x1x1x384xbf16>
    %13 = arith.maximumf %7, %8 : vector<2x1x1x384xbf16>
    %14 = arith.maximumf %10, %11 : vector<2x1x1x384xbf16>
    %15 = arith.maximumf %12, %13 : vector<2x1x1x384xbf16>
    %16 = arith.maximumf %14, %15 : vector<2x1x1x384xbf16>
    %17 = arith.maximumf %16, %9 : vector<2x1x1x384xbf16>
    %c0_3 = arith.constant 0 : index
    %c0_4 = arith.constant 0 : index
    %c0_5 = arith.constant 0 : index
    %c0_6 = arith.constant 0 : index
    %18 = vector.load %arg1[%c0_3, %c0_4, %c0_5, %c0_6] : memref<2x1x1x384xbf16, #tpu.memory_space<vmem>>, vector<2x1x1x384xbf16>
    tpu.vector_store %arg1[%c0_3, %c0_4, %c0_5, %c0_6], %17 {strides = array<i32>} : memref<2x1x1x384xbf16, #tpu.memory_space<vmem>>, vector<2x1x1x384xbf16>,
    return
  }
}

module attributes {stable_mosaic.version = 11 : i64} {
  func.func @_nin_block_kernel(%arg0: i32, %arg1: i32, %arg2: memref<16x512xbf16, #tpu.memory_space<vmem>>, %arg3: memref<512x128xbf16, #tpu.memory_space<vmem>>, %arg4: memref<1x128xf32, #tpu.memory_space<vmem>>, %arg5: memref<128x128xbf16, #tpu.memory_space<vmem>>, %arg6: memref<1x128xf32, #tpu.memory_space<vmem>>, %arg7: memref<128x128xbf16, #tpu.memory_space<vmem>>, %arg8: memref<1x128xf32, #tpu.memory_space<vmem>>, %arg9: memref<16x128xbf16, #tpu.memory_space<vmem>>, %arg10: memref<16x128xf32, #tpu.memory_space<vmem>>) attributes {dimension_semantics = [#tpu.dimension_semantics<parallel>, #tpu.dimension_semantics<arbitrary>], iteration_bounds = array<i64: 1, 7>, scalar_prefetch = 0 : i64, scratch_operands = 1 : i64, tpu.core_type = #tpu.core_type<tc>, window_params = [{transform_indices = @transform_0, window_bounds = array<i64: 16, 512>}, {transform_indices = @transform_1, window_bounds = array<i64: 512, 128>}, {pipeline_mode = #tpu.pipeline_mode<synchronous>, transform_indices = @transform_2, window_bounds = array<i64: 1, 128>}, {pipeline_mode = #tpu.pipeline_mode<synchronous>, transform_indices = @transform_3, window_bounds = array<i64: 128, 128>}, {pipeline_mode = #tpu.pipeline_mode<synchronous>, transform_indices = @transform_4, window_bounds = array<i64: 1, 128>}, {pipeline_mode = #tpu.pipeline_mode<synchronous>, transform_indices = @transform_5, window_bounds = array<i64: 128, 128>}, {pipeline_mode = #tpu.pipeline_mode<synchronous>, transform_indices = @transform_6, window_bounds = array<i64: 1, 128>}, {transform_indices = @transform_7, window_bounds = array<i64: 16, 128>}]} {
    %c0_i32 = arith.constant 0 : i32
    %0 = arith.cmpi eq, %arg1, %c0_i32 : i32
    %1 = arith.extui %0 : i1 to i32
    %c0_i32_0 = arith.constant 0 : i32
    %2 = arith.cmpi ne, %1, %c0_i32_0 : i32
    scf.if %2 {
      %cst_9 = arith.constant 0.000000e+00 : f32
      %12 = vector.broadcast %cst_9 : f32 to vector<16x128xf32>
      %c0_10 = arith.constant 0 : index
      %c0_11 = arith.constant 0 : index
      %13 = vector.load %arg10[%c0_10, %c0_11] : memref<16x128xf32, #tpu.memory_space<vmem>>, vector<16x128xf32>
      tpu.vector_store %arg10[%c0_10, %c0_11], %12 {strides = array<i32>} : memref<16x128xf32, #tpu.memory_space<vmem>>, vector<16x128xf32>,
    } else {
    }
    %c0 = arith.constant 0 : index
    %c0_1 = arith.constant 0 : index
    %3 = vector.load %arg10[%c0, %c0_1] : memref<16x128xf32, #tpu.memory_space<vmem>>, vector<16x128xf32>
    %c0_2 = arith.constant 0 : index
    %c0_3 = arith.constant 0 : index
    %4 = vector.load %arg2[%c0_2, %c0_3] : memref<16x512xbf16, #tpu.memory_space<vmem>>, vector<16x512xbf16>
    %c0_4 = arith.constant 0 : index
    %c0_5 = arith.constant 0 : index
    %5 = vector.load %arg3[%c0_4, %c0_5] : memref<512x128xbf16, #tpu.memory_space<vmem>>, vector<512x128xbf16>
    %cst = arith.constant dense<0.000000e+00> : vector<16x128xf32>
    %6 = tpu.matmul %4, %5, %cst {dimension_numbers = #tpu.dot_dimension_numbers<[1], [0], [0], [1], [0, 0, 1, 1], [], []>} : vector<16x512xbf16>, vector<512x128xbf16>, vector<16x128xf32> -> vector<16x128xf32>
    %7 = arith.addf %3, %6 : vector<16x128xf32>
    %c0_6 = arith.constant 0 : index
    %c0_7 = arith.constant 0 : index
    %8 = vector.load %arg10[%c0_6, %c0_7] : memref<16x128xf32, #tpu.memory_space<vmem>>, vector<16x128xf32>
    tpu.vector_store %arg10[%c0_6, %c0_7], %7 {strides = array<i32>} : memref<16x128xf32, #tpu.memory_space<vmem>>, vector<16x128xf32>,
    %c6_i32 = arith.constant 6 : i32
    %9 = arith.cmpi eq, %arg1, %c6_i32 : i32
    %10 = arith.extui %9 : i1 to i32
    %c0_i32_8 = arith.constant 0 : i32
    %11 = arith.cmpi ne, %10, %c0_i32_8 : i32
    scf.if %11 {
      %c0_9 = arith.constant 0 : index
      %c0_10 = arith.constant 0 : index
      %12 = vector.load %arg10[%c0_9, %c0_10] : memref<16x128xf32, #tpu.memory_space<vmem>>, vector<16x128xf32>
      %c0_11 = arith.constant 0 : index
      %c0_12 = arith.constant 0 : index
      %13 = vector.load %arg4[%c0_11, %c0_12] : memref<1x128xf32, #tpu.memory_space<vmem>>, vector<1x128xf32>
      %14 = vector.broadcast %13 : vector<1x128xf32> to vector<16x128xf32>
      %15 = arith.addf %12, %14 : vector<16x128xf32>
      %cst_13 = arith.constant 0.000000e+00 : f32
      %16 = vector.broadcast %cst_13 : f32 to vector<16x128xf32>
      %17 = arith.maximumf %15, %16 : vector<16x128xf32>
      %18 = arith.truncf %17 : vector<16x128xf32> to vector<16x128xbf16>
      %c0_14 = arith.constant 0 : index
      %c0_15 = arith.constant 0 : index
      %19 = vector.load %arg5[%c0_14, %c0_15] : memref<128x128xbf16, #tpu.memory_space<vmem>>, vector<128x128xbf16>
      %cst_16 = arith.constant dense<0.000000e+00> : vector<16x128xf32>
      %20 = tpu.matmul %18, %19, %cst_16 {dimension_numbers = #tpu.dot_dimension_numbers<[1], [0], [0], [1], [0, 0, 1, 1], [], []>} : vector<16x128xbf16>, vector<128x128xbf16>, vector<16x128xf32> -> vector<16x128xf32>
      %c0_17 = arith.constant 0 : index
      %c0_18 = arith.constant 0 : index
      %21 = vector.load %arg6[%c0_17, %c0_18] : memref<1x128xf32, #tpu.memory_space<vmem>>, vector<1x128xf32>
      %22 = vector.broadcast %21 : vector<1x128xf32> to vector<16x128xf32>
      %23 = arith.addf %20, %22 : vector<16x128xf32>
      %cst_19 = arith.constant 0.000000e+00 : f32
      %24 = vector.broadcast %cst_19 : f32 to vector<16x128xf32>
      %25 = arith.maximumf %23, %24 : vector<16x128xf32>
      %26 = arith.truncf %25 : vector<16x128xf32> to vector<16x128xbf16>
      %c0_20 = arith.constant 0 : index
      %c0_21 = arith.constant 0 : index
      %27 = vector.load %arg7[%c0_20, %c0_21] : memref<128x128xbf16, #tpu.memory_space<vmem>>, vector<128x128xbf16>
      %cst_22 = arith.constant dense<0.000000e+00> : vector<16x128xf32>
      %28 = tpu.matmul %26, %27, %cst_22 {dimension_numbers = #tpu.dot_dimension_numbers<[1], [0], [0], [1], [0, 0, 1, 1], [], []>} : vector<16x128xbf16>, vector<128x128xbf16>, vector<16x128xf32> -> vector<16x128xf32>
      %c0_23 = arith.constant 0 : index
      %c0_24 = arith.constant 0 : index
      %29 = vector.load %arg8[%c0_23, %c0_24] : memref<1x128xf32, #tpu.memory_space<vmem>>, vector<1x128xf32>
      %30 = vector.broadcast %29 : vector<1x128xf32> to vector<16x128xf32>
      %31 = arith.addf %28, %30 : vector<16x128xf32>
      %cst_25 = arith.constant 0.000000e+00 : f32
      %32 = vector.broadcast %cst_25 : f32 to vector<16x128xf32>
      %33 = arith.maximumf %31, %32 : vector<16x128xf32>
      %34 = arith.truncf %33 : vector<16x128xf32> to vector<16x128xbf16>
      %c0_26 = arith.constant 0 : index
      %c0_27 = arith.constant 0 : index
      %35 = vector.load %arg9[%c0_26, %c0_27] : memref<16x128xbf16, #tpu.memory_space<vmem>>, vector<16x128xbf16>
      tpu.vector_store %arg9[%c0_26, %c0_27], %34 {strides = array<i32>} : memref<16x128xbf16, #tpu.memory_space<vmem>>, vector<16x128xbf16>,
    } else {
    }
    return
  }
  func.func @transform_0(%arg0: i32, %arg1: i32) -> (i32, i32) {
    %c0_i32 = arith.constant 0 : i32
    return %arg0, %arg1 : i32, i32
  }
  func.func @transform_1(%arg0: i32, %arg1: i32) -> (i32, i32) {
    %c0_i32 = arith.constant 0 : i32
    %c0_i32_0 = arith.constant 0 : i32
    return %arg1, %c0_i32 : i32, i32
  }
  func.func @transform_2(%arg0: i32, %arg1: i32) -> (i32, i32) {
    %c0_i32 = arith.constant 0 : i32
    %c0_i32_0 = arith.constant 0 : i32
    %c0_i32_1 = arith.constant 0 : i32
    return %c0_i32, %c0_i32_0 : i32, i32
  }
  func.func @transform_3(%arg0: i32, %arg1: i32) -> (i32, i32) {
    %c0_i32 = arith.constant 0 : i32
    %c0_i32_0 = arith.constant 0 : i32
    %c0_i32_1 = arith.constant 0 : i32
    return %c0_i32, %c0_i32_0 : i32, i32
  }
  func.func @transform_4(%arg0: i32, %arg1: i32) -> (i32, i32) {
    %c0_i32 = arith.constant 0 : i32
    %c0_i32_0 = arith.constant 0 : i32
    %c0_i32_1 = arith.constant 0 : i32
    return %c0_i32, %c0_i32_0 : i32, i32
  }
  func.func @transform_5(%arg0: i32, %arg1: i32) -> (i32, i32) {
    %c0_i32 = arith.constant 0 : i32
    %c0_i32_0 = arith.constant 0 : i32
    %c0_i32_1 = arith.constant 0 : i32
    return %c0_i32, %c0_i32_0 : i32, i32
  }
  func.func @transform_6(%arg0: i32, %arg1: i32) -> (i32, i32) {
    %c0_i32 = arith.constant 0 : i32
    %c0_i32_0 = arith.constant 0 : i32
    %c0_i32_1 = arith.constant 0 : i32
    return %c0_i32, %c0_i32_0 : i32, i32
  }
  func.func @transform_7(%arg0: i32, %arg1: i32) -> (i32, i32) {
    %c0_i32 = arith.constant 0 : i32
    %c0_i32_0 = arith.constant 0 : i32
    return %arg0, %c0_i32 : i32, i32
  }
}

module attributes {stable_mosaic.version = 11 : i64} {
  func.func @_global_avg_kernel(%arg0: memref<2x1x10xbf16, #tpu.memory_space<vmem>>, %arg1: memref<2x10xf32, #tpu.memory_space<vmem>>) attributes {dimension_semantics = [], scalar_prefetch = 0 : i64, scratch_operands = 0 : i64, tpu.core_type = #tpu.core_type<tc>} {
    %c0 = arith.constant 0 : index
    %c0_0 = arith.constant 0 : index
    %c0_1 = arith.constant 0 : index
    %0 = vector.load %arg0[%c0, %c0_0, %c0_1] : memref<2x1x10xbf16, #tpu.memory_space<vmem>>, vector<2x1x10xbf16>
    %1 = arith.extf %0 : vector<2x1x10xbf16> to vector<2x1x10xf32>
    %cst = arith.constant dense<0.000000e+00> : vector<2x10xf32>
    %2 = vector.multi_reduction <add>, %1, %cst [1] : vector<2x1x10xf32> to vector<2x10xf32>
    %cst_2 = arith.constant 1.000000e+00 : f32
    %3 = vector.broadcast %cst_2 : f32 to vector<2x10xf32>
    %4 = arith.divf %2, %3 : vector<2x10xf32>
    %c0_3 = arith.constant 0 : index
    %c0_4 = arith.constant 0 : index
    %5 = vector.load %arg1[%c0_3, %c0_4] : memref<2x10xf32, #tpu.memory_space<vmem>>, vector<2x10xf32>
    tpu.vector_store %arg1[%c0_3, %c0_4], %4 {strides = array<i32>} : memref<2x10xf32, #tpu.memory_space<vmem>>, vector<2x10xf32>,
    return
  }
}

</mosaic_0001>

<bundles_post_ra>
// kernel: nin_forward.8
= control target key start
LH: loop header
LB: loop body
LE: loop exit
PB: predicated region body
PF: predicated region fallthrough
CT: control target
= control target key end

     0   :  { %s3013_s24 = smov 0   ;;  %s3015_s25 = smov 0   ;;  %s3379_s0 = inlined_call_operand.vmem [shape: bf16[512,384], index: 0, kind: input, shape index: {}]   ;;  %s3380_s1 = inlined_call_operand.vmem [shape: bf16[384,128], index: 1, kind: input, shape index: {}]   ;;  %s3381_s2 = inlined_call_operand.vmem [shape: f32[1,128], index: 2, kind: input, shape index: {}]   ;;  %s3382_s3 = inlined_call_operand.vmem [shape: bf16[128,128], index: 3, kind: input, shape index: {}]   ;;  %s3383_s4 = inlined_call_operand.vmem [shape: f32[1,128], index: 4, kind: input, shape index: {}]   ;;  %s3384_s5 = inlined_call_operand.vmem [shape: bf16[128,128], index: 5, kind: input, shape index: {}]   ;;  %s3385_s6 = inlined_call_operand.vmem [shape: f32[1,128], index: 6, kind: input, shape index: {}]   ;;  %s3386_s7 = inlined_call_operand.vmem [shape: bf16[512,128], index: 7, kind: output, shape index: {}]  }
   0x1   :  { %s3017_s26 = smov 0  }
   0x2 LB: > { %s29_s27 = sadd.s32 1, %s2967_s25  ;;  %p2219_p0 = scmp.ge.s32.totalorder %s2971_s26, 1  ;;  %s2971_s26 = sphi %s3017_s26, %s17_s26   ;;  %s2967_s25 = sphi %s3015_s25, %s3388_s25   ;;  %s2963_s24 = sphi %s3013_s24, %s3387_s24  }
   0x3   : > { %p31_p1 = scmp.ge.s32.totalorder %s29_s27, 2  ;;  %p269_p2 = scmp.lt.s32.totalorder %s2971_s26, 3 }
   0x5   : > { %s3390_s27 = smov (%p31_p1, %s29_s27), 0  ;;  %p270_p3 = pnand %p2219_p0, %p269_p2 }
   0x6   : > { %v2845_v0 = vld [vmem:[%s3380_s1 + $0x40] sm:$0xff] (!%p270_p3)   ;;  %s2220_s30 = sshll.u32 (!%p270_p3), %s2963_s24, 5  ;;  %v2847_v2 = vld [vmem:[%s3380_s1 + $0x48] sm:$0xff] (!%p270_p3)   ;;  %v2849_v4 = vld [vmem:[%s3380_s1 + $0x50] sm:$0xff] (!%p270_p3)  }
   0x7   : > { %273 = sbr.rel (%p270_p3) target bundleno = 812 (0x32c), region = 48  ;;  %v2846_v1 = vld [vmem:[%s3380_s1] sm:$0xff] (!%p270_p3)   ;;  %2476 = vmatprep.subr.bf16.mxu0 (!%p270_p3), %v2845_v0  ;;  %2804 = vmatprep.subr.bf16.mxu1 (!%p270_p3), %v2845_v0  ;;  %p313_p4 = scmp.lt.s32.totalorder (!%p270_p3), %s2220_s30, 63  ;;  %v2848_v3 = vld [vmem:[%s3380_s1 + $0x8] sm:$0xff] (!%p270_p3)   ;;  %v2850_v5 = vld [vmem:[%s3380_s1 + $0x10] sm:$0xff] (!%p270_p3)  }
   0x8   : > { %2477 = vmatpush3.bf16.msra.mxu0 (!%p270_p3), %v2846_v1  ;;  %2812 = vmatpush3.bf16.msra.mxu1 (!%p270_p3), %v2846_v1  ;;  %v2851_v6 = vld [vmem:[%s3380_s1 + $0x58] sm:$0xff] (!%p270_p3)   ;;  %v2853_v8 = vld [vmem:[%s3380_s1 + $0x60] sm:$0xff] (!%p270_p3)   ;;  %v2855_v10 = vld [vmem:[%s3380_s1 + $0x68] sm:$0xff] (!%p270_p3)  }
   0x9   : > { %2478 = vmatprep.subr.bf16.mxu0 (!%p270_p3), %v2847_v2  ;;  %2805 = vmatprep.subr.bf16.mxu1 (!%p270_p3), %v2847_v2  ;;  %v2852_v7 = vld [vmem:[%s3380_s1 + $0x18] sm:$0xff] (!%p270_p3)   ;;  %v2854_v9 = vld [vmem:[%s3380_s1 + $0x20] sm:$0xff] (!%p270_p3)   ;;  %v2856_v13 = vld [vmem:[%s3380_s1 + $0x28] sm:$0xff] (!%p270_p3)  }
   0xa   : > { %v2857_v14 = vld [vmem:[%s3380_s1 + $0x70] sm:$0xff] (!%p270_p3)   ;;  %v2859_v16 = vld [vmem:[%s3380_s1 + $0x78] sm:$0xff] (!%p270_p3)   ;;  %v2867_v18 = vld [vmem:[%s3380_s1 + $0x80] sm:$0xff] (!%p270_p3)  }
   0xb   : > { %v2858_v15 = vld [vmem:[%s3380_s1 + $0x30] sm:$0xff] (!%p270_p3)   ;;  %v2860_v17 = vld [vmem:[%s3380_s1 + $0x38] sm:$0xff] (!%p270_p3)   ;;  %v2868_v22 = vld [vmem:[%s3380_s1 + $0x88] sm:$0xff] (!%p270_p3)  }
   0xc   : > { %2479 = vmatpush3.bf16.msra.mxu0 (!%p270_p3), %v2848_v3  ;;  %2813 = vmatpush3.bf16.msra.mxu1 (!%p270_p3), %v2848_v3  ;;  %v2875_v25 = vld [vmem:[%s3380_s1 + $0x90] sm:$0xff] (!%p270_p3)   ;;  %v2876_v27 = vld [vmem:[%s3380_s1 + $0x98] sm:$0xff] (!%p270_p3)   ;;  %v2883_v30 = vld [vmem:[%s3380_s1 + $0xa0] sm:$0xff] (!%p270_p3)  }
   0xd   : > { %2480 = vmatprep.subr.bf16.mxu0 (!%p270_p3), %v2849_v4  ;;  %2806 = vmatprep.subr.bf16.mxu1 (!%p270_p3), %v2849_v4  ;;  %v2884_v33 = vld [vmem:[%s3380_s1 + $0xa8] sm:$0xff] (!%p270_p3)   ;;  %v2891_v36 = vld [vmem:[%s3380_s1 + $0xb0] sm:$0xff] (!%p270_p3)   ;;  %v2892_v40 = vld [vmem:[%s3380_s1 + $0xb8] sm:$0xff] (!%p270_p3)  }
   0xe   : > { %s3392_s30 = smov (!%p313_p4, %s2220_s30), 63  ;;  %v2933_v46 = vld [vmem:[%s3382_s3] sm:$0xff]  }
   0xf   : > { %s2820_s20 = smul.u32 12, %s3392_s30  ;;  %s2223_s21 = sshll.u32 %s3392_s30, 2 }
  0x10   : > { %2481 = vmatpush3.bf16.msra.mxu0 %v2850_v5  ;;  %2814 = vmatpush3.bf16.msra.mxu1 %v2850_v5  ;;  %s3324_s24 = scalar_lea.vmem %s3386_s7, %s2223_s21 }
  0x11   : > { %2482 = vmatprep.subr.bf16.mxu0 %v2851_v6  ;;  %2807 = vmatprep.subr.bf16.mxu1 %v2851_v6  ;;  %s3064_s8 = scalar_lea.vmem %s3379_s0, %s2820_s20 }
  0x12   : > { %v2863_v11 = vld [vmem:[%s3064_s8 + $0x4] ss:$12 sps:$4 sm:$0xff]   ;;  %v2861_v19 = vld [vmem:[%s3064_s8] ss:$12 sps:$4 sm:$0xff]   ;;  %v2869_v21 = vld [vmem:[%s3064_s8 + $0x1c] ss:$12 sps:$4 sm:$0xff]  }
  0x13   : > { %v2866_v12 = vld [vmem:[%s3064_s8 + $0x124] ss:$12 sps:$4 sm:$0xff]   ;;  %948 = vmatprep.mubr.bf16.mxu0 %v2863_v11  ;;  %v2864_v20 = vld [vmem:[%s3064_s8 + $0x120] ss:$12 sps:$4 sm:$0xff]   ;;  %v2871_v23 = vld [vmem:[%s3064_s8 + $0x13c] ss:$12 sps:$4 sm:$0xff]  }
  0x14   : > { %2483 = vmatpush3.bf16.msra.mxu0 %v2852_v7  ;;  %2815 = vmatpush3.bf16.msra.mxu1 %v2852_v7  ;;  %v2873_v24 = vld [vmem:[%s3064_s8 + $0x18] ss:$12 sps:$4 sm:$0xff]   ;;  %v2877_v28 = vld [vmem:[%s3064_s8 + $0x34] ss:$12 sps:$4 sm:$0xff]   ;;  %v2881_v31 = vld [vmem:[%s3064_s8 + $0x30] ss:$12 sps:$4 sm:$0xff]  }
  0x15   : > { %2484 = vmatprep.subr.bf16.mxu0 %v2853_v8  ;;  %2808 = vmatprep.subr.bf16.mxu1 %v2853_v8  ;;  %v2874_v26 = vld [vmem:[%s3064_s8 + $0x138] ss:$12 sps:$4 sm:$0xff]   ;;  %v2879_v29 = vld [vmem:[%s3064_s8 + $0x154] ss:$12 sps:$4 sm:$0xff]   ;;  %v2882_v32 = vld [vmem:[%s3064_s8 + $0x150] ss:$12 sps:$4 sm:$0xff]  }
  0x16   : > { %1044 = vmatprep.mubr.bf16.mxu1 %v2866_v12  ;;  %v2885_v34 = vld [vmem:[%s3064_s8 + $0x4c] ss:$12 sps:$4 sm:$0xff]   ;;  %v2889_v37 = vld [vmem:[%s3064_s8 + $0x48] ss:$12 sps:$4 sm:$0xff]   ;;  %v2893_v39 = vld [vmem:[%s3064_s8 + $0x64] ss:$12 sps:$4 sm:$0xff]  }
  0x17   : > { %v2887_v35 = vld [vmem:[%s3064_s8 + $0x16c] ss:$12 sps:$4 sm:$0xff]   ;;  %v2890_v38 = vld [vmem:[%s3064_s8 + $0x168] ss:$12 sps:$4 sm:$0xff]   ;;  %v2902_v48 = vld [vmem:[%s3064_s8 + $0x50] ss:$12 sps:$4 sm:$0xff]  }
  0x18   : > { %2485 = vmatpush3.bf16.msra.mxu0 %v2854_v9  ;;  %2816 = vmatpush3.bf16.msra.mxu1 %v2854_v9  ;;  %v2895_v41 = vld [vmem:[%s3064_s8 + $0x8] ss:$12 sps:$4 sm:$0xff]   ;;  %v2896_v42 = vld [vmem:[%s3064_s8 + $0x60] ss:$12 sps:$4 sm:$0xff]   ;;  %v2900_v45 = vld [vmem:[%s3064_s8 + $0x38] ss:$12 sps:$4 sm:$0xff]  }
  0x19   : > { %2486 = vmatprep.subr.bf16.mxu0 %v2855_v10  ;;  %2809 = vmatprep.subr.bf16.mxu1 %v2855_v10  ;;  %v2897_v43 = vld [vmem:[%s3064_s8 + $0x20] ss:$12 sps:$4 sm:$0xff]   ;;  %v2898_v44 = vld [vmem:[%s3064_s8 + $0x7c] ss:$12 sps:$4 sm:$0xff]   ;;  %v2901_v47 = vld [vmem:[%s3064_s8 + $0x78] ss:$12 sps:$4 sm:$0xff]  }
  0x1a   : > { %v2903_v49 = vld [vmem:[%s3064_s8 + $0x94] ss:$12 sps:$4 sm:$0xff]   ;;  %v2906_v51 = vld [vmem:[%s3064_s8 + $0x90] ss:$12 sps:$4 sm:$0xff]   ;;  %v2908_v53 = vld [vmem:[%s3064_s8 + $0xac] ss:$12 sps:$4 sm:$0xff]  }
  0x1b   : > { %v2905_v50 = vld [vmem:[%s3064_s8 + $0x68] ss:$12 sps:$4 sm:$0xff]   ;;  %v2907_v52 = vld [vmem:[%s3064_s8 + $0x80] ss:$12 sps:$4 sm:$0xff]   ;;  %v2910_v54 = vld [vmem:[%s3064_s8 + $0x98] ss:$12 sps:$4 sm:$0xff]  }
  0x1c   : > { %2487 = vmatpush3.bf16.msra.mxu0 %v2856_v13  ;;  %2817 = vmatpush3.bf16.msra.mxu1 %v2856_v13  ;;  %v2911_v55 = vld [vmem:[%s3064_s8 + $0xa8] ss:$12 sps:$4 sm:$0xff]   ;;  %v2912_v56 = vld [vmem:[%s3064_s8 + $0xb0] ss:$12 sps:$4 sm:$0xff]   ;;  %v2916_v59 = vld [vmem:[%s3064_s8 + $0xc0] ss:$12 sps:$4 sm:$0xff]  }
  0x1d   : > { %2488 = vmatprep.subr.bf16.mxu0 %v2857_v14  ;;  %2810 = vmatprep.subr.bf16.mxu1 %v2857_v14  ;;  %v2913_v57 = vld [vmem:[%s3064_s8 + $0xc4] ss:$12 sps:$4 sm:$0xff]   ;;  %v2915_v58 = vld [vmem:[%s3064_s8 + $0xc8] ss:$12 sps:$4 sm:$0xff]   ;;  %v2917_v60 = vld [vmem:[%s3064_s8 + $0xe0] ss:$12 sps:$4 sm:$0xff]  }
  0x1e   : > { %v2918_v61 = vld [vmem:[%s3064_s8 + $0xdc] ss:$12 sps:$4 sm:$0xff]   ;;  %v2920_v62 = vld [vmem:[%s3064_s8 + $0xf8] ss:$12 sps:$4 sm:$0xff]   ;;  %v2923_v1 = vld [vmem:[%s3064_s8 + $0xf4] ss:$12 sps:$4 sm:$0xff]  }
  0x1f   : > { %v2921_v63 = vld [vmem:[%s3064_s8 + $0xd8] ss:$12 sps:$4 sm:$0xff]   ;;  %v2922_v0 = vld [vmem:[%s3064_s8 + $0x110] ss:$12 sps:$4 sm:$0xff]   ;;  %v2925_v2 = vld [vmem:[%s3064_s8 + $0x128] ss:$12 sps:$4 sm:$0xff]  }
  0x20   : > { %2489 = vmatpush3.bf16.msra.mxu0 %v2858_v15  ;;  %2818 = vmatpush3.bf16.msra.mxu1 %v2858_v15  ;;  %v2926_v3 = vld [vmem:[%s3064_s8 + $0xf0] ss:$12 sps:$4 sm:$0xff]   ;;  %v2927_v4 = vld [vmem:[%s3064_s8 + $0x140] ss:$12 sps:$4 sm:$0xff]   ;;  %v2930_v6 = vld [vmem:[%s3064_s8 + $0x158] ss:$12 sps:$4 sm:$0xff]  }
  0x21   : > { %2490 = vmatprep.subr.bf16.mxu0 %v2859_v16  ;;  %2811 = vmatprep.subr.bf16.mxu1 %v2859_v16  ;;  %v2928_v5 = vld [vmem:[%s3064_s8 + $0x10c] ss:$12 sps:$4 sm:$0xff]   ;;  %v2931_v7 = vld [vmem:[%s3064_s8 + $0x108] ss:$12 sps:$4 sm:$0xff]   ;;  %v2932_v8 = vld [vmem:[%s3064_s8 + $0x170] ss:$12 sps:$4 sm:$0xff]  }
  0x22   : > { %v2934_v9 = vld [vmem:[%s3382_s3 + $0x8] sm:$0xff]   ;;  %v2935_v10 = vld [vmem:[%s3382_s3 + $0x10] sm:$0xff]   ;;  %v2936_v11 = vld [vmem:[%s3382_s3 + $0x18] sm:$0xff]  }
  0x23   : > { %v2937_v12 = vld [vmem:[%s3382_s3 + $0x20] sm:$0xff]   ;;  %v2938_v13 = vld [vmem:[%s3382_s3 + $0x28] sm:$0xff]   ;;  %v2939_v14 = vld [vmem:[%s3382_s3 + $0x30] sm:$0xff]  }
  0x24   : > { %2491 = vmatpush3.bf16.msra.mxu0 %v2860_v17  ;;  %2819 = vmatpush3.bf16.msra.mxu1 %v2860_v17  ;;  %v2940_v15 = vld [vmem:[%s3382_s3 + $0x38] sm:$0xff]   ;;  %v2941_v16 = vld [vmem:[%s3384_s5] sm:$0xff]   ;;  %v2942_v17 = vld [vmem:[%s3384_s5 + $0x8] sm:$0xff]  }
  0x25   : > { %2660 = vmatprep.subr.bf16.mxu1 %v2867_v18  ;;  %2756 = vmatprep.subr.bf16.mxu0 %v2941_v16 }
  0x27   : > { %949 = vmatmul.mubr.bf16.vlgmr.msra.gmra.mrb[0].mxu0 %v2861_v19  ;;  %1045 = vmatmul.mubr.bf16.vlgmr.msra.gmra.mrb[0].mxu1 %v2864_v20  ;;  %v2944_v19 = vld [vmem:[%s3384_s5 + $0x18] sm:$0xff]  }
  0x28   : > { %2661 = vmatpush3.bf16.msra.mxu1 %v2867_v18  ;;  %956 = vmatprep.mubr.bf16.mxu0 %v2869_v21  ;;  %v2943_v18 = vld [vmem:[%s3384_s5 + $0x10] sm:$0xff]  }
  0x29   : > { %2662 = vmatprep.subr.bf16.mxu1 %v2868_v22  ;;  %1052 = vmatprep.mubr.bf16.mxu1 %v2871_v23 }
  0x2a   : > { %2757 = vmatpush3.bf16.msra.mxu0 %v2941_v16 }
  0x2b   : > { %2758 = vmatprep.subr.bf16.mxu0 %v2942_v17 }
  0x2c   : > { %2663 = vmatpush3.bf16.msra.mxu1 %v2868_v22 }
  0x2d   : > { %2664 = vmatprep.subr.bf16.mxu1 %v2875_v25 }
  0x2e   : > { %2759 = vmatpush3.bf16.msra.mxu0 %v2942_v17 }
  0x2f   : > { %957 = vmatmul.mubr.bf16.gmra.mrb[4].mxu0 %v2873_v24  ;;  %1053 = vmatmul.mubr.bf16.gmra.mrb[4].mxu1 %v2874_v26 }
  0x30   : > { %2665 = vmatpush3.bf16.msra.mxu1 %v2875_v25  ;;  %964 = vmatprep.mubr.bf16.mxu0 %v2877_v28  ;;  %v2945_v28 = vld [vmem:[%s3384_s5 + $0x20] sm:$0xff]  }
  0x31   : > { %2666 = vmatprep.subr.bf16.mxu1 %v2876_v27  ;;  %1060 = vmatprep.mubr.bf16.mxu1 %v2879_v29 }
  0x32   : > { %2760 = vmatprep.subr.bf16.mxu0 %v2943_v18 }
  0x33   : > { %2761 = vmatpush3.bf16.msra.mxu0 %v2943_v18 }
  0x34   : > { %2667 = vmatpush3.bf16.msra.mxu1 %v2876_v27  ;;  %2762 = vmatprep.subr.bf16.mxu0 %v2944_v19 }
  0x35   : > { %2668 = vmatprep.subr.bf16.mxu1 %v2883_v30 }
  0x37   : > { %965 = vmatmul.mubr.bf16.gmra.mrb[8].mxu0 %v2881_v31  ;;  %1061 = vmatmul.mubr.bf16.gmra.mrb[8].mxu1 %v2882_v32 }
  0x38   : > { %2669 = vmatpush3.bf16.msra.mxu1 %v2883_v30  ;;  %972 = vmatprep.mubr.bf16.mxu0 %v2885_v34 }
  0x39   : > { %2670 = vmatprep.subr.bf16.mxu1 %v2884_v33  ;;  %1068 = vmatprep.mubr.bf16.mxu1 %v2887_v35 }
  0x3a   : > { %2763 = vmatpush3.bf16.msra.mxu0 %v2944_v19 }
  0x3b   : > { %2764 = vmatprep.subr.bf16.mxu0 %v2945_v28 }
  0x3c   : > { %2671 = vmatpush3.bf16.msra.mxu1 %v2884_v33  ;;  %v2946_v33 = vld [vmem:[%s3384_s5 + $0x28] sm:$0xff]  }
  0x3d   : > { %2672 = vmatprep.subr.bf16.mxu1 %v2891_v36 }
  0x3e   : > { %2765 = vmatpush3.bf16.msra.mxu0 %v2945_v28 }
  0x3f   : > { %973 = vmatmul.mubr.bf16.gmra.mrb[12].mxu0 %v2889_v37  ;;  %1069 = vmatmul.mubr.bf16.gmra.mrb[12].mxu1 %v2890_v38 }
  0x40   : > { %2673 = vmatpush3.bf16.msra.mxu1 %v2891_v36  ;;  %980 = vmatprep.mubr.bf16.mxu0 %v2893_v39 }
  0x41   : > { %2674 = vmatprep.subr.bf16.mxu1 %v2892_v40  ;;  %2676 = vmatprep.mubr.bf16.mxu1 %v2895_v41 }
  0x42   : > { %2766 = vmatprep.subr.bf16.mxu0 %v2946_v33 }
  0x43   : > { %2767 = vmatpush3.bf16.msra.mxu0 %v2946_v33 }
  0x44   : > { %2675 = vmatpush3.bf16.msra.mxu1 %v2892_v40 }
  0x45   : > { %2708 = vmatprep.subr.bf16.mxu1 %v2933_v46 }
  0x47   : > { %981 = vmatmul.mubr.bf16.gmra.mrb[16].mxu0 %v2896_v42  ;;  %2677 = vmatmul.mubr.bf16.vlgmr.msra.gmra.mrb[16].mxu1 %v2897_v43 }
  0x48   : > { %988 = vmatprep.mubr.bf16.mxu0 %v2898_v44  ;;  %2680 = vmatprep.mubr.bf16.mxu1 %v2900_v45 }
  0x49   : > { %2709 = vmatpush3.bf16.msra.mxu1 %v2933_v46 }
  0x4a   : > { %2710 = vmatprep.subr.bf16.mxu1 %v2934_v9 }
  0x4d   : > { %2711 = vmatpush3.bf16.msra.mxu1 %v2934_v9 }
  0x4e   : > { %2712 = vmatprep.subr.bf16.mxu1 %v2935_v10 }
  0x4f   : > { %989 = vmatmul.mubr.bf16.gmra.mrb[20].mxu0 %v2901_v47  ;;  %2681 = vmatmul.mubr.bf16.gmra.mrb[20].mxu1 %v2902_v48 }
  0x50   : > { %996 = vmatprep.mubr.bf16.mxu0 %v2903_v49  ;;  %2684 = vmatprep.mubr.bf16.mxu1 %v2905_v50 }
  0x51   : > { %2713 = vmatpush3.bf16.msra.mxu1 %v2935_v10 }
  0x52   : > { %2714 = vmatprep.subr.bf16.mxu1 %v2936_v11 }
  0x55   : > { %2715 = vmatpush3.bf16.msra.mxu1 %v2936_v11 }
  0x56   : > { %2716 = vmatprep.subr.bf16.mxu1 %v2937_v12 }
  0x57   : > { %997 = vmatmul.mubr.bf16.gmra.mrb[24].mxu0 %v2906_v51  ;;  %2685 = vmatmul.mubr.bf16.gmra.mrb[24].mxu1 %v2907_v52 }
  0x58   : > { %1004 = vmatprep.mubr.bf16.mxu0 %v2908_v53  ;;  %2688 = vmatprep.mubr.bf16.mxu1 %v2910_v54 }
  0x59   : > { %2717 = vmatpush3.bf16.msra.mxu1 %v2937_v12 }
  0x5a   : > { %2718 = vmatprep.subr.bf16.mxu1 %v2938_v13 }
  0x5d   : > { %2719 = vmatpush3.bf16.msra.mxu1 %v2938_v13 }
  0x5e   : > { %2720 = vmatprep.subr.bf16.mxu1 %v2939_v14 }
  0x5f   : > { %1005 = vmatmul.mubr.bf16.gmra.mrb[28].mxu0 %v2911_v55  ;;  %2689 = vmatmul.mubr.bf16.gmra.mrb[28].mxu1 %v2912_v56 }
  0x60   : > { %1012 = vmatprep.mubr.bf16.mxu0 %v2913_v57  ;;  %2692 = vmatprep.mubr.bf16.mxu1 %v2915_v58 }
  0x61   : > { %2721 = vmatpush3.bf16.msra.mxu1 %v2939_v14 }
  0x62   : > { %2722 = vmatprep.subr.bf16.mxu1 %v2940_v15 }
  0x65   : > { %2723 = vmatpush3.bf16.msra.mxu1 %v2940_v15 }
  0x67   : > { %1013 = vmatmul.mubr.bf16.gmra.mrb[32].mxu0 %v2916_v59  ;;  %2693 = vmatmul.mubr.bf16.gmra.mrb[32].mxu1 %v2917_v60 }
  0x68   : > { %1020 = vmatprep.mubr.bf16.mxu0 %v2918_v61  ;;  %2696 = vmatprep.mubr.bf16.mxu1 %v2920_v62 }
  0x6f   : > { %1021 = vmatmul.mubr.bf16.gmra.mrb[36].mxu0 %v2921_v63  ;;  %2697 = vmatmul.mubr.bf16.gmra.mrb[36].mxu1 %v2922_v0 }
  0x70   : > { %1028 = vmatprep.mubr.bf16.mxu0 %v2923_v1  ;;  %2700 = vmatprep.mubr.bf16.mxu1 %v2925_v2 }
  0x77   : > { %1029 = vmatmul.mubr.bf16.gmra.mrb[40].mxu0 %v2926_v3  ;;  %2701 = vmatmul.mubr.bf16.gmra.mrb[40].mxu1 %v2927_v4 }
  0x78   : > { %1036 = vmatprep.mubr.bf16.mxu0 %v2928_v5  ;;  %2704 = vmatprep.mubr.bf16.mxu1 %v2930_v6 }
  0x7f   : > { %1037 = vmatmul.mubr.bf16.gmra.mrb[44].mxu0 %v2931_v7  ;;  %2705 = vmatmul.mubr.bf16.gmra.mrb[44].mxu1 %v2932_v8  ;;  %v3220_v8 = vld [vmem:[%s3381_s2] ss:$0 sm:$0xff] }
  0xfa   : > { %v2492_v20 = vpop.f32.mrb[0].mxu0  ;;  %v2564_v21 = vpop.f32.mrb[0].mxu1 }
  0xfb   : > { %v2493_v22 = vpop.f32.mrb[1].mxu0  ;;  %v2565_v23 = vpop.f32.mrb[1].mxu1 }
  0xfc   : > { %v2494_v24 = vadd.f32 %v2493_v22, %v2492_v20  ;;  %v2495_v25 = vpop.f32.mrb[2].mxu0  ;;  %v3195_v26 = vadd.f32 %v2565_v23, %v2564_v21  ;;  %v2567_v27 = vpop.f32.mrb[2].mxu1 }
  0xfd   : > { %v2496_v29 = vpop.f32.mrb[3].mxu0  ;;  %v2568_v30 = vpop.f32.mrb[3].mxu1 }
  0xfe   : > { %v2497_v31 = vadd.f32 %v2496_v29, %v2495_v25  ;;  %v3200_v32 = vadd.f32 %v2568_v30, %v2567_v27 }
 0x102   : > { %v2498_v34 = vpop.f32.mrb[4].mxu0  ;;  %v2570_v35 = vpop.f32.mrb[4].mxu1 }
 0x103   : > { %v2499_v36 = vpop.f32.mrb[5].mxu0  ;;  %v2571_v37 = vpop.f32.mrb[5].mxu1 }
 0x104   : > { %v2500_v38 = vadd.f32 %v2499_v36, %v2498_v34  ;;  %v2501_v39 = vpop.f32.mrb[6].mxu0  ;;  %v3205_v40 = vadd.f32 %v2571_v37, %v2570_v35  ;;  %v2573_v41 = vpop.f32.mrb[6].mxu1 }
 0x105   : > { %v2502_v42 = vpop.f32.mrb[7].mxu0  ;;  %v2574_v43 = vpop.f32.mrb[7].mxu1 }
 0x106   : > { %v2503_v44 = vadd.f32 %v2502_v42, %v2501_v39  ;;  %v3207_v45 = vadd.f32 %v2574_v43, %v2573_v41 }
 0x10a   : > { %v2504_v46 = vpop.f32.mrb[8].mxu0  ;;  %v2576_v47 = vpop.f32.mrb[8].mxu1 }
 0x10b   : > { %v2505_v48 = vpop.f32.mrb[9].mxu0  ;;  %v2577_v49 = vpop.f32.mrb[9].mxu1 }
 0x10c   : > { %v2506_v50 = vadd.f32 %v2505_v48, %v2504_v46  ;;  %v2507_v51 = vpop.f32.mrb[10].mxu0  ;;  %v3209_v52 = vadd.f32 %v2577_v49, %v2576_v47  ;;  %v2579_v53 = vpop.f32.mrb[10].mxu1 }
 0x10d   : > { %v2508_v54 = vpop.f32.mrb[11].mxu0  ;;  %v2580_v55 = vpop.f32.mrb[11].mxu1 }
 0x10e   : > { %v2509_v56 = vadd.f32 %v2508_v54, %v2507_v51  ;;  %v3211_v57 = vadd.f32 %v2580_v55, %v2579_v53 }
 0x112   : > { %v2510_v58 = vpop.f32.mrb[12].mxu0  ;;  %v2582_v59 = vpop.f32.mrb[12].mxu1 }
 0x113   : > { %v2511_v60 = vpop.f32.mrb[13].mxu0  ;;  %v2583_v61 = vpop.f32.mrb[13].mxu1 }
 0x114   : > { %v2512_v62 = vadd.f32 %v2511_v60, %v2510_v58  ;;  %v2513_v63 = vpop.f32.mrb[14].mxu0  ;;  %v3213_v0 = vadd.f32 %v2583_v61, %v2582_v59  ;;  %v2585_v1 = vpop.f32.mrb[14].mxu1 }
 0x115   : > { %v2514_v2 = vpop.f32.mrb[15].mxu0  ;;  %v2586_v3 = vpop.f32.mrb[15].mxu1 }
 0x116   : > { %v2515_v4 = vadd.f32 %v2514_v2, %v2513_v63  ;;  %v3215_v5 = vadd.f32 %v2586_v3, %v2585_v1 }
 0x11a   : > { %v2516_v6 = vpop.f32.mrb[16].mxu0  ;;  %v2678_v7 = vpop.f32.mrb[16].mxu1 }
 0x11b   : > { %v1120_v9 = vadd.f32 %v2678_v7, %v2500_v38  ;;  %v2517_v10 = vpop.f32.mrb[17].mxu0  ;;  %v1111_v11 = vpop.f32.mrb[17].mxu1 }
 0x11c   : > { %v2518_v12 = vadd.f32 %v2517_v10, %v2516_v6  ;;  %v1112_v13 = vadd.f32 %v2494_v24, %v1111_v11  ;;  %v2519_v14 = vpop.f32.mrb[18].mxu0  ;;  %v2679_v15 = vpop.f32.mrb[18].mxu1 }
 0x11d   : > { %v1346_v16 = vadd.f32 %v3220_v8, %v1120_v9  ;;  %v1123_v17 = vadd.f32 %v2679_v15, %v2503_v44  ;;  %v2520_v18 = vpop.f32.mrb[19].mxu0  ;;  %v1114_v19 = vpop.f32.mrb[19].mxu1 }
 0x11e   : > { %v1344_v20 = vadd.f32 %v3220_v8, %v1112_v13  ;;  %v2521_v21 = vadd.f32 %v2520_v18, %v2519_v14  ;;  %v1115_v22 = vadd.f32 %v2497_v31, %v1114_v19 }
 0x11f   : > { %v1347_v23 = vadd.f32 %v3220_v8, %v1123_v17  ;;  %v1378_v27 = vmax.f32 %v1346_v16, 0.0 }
 0x120   : > { %v1345_v25 = vadd.f32 %v3220_v8, %v1115_v22  ;;  %v1376_v29 = vmax.f32 %v1344_v20, 0.0 }
 0x121   : > { %v1379_v28 = vmax.f32 %v1347_v23, 0.0 }
 0x122   : > { %v1377_v30 = vmax.f32 %v1345_v25, 0.0  ;;  %v2522_v24 = vpop.f32.mrb[20].mxu0  ;;  %v2682_v33 = vpop.f32.mrb[20].mxu1 }
 0x123   : > { %v1409_v34 = vpack.c.bf16 %v1379_v28, %v1378_v27  ;;  %v1136_v35 = vadd.f32 %v2682_v33, %v2512_v62  ;;  %v2523_v36 = vpop.f32.mrb[21].mxu0  ;;  %v1127_v37 = vpop.f32.mrb[21].mxu1 }
 0x124   : > { %v2524_v38 = vadd.f32 %v2523_v36, %v2522_v24  ;;  %v1128_v39 = vadd.f32 %v2506_v50, %v1127_v37  ;;  %v2525_v41 = vpop.f32.mrb[22].mxu0  ;;  %v2683_v42 = vpop.f32.mrb[22].mxu1  ;;  %v1408_v43 = vpack.c.bf16 %v1377_v30, %v1376_v29 }
 0x125   : > { %v1350_v31 = vadd.f32 %v3220_v8, %v1136_v35  ;;  %v1139_v44 = vadd.f32 %v2683_v42, %v2515_v4  ;;  %v2526_v46 = vpop.f32.mrb[23].mxu0  ;;  %v1130_v47 = vpop.f32.mrb[23].mxu1 }
 0x126   : > { %v1348_v48 = vadd.f32 %v3220_v8, %v1128_v39  ;;  %v2527_v49 = vadd.f32 %v2526_v46, %v2525_v41  ;;  %v1131_v51 = vadd.f32 %v2509_v56, %v1130_v47  ;;  %2724 = vmatprep.mubr.bf16.mxu1 %v1408_v43 }
 0x127   : > { %v1351_v53 = vadd.f32 %v3220_v8, %v1139_v44  ;;  %2725 = vmatmul.mubr.bf16.vlgmr.msra.gmra.mrb[48].mxu1 %v1409_v34  ;;  %v1382_v55 = vmax.f32 %v1350_v31, 0.0 }
 0x128   : > { %v1349_v54 = vadd.f32 %v3220_v8, %v1131_v51  ;;  %v1380_v58 = vmax.f32 %v1348_v48, 0.0 }
 0x129   : > { %v1383_v50 = vmax.f32 %v1351_v53, 0.0 }
 0x12a   : > { %v1381_v59 = vmax.f32 %v1349_v54, 0.0  ;;  %v2528_v60 = vpop.f32.mrb[24].mxu0  ;;  %v2686_v61 = vpop.f32.mrb[24].mxu1 }
 0x12b   : > { %v1152_v62 = vadd.f32 %v2686_v61, %v2524_v38  ;;  %v2529_v63 = vpop.f32.mrb[25].mxu0  ;;  %v1143_v1 = vpop.f32.mrb[25].mxu1  ;;  %v1411_v2 = vpack.c.bf16 %v1383_v50, %v1382_v55 }
 0x12c   : > { %v2530_v3 = vadd.f32 %v2529_v63, %v2528_v60  ;;  %v1144_v4 = vadd.f32 %v2518_v12, %v1143_v1  ;;  %v2531_v6 = vpop.f32.mrb[26].mxu0  ;;  %v2687_v56 = vpop.f32.mrb[26].mxu1  ;;  %v1410_v7 = vpack.c.bf16 %v1381_v59, %v1380_v58 }
 0x12d   : > { %v1354_v9 = vadd.f32 %v3220_v8, %v1152_v62  ;;  %v1155_v10 = vadd.f32 %v2687_v56, %v2527_v49  ;;  %v2532_v11 = vpop.f32.mrb[27].mxu0  ;;  %v1146_v13 = vpop.f32.mrb[27].mxu1 }
 0x12e   : > { %v1352_v14 = vadd.f32 %v3220_v8, %v1144_v4  ;;  %v2533_v15 = vadd.f32 %v2532_v11, %v2531_v6  ;;  %v1147_v16 = vadd.f32 %v2521_v21, %v1146_v13  ;;  %2728 = vmatprep.mubr.bf16.mxu1 %v1410_v7 }
 0x12f   : > { %v1355_v17 = vadd.f32 %v3220_v8, %v1155_v10  ;;  %2729 = vmatmul.mubr.bf16.gmra.mrb[52].mxu1 %v1411_v2  ;;  %v1386_v19 = vmax.f32 %v1354_v9, 0.0 }
 0x130   : > { %v1353_v18 = vadd.f32 %v3220_v8, %v1147_v16  ;;  %v1384_v20 = vmax.f32 %v1352_v14, 0.0 }
 0x131   : > { %v1387_v12 = vmax.f32 %v1355_v17, 0.0 }
 0x132   : > { %v1385_v22 = vmax.f32 %v1353_v18, 0.0  ;;  %v2534_v23 = vpop.f32.mrb[28].mxu0  ;;  %v2690_v25 = vpop.f32.mrb[28].mxu1 }
 0x133   : > { %v2535_v27 = vpop.f32.mrb[29].mxu0  ;;  %v1159_v28 = vpop.f32.mrb[29].mxu1  ;;  %v1413_v29 = vpack.c.bf16 %v1387_v12, %v1386_v19 }
 0x134   : > { %v2536_v30 = vadd.f32 %v2535_v27, %v2534_v23  ;;  %v1160_v24 = vadd.f32 %v2530_v3, %v1159_v28  ;;  %v2537_v33 = vpop.f32.mrb[30].mxu0  ;;  %v2691_v34 = vpop.f32.mrb[30].mxu1  ;;  %v1412_v21 = vpack.c.bf16 %v1385_v22, %v1384_v20 }
 0x135   : > { %v2538_v35 = vpop.f32.mrb[31].mxu0  ;;  %v1162_v36 = vpop.f32.mrb[31].mxu1 }
 0x136   : > { %v1168_v37 = vadd.f32 %v2690_v25, %v2536_v30  ;;  %v1356_v38 = vadd.f32 %v3220_v8, %v1160_v24  ;;  %v2539_v39 = vadd.f32 %v2538_v35, %v2537_v33  ;;  %v1163_v41 = vadd.f32 %v2533_v15, %v1162_v36  ;;  %2732 = vmatprep.mubr.bf16.mxu1 %v1412_v21 }
 0x137   : > { %2733 = vmatmul.mubr.bf16.gmra.mrb[56].mxu1 %v1413_v29 }
 0x138   : > { %v1358_v42 = vadd.f32 %v3220_v8, %v1168_v37  ;;  %v1171_v43 = vadd.f32 %v2691_v34, %v2539_v39  ;;  %v1357_v31 = vadd.f32 %v3220_v8, %v1163_v41  ;;  %v1388_v44 = vmax.f32 %v1356_v38, 0.0 }
 0x13a   : > { %v1359_v46 = vadd.f32 %v3220_v8, %v1171_v43  ;;  %v1389_v47 = vmax.f32 %v1357_v31, 0.0  ;;  %v2540_v48 = vpop.f32.mrb[32].mxu0  ;;  %v2694_v49 = vpop.f32.mrb[32].mxu1  ;;  %v1390_v54 = vmax.f32 %v1358_v42, 0.0 }
 0x13b   : > { %v2541_v51 = vpop.f32.mrb[33].mxu0  ;;  %v1175_v53 = vpop.f32.mrb[33].mxu1 }
 0x13c   : > { %v1391_v55 = vmax.f32 %v1359_v46, 0.0  ;;  %v2542_v50 = vadd.f32 %v2541_v51, %v2540_v48  ;;  %v2543_v58 = vpop.f32.mrb[34].mxu0  ;;  %v2695_v59 = vpop.f32.mrb[34].mxu1  ;;  %v1414_v60 = vpack.c.bf16 %v1389_v47, %v1388_v44 }
 0x13d   : > { %v2544_v61 = vpop.f32.mrb[35].mxu0  ;;  %v1178_v62 = vpop.f32.mrb[35].mxu1 }
 0x13e   : > { %v2545_v63 = vadd.f32 %v2544_v61, %v2543_v58  ;;  %v1176_v1 = vadd.f32 %v2542_v50, %v1175_v53  ;;  %2736 = vmatprep.mubr.bf16.mxu1 %v1414_v60  ;;  %v1415_v2 = vpack.c.bf16 %v1391_v55, %v1390_v54 }
 0x140   : > { %v1360_v3 = vadd.f32 %v3220_v8, %v1176_v1  ;;  %v1179_v4 = vadd.f32 %v2545_v63, %v1178_v62  ;;  %2737 = vmatmul.mubr.bf16.gmra.mrb[60].mxu1 %v1415_v2 }
 0x142   : > { %v1361_v6 = vadd.f32 %v3220_v8, %v1179_v4  ;;  %v2546_v56 = vpop.f32.mrb[36].mxu0  ;;  %v3240_v7 = vpop.f32.mrb[36].mxu1  ;;  %v1392_v11 = vmax.f32 %v1360_v3, 0.0 }
 0x143   : > { %v2547_v9 = vpop.f32.mrb[37].mxu0  ;;  %v1191_v10 = vpop.f32.mrb[37].mxu1 }
 0x144   : > { %v1393_v13 = vmax.f32 %v1361_v6, 0.0  ;;  %v2548_v14 = vadd.f32 %v2547_v9, %v2546_v56  ;;  %v2549_v15 = vpop.f32.mrb[38].mxu0  ;;  %v3242_v16 = vpop.f32.mrb[38].mxu1 }
 0x145   : > { %v2550_v17 = vpop.f32.mrb[39].mxu0  ;;  %v1194_v18 = vpop.f32.mrb[39].mxu1 }
 0x146   : > { %v1184_v19 = vadd.f32 %v2694_v49, %v2548_v14  ;;  %v2551_v12 = vadd.f32 %v2550_v17, %v2549_v15  ;;  %v1416_v20 = vpack.c.bf16 %v1393_v13, %v1392_v11 }
 0x148   : > { %v1187_v22 = vadd.f32 %v2695_v59, %v2551_v12  ;;  %2740 = vmatprep.mubr.bf16.mxu1 %v1416_v20  ;;  %v1362_v23 = vadd.f32 %v3220_v8, %v1184_v19 }
 0x14a   : > { %v1363_v25 = vadd.f32 %v3220_v8, %v1187_v22  ;;  %v2552_v27 = vpop.f32.mrb[40].mxu0  ;;  %v2702_v28 = vpop.f32.mrb[40].mxu1  ;;  %v1394_v37 = vmax.f32 %v1362_v23, 0.0 }
 0x14b   : > { %v1216_v29 = vadd.f32 %v2702_v28, %v3205_v40  ;;  %v2553_v30 = vpop.f32.mrb[41].mxu0  ;;  %v1207_v24 = vpop.f32.mrb[41].mxu1 }
 0x14c   : > { %v1395_v33 = vmax.f32 %v1363_v25, 0.0  ;;  %v2554_v34 = vadd.f32 %v2553_v30, %v2552_v27  ;;  %v1208_v21 = vadd.f32 %v3195_v26, %v1207_v24  ;;  %v2555_v35 = vpop.f32.mrb[42].mxu0  ;;  %v2703_v36 = vpop.f32.mrb[42].mxu1  ;;  %v3277_v30 = vld [vmem:[%s3383_s4] ss:$0 sm:$0xff] }
 0x14d   : > { %v1370_v38 = vadd.f32 %v3220_v8, %v1216_v29  ;;  %v1219_v39 = vadd.f32 %v2703_v36, %v3207_v45  ;;  %v2556_v41 = vpop.f32.mrb[43].mxu0  ;;  %v1210_v42 = vpop.f32.mrb[43].mxu1 }
 0x14e   : > { %v1192_v43 = vadd.f32 %v2554_v34, %v1191_v10  ;;  %v1368_v31 = vadd.f32 %v3220_v8, %v1208_v21  ;;  %v2557_v44 = vadd.f32 %v2556_v41, %v2555_v35  ;;  %v1211_v40 = vadd.f32 %v3200_v32, %v1210_v42 }
 0x14f   : > { %v1371_v46 = vadd.f32 %v3220_v8, %v1219_v39  ;;  %v1417_v47 = vpack.c.bf16 %v1395_v33, %v1394_v37  ;;  %v1402_v49 = vmax.f32 %v1370_v38, 0.0 }
 0x150   : > { %v1195_v48 = vadd.f32 %v2557_v44, %v1194_v18  ;;  %v1369_v26 = vadd.f32 %v3220_v8, %v1211_v40  ;;  %v1364_v51 = vadd.f32 %v3220_v8, %v1192_v43  ;;  %v1400_v45 = vmax.f32 %v1368_v31, 0.0 }
 0x151   : > { %v1403_v53 = vmax.f32 %v1371_v46, 0.0  ;;  %2741 = vmatmul.mubr.bf16.gmra.mrb[64].mxu1 %v1417_v47 }
 0x152   : > { %v1365_v54 = vadd.f32 %v3220_v8, %v1195_v48  ;;  %v1401_v55 = vmax.f32 %v1369_v26, 0.0  ;;  %v2558_v50 = vpop.f32.mrb[44].mxu0  ;;  %v2706_v58 = vpop.f32.mrb[44].mxu1  ;;  %v1396_v6 = vmax.f32 %v1364_v51, 0.0 }
 0x153   : > { %v1232_v59 = vadd.f32 %v2706_v58, %v3213_v0  ;;  %v2559_v32 = vpop.f32.mrb[45].mxu0  ;;  %v1223_v60 = vpop.f32.mrb[45].mxu1  ;;  %v1421_v61 = vpack.c.bf16 %v1403_v53, %v1402_v49 }
 0x154   : > { %v1397_v62 = vmax.f32 %v1365_v54, 0.0  ;;  %v2560_v63 = vadd.f32 %v2559_v32, %v2558_v50  ;;  %v1224_v1 = vadd.f32 %v3209_v52, %v1223_v60  ;;  %v2561_v2 = vpop.f32.mrb[46].mxu0  ;;  %v2707_v3 = vpop.f32.mrb[46].mxu1  ;;  %v1420_v4 = vpack.c.bf16 %v1401_v55, %v1400_v45 }
 0x155   : > { %v1374_v56 = vadd.f32 %v3220_v8, %v1232_v59  ;;  %v1235_v9 = vadd.f32 %v2707_v3, %v3215_v5  ;;  %v2562_v10 = vpop.f32.mrb[47].mxu0  ;;  %v1226_v11 = vpop.f32.mrb[47].mxu1 }
 0x156   : > { %v1200_v13 = vadd.f32 %v3240_v7, %v2560_v63  ;;  %v1372_v0 = vadd.f32 %v3220_v8, %v1224_v1  ;;  %v2563_v14 = vadd.f32 %v2562_v10, %v2561_v2  ;;  %v1227_v15 = vadd.f32 %v3211_v57, %v1226_v11 }
 0x157   : > { %v1375_v17 = vadd.f32 %v3220_v8, %v1235_v9  ;;  %v1418_v52 = vpack.c.bf16 %v1397_v62, %v1396_v6  ;;  %v1406_v20 = vmax.f32 %v1374_v56, 0.0 }
 0x158   : > { %v1366_v18 = vadd.f32 %v3220_v8, %v1200_v13  ;;  %v1203_v19 = vadd.f32 %v3242_v16, %v2563_v14  ;;  %v1373_v12 = vadd.f32 %v3220_v8, %v1227_v15  ;;  %v1404_v22 = vmax.f32 %v1372_v0, 0.0  ;;  %v2947_v16 = vld [vmem:[%s3384_s5 + $0x30] sm:$0xff]  }
 0x159   : > { %v1407_v5 = vmax.f32 %v1375_v17, 0.0  ;;  %2744 = vmatprep.mubr.bf16.mxu1 %v1418_v52  ;;  %2768 = vmatprep.subr.bf16.mxu0 %v2947_v16 }
 0x15a   : > { %v1367_v7 = vadd.f32 %v3220_v8, %v1203_v19  ;;  %v1405_v23 = vmax.f32 %v1373_v12, 0.0  ;;  %v1398_v27 = vmax.f32 %v1366_v18, 0.0  ;;  %2769 = vmatpush3.bf16.msra.mxu0 %v2947_v16  ;;  %v2948_v8 = vld [vmem:[%s3384_s5 + $0x38] sm:$0xff]  }
 0x15b   : > { %v1423_v25 = vpack.c.bf16 %v1407_v5, %v1406_v20  ;;  %2770 = vmatprep.subr.bf16.mxu0 %v2948_v8 }
 0x15c   : > { %v1399_v28 = vmax.f32 %v1367_v7, 0.0  ;;  %v1422_v57 = vpack.c.bf16 %v1405_v23, %v1404_v22 }
 0x15e   : > { %v1419_v29 = vpack.c.bf16 %v1399_v28, %v1398_v27  ;;  %2771 = vmatpush3.bf16.msra.mxu0 %v2948_v8 }
 0x160   : > { %2745 = vmatmul.mubr.bf16.gmra.mrb[68].mxu1 %v1419_v29 }
 0x161   : > { %2748 = vmatprep.mubr.bf16.mxu1 %v1420_v4 }
 0x168   : > { %2749 = vmatmul.mubr.bf16.gmra.mrb[72].mxu1 %v1421_v61 }
 0x169   : > { %2752 = vmatprep.mubr.bf16.mxu1 %v1422_v57 }
 0x170   : > { %2753 = vmatmul.mubr.bf16.gmra.mrb[76].mxu1 %v1423_v25 }
 0x1fa   : > { %v2726_v24 = vpop.f32.mrb[48].mxu1 }
 0x1fb   : > { %v1538_v33 = vadd.f32 %v2726_v24, %v3277_v30  ;;  %v1529_v34 = vpop.f32.mrb[49].mxu1 }
 0x1fc   : > { %v1530_v21 = vadd.f32 %v3277_v30, %v1529_v34  ;;  %v2727_v35 = vpop.f32.mrb[50].mxu1 }
 0x1fd   : > { %v1541_v36 = vadd.f32 %v2727_v35, %v3277_v30  ;;  %v1532_v37 = vpop.f32.mrb[51].mxu1  ;;  %v1658_v39 = vmax.f32 %v1538_v33, 0.0 }
 0x1fe   : > { %v1533_v38 = vadd.f32 %v3277_v30, %v1532_v37  ;;  %v1656_v42 = vmax.f32 %v1530_v21, 0.0 }
 0x1ff   : > { %v1659_v41 = vmax.f32 %v1541_v36, 0.0 }
 0x200   : > { %v1657_v43 = vmax.f32 %v1533_v38, 0.0 }
 0x201   : > { %v1689_v31 = vpack.c.bf16 %v1659_v41, %v1658_v39 }
 0x202   : > { %v1688_v44 = vpack.c.bf16 %v1657_v43, %v1656_v42  ;;  %v2730_v40 = vpop.f32.mrb[52].mxu1 }
 0x203   : > { %v1554_v46 = vadd.f32 %v2730_v40, %v3277_v30  ;;  %v1545_v47 = vpop.f32.mrb[53].mxu1 }
 0x204   : > { %v1546_v48 = vadd.f32 %v3277_v30, %v1545_v47  ;;  %v2731_v26 = vpop.f32.mrb[54].mxu1  ;;  %2772 = vmatprep.mubr.bf16.mxu0 %v1688_v44 }
 0x205   : > { %v1557_v49 = vadd.f32 %v2731_v26, %v3277_v30  ;;  %v1548_v51 = vpop.f32.mrb[55].mxu1  ;;  %2773 = vmatmul.mubr.bf16.vlgmr.msra.gmra.mrb[48].mxu0 %v1689_v31  ;;  %v1662_v45 = vmax.f32 %v1554_v46, 0.0 }
 0x206   : > { %v1549_v53 = vadd.f32 %v3277_v30, %v1548_v51  ;;  %v1660_v55 = vmax.f32 %v1546_v48, 0.0 }
 0x207   : > { %v1663_v54 = vmax.f32 %v1557_v49, 0.0 }
 0x208   : > { %v1661_v50 = vmax.f32 %v1549_v53, 0.0 }
 0x209   : > { %v1691_v58 = vpack.c.bf16 %v1663_v54, %v1662_v45 }
 0x20a   : > { %v1690_v59 = vpack.c.bf16 %v1661_v50, %v1660_v55  ;;  %v2734_v32 = vpop.f32.mrb[56].mxu1 }
 0x20b   : > { %v1570_v60 = vadd.f32 %v2734_v32, %v3277_v30  ;;  %v1561_v61 = vpop.f32.mrb[57].mxu1 }
 0x20c   : > { %v1562_v62 = vadd.f32 %v3277_v30, %v1561_v61  ;;  %v2735_v63 = vpop.f32.mrb[58].mxu1  ;;  %2776 = vmatprep.mubr.bf16.mxu0 %v1690_v59 }
 0x20d   : > { %v1573_v1 = vadd.f32 %v2735_v63, %v3277_v30  ;;  %v1564_v2 = vpop.f32.mrb[59].mxu1  ;;  %2777 = vmatmul.mubr.bf16.gmra.mrb[52].mxu0 %v1691_v58  ;;  %v1666_v4 = vmax.f32 %v1570_v60, 0.0 }
 0x20e   : > { %v1565_v3 = vadd.f32 %v3277_v30, %v1564_v2  ;;  %v1664_v56 = vmax.f32 %v1562_v62, 0.0 }
 0x20f   : > { %v1667_v6 = vmax.f32 %v1573_v1, 0.0 }
 0x210   : > { %v1665_v9 = vmax.f32 %v1565_v3, 0.0 }
 0x211   : > { %v1693_v10 = vpack.c.bf16 %v1667_v6, %v1666_v4 }
 0x212   : > { %v1692_v11 = vpack.c.bf16 %v1665_v9, %v1664_v56 }
 0x213   : > { %v2738_v13 = vpop.f32.mrb[60].mxu1 }
 0x214   : > { %v1586_v0 = vadd.f32 %v2738_v13, %v3277_v30  ;;  %v1577_v14 = vpop.f32.mrb[61].mxu1  ;;  %2780 = vmatprep.mubr.bf16.mxu0 %v1692_v11 }
 0x215   : > { %v1578_v15 = vadd.f32 %v3277_v30, %v1577_v14  ;;  %v2739_v17 = vpop.f32.mrb[62].mxu1  ;;  %2781 = vmatmul.mubr.bf16.gmra.mrb[56].mxu0 %v1693_v10 }
 0x216   : > { %v1589_v52 = vadd.f32 %v2739_v17, %v3277_v30  ;;  %v1580_v18 = vpop.f32.mrb[63].mxu1  ;;  %v1670_v12 = vmax.f32 %v1586_v0, 0.0 }
 0x217   : > { %v1581_v19 = vadd.f32 %v3277_v30, %v1580_v18  ;;  %v1668_v5 = vmax.f32 %v1578_v15, 0.0 }
 0x218   : > { %v1671_v20 = vmax.f32 %v1589_v52, 0.0 }
 0x219   : > { %v1669_v22 = vmax.f32 %v1581_v19, 0.0  ;;  %v3314_v19 = vld [vmem:[%s3385_s6] ss:$0 sm:$0xff] }
 0x21a   : > { %v1695_v7 = vpack.c.bf16 %v1671_v20, %v1670_v12 }
 0x21b   : > { %v1694_v23 = vpack.c.bf16 %v1669_v22, %v1668_v5 }
 0x21d   : > { %2784 = vmatprep.mubr.bf16.mxu0 %v1694_v23 }
 0x21e   : > { %2785 = vmatmul.mubr.bf16.gmra.mrb[60].mxu0 %v1695_v7 }
 0x224   : > { %v2742_v25 = vpop.f32.mrb[64].mxu1 }
 0x225   : > { %v1602_v27 = vadd.f32 %v2742_v25, %v3277_v30  ;;  %v1593_v28 = vpop.f32.mrb[65].mxu1 }
 0x226   : > { %v1594_v57 = vadd.f32 %v3277_v30, %v1593_v28  ;;  %v2743_v29 = vpop.f32.mrb[66].mxu1 }
 0x227   : > { %v1605_v16 = vadd.f32 %v2743_v29, %v3277_v30  ;;  %v1596_v8 = vpop.f32.mrb[67].mxu1  ;;  %v1674_v33 = vmax.f32 %v1602_v27, 0.0 }
 0x228   : > { %v1597_v24 = vadd.f32 %v3277_v30, %v1596_v8  ;;  %v1672_v21 = vmax.f32 %v1594_v57, 0.0 }
 0x229   : > { %v1675_v34 = vmax.f32 %v1605_v16, 0.0 }
 0x22a   : > { %v1673_v35 = vmax.f32 %v1597_v24, 0.0 }
 0x22b   : > { %v1697_v36 = vpack.c.bf16 %v1675_v34, %v1674_v33 }
 0x22c   : > { %v1696_v37 = vpack.c.bf16 %v1673_v35, %v1672_v21 }
 0x22e   : > { %2788 = vmatprep.mubr.bf16.mxu0 %v1696_v37 }
 0x22f   : > { %2789 = vmatmul.mubr.bf16.gmra.mrb[64].mxu0 %v1697_v36 }
 0x233   : > { %v2746_v38 = vpop.f32.mrb[68].mxu1 }
 0x234   : > { %v1618_v39 = vadd.f32 %v2746_v38, %v3277_v30  ;;  %v1609_v41 = vpop.f32.mrb[69].mxu1 }
 0x235   : > { %v1610_v42 = vadd.f32 %v3277_v30, %v1609_v41  ;;  %v2747_v43 = vpop.f32.mrb[70].mxu1 }
 0x236   : > { %v1621_v31 = vadd.f32 %v2747_v43, %v3277_v30  ;;  %v1612_v44 = vpop.f32.mrb[71].mxu1  ;;  %v1678_v46 = vmax.f32 %v1618_v39, 0.0 }
 0x237   : > { %v1613_v40 = vadd.f32 %v3277_v30, %v1612_v44  ;;  %v1676_v48 = vmax.f32 %v1610_v42, 0.0 }
 0x238   : > { %v1679_v47 = vmax.f32 %v1621_v31, 0.0 }
 0x239   : > { %v1677_v26 = vmax.f32 %v1613_v40, 0.0 }
 0x23a   : > { %v1699_v49 = vpack.c.bf16 %v1679_v47, %v1678_v46 }
 0x23b   : > { %v1698_v51 = vpack.c.bf16 %v1677_v26, %v1676_v48  ;;  %v2750_v53 = vpop.f32.mrb[72].mxu1 }
 0x23c   : > { %v1634_v45 = vadd.f32 %v2750_v53, %v3277_v30  ;;  %v1625_v54 = vpop.f32.mrb[73].mxu1 }
 0x23d   : > { %v1626_v55 = vadd.f32 %v3277_v30, %v1625_v54  ;;  %v2751_v50 = vpop.f32.mrb[74].mxu1  ;;  %2792 = vmatprep.mubr.bf16.mxu0 %v1698_v51 }
 0x23e   : > { %v1637_v58 = vadd.f32 %v2751_v50, %v3277_v30  ;;  %v1628_v59 = vpop.f32.mrb[75].mxu1  ;;  %2793 = vmatmul.mubr.bf16.gmra.mrb[68].mxu0 %v1699_v49  ;;  %v1682_v60 = vmax.f32 %v1634_v45, 0.0 }
 0x23f   : > { %v1629_v32 = vadd.f32 %v3277_v30, %v1628_v59  ;;  %v1680_v62 = vmax.f32 %v1626_v55, 0.0 }
 0x240   : > { %v1683_v61 = vmax.f32 %v1637_v58, 0.0 }
 0x241   : > { %v1681_v63 = vmax.f32 %v1629_v32, 0.0 }
 0x242   : > { %v1701_v1 = vpack.c.bf16 %v1683_v61, %v1682_v60 }
 0x243   : > { %v1700_v2 = vpack.c.bf16 %v1681_v63, %v1680_v62  ;;  %v2754_v3 = vpop.f32.mrb[76].mxu1 }
 0x244   : > { %v1650_v4 = vadd.f32 %v2754_v3, %v3277_v30  ;;  %v1641_v6 = vpop.f32.mrb[77].mxu1 }
 0x245   : > { %v1642_v56 = vadd.f32 %v3277_v30, %v1641_v6  ;;  %v2755_v9 = vpop.f32.mrb[78].mxu1  ;;  %2796 = vmatprep.mubr.bf16.mxu0 %v1700_v2 }
 0x246   : > { %v1653_v10 = vadd.f32 %v2755_v9, %v3277_v30  ;;  %v1644_v11 = vpop.f32.mrb[79].mxu1  ;;  %2797 = vmatmul.mubr.bf16.gmra.mrb[72].mxu0 %v1701_v1  ;;  %v1686_v0 = vmax.f32 %v1650_v4, 0.0 }
 0x247   : > { %v1645_v13 = vadd.f32 %v3277_v30, %v1644_v11  ;;  %v1684_v15 = vmax.f32 %v1642_v56, 0.0 }
 0x248   : > { %v1687_v14 = vmax.f32 %v1653_v10, 0.0 }
 0x249   : > { %v1685_v17 = vmax.f32 %v1645_v13, 0.0 }
 0x24a   : > { %v1703_v52 = vpack.c.bf16 %v1687_v14, %v1686_v0 }
 0x24b   : > { %v1702_v18 = vpack.c.bf16 %v1685_v17, %v1684_v15 }
 0x24d   : > { %2800 = vmatprep.mubr.bf16.mxu0 %v1702_v18 }
 0x24e   : > { %2801 = vmatmul.mubr.bf16.gmra.mrb[76].mxu0 %v1703_v52 }
 0x2d8   : > { %v2774_v12 = vpop.f32.mrb[48].mxu0 }
 0x2d9   : > { %v1818_v20 = vadd.f32 %v2774_v12, %v3314_v19  ;;  %v1809_v5 = vpop.f32.mrb[49].mxu0 }
 0x2da   : > { %v1810_v22 = vadd.f32 %v3314_v19, %v1809_v5  ;;  %v2775_v30 = vpop.f32.mrb[50].mxu0 }
 0x2db   : > { %v1821_v7 = vadd.f32 %v2775_v30, %v3314_v19  ;;  %v1812_v23 = vpop.f32.mrb[51].mxu0  ;;  %v1938_v27 = vmax.f32 %v1818_v20, 0.0 }
 0x2dc   : > { %v1813_v25 = vadd.f32 %v3314_v19, %v1812_v23  ;;  %v1936_v57 = vmax.f32 %v1810_v22, 0.0 }
 0x2dd   : > { %v1939_v28 = vmax.f32 %v1821_v7, 0.0 }
 0x2de   : > { %v1937_v29 = vmax.f32 %v1813_v25, 0.0 }
 0x2df   : > { %v2389_v16 = vpack.c.bf16 %v1939_v28, %v1938_v27 }
 0x2e0   : > { %v2384_v8 = vpack.c.bf16 %v1937_v29, %v1936_v57  ;;  %v2778_v24 = vpop.f32.mrb[52].mxu0 }
 0x2e1   : > { %2461 = vst [vmem:[%s3324_s24 + $0x8] sm:$0xff] %v2389_v16   ;;  %v1834_v33 = vadd.f32 %v2778_v24, %v3314_v19  ;;  %v1825_v34 = vpop.f32.mrb[53].mxu0 }
 0x2e2   : > { %2385 = vst [vmem:[%s3324_s24] sm:$0xff] %v2384_v8   ;;  %v1826_v21 = vadd.f32 %v3314_v19, %v1825_v34  ;;  %v2779_v35 = vpop.f32.mrb[54].mxu0 }
 0x2e3   : > { %v1837_v36 = vadd.f32 %v2779_v35, %v3314_v19  ;;  %v1828_v37 = vpop.f32.mrb[55].mxu0  ;;  %v1942_v39 = vmax.f32 %v1834_v33, 0.0 }
 0x2e4   : > { %v1829_v38 = vadd.f32 %v3314_v19, %v1828_v37  ;;  %v1940_v42 = vmax.f32 %v1826_v21, 0.0 }
 0x2e5   : > { %v1943_v41 = vmax.f32 %v1837_v36, 0.0 }
 0x2e6   : > { %v1941_v43 = vmax.f32 %v1829_v38, 0.0 }
 0x2e7   : > { %v2399_v31 = vpack.c.bf16 %v1943_v41, %v1942_v39 }
 0x2e8   : > { %v2394_v44 = vpack.c.bf16 %v1941_v43, %v1940_v42  ;;  %v2782_v40 = vpop.f32.mrb[56].mxu0 }
 0x2e9   : > { %2463 = vst [vmem:[%s3324_s24 + $0x18] sm:$0xff] %v2399_v31   ;;  %v1850_v46 = vadd.f32 %v2782_v40, %v3314_v19  ;;  %v1841_v47 = vpop.f32.mrb[57].mxu0 }
 0x2ea   : > { %2462 = vst [vmem:[%s3324_s24 + $0x10] sm:$0xff] %v2394_v44   ;;  %v1842_v48 = vadd.f32 %v3314_v19, %v1841_v47  ;;  %v2783_v26 = vpop.f32.mrb[58].mxu0 }
 0x2eb   : > { %v1853_v49 = vadd.f32 %v2783_v26, %v3314_v19  ;;  %v1844_v51 = vpop.f32.mrb[59].mxu0  ;;  %v1946_v45 = vmax.f32 %v1850_v46, 0.0 }
 0x2ec   : > { %v1845_v53 = vadd.f32 %v3314_v19, %v1844_v51  ;;  %v1944_v55 = vmax.f32 %v1842_v48, 0.0 }
 0x2ed   : > { %v1947_v54 = vmax.f32 %v1853_v49, 0.0 }
 0x2ee   : > { %v1945_v50 = vmax.f32 %v1845_v53, 0.0 }
 0x2ef   : > { %v2409_v58 = vpack.c.bf16 %v1947_v54, %v1946_v45 }
 0x2f0   : > { %v2404_v59 = vpack.c.bf16 %v1945_v50, %v1944_v55 }
 0x2f1   : > { %2465 = vst [vmem:[%s3324_s24 + $0x28] sm:$0xff] %v2409_v58   ;;  %v2786_v32 = vpop.f32.mrb[60].mxu0 }
 0x2f2   : > { %2464 = vst [vmem:[%s3324_s24 + $0x20] sm:$0xff] %v2404_v59   ;;  %v1866_v60 = vadd.f32 %v2786_v32, %v3314_v19  ;;  %v1857_v61 = vpop.f32.mrb[61].mxu0 }
 0x2f3   : > { %v1858_v62 = vadd.f32 %v3314_v19, %v1857_v61  ;;  %v2787_v63 = vpop.f32.mrb[62].mxu0 }
 0x2f4   : > { %v1869_v1 = vadd.f32 %v2787_v63, %v3314_v19  ;;  %v1860_v2 = vpop.f32.mrb[63].mxu0  ;;  %v1950_v4 = vmax.f32 %v1866_v60, 0.0 }
 0x2f5   : > { %v1861_v3 = vadd.f32 %v3314_v19, %v1860_v2  ;;  %v1948_v56 = vmax.f32 %v1858_v62, 0.0 }
 0x2f6   : > { %v1951_v6 = vmax.f32 %v1869_v1, 0.0 }
 0x2f7   : > { %v1949_v9 = vmax.f32 %v1861_v3, 0.0 }
 0x2f8   : > { %v2419_v10 = vpack.c.bf16 %v1951_v6, %v1950_v4 }
 0x2f9   : > { %v2414_v11 = vpack.c.bf16 %v1949_v9, %v1948_v56 }
 0x2fa   : > { %2467 = vst [vmem:[%s3324_s24 + $0x38] sm:$0xff] %v2419_v10  }
 0x2fb   : > { %2466 = vst [vmem:[%s3324_s24 + $0x30] sm:$0xff] %v2414_v11  }
 0x302   : > { %v2790_v13 = vpop.f32.mrb[64].mxu0 }
 0x303   : > { %v1882_v0 = vadd.f32 %v2790_v13, %v3314_v19  ;;  %v1873_v14 = vpop.f32.mrb[65].mxu0 }
 0x304   : > { %v1874_v15 = vadd.f32 %v3314_v19, %v1873_v14  ;;  %v2791_v17 = vpop.f32.mrb[66].mxu0 }
 0x305   : > { %v1885_v52 = vadd.f32 %v2791_v17, %v3314_v19  ;;  %v1876_v18 = vpop.f32.mrb[67].mxu0  ;;  %v1954_v20 = vmax.f32 %v1882_v0, 0.0 }
 0x306   : > { %v1877_v12 = vadd.f32 %v3314_v19, %v1876_v18  ;;  %v1952_v22 = vmax.f32 %v1874_v15, 0.0 }
 0x307   : > { %v1955_v5 = vmax.f32 %v1885_v52, 0.0 }
 0x308   : > { %v1953_v30 = vmax.f32 %v1877_v12, 0.0 }
 0x309   : > { %v2429_v7 = vpack.c.bf16 %v1955_v5, %v1954_v20 }
 0x30a   : > { %v2424_v23 = vpack.c.bf16 %v1953_v30, %v1952_v22 }
 0x30b   : > { %2469 = vst [vmem:[%s3324_s24 + $0x48] sm:$0xff] %v2429_v7  }
 0x30c   : > { %2468 = vst [vmem:[%s3324_s24 + $0x40] sm:$0xff] %v2424_v23  }
 0x311   : > { %v2794_v25 = vpop.f32.mrb[68].mxu0 }
 0x312   : > { %v1898_v27 = vadd.f32 %v2794_v25, %v3314_v19  ;;  %v1889_v28 = vpop.f32.mrb[69].mxu0 }
 0x313   : > { %v1890_v57 = vadd.f32 %v3314_v19, %v1889_v28  ;;  %v2795_v29 = vpop.f32.mrb[70].mxu0 }
 0x314   : > { %v1901_v16 = vadd.f32 %v2795_v29, %v3314_v19  ;;  %v1892_v8 = vpop.f32.mrb[71].mxu0  ;;  %v1958_v33 = vmax.f32 %v1898_v27, 0.0 }
 0x315   : > { %v1893_v24 = vadd.f32 %v3314_v19, %v1892_v8  ;;  %v1956_v21 = vmax.f32 %v1890_v57, 0.0 }
 0x316   : > { %v1959_v34 = vmax.f32 %v1901_v16, 0.0 }
 0x317   : > { %v1957_v35 = vmax.f32 %v1893_v24, 0.0 }
 0x318   : > { %v2439_v36 = vpack.c.bf16 %v1959_v34, %v1958_v33 }
 0x319   : > { %v2434_v37 = vpack.c.bf16 %v1957_v35, %v1956_v21  ;;  %v2798_v38 = vpop.f32.mrb[72].mxu0 }
 0x31a   : > { %2471 = vst [vmem:[%s3324_s24 + $0x58] sm:$0xff] %v2439_v36   ;;  %v1914_v39 = vadd.f32 %v2798_v38, %v3314_v19  ;;  %v1905_v41 = vpop.f32.mrb[73].mxu0 }
 0x31b   : > { %2470 = vst [vmem:[%s3324_s24 + $0x50] sm:$0xff] %v2434_v37   ;;  %v1906_v42 = vadd.f32 %v3314_v19, %v1905_v41  ;;  %v2799_v43 = vpop.f32.mrb[74].mxu0 }
 0x31c   : > { %v1917_v31 = vadd.f32 %v2799_v43, %v3314_v19  ;;  %v1908_v44 = vpop.f32.mrb[75].mxu0  ;;  %v1962_v46 = vmax.f32 %v1914_v39, 0.0 }
 0x31d   : > { %v1909_v40 = vadd.f32 %v3314_v19, %v1908_v44  ;;  %v1960_v48 = vmax.f32 %v1906_v42, 0.0 }
 0x31e   : > { %v1963_v47 = vmax.f32 %v1917_v31, 0.0 }
 0x31f   : > { %v1961_v26 = vmax.f32 %v1909_v40, 0.0 }
 0x320   : > { %v2449_v49 = vpack.c.bf16 %v1963_v47, %v1962_v46 }
 0x321   : > { %v2444_v51 = vpack.c.bf16 %v1961_v26, %v1960_v48  ;;  %v2802_v53 = vpop.f32.mrb[76].mxu0 }
 0x322   : > { %2473 = vst [vmem:[%s3324_s24 + $0x68] sm:$0xff] %v2449_v49   ;;  %v1930_v45 = vadd.f32 %v2802_v53, %v3314_v19  ;;  %v1921_v54 = vpop.f32.mrb[77].mxu0 }
 0x323   : > { %2472 = vst [vmem:[%s3324_s24 + $0x60] sm:$0xff] %v2444_v51   ;;  %v1922_v55 = vadd.f32 %v3314_v19, %v1921_v54  ;;  %v2803_v50 = vpop.f32.mrb[78].mxu0 }
 0x324   : > { %v1933_v58 = vadd.f32 %v2803_v50, %v3314_v19  ;;  %v1924_v59 = vpop.f32.mrb[79].mxu0  ;;  %v1966_v60 = vmax.f32 %v1930_v45, 0.0 }
 0x325   : > { %v1925_v32 = vadd.f32 %v3314_v19, %v1924_v59  ;;  %v1964_v62 = vmax.f32 %v1922_v55, 0.0 }
 0x326   : > { %v1967_v61 = vmax.f32 %v1933_v58, 0.0 }
 0x327   : > { %v1965_v63 = vmax.f32 %v1925_v32, 0.0 }
 0x328   : > { %v2459_v1 = vpack.c.bf16 %v1967_v61, %v1966_v60 }
 0x329   : > { %v2454_v2 = vpack.c.bf16 %v1965_v63, %v1964_v62 }
 0x32a   : > { %2475 = vst [vmem:[%s3324_s24 + $0x78] sm:$0xff] %v2459_v1  }
 0x32b   : > { %2474 = vst [vmem:[%s3324_s24 + $0x70] sm:$0xff] %v2454_v2  }
 0x32c PF: > { %s17_s26 = sadd.s32 1, %s2971_s26   ;;  %s3387_s24 = smov %s2967_s25 }
 0x32d   : > { %p14_p5 = scmp.ge.s32.totalorder %s17_s26, 4   ;;  %s3388_s25 = smov %s3390_s27 }
 0x32f   :  { %16 = sbr.rel (!%p14_p5) target bundleno = 2 (0x2), region = 89 }

// kernel: nin_forward.9
= control target key start
LH: loop header
LB: loop body
LE: loop exit
PB: predicated region body
PF: predicated region fallthrough
CT: control target
= control target key end

     0   :  { %vm68_vm0 = vsmask.f32 3328  ;;  %vm69_vm1 = vsmask.f32 7440  ;;  %vm721_vm2 = vcmask 1040384   ;;  %vm722_vm3 = vcmask 1044484   ;;  %s4649_s0 = inlined_call_operand.vmem [shape: bf16[2,15,15,96], index: 0, kind: input, shape index: {}]   ;;  %s4650_s1 = inlined_call_operand.vmem [shape: bf16[2,13,13,96], index: 1, kind: output, shape index: {}]  }
   0x1   :  { %v8_v0 = vld [vmem:[%s4649_s0] sm:$0xf]  ;;  %v2852_v1 = vld [vmem:[%s4649_s0 + $0x4] sm:$0xf]  ;;  %v2857_v2 = vld [vmem:[%s4649_s0 + $0x8] sm:$0xf] }
   0x2   :  { %v2862_v3 = vld [vmem:[%s4649_s0 + $0xc] sm:$0xf]  ;;  %v2867_v4 = vld [vmem:[%s4649_s0 + $0x10] sm:$0xf]  ;;  %v72_v5 = vshrl.u32 %v8_v0, 16  ;;  %v75_v6 = vshll.u32 %v8_v0, 16  ;;  %vm2889_vm4 = vmor %vm721_vm2, %vm722_vm3 }
   0x3   :  { %v81_v7 = vshll.u32 %v2852_v1, 16  ;;  %v91_v8 = vshrl.u32 %v2857_v2, 16  ;;  %v2874_v9 = vld [vmem:[%s4649_s0 + $0x14] sm:$0xf]  ;;  %v94_v10 = vshll.u32 %v2857_v2, 16  ;;  %v100_v11 = vshll.u32 %v2862_v3, 16  ;;  %vm2895_vm5 = vmor %vm68_vm0, %vm69_vm1 }
   0x4   :  { %v104_v12 = vshrl.u32 %v2862_v3, 16  ;;  %v110_v13 = vshrl.u32 %v2867_v4, 16  ;;  %v74_v14 = vrot.slane %v72_v5, 4  ;;  %v77_v15 = vrot.slane %v75_v6, 5  ;;  %v2932_v59 = vld [vmem:[%s4649_s0 + $0x18] sm:$0xf] }
   0x5   :  { %v2880_v16 = vrot.slane %v81_v7, 5  ;;  %v93_v17 = vrot.slane %v91_v8, 4  ;;  %v96_v18 = vrot.slane %v94_v10, 5  ;;  %v102_v19 = vrot.slane %v100_v11, 5  ;;  %v2943_v63 = vld [vmem:[%s4649_s0 + $0x1c] sm:$0xf] }
   0x6   :  { %v106_v20 = vrot.slane %v104_v12, 4  ;;  %v112_v21 = vrot.slane %v110_v13, 4  ;;  %v78_v22 = vor.u32 %v77_v15, %v74_v14  ;;  %v113_v23 = vshll.u32 %v2867_v4, 16 }
   0x7   :  { %v119_v24 = vshll.u32 %v2874_v9, 16  ;;  %v123_v25 = vshrl.u32 %v2874_v9, 16  ;;  %v97_v26 = vor.u32 %v96_v18, %v93_v17  ;;  %v724_v28 = vrot.slane %v2857_v2, 7 }
   0x8   :  { %v107_v27 = vor.u32 %v106_v20, %v102_v19  ;;  %v726_v29 = vrot.slane %v2862_v3, 7  ;;  %v79_v30 = vrot.slane %v78_v22, 4  ;;  %v115_v31 = vrot.slane %v113_v23, 5 }
   0x9   :  { %v121_v32 = vrot.slane %v119_v24, 5  ;;  %v125_v33 = vrot.slane %v123_v25, 4  ;;  %v98_v36 = vrot.slane %v97_v26, 4  ;;  %v725_v37 = vrot.slane %v724_v28, 4 }
   0xa   :  { %v880_v38 = vmax.bf16 %v724_v28, %v8_v0  ;;  %v84_v39 = vsel %vm2895_vm5, %v79_v30, %v2880_v16  ;;  %v108_v40 = vrot.slane %v107_v27, 4  ;;  %v116_v41 = vor.u32 %v115_v31, %v112_v21 }
   0xb   :  { %v126_v42 = vor.u32 %v125_v33, %v121_v32  ;;  %v727_v43 = vsel %vm2889_vm4, %v725_v37, %v726_v29  ;;  %vm1076_vm6 = vcmask 1042432   ;;  %v103_v44 = vsel %vm2895_vm5, %v98_v36, %v102_v19 }
   0xc   :  { %v117_v45 = vrot.slane %v116_v41, 4  ;;  %v881_v47 = vmax.bf16 %v727_v43, %v2852_v1  ;;  %v2907_v48 = vmax.bf16 %v84_v39, %v8_v0  ;;  %vm1077_vm7 = vcmask 1046532  }
   0xd   :  { %v127_v46 = vrot.slane %v126_v42, 4  ;;  %v2784_v49 = vrot.slane %v880_v38, 9  ;;  %v2912_v51 = vmax.bf16 %v108_v40, %v2862_v3  ;;  %vm2917_vm8 = vmor %vm1076_vm6, %vm1077_vm7  ;;  %v2922_v55 = vmax.bf16 %v103_v44, %v2857_v2 }
   0xe   :  { %v122_v50 = vsel %vm2895_vm5, %v117_v45, %v121_v32  ;;  %v1081_v54 = vrot.slane %v881_v47, 5  ;;  %v2440_v57 = vrot.slane %v2874_v9, 5  ;;  %v85_v58 = vshrl.u32 %v2852_v1, 16 }
   0xf   :  { %v2915_v52 = vmax.bf16 %v127_v46, %v2874_v9  ;;  %v2925_v56 = vmax.bf16 %v122_v50, %v2867_v4  ;;  %vm1313_vm9 = vsmask.f32 256  ;;  %vm1314_vm10 = vsmask.f32 4368 }
  0x10   :  { %v2936_v60 = vsel %vm2917_vm8, %v2784_v49, %v1081_v54  ;;  %v2810_v6 = vrot.slane %v2867_v4, 9  ;;  %v87_v10 = vrot.slane %v85_v58, 4  ;;  %v1083_v11 = vrot.slane %v1081_v54, 4  ;;  %vm2957_vm11 = vmor %vm1313_vm9, %vm1314_vm10 }
  0x11   :  { %v1325_v61 = vshrl.u32 %v2915_v52, 16  ;;  %v1328_v62 = vshll.u32 %v2915_v52, 16  ;;  %v1317_v0 = vshrl.u32 %v2925_v56, 16  ;;  %v1320_v5 = vshll.u32 %v2925_v56, 16 }
  0x12   :  { %v1261_v7 = vmax.bf16 %v2936_v60, %v2907_v48  ;;  %v2952_v13 = vrot.slane %v2440_v57, 4  ;;  %v129_v14 = vshrl.u32 %v2932_v59, 16  ;;  %v132_v15 = vshll.u32 %v2932_v59, 16  ;;  %v2677_v48 = vld [vmem:[%s4650_s1 + $0x4] sm:$0x7] }
  0x13   :  { %v1327_v8 = vrot.slane %v1325_v61, 7  ;;  %v1319_v12 = vrot.slane %v1317_v0, 7  ;;  %v88_v19 = vor.u32 %v87_v10, %v2880_v16  ;;  %v138_v20 = vshll.u32 %v2943_v63, 16  ;;  %v2987_v10 = vld [vmem:[%s4649_s0 + $0x20] sm:$0xf] }
  0x14   :  { %v142_v21 = vshrl.u32 %v2943_v63, 16  ;;  %v131_v24 = vrot.slane %v129_v14, 4  ;;  %v134_v25 = vrot.slane %v132_v15, 5  ;;  %v728_v29 = vrot.slane %v2867_v4, 7 }
  0x15   :  { %v1330_v18 = vor.u32 %v1328_v62, %v1327_v8  ;;  %v1322_v22 = vor.u32 %v1320_v5, %v1319_v12  ;;  %v1323_v23 = vrot.slane %v1319_v12, 4  ;;  %v89_v26 = vrot.slane %v88_v19, 4 }
  0x16   :  { %v140_v27 = vrot.slane %v138_v20, 5  ;;  %v144_v28 = vrot.slane %v142_v21, 4  ;;  %v135_v32 = vor.u32 %v134_v25, %v131_v24  ;;  %v730_v16 = vrot.slane %v2874_v9, 7 }
  0x17   :  { %v1331_v30 = vsel %vm2957_vm11, %v1323_v23, %v1330_v18  ;;  %v1784_v31 = vmax.bf16 %v1322_v22, %v2922_v55  ;;  %v618_v36 = vmax.bf16 %v89_v26, %v2852_v1  ;;  %vm2674_vm12 = vcmask 780288  }
  0x18   :  { %v1785_v33 = vmax.bf16 %v1331_v30, %v2912_v51  ;;  %vm2675_vm13 = vsmask.f32 2304  ;;  %v145_v37 = vor.u32 %v144_v28, %v140_v27  ;;  %v729_v38 = vrot.slane %v728_v29, 4 }
  0x19   :  { %v1837_v39 = vshrl.u32 %v1784_v31, 16  ;;  %v1840_v40 = vshll.u32 %v1784_v31, 16  ;;  %v136_v41 = vrot.slane %v135_v32, 4  ;;  %v882_v42 = vmax.bf16 %v728_v29, %v2857_v2  ;;  %vm3019_vm15 = vmand %vm2674_vm12, %vm2675_vm13 }
  0x1a   :  { %v1846_v43 = vshll.u32 %v1785_v33, 16  ;;  %v1262_v44 = vmax.bf16 %v1083_v11, %v618_v36  ;;  %v1850_v45 = vshrl.u32 %v1785_v33, 16  ;;  %v146_v46 = vrot.slane %v145_v37, 4 }
  0x1b   :  { %v1839_v47 = vrot.slane %v1837_v39, 4  ;;  %v1842_v49 = vrot.slane %v1840_v40, 5  ;;  %vm2672_vm14 = vcmask 781312   ;;  %v141_v50 = vsel %vm2895_vm5, %v136_v41, %v140_v27 }
  0x1c   :  { %v731_v1 = vsel %vm2889_vm4, %v729_v38, %v730_v16  ;;  %v1848_v54 = vrot.slane %v1846_v43, 5  ;;  %v1852_v58 = vrot.slane %v1850_v45, 4  ;;  %v2977_v61 = vmax.bf16 %v141_v50, %v2932_v59  ;;  %v3015_v16 = vld [vmem:[%s4649_s0 + $0x24] sm:$0xf] }
  0x1d   :  { %v2980_v2 = vmax.bf16 %v146_v46, %v2943_v63  ;;  %v1843_v62 = vor.u32 %v1842_v49, %v1839_v47  ;;  %v883_v0 = vmax.bf16 %v731_v1, %v2862_v3  ;;  %v2785_v5 = vrot.slane %v882_v42, 9 }
  0x1e   :  { %v2811_v8 = vrot.slane %v2932_v59, 9  ;;  %v1853_v11 = vor.u32 %v1852_v58, %v1848_v54  ;;  %v1333_v12 = vshrl.u32 %v2977_v61, 16  ;;  %v1336_v14 = vshll.u32 %v2977_v61, 16 }
  0x1f   :  { %v1341_v15 = vshrl.u32 %v2980_v2, 16  ;;  %v1844_v18 = vrot.slane %v1843_v62, 4  ;;  %v1086_v19 = vrot.slane %v883_v0, 5  ;;  %v1344_v20 = vshll.u32 %v2980_v2, 16 }
  0x20   :  { %v2445_v3 = vrot.slane %v2943_v63, 5  ;;  %v1854_v21 = vrot.slane %v1853_v11, 4  ;;  %v1335_v22 = vrot.slane %v1333_v12, 7  ;;  %v148_v24 = vshrl.u32 %v2987_v10, 16 }
  0x21   :  { %v1343_v23 = vrot.slane %v1341_v15, 7  ;;  %v1849_v25 = vsel %vm2895_vm5, %v1844_v18, %v1848_v54  ;;  %v2441_v26 = vsel %vm2917_vm8, %v2810_v6, %v2440_v57  ;;  %v1087_v27 = vsel %vm2917_vm8, %v2785_v5, %v1086_v19 }
  0x22   :  { %v1088_v28 = vrot.slane %v1086_v19, 4  ;;  %v2382_v29 = vmax.bf16 %v1849_v25, %v1261_v7  ;;  %v2383_v30 = vmax.bf16 %v1854_v21, %v1262_v44  ;;  %v1338_v31 = vor.u32 %v1336_v14, %v1335_v22 }
  0x23   :  { %v3010_v32 = vsel %vm2917_vm8, %v2811_v8, %v2445_v3  ;;  %v1263_v60 = vmax.bf16 %v1087_v27, %v2922_v55  ;;  %v1339_v6 = vrot.slane %v1335_v22, 4  ;;  %v1346_v7 = vor.u32 %v1344_v20, %v1343_v23 }
  0x24   :  { %v3028_v33 = vmax.bf16 %v1088_v28, %v2912_v51  ;;  %v2620_v36 = vmax.bf16 %v2441_v26, %v2382_v29  ;;  %v2621_v37 = vmax.bf16 %v2952_v13, %v2383_v30  ;;  %v1786_v38 = vmax.bf16 %v1338_v31, %v2925_v56  ;;  %v3056_v26 = vld [vmem:[%s4649_s0 + $0x28] sm:$0xf] }
  0x25   :  { %v150_v39 = vrot.slane %v148_v24, 4  ;;  %v1347_v40 = vsel %vm2957_vm11, %v1339_v6, %v1346_v7  ;;  %v151_v41 = vshll.u32 %v2987_v10, 16  ;;  %v157_v42 = vshll.u32 %v3015_v16, 16 }
  0x26   :  { %v161_v55 = vshrl.u32 %v3015_v16, 16  ;;  %2673 = vst.msk [vmem:[%s4650_s1] sm:$0xf] %vm2672_vm14, %v2620_v36  ;;  %v2678_v51 = vsel %vm3019_vm15, %v2621_v37, %v2677_v48  ;;  %v1787_v13 = vmax.bf16 %v1347_v40, %v2915_v52  ;;  %v1856_v43 = vshrl.u32 %v1786_v38, 16 }
  0x27   :  { %v1859_v44 = vshll.u32 %v1786_v38, 16  ;;  %2679 = vst [vmem:[%s4650_s1 + $0x4] sm:$0x7] %v2678_v51  ;;  %v153_v45 = vrot.slane %v151_v41, 5  ;;  %v159_v46 = vrot.slane %v157_v42, 5  ;;  %v732_v49 = vrot.slane %v2932_v59, 7 }
  0x28   :  { %v163_v47 = vrot.slane %v161_v55, 4  ;;  %v1858_v50 = vrot.slane %v1856_v43, 4  ;;  %v1865_v54 = vshll.u32 %v1787_v13, 16  ;;  %v1869_v58 = vshrl.u32 %v1787_v13, 16 }
  0x29   :  { %v1861_v1 = vrot.slane %v1859_v44, 5  ;;  %v154_v62 = vor.u32 %v153_v45, %v150_v39  ;;  %v733_v5 = vrot.slane %v732_v49, 4  ;;  %v734_v8 = vrot.slane %v2943_v63, 7 }
  0x2a   :  { %v164_v0 = vor.u32 %v163_v47, %v159_v46  ;;  %v1867_v12 = vrot.slane %v1865_v54, 5  ;;  %v1871_v14 = vrot.slane %v1869_v58, 4  ;;  %v884_v15 = vmax.bf16 %v732_v49, %v2867_v4 }
  0x2b   :  { %v1862_v11 = vor.u32 %v1861_v1, %v1858_v50  ;;  %v2447_v18 = vrot.slane %v2445_v3, 4  ;;  %v155_v19 = vrot.slane %v154_v62, 4  ;;  %v735_v21 = vsel %vm2889_vm4, %v733_v5, %v734_v8 }
  0x2c   :  { %v165_v20 = vrot.slane %v164_v0, 4  ;;  %v1872_v23 = vor.u32 %v1871_v14, %v1867_v12  ;;  %v885_v24 = vmax.bf16 %v735_v21, %v2874_v9  ;;  %v2786_v25 = vrot.slane %v884_v15, 9 }
  0x2d   :  { %v1863_v22 = vrot.slane %v1862_v11, 4  ;;  %v160_v27 = vsel %vm2895_vm5, %v155_v19, %v159_v46  ;;  %v2812_v3 = vrot.slane %v2987_v10, 9  ;;  %v2450_v28 = vrot.slane %v3015_v16, 5 }
  0x2e   :  { %v3061_v4 = vmax.bf16 %v165_v20, %v3015_v16  ;;  %v1873_v9 = vrot.slane %v1872_v23, 4  ;;  %v3068_v30 = vmax.bf16 %v160_v27, %v2987_v10  ;;  %v3070_v31 = vrot.slane %v885_v24, 5 }
  0x2f   :  { %v1868_v29 = vsel %vm2895_vm5, %v1863_v22, %v1867_v12  ;;  %v167_v36 = vshrl.u32 %v3056_v26, 16  ;;  %v3096_v51 = vsel %vm2917_vm8, %v2812_v3, %v2450_v28  ;;  %v3099_v45 = vrot.slane %v2450_v28, 4 }
  0x30   :  { %v2384_v48 = vmax.bf16 %v1868_v29, %v1263_v60  ;;  %v1357_v6 = vshrl.u32 %v3061_v4, 16  ;;  %v1360_v7 = vshll.u32 %v3061_v4, 16  ;;  %v2385_v37 = vmax.bf16 %v1873_v9, %v3028_v33  ;;  %v3086_v60 = vld [vmem:[%s4649_s0 + $0x2c] sm:$0xf] }
  0x31   :  { %v3079_v38 = vsel %vm2917_vm8, %v2786_v25, %v3070_v31  ;;  %v1349_v39 = vshrl.u32 %v3068_v30, 16  ;;  %v1352_v40 = vshll.u32 %v3068_v30, 16  ;;  %v2681_v33 = vld [vmem:[%s4650_s1 + $0xc] sm:$0x7]  ;;  %v1093_v44 = vrot.slane %v3070_v31, 4 }
  0x32   :  { %v2622_v41 = vmax.bf16 %v3010_v32, %v2384_v48  ;;  %v1265_v42 = vmax.bf16 %v3079_v38, %v2925_v56  ;;  %v1359_v55 = vrot.slane %v1357_v6, 7  ;;  %v2623_v13 = vmax.bf16 %v2447_v18, %v2385_v37 }
  0x33   :  { %v1351_v43 = vrot.slane %v1349_v39, 7  ;;  %v169_v46 = vrot.slane %v167_v36, 4  ;;  %v170_v47 = vshll.u32 %v3056_v26, 16  ;;  %v176_v49 = vshll.u32 %v3086_v60, 16 }
  0x34   :  { %2680 = vst.msk [vmem:[%s4650_s1 + $0x8] sm:$0xf] %vm2672_vm14, %v2622_v41  ;;  %v1362_v32 = vor.u32 %v1360_v7, %v1359_v55  ;;  %v2682_v50 = vsel %vm3019_vm15, %v2623_v13, %v2681_v33  ;;  %v180_v58 = vshrl.u32 %v3086_v60, 16  ;;  %v736_v5 = vrot.slane %v2987_v10, 7 }
  0x35   :  { %v1354_v1 = vor.u32 %v1352_v40, %v1351_v43  ;;  %v1355_v54 = vrot.slane %v1351_v43, 4  ;;  %2683 = vst [vmem:[%s4650_s1 + $0xc] sm:$0x7] %v2682_v50  ;;  %v172_v62 = vrot.slane %v170_v47, 5  ;;  %v178_v0 = vrot.slane %v176_v49, 5 }
  0x36   :  { %v738_v8 = vrot.slane %v3015_v16, 7  ;;  %v182_v14 = vrot.slane %v180_v58, 4  ;;  %v2813_v15 = vrot.slane %v3056_v26, 9  ;;  %v737_v20 = vrot.slane %v736_v5, 4  ;;  %v3159_v58 = vld [vmem:[%s4649_s0 + $0x34] sm:$0xf] }
  0x37   :  { %v1363_v11 = vsel %vm2957_vm11, %v1355_v54, %v1362_v32  ;;  %v1788_v12 = vmax.bf16 %v1354_v1, %v2977_v61  ;;  %v173_v19 = vor.u32 %v172_v62, %v169_v46  ;;  %v886_v21 = vmax.bf16 %v736_v5, %v2932_v59  ;;  %v3128_v59 = vld [vmem:[%s4649_s0 + $0x30] sm:$0xf] }
  0x38   :  { %v1789_v18 = vmax.bf16 %v1363_v11, %v2980_v2  ;;  %v183_v24 = vor.u32 %v182_v14, %v178_v0  ;;  %v2455_v25 = vrot.slane %v3086_v60, 5  ;;  %v739_v29 = vsel %vm2889_vm4, %v737_v20, %v738_v8 }
  0x39   :  { %v1875_v22 = vshrl.u32 %v1788_v12, 16  ;;  %v1878_v23 = vshll.u32 %v1788_v12, 16  ;;  %v174_v28 = vrot.slane %v173_v19, 4  ;;  %v887_v6 = vmax.bf16 %v739_v29, %v2943_v63 }
  0x3a   :  { %v1884_v27 = vshll.u32 %v1789_v18, 16  ;;  %v1888_v3 = vshrl.u32 %v1789_v18, 16  ;;  %v184_v48 = vrot.slane %v183_v24, 4  ;;  %v2787_v39 = vrot.slane %v886_v21, 9  ;;  %v2685_v18 = vld [vmem:[%s4650_s1 + $0x14] sm:$0x7] }
  0x3b   :  { %v1877_v9 = vrot.slane %v1875_v22, 4  ;;  %v1880_v31 = vrot.slane %v1878_v23, 5  ;;  %v179_v37 = vsel %vm2895_vm5, %v174_v28, %v178_v0  ;;  %v1096_v55 = vrot.slane %v887_v6, 5 }
  0x3c   :  { %v1886_v7 = vrot.slane %v1884_v27, 5  ;;  %v1890_v36 = vrot.slane %v1888_v3, 4  ;;  %v3133_v41 = vmax.bf16 %v179_v37, %v3056_v26  ;;  %v3136_v33 = vmax.bf16 %v184_v48, %v3086_v60 }
  0x3d   :  { %v1881_v40 = vor.u32 %v1880_v31, %v1877_v9  ;;  %v1266_v63 = vmax.bf16 %v1093_v44, %v2915_v52  ;;  %v3143_v43 = vsel %vm2917_vm8, %v2813_v15, %v2455_v25  ;;  %v186_v32 = vshrl.u32 %v3128_v59, 16 }
  0x3e   :  { %v1891_v13 = vor.u32 %v1890_v36, %v1886_v7  ;;  %v3148_v47 = vsel %vm2917_vm8, %v2787_v39, %v1096_v55  ;;  %v1365_v49 = vshrl.u32 %v3133_v41, 16  ;;  %v1368_v50 = vshll.u32 %v3133_v41, 16 }
  0x3f   :  { %v1882_v46 = vrot.slane %v1881_v40, 4  ;;  %v1267_v52 = vmax.bf16 %v3148_v47, %v2977_v61  ;;  %v1373_v44 = vshrl.u32 %v3136_v33, 16  ;;  %v1376_v54 = vshll.u32 %v3136_v33, 16  ;;  %v2689_v47 = vld [vmem:[%s4650_s1 + $0x1c] sm:$0x7] }
  0x40   :  { %v1892_v1 = vrot.slane %v1891_v13, 4  ;;  %v1367_v0 = vrot.slane %v1365_v49, 7  ;;  %v1098_v5 = vrot.slane %v1096_v55, 4  ;;  %v188_v8 = vrot.slane %v186_v32, 4  ;;  %v3197_v32 = vld [vmem:[%s4649_s0 + $0x38] sm:$0xf] }
  0x41   :  { %v1887_v62 = vsel %vm2895_vm5, %v1882_v46, %v1886_v7  ;;  %v1375_v14 = vrot.slane %v1373_v44, 7  ;;  %v189_v15 = vshll.u32 %v3128_v59, 16  ;;  %v195_v22 = vshll.u32 %v3159_v58, 16 }
  0x42   :  { %v2386_v11 = vmax.bf16 %v1887_v62, %v1265_v42  ;;  %v2387_v12 = vmax.bf16 %v1892_v1, %v1266_v63  ;;  %v1370_v19 = vor.u32 %v1368_v50, %v1367_v0  ;;  %v1371_v20 = vrot.slane %v1367_v0, 4 }
  0x43   :  { %v3171_v21 = vmax.bf16 %v1098_v5, %v2980_v2  ;;  %v1378_v38 = vor.u32 %v1376_v54, %v1375_v14  ;;  %v191_v42 = vrot.slane %v189_v15, 5  ;;  %v197_v27 = vrot.slane %v195_v22, 5 }
  0x44   :  { %v2624_v23 = vmax.bf16 %v3096_v51, %v2386_v11  ;;  %v2625_v56 = vmax.bf16 %v3099_v45, %v2387_v12  ;;  %v1790_v24 = vmax.bf16 %v1370_v19, %v3068_v30  ;;  %v199_v3 = vshrl.u32 %v3159_v58, 16 }
  0x45   :  { %v740_v28 = vrot.slane %v3056_v26, 7  ;;  %v1379_v51 = vsel %vm2957_vm11, %v1371_v20, %v1378_v38  ;;  %v192_v45 = vor.u32 %v191_v42, %v188_v8  ;;  %v742_v29 = vrot.slane %v3086_v60, 7 }
  0x46   :  { %2684 = vst.msk [vmem:[%s4650_s1 + $0x10] sm:$0xf] %vm2672_vm14, %v2624_v23  ;;  %v2686_v2 = vsel %vm3019_vm15, %v2625_v56, %v2685_v18  ;;  %v1791_v9 = vmax.bf16 %v1379_v51, %v3061_v4  ;;  %v1894_v31 = vshrl.u32 %v1790_v24, 16  ;;  %v1897_v48 = vshll.u32 %v1790_v24, 16 }
  0x47   :  { %2687 = vst [vmem:[%s4650_s1 + $0x14] sm:$0x7] %v2686_v2  ;;  %v201_v6 = vrot.slane %v199_v3, 4  ;;  %v193_v7 = vrot.slane %v192_v45, 4  ;;  %v741_v36 = vrot.slane %v740_v28, 4  ;;  %v888_v37 = vmax.bf16 %v740_v28, %v2987_v10 }
  0x48   :  { %v2814_v39 = vrot.slane %v3128_v59, 9  ;;  %v1896_v40 = vrot.slane %v1894_v31, 4  ;;  %v1899_v55 = vrot.slane %v1897_v48, 5  ;;  %v1903_v63 = vshll.u32 %v1791_v9, 16  ;;  %v3234_v28 = vld [vmem:[%s4649_s0 + $0x3c] sm:$0xf] }
  0x49   :  { %v1907_v13 = vshrl.u32 %v1791_v9, 16  ;;  %v198_v46 = vsel %vm2895_vm5, %v193_v7, %v197_v27  ;;  %v202_v49 = vor.u32 %v201_v6, %v197_v27  ;;  %v743_v50 = vsel %vm2889_vm4, %v741_v36, %v742_v29 }
  0x4a   :  { %v2788_v1 = vrot.slane %v888_v37, 9  ;;  %v1900_v10 = vor.u32 %v1899_v55, %v1896_v40  ;;  %v1905_v44 = vrot.slane %v1903_v63, 5  ;;  %v3204_v62 = vmax.bf16 %v198_v46, %v3128_v59 }
  0x4b   :  { %v1909_v54 = vrot.slane %v1907_v13, 4  ;;  %v203_v0 = vrot.slane %v202_v49, 4  ;;  %v889_v5 = vmax.bf16 %v743_v50, %v3015_v16  ;;  %v2460_v8 = vrot.slane %v3159_v58, 5 }
  0x4c   :  { %v205_v11 = vshrl.u32 %v3197_v32, 16  ;;  %v1901_v12 = vrot.slane %v1900_v10, 4  ;;  %v1381_v15 = vshrl.u32 %v3204_v62, 16  ;;  %v1384_v18 = vshll.u32 %v3204_v62, 16 }
  0x4d   :  { %v1910_v14 = vor.u32 %v1909_v54, %v1905_v44  ;;  %v2457_v19 = vrot.slane %v2455_v25, 4  ;;  %v3214_v20 = vmax.bf16 %v203_v0, %v3159_v58  ;;  %v1101_v22 = vrot.slane %v889_v5, 5 }
  0x4e   :  { %v3220_v16 = vsel %vm2917_vm8, %v2814_v39, %v2460_v8  ;;  %v1906_v23 = vsel %vm2895_vm5, %v1901_v12, %v1905_v44  ;;  %v1383_v38 = vrot.slane %v1381_v15, 7  ;;  %v207_v42 = vrot.slane %v205_v11, 4 }
  0x4f   :  { %v1911_v56 = vrot.slane %v1910_v14, 4  ;;  %v2388_v25 = vmax.bf16 %v1906_v23, %v1267_v52  ;;  %v1102_v24 = vsel %vm2917_vm8, %v2788_v1, %v1101_v22  ;;  %v1389_v27 = vshrl.u32 %v3214_v20, 16 }
  0x50   :  { %v1392_v3 = vshll.u32 %v3214_v20, 16  ;;  %v1269_v51 = vmax.bf16 %v1102_v24, %v3068_v30  ;;  %v1386_v45 = vor.u32 %v1384_v18, %v1383_v38  ;;  %v1387_v29 = vrot.slane %v1383_v38, 4 }
  0x51   :  { %v2389_v2 = vmax.bf16 %v1911_v56, %v3171_v21  ;;  %v2626_v61 = vmax.bf16 %v3143_v43, %v2388_v25  ;;  %v1391_v52 = vrot.slane %v1389_v27, 7  ;;  %v1103_v9 = vrot.slane %v1101_v22, 4 }
  0x52   :  { %v208_v31 = vshll.u32 %v3197_v32, 16  ;;  %v1792_v6 = vmax.bf16 %v1386_v45, %v3133_v41  ;;  %v214_v7 = vshll.u32 %v3234_v28, 16  ;;  %v218_v21 = vshrl.u32 %v3234_v28, 16 }
  0x53   :  { %v2627_v48 = vmax.bf16 %v2457_v19, %v2389_v2  ;;  %2688 = vst.msk [vmem:[%s4650_s1 + $0x18] sm:$0xf] %vm2672_vm14, %v2626_v61  ;;  %v1394_v30 = vor.u32 %v1392_v3, %v1391_v52  ;;  %v3251_v43 = vmax.bf16 %v1103_v9, %v3061_v4  ;;  %v744_v37 = vrot.slane %v3128_v59, 7  ;;  %v3270_v19 = vld [vmem:[%s4649_s0 + $0x40] sm:$0xf] }
  0x54   :  { %v210_v36 = vrot.slane %v208_v31, 5  ;;  %v1913_v40 = vshrl.u32 %v1792_v6, 16  ;;  %v1916_v55 = vshll.u32 %v1792_v6, 16  ;;  %v216_v63 = vrot.slane %v214_v7, 5 }
  0x55   :  { %v2690_v39 = vsel %vm3019_vm15, %v2627_v48, %v2689_v47  ;;  %v1395_v13 = vsel %vm2957_vm11, %v1387_v29, %v1394_v30  ;;  %v220_v49 = vrot.slane %v218_v21, 4  ;;  %v745_v4 = vrot.slane %v744_v37, 4 }
  0x56   :  { %2691 = vst [vmem:[%s4650_s1 + $0x1c] sm:$0x7] %v2690_v39  ;;  %v211_v46 = vor.u32 %v210_v36, %v207_v42  ;;  %v1793_v50 = vmax.bf16 %v1395_v13, %v3136_v33  ;;  %v1915_v1 = vrot.slane %v1913_v40, 4  ;;  %v1918_v10 = vrot.slane %v1916_v55, 5 }
  0x57   :  { %v746_v44 = vrot.slane %v3159_v58, 7  ;;  %v221_v0 = vor.u32 %v220_v49, %v216_v63  ;;  %v890_v5 = vmax.bf16 %v744_v37, %v3056_v26  ;;  %v2815_v11 = vrot.slane %v3197_v32, 9 }
  0x58   :  { %v212_v54 = vrot.slane %v211_v46, 4  ;;  %v1919_v12 = vor.u32 %v1918_v10, %v1915_v1  ;;  %v1922_v14 = vshll.u32 %v1793_v50, 16  ;;  %v1926_v15 = vshrl.u32 %v1793_v50, 16 }
  0x59   :  { %v747_v18 = vsel %vm2889_vm4, %v745_v4, %v746_v44  ;;  %v222_v23 = vrot.slane %v221_v0, 4  ;;  %v2789_v26 = vrot.slane %v890_v5, 9  ;;  %v2465_v2 = vrot.slane %v3234_v28, 5 }
  0x5a   :  { %v217_v22 = vsel %vm2895_vm5, %v212_v54, %v216_v63  ;;  %v891_v56 = vmax.bf16 %v747_v18, %v3086_v60  ;;  %v1920_v38 = vrot.slane %v1919_v12, 4  ;;  %v1924_v42 = vrot.slane %v1922_v14, 5 }
  0x5b   :  { %v1928_v25 = vrot.slane %v1926_v15, 4  ;;  %v3276_v24 = vmax.bf16 %v217_v22, %v3197_v32  ;;  %v3279_v27 = vmax.bf16 %v222_v23, %v3234_v28  ;;  %v224_v45 = vshrl.u32 %v3270_v19, 16 }
  0x5c   :  { %v1106_v3 = vrot.slane %v891_v56, 5  ;;  %v1925_v29 = vsel %vm2895_vm5, %v1920_v38, %v1924_v42  ;;  %v2462_v7 = vrot.slane %v2460_v8, 4  ;;  %v3307_v39 = vsel %vm2917_vm8, %v2815_v11, %v2465_v2 }
  0x5d   :  { %v1929_v61 = vor.u32 %v1928_v25, %v1924_v42  ;;  %v1397_v60 = vshrl.u32 %v3276_v24, 16  ;;  %v1400_v47 = vshll.u32 %v3276_v24, 16  ;;  %v2390_v52 = vmax.bf16 %v1925_v29, %v1269_v51  ;;  %v3300_v51 = vld [vmem:[%s4649_s0 + $0x44] sm:$0xf] }
  0x5e   :  { %v3289_v9 = vsel %vm2917_vm8, %v2789_v26, %v1106_v3  ;;  %v1405_v31 = vshrl.u32 %v3279_v27, 16  ;;  %v1408_v48 = vshll.u32 %v3279_v27, 16  ;;  %v1108_v40 = vrot.slane %v1106_v3, 4 }
  0x5f   :  { %v1930_v6 = vrot.slane %v1929_v61, 4  ;;  %v1271_v21 = vmax.bf16 %v3289_v9, %v3133_v41  ;;  %v1399_v30 = vrot.slane %v1397_v60, 7  ;;  %v2628_v36 = vmax.bf16 %v3220_v16, %v2390_v52  ;;  %v2693_v16 = vld [vmem:[%s4650_s1 + $0x24] sm:$0x7]  ;;  %v2697_v9 = vld [vmem:[%s4650_s1 + $0x2c] sm:$0x7] }
  0x60   :  { %v1407_v37 = vrot.slane %v1405_v31, 7  ;;  %v226_v13 = vrot.slane %v224_v45, 4  ;;  %v3318_v49 = vmax.bf16 %v1108_v40, %v3136_v33  ;;  %v227_v4 = vshll.u32 %v3270_v19, 16 }
  0x61   :  { %v2391_v8 = vmax.bf16 %v1930_v6, %v3251_v43  ;;  %v1402_v55 = vor.u32 %v1400_v47, %v1399_v30  ;;  %v1403_v63 = vrot.slane %v1399_v30, 4  ;;  %2692 = vst.msk [vmem:[%s4650_s1 + $0x20] sm:$0xf] %vm2672_vm14, %v2628_v36  ;;  %v233_v43 = vshll.u32 %v3300_v51, 16 }
  0x62   :  { %v1410_v46 = vor.u32 %v1408_v48, %v1407_v37  ;;  %v237_v10 = vshrl.u32 %v3300_v51, 16  ;;  %v748_v44 = vrot.slane %v3197_v32, 7  ;;  %v229_v0 = vrot.slane %v227_v4, 5  ;;  %v3341_v48 = vld [vmem:[%s4649_s0 + $0x48] sm:$0xf] }
  0x63   :  { %v2629_v50 = vmax.bf16 %v2462_v7, %v2391_v8  ;;  %v1794_v1 = vmax.bf16 %v1402_v55, %v3204_v62  ;;  %v235_v5 = vrot.slane %v233_v43, 5  ;;  %v750_v11 = vrot.slane %v3234_v28, 7 }
  0x64   :  { %v1411_v54 = vsel %vm2957_vm11, %v1403_v63, %v1410_v46  ;;  %v230_v18 = vor.u32 %v229_v0, %v226_v13  ;;  %v239_v22 = vrot.slane %v237_v10, 4  ;;  %v749_v23 = vrot.slane %v748_v44, 4 }
  0x65   :  { %v2694_v33 = vsel %vm3019_vm15, %v2629_v50, %v2693_v16  ;;  %v1795_v12 = vmax.bf16 %v1411_v54, %v3214_v20  ;;  %v1932_v14 = vshrl.u32 %v1794_v1, 16  ;;  %v1935_v15 = vshll.u32 %v1794_v1, 16 }
  0x66   :  { %2695 = vst [vmem:[%s4650_s1 + $0x24] sm:$0x7] %v2694_v33  ;;  %v892_v56 = vmax.bf16 %v748_v44, %v3128_v59  ;;  %v231_v3 = vrot.slane %v230_v18, 4  ;;  %v240_v45 = vor.u32 %v239_v22, %v235_v5  ;;  %v751_v29 = vsel %vm2889_vm4, %v749_v23, %v750_v11  ;;  %v3381_v11 = vld [vmem:[%s4649_s0 + $0x4c] sm:$0xf] }
  0x67   :  { %v1934_v26 = vrot.slane %v1932_v14, 4  ;;  %v1937_v38 = vrot.slane %v1935_v15, 5  ;;  %v1941_v42 = vshll.u32 %v1795_v12, 16  ;;  %v1945_v25 = vshrl.u32 %v1795_v12, 16 }
  0x68   :  { %v2790_v61 = vrot.slane %v892_v56, 9  ;;  %v893_v31 = vmax.bf16 %v751_v29, %v3159_v58  ;;  %v236_v59 = vsel %vm2895_vm5, %v231_v3, %v235_v5  ;;  %v241_v6 = vrot.slane %v240_v45, 4 }
  0x69   :  { %v1938_v60 = vor.u32 %v1937_v38, %v1934_v26  ;;  %v1943_v47 = vrot.slane %v1941_v42, 5  ;;  %v1947_v52 = vrot.slane %v1945_v25, 4  ;;  %v2816_v7 = vrot.slane %v3270_v19, 9 }
  0x6a   :  { %v2470_v30 = vrot.slane %v3300_v51, 5  ;;  %v3348_v40 = vmax.bf16 %v236_v59, %v3270_v19  ;;  %v1111_v8 = vrot.slane %v893_v31, 5  ;;  %v2467_v58 = vrot.slane %v2465_v2, 4 }
  0x6b   :  { %v1939_v36 = vrot.slane %v1938_v60, 4  ;;  %v1948_v37 = vor.u32 %v1947_v52, %v1943_v47  ;;  %v3353_v55 = vmax.bf16 %v241_v6, %v3300_v51  ;;  %v243_v13 = vshrl.u32 %v3341_v48, 16 }
  0x6c   :  { %v3357_v63 = vsel %vm2917_vm8, %v2816_v7, %v2470_v30  ;;  %v3364_v4 = vsel %vm2917_vm8, %v2790_v61, %v1111_v8  ;;  %v1413_v43 = vshrl.u32 %v3348_v40, 16  ;;  %v1416_v50 = vshll.u32 %v3348_v40, 16 }
  0x6d   :  { %v1944_v16 = vsel %vm2895_vm5, %v1939_v36, %v1943_v47  ;;  %v1949_v46 = vrot.slane %v1948_v37, 4  ;;  %v1421_v1 = vshrl.u32 %v3353_v55, 16  ;;  %v3372_v10 = vrot.slane %v2470_v30, 4 }
  0x6e   :  { %v2392_v2 = vmax.bf16 %v1944_v16, %v1271_v21  ;;  %v1273_v54 = vmax.bf16 %v3364_v4, %v3204_v62  ;;  %v1415_v0 = vrot.slane %v1413_v43, 7  ;;  %v1424_v5 = vshll.u32 %v3353_v55, 16  ;;  %v2701_v62 = vld [vmem:[%s4650_s1 + $0x34] sm:$0x7] }
  0x6f   :  { %v2393_v44 = vmax.bf16 %v1949_v46, %v3318_v49  ;;  %v1423_v21 = vrot.slane %v1421_v1, 7  ;;  %v245_v33 = vrot.slane %v243_v13, 4  ;;  %v246_v49 = vshll.u32 %v3341_v48, 16 }
  0x70   :  { %v2630_v41 = vmax.bf16 %v3307_v39, %v2392_v2  ;;  %v1418_v14 = vor.u32 %v1416_v50, %v1415_v0  ;;  %v1419_v15 = vrot.slane %v1415_v0, 4  ;;  %v1113_v18 = vrot.slane %v1111_v8, 4 }
  0x71   :  { %v2631_v12 = vmax.bf16 %v2467_v58, %v2393_v44  ;;  %v1426_v22 = vor.u32 %v1424_v5, %v1423_v21  ;;  %v248_v23 = vrot.slane %v246_v49, 5  ;;  %v252_v39 = vshll.u32 %v3381_v11, 16 }
  0x72   :  { %2696 = vst.msk [vmem:[%s4650_s1 + $0x28] sm:$0xf] %vm2672_vm14, %v2630_v41  ;;  %v256_v56 = vshrl.u32 %v3381_v11, 16  ;;  %v1796_v38 = vmax.bf16 %v1418_v14, %v3276_v24  ;;  %v752_v42 = vrot.slane %v3270_v19, 7  ;;  %v754_v25 = vrot.slane %v3300_v51, 7 }
  0x73   :  { %v2698_v26 = vsel %vm3019_vm15, %v2631_v12, %v2697_v9  ;;  %v1427_v3 = vsel %vm2957_vm11, %v1419_v15, %v1426_v22  ;;  %v249_v45 = vor.u32 %v248_v23, %v245_v33  ;;  %v254_v29 = vrot.slane %v252_v39, 5 }
  0x74   :  { %2699 = vst [vmem:[%s4650_s1 + $0x2c] sm:$0x7] %v2698_v26  ;;  %v258_v61 = vrot.slane %v256_v56, 4  ;;  %v1797_v60 = vmax.bf16 %v1427_v3, %v3279_v27  ;;  %v1951_v47 = vshrl.u32 %v1796_v38, 16  ;;  %v1954_v52 = vshll.u32 %v1796_v38, 16 }
  0x75   :  { %v753_v31 = vrot.slane %v752_v42, 4  ;;  %v1274_v59 = vmax.bf16 %v1113_v18, %v3214_v20  ;;  %v250_v6 = vrot.slane %v249_v45, 4  ;;  %v894_v30 = vmax.bf16 %v752_v42, %v3197_v32  ;;  %v3418_v32 = vld [vmem:[%s4649_s0 + $0x50] sm:$0xf] }
  0x76   :  { %v259_v7 = vor.u32 %v258_v61, %v254_v29  ;;  %v1953_v36 = vrot.slane %v1951_v47, 4  ;;  %v1956_v37 = vrot.slane %v1954_v52, 5  ;;  %v1960_v8 = vshll.u32 %v1797_v60, 16 }
  0x77   :  { %v1964_v58 = vshrl.u32 %v1797_v60, 16  ;;  %v255_v13 = vsel %vm2895_vm5, %v250_v6, %v254_v29  ;;  %v755_v46 = vsel %vm2889_vm4, %v753_v31, %v754_v25  ;;  %v2817_v43 = vrot.slane %v3341_v48, 9  ;;  %v3446_v25 = vld [vmem:[%s4649_s0 + $0x54] sm:$0xf] }
  0x78   :  { %v260_v16 = vrot.slane %v259_v7, 4  ;;  %v1957_v2 = vor.u32 %v1956_v37, %v1953_v36  ;;  %v1962_v50 = vrot.slane %v1960_v8, 5  ;;  %v3413_v1 = vmax.bf16 %v255_v13, %v3341_v48 }
  0x79   :  { %v1966_v20 = vrot.slane %v1964_v58, 4  ;;  %v895_v0 = vmax.bf16 %v755_v46, %v3234_v28  ;;  %v2791_v5 = vrot.slane %v894_v30, 9  ;;  %v2475_v41 = vrot.slane %v3381_v11, 5 }
  0x7a   :  { %v3421_v44 = vmax.bf16 %v260_v16, %v3381_v11  ;;  %v1958_v9 = vrot.slane %v1957_v2, 4  ;;  %v1429_v33 = vshrl.u32 %v3413_v1, 16  ;;  %v1432_v49 = vshll.u32 %v3413_v1, 16 }
  0x7b   :  { %v1967_v21 = vor.u32 %v1966_v20, %v1962_v50  ;;  %v1116_v12 = vrot.slane %v895_v0, 5  ;;  %v262_v18 = vshrl.u32 %v3418_v32, 16  ;;  %v3434_v39 = vsel %vm2917_vm8, %v2817_v43, %v2475_v41 }
  0x7c   :  { %v1437_v14 = vshrl.u32 %v3421_v44, 16  ;;  %v1440_v15 = vshll.u32 %v3421_v44, 16  ;;  %v1963_v22 = vsel %vm2895_vm5, %v1958_v9, %v1962_v50  ;;  %v1431_v23 = vrot.slane %v1429_v33, 7 }
  0x7d   :  { %v1968_v28 = vrot.slane %v1967_v21, 4  ;;  %v2394_v56 = vmax.bf16 %v1963_v22, %v1273_v54  ;;  %v1117_v26 = vsel %vm2917_vm8, %v2791_v5, %v1116_v12  ;;  %v3441_v42 = vrot.slane %v2475_v41, 4 }
  0x7e   :  { %v1439_v38 = vrot.slane %v1437_v14, 7  ;;  %v1434_v45 = vor.u32 %v1432_v49, %v1431_v23  ;;  %v1435_v29 = vrot.slane %v1431_v23, 4  ;;  %v1118_v61 = vrot.slane %v1116_v12, 4  ;;  %v3479_v14 = vld [vmem:[%s4649_s0 + $0x58] sm:$0xf] }
  0x7f   :  { %v2395_v3 = vmax.bf16 %v1968_v28, %v1274_v59  ;;  %v2632_v60 = vmax.bf16 %v3357_v63, %v2394_v56  ;;  %v1275_v4 = vmax.bf16 %v1117_v26, %v3276_v24  ;;  %v264_v47 = vrot.slane %v262_v18, 4 }
  0x80   :  { %v1442_v54 = vor.u32 %v1440_v15, %v1439_v38  ;;  %v1798_v31 = vmax.bf16 %v1434_v45, %v3348_v40  ;;  %v265_v6 = vshll.u32 %v3418_v32, 16  ;;  %v271_v59 = vshll.u32 %v3446_v25, 16 }
  0x81   :  { %v2633_v52 = vmax.bf16 %v3372_v10, %v2395_v3  ;;  %2700 = vst.msk [vmem:[%s4650_s1 + $0x30] sm:$0xf] %vm2672_vm14, %v2632_v60  ;;  %v275_v24 = vshrl.u32 %v3446_v25, 16  ;;  %v756_v7 = vrot.slane %v3341_v48, 7  ;;  %v758_v10 = vrot.slane %v3381_v11, 7 }
  0x82   :  { %v1443_v63 = vsel %vm2957_vm11, %v1435_v29, %v1442_v54  ;;  %v1970_v37 = vshrl.u32 %v1798_v31, 16  ;;  %v1973_v8 = vshll.u32 %v1798_v31, 16  ;;  %v267_v58 = vrot.slane %v265_v6, 5 }
  0x83   :  { %v2702_v30 = vsel %vm3019_vm15, %v2633_v52, %v2701_v62  ;;  %v1799_v36 = vmax.bf16 %v1443_v63, %v3353_v55  ;;  %v273_v13 = vrot.slane %v271_v59, 5  ;;  %v277_v16 = vrot.slane %v275_v24, 4  ;;  %v3512_v24 = vld [vmem:[%s4649_s0 + $0x5c] sm:$0xf] }
  0x84   :  { %2703 = vst [vmem:[%s4650_s1 + $0x34] sm:$0x7] %v2702_v30  ;;  %v757_v46 = vrot.slane %v756_v7, 4  ;;  %v1972_v43 = vrot.slane %v1970_v37, 4  ;;  %v1975_v2 = vrot.slane %v1973_v8, 5  ;;  %v268_v0 = vor.u32 %v267_v58, %v264_v47 }
  0x85   :  { %v1979_v50 = vshll.u32 %v1799_v36, 16  ;;  %v1983_v20 = vshrl.u32 %v1799_v36, 16  ;;  %v278_v5 = vor.u32 %v277_v16, %v273_v13  ;;  %v896_v9 = vmax.bf16 %v756_v7, %v3270_v19  ;;  %v2705_v7 = vld [vmem:[%s4650_s1 + $0x3c] sm:$0x7] }
  0x86   :  { %v759_v41 = vsel %vm2889_vm4, %v757_v46, %v758_v10  ;;  %v1976_v21 = vor.u32 %v1975_v2, %v1972_v43  ;;  %v1276_v15 = vmax.bf16 %v1118_v61, %v3279_v27  ;;  %v269_v18 = vrot.slane %v268_v0, 4 }
  0x87   :  { %v1981_v33 = vrot.slane %v1979_v50, 5  ;;  %v1985_v49 = vrot.slane %v1983_v20, 4  ;;  %v897_v12 = vmax.bf16 %v759_v41, %v3300_v51  ;;  %v279_v22 = vrot.slane %v278_v5, 4 }
  0x88   :  { %v2792_v28 = vrot.slane %v896_v9, 9  ;;  %v1977_v23 = vrot.slane %v1976_v21, 4  ;;  %v2818_v19 = vrot.slane %v3418_v32, 9  ;;  %v274_v38 = vsel %vm2895_vm5, %v269_v18, %v273_v13 }
  0x89   :  { %v1986_v56 = vor.u32 %v1985_v49, %v1981_v33  ;;  %v3482_v26 = vrot.slane %v897_v12, 5  ;;  %v3488_v51 = vmax.bf16 %v279_v22, %v3446_v25  ;;  %v281_v3 = vshrl.u32 %v3479_v14, 16 }
  0x8a   :  { %v284_v45 = vshll.u32 %v3479_v14, 16  ;;  %v1982_v27 = vsel %vm2895_vm5, %v1977_v23, %v1981_v33  ;;  %v3495_v61 = vmax.bf16 %v274_v38, %v3418_v32  ;;  %v2480_v52 = vrot.slane %v3446_v25, 5 }
  0x8b   :  { %v1987_v29 = vrot.slane %v1986_v56, 4  ;;  %v3500_v60 = vsel %vm2917_vm8, %v2792_v28, %v3482_v26  ;;  %v2396_v62 = vmax.bf16 %v1982_v27, %v1275_v4  ;;  %v1453_v54 = vshrl.u32 %v3488_v51, 16 }
  0x8c   :  { %v1456_v47 = vshll.u32 %v3488_v51, 16  ;;  %v1277_v6 = vmax.bf16 %v3500_v60, %v3348_v40  ;;  %v1445_v59 = vshrl.u32 %v3495_v61, 16  ;;  %v1448_v63 = vshll.u32 %v3495_v61, 16 }
  0x8d   :  { %v2397_v31 = vmax.bf16 %v1987_v29, %v1276_v15  ;;  %v2634_v4 = vmax.bf16 %v3434_v39, %v2396_v62  ;;  %v1455_v10 = vrot.slane %v1453_v54, 7  ;;  %v3520_v30 = vsel %vm2917_vm8, %v2818_v19, %v2480_v52 }
  0x8e   :  { %v1123_v36 = vrot.slane %v3482_v26, 4  ;;  %v1447_v8 = vrot.slane %v1445_v59, 7  ;;  %v283_v58 = vrot.slane %v281_v3, 4  ;;  %v286_v13 = vrot.slane %v284_v45, 5 }
  0x8f   :  { %v2635_v37 = vmax.bf16 %v3441_v42, %v2397_v31  ;;  %2704 = vst.msk [vmem:[%s4650_s1 + $0x38] sm:$0xf] %vm2672_vm14, %v2634_v4  ;;  %v1458_v39 = vor.u32 %v1456_v47, %v1455_v10  ;;  %v3528_v16 = vrot.slane %v2480_v52, 4  ;;  %v290_v46 = vshll.u32 %v3512_v24, 16 }
  0x90   :  { %v294_v43 = vshrl.u32 %v3512_v24, 16  ;;  %v1450_v50 = vor.u32 %v1448_v63, %v1447_v8  ;;  %v1451_v42 = vrot.slane %v1447_v8, 4  ;;  %v287_v20 = vor.u32 %v286_v13, %v283_v58  ;;  %v3560_v63 = vld [vmem:[%s4649_s0 + $0x60] sm:$0xf] }
  0x91   :  { %v2706_v2 = vsel %vm3019_vm15, %v2635_v37, %v2705_v7  ;;  %v292_v0 = vrot.slane %v290_v46, 5  ;;  %v760_v41 = vrot.slane %v3418_v32, 7  ;;  %v762_v9 = vrot.slane %v3446_v25, 7 }
  0x92   :  { %2707 = vst [vmem:[%s4650_s1 + $0x3c] sm:$0x7] %v2706_v2  ;;  %v296_v5 = vrot.slane %v294_v43, 4  ;;  %v1459_v21 = vsel %vm2957_vm11, %v1451_v42, %v1458_v39  ;;  %v1800_v33 = vmax.bf16 %v1450_v50, %v3413_v1  ;;  %v288_v49 = vrot.slane %v287_v20, 4  ;;  %v3579_v20 = vld [vmem:[%s4649_s0 + $0x64] sm:$0xf] }
  0x93   :  { %v2819_v12 = vrot.slane %v3479_v14, 9  ;;  %v1801_v15 = vmax.bf16 %v1459_v21, %v3421_v44  ;;  %v761_v22 = vrot.slane %v760_v41, 4  ;;  %v898_v28 = vmax.bf16 %v760_v41, %v3341_v48 }
  0x94   :  { %v297_v18 = vor.u32 %v296_v5, %v292_v0  ;;  %v1989_v23 = vshrl.u32 %v1800_v33, 16  ;;  %v1992_v56 = vshll.u32 %v1800_v33, 16  ;;  %v293_v26 = vsel %vm2895_vm5, %v288_v49, %v292_v0 }
  0x95   :  { %v2485_v19 = vrot.slane %v3512_v24, 5  ;;  %v1998_v38 = vshll.u32 %v1801_v15, 16  ;;  %v2002_v3 = vshrl.u32 %v1801_v15, 16  ;;  %v3549_v27 = vmax.bf16 %v293_v26, %v3479_v14  ;;  %v2709_v15 = vld [vmem:[%s4650_s1 + $0x44] sm:$0x7] }
  0x96   :  { %v298_v45 = vrot.slane %v297_v18, 4  ;;  %v1991_v29 = vrot.slane %v1989_v23, 4  ;;  %v1994_v62 = vrot.slane %v1992_v56, 5  ;;  %v763_v54 = vsel %vm2889_vm4, %v761_v22, %v762_v9 }
  0x97   :  { %v2793_v47 = vrot.slane %v898_v28, 9  ;;  %v2000_v48 = vrot.slane %v1998_v38, 5  ;;  %v2004_v52 = vrot.slane %v2002_v3, 4  ;;  %v899_v59 = vmax.bf16 %v763_v54, %v3381_v11 }
  0x98   :  { %v3554_v31 = vmax.bf16 %v298_v45, %v3512_v24  ;;  %v1995_v4 = vor.u32 %v1994_v62, %v1991_v29  ;;  %v1278_v7 = vmax.bf16 %v1123_v36, %v3353_v55  ;;  %v1461_v10 = vshrl.u32 %v3549_v27, 16 }
  0x99   :  { %v1464_v37 = vshll.u32 %v3549_v27, 16  ;;  %v2005_v8 = vor.u32 %v2004_v52, %v2000_v48  ;;  %v1126_v58 = vrot.slane %v899_v59, 5  ;;  %v3569_v43 = vsel %vm2917_vm8, %v2819_v12, %v2485_v19 }
  0x9a   :  { %v1469_v13 = vshrl.u32 %v3554_v31, 16  ;;  %v1472_v39 = vshll.u32 %v3554_v31, 16  ;;  %v1996_v46 = vrot.slane %v1995_v4, 4  ;;  %v1463_v11 = vrot.slane %v1461_v10, 7 }
  0x9b   :  { %v300_v2 = vshrl.u32 %v3560_v63, 16  ;;  %v2006_v50 = vrot.slane %v2005_v8, 4  ;;  %v1127_v55 = vsel %vm2917_vm8, %v2793_v47, %v1126_v58  ;;  %v3574_v42 = vrot.slane %v2485_v19, 4 }
  0x9c   :  { %v1471_v36 = vrot.slane %v1469_v13, 7  ;;  %v2001_v0 = vsel %vm2895_vm5, %v1996_v46, %v2000_v48  ;;  %v1466_v5 = vor.u32 %v1464_v37, %v1463_v11  ;;  %v1467_v41 = vrot.slane %v1463_v11, 4 }
  0x9d   :  { %v1128_v9 = vrot.slane %v1126_v58, 4  ;;  %v2398_v21 = vmax.bf16 %v2001_v0, %v1277_v6  ;;  %v2399_v33 = vmax.bf16 %v2006_v50, %v1278_v7  ;;  %v1279_v49 = vmax.bf16 %v1127_v55, %v3413_v1 }
  0x9e   :  { %v1474_v12 = vor.u32 %v1472_v39, %v1471_v36  ;;  %v1802_v18 = vmax.bf16 %v1466_v5, %v3495_v61  ;;  %v302_v22 = vrot.slane %v300_v2, 4  ;;  %v303_v28 = vshll.u32 %v3560_v63, 16 }
  0x9f   :  { %v309_v23 = vshll.u32 %v3579_v20, 16  ;;  %v2636_v56 = vmax.bf16 %v3520_v30, %v2398_v21  ;;  %v2637_v40 = vmax.bf16 %v3528_v16, %v2399_v33  ;;  %v313_v1 = vshrl.u32 %v3579_v20, 16 }
  0xa0   :  { %v1475_v60 = vsel %vm2957_vm11, %v1467_v41, %v1474_v12  ;;  %v2008_v26 = vshrl.u32 %v1802_v18, 16  ;;  %v2011_v19 = vshll.u32 %v1802_v18, 16  ;;  %v305_v38 = vrot.slane %v303_v28, 5 }
  0xa1   :  { %v1803_v6 = vmax.bf16 %v1475_v60, %v3488_v51  ;;  %2708 = vst.msk [vmem:[%s4650_s1 + $0x40] sm:$0xf] %vm2672_vm14, %v2636_v56  ;;  %v2710_v30 = vsel %vm3019_vm15, %v2637_v40, %v2709_v15  ;;  %v311_v3 = vrot.slane %v309_v23, 5  ;;  %v315_v16 = vrot.slane %v313_v1, 4 }
  0xa2   :  { %v764_v45 = vrot.slane %v3479_v14, 7  ;;  %2711 = vst [vmem:[%s4650_s1 + $0x44] sm:$0x7] %v2710_v30  ;;  %v2010_v29 = vrot.slane %v2008_v26, 4  ;;  %v2013_v62 = vrot.slane %v2011_v19, 5  ;;  %v306_v48 = vor.u32 %v305_v38, %v302_v22 }
  0xa3   :  { %v2017_v54 = vshll.u32 %v1803_v6, 16  ;;  %v2021_v47 = vshrl.u32 %v1803_v6, 16  ;;  %v316_v52 = vor.u32 %v315_v16, %v311_v3  ;;  %v766_v4 = vrot.slane %v3512_v24, 7  ;;  %v3649_v6 = vld [vmem:[%s4649_s0 + $0x68] sm:$0xf] }
  0xa4   :  { %v765_v59 = vrot.slane %v764_v45, 4  ;;  %v2014_v7 = vor.u32 %v2013_v62, %v2010_v29  ;;  %v900_v8 = vmax.bf16 %v764_v45, %v3418_v32  ;;  %v1280_v58 = vmax.bf16 %v1128_v9, %v3421_v44  ;;  %v3655_v38 = vld [vmem:[%s4649_s0 + $0x6c] sm:$0xf] }
  0xa5   :  { %v2019_v10 = vrot.slane %v2017_v54, 5  ;;  %v2023_v37 = vrot.slane %v2021_v47, 4  ;;  %v307_v13 = vrot.slane %v306_v48, 4  ;;  %v317_v39 = vrot.slane %v316_v52, 4 }
  0xa6   :  { %v767_v46 = vsel %vm2889_vm4, %v765_v59, %v766_v4  ;;  %v2015_v11 = vrot.slane %v2014_v7, 4  ;;  %v2794_v55 = vrot.slane %v900_v8, 9  ;;  %v2820_v32 = vrot.slane %v3560_v63, 9 }
  0xa7   :  { %v2024_v2 = vor.u32 %v2023_v37, %v2019_v10  ;;  %v901_v50 = vmax.bf16 %v767_v46, %v3446_v25  ;;  %v312_v36 = vsel %vm2895_vm5, %v307_v13, %v311_v3  ;;  %v3618_v0 = vmax.bf16 %v317_v39, %v3579_v20 }
  0xa8   :  { %v768_v44 = vrot.slane %v3560_v63, 7  ;;  %v2020_v5 = vsel %vm2895_vm5, %v2015_v11, %v2019_v10  ;;  %v3625_v9 = vmax.bf16 %v312_v36, %v3560_v63  ;;  %v2490_v15 = vrot.slane %v3579_v20, 5 }
  0xa9   :  { %v2025_v41 = vrot.slane %v2024_v2, 4  ;;  %v1131_v21 = vrot.slane %v901_v50, 5  ;;  %v2400_v25 = vmax.bf16 %v2020_v5, %v1279_v49  ;;  %v1485_v33 = vshrl.u32 %v3618_v0, 16  ;;  %v2713_v49 = vld [vmem:[%s4650_s1 + $0x4c] sm:$0x7] }
  0xaa   :  { %v1488_v12 = vshll.u32 %v3618_v0, 16  ;;  %v1477_v28 = vshrl.u32 %v3625_v9, 16  ;;  %v1480_v23 = vshll.u32 %v3625_v9, 16  ;;  %v3644_v1 = vsel %vm2917_vm8, %v2820_v32, %v2490_v15 }
  0xab   :  { %v2401_v18 = vmax.bf16 %v2025_v41, %v1280_v58  ;;  %v3632_v22 = vsel %vm2917_vm8, %v2794_v55, %v1131_v21  ;;  %v2638_v56 = vmax.bf16 %v3569_v43, %v2400_v25  ;;  %v1487_v60 = vrot.slane %v1485_v33, 7 }
  0xac   :  { %v1281_v40 = vmax.bf16 %v3632_v22, %v3495_v61  ;;  %v1479_v43 = vrot.slane %v1477_v28, 7  ;;  %v1133_v19 = vrot.slane %v1131_v21, 4  ;;  %v769_v30 = vrot.slane %v768_v44, 4 }
  0xad   :  { %v2639_v26 = vmax.bf16 %v3574_v42, %v2401_v18  ;;  %2712 = vst.msk [vmem:[%s4650_s1 + $0x48] sm:$0xf] %vm2672_vm14, %v2638_v56  ;;  %v1490_v3 = vor.u32 %v1488_v12, %v1487_v60  ;;  %v3661_v16 = vrot.slane %v2490_v15, 4  ;;  %v770_v45 = vrot.slane %v3579_v20, 7 }
  0xae   :  { %v902_v42 = vmax.bf16 %v768_v44, %v3479_v14  ;;  %v1482_v62 = vor.u32 %v1480_v23, %v1479_v43  ;;  %v1483_v54 = vrot.slane %v1479_v43, 4  ;;  %v933_v47 = vshrl.u32 %v3649_v6, 16 }
  0xaf   :  { %v2714_v29 = vsel %vm3019_vm15, %v2639_v26, %v2713_v49  ;;  %v771_v48 = vsel %vm2889_vm4, %v769_v30, %v770_v45  ;;  %v936_v52 = vshll.u32 %v3649_v6, 16  ;;  %v942_v59 = vshll.u32 %v3655_v38, 16 }
  0xb0   :  { %2715 = vst [vmem:[%s4650_s1 + $0x4c] sm:$0x7] %v2714_v29  ;;  %v946_v14 = vshrl.u32 %v3655_v38, 16  ;;  %v1491_v4 = vsel %vm2957_vm11, %v1483_v54, %v1490_v3  ;;  %v1804_v7 = vmax.bf16 %v1482_v62, %v3549_v27  ;;  %v903_v10 = vmax.bf16 %v771_v48, %v3512_v24 }
  0xb1   :  { %v935_v37 = vrot.slane %v933_v47, 4  ;;  %v1805_v8 = vmax.bf16 %v1491_v4, %v3554_v31  ;;  %v938_v58 = vrot.slane %v936_v52, 5  ;;  %v944_v13 = vrot.slane %v942_v59, 5 }
  0xb2   :  { %v948_v39 = vrot.slane %v946_v14, 4  ;;  %v2027_v46 = vshrl.u32 %v1804_v7, 16  ;;  %v2030_v11 = vshll.u32 %v1804_v7, 16  ;;  %v2795_v2 = vrot.slane %v902_v42, 9 }
  0xb3   :  { %v1136_v50 = vrot.slane %v903_v10, 5  ;;  %v2036_v55 = vshll.u32 %v1805_v8, 16  ;;  %v2040_v36 = vshrl.u32 %v1805_v8, 16  ;;  %v939_v32 = vor.u32 %v938_v58, %v935_v37  ;;  %v2717_v10 = vld [vmem:[%s4650_s1 + $0x54] sm:$0x7] }
  0xb4   :  { %v949_v44 = vor.u32 %v948_v39, %v944_v13  ;;  %v2029_v5 = vrot.slane %v2027_v46, 4  ;;  %v2032_v41 = vrot.slane %v2030_v11, 5  ;;  %v2821_v24 = vrot.slane %v3649_v6, 9 }
  0xb5   :  { %v3683_v21 = vsel %vm2917_vm8, %v2795_v2, %v1136_v50  ;;  %v2038_v25 = vrot.slane %v2036_v55, 5  ;;  %v2042_v33 = vrot.slane %v2040_v36, 4  ;;  %v940_v12 = vrot.slane %v939_v32, 4 }
  0xb6   :  { %v950_v15 = vrot.slane %v949_v44, 4  ;;  %v2033_v18 = vor.u32 %v2032_v41, %v2029_v5  ;;  %v1282_v28 = vmax.bf16 %v1133_v19, %v3488_v51  ;;  %v2495_v23 = vrot.slane %v3655_v38, 5 }
  0xb7   :  { %v1138_v56 = vrot.slane %v1136_v50, 4  ;;  %v2043_v49 = vor.u32 %v2042_v33, %v2038_v25  ;;  %v945_v60 = vsel %vm2895_vm5, %v940_v12, %v944_v13  ;;  %v772_v43 = vrot.slane %v3649_v6, 7 }
  0xb8   :  { %v3691_v26 = vmax.bf16 %v950_v15, %v3655_v38  ;;  %v2034_v30 = vrot.slane %v2033_v18, 4  ;;  %v3695_v3 = vmax.bf16 %v945_v60, %v3649_v6  ;;  %v1283_v45 = vmax.bf16 %v3683_v21, %v3549_v27  ;;  %v36_v6 = vld [vmem:[%s4649_s0 + $0x70] sm:$0xf]  ;;  %v2721_v27 = vld [vmem:[%s4650_s1 + $0x5c] sm:$0x7] }
  0xb9   :  { %v3701_v51 = vsel %vm2917_vm8, %v2821_v24, %v2495_v23  ;;  %v2044_v19 = vrot.slane %v2043_v49, 4  ;;  %v3706_v62 = vmax.bf16 %v1138_v56, %v3554_v31  ;;  %v773_v52 = vrot.slane %v772_v43, 4  ;;  %v37_v31 = vld [vmem:[%s4649_s0 + $0x74] sm:$0xf] }
  0xba   :  { %v1501_v42 = vshrl.u32 %v3691_v26, 16  ;;  %v1504_v29 = vshll.u32 %v3691_v26, 16  ;;  %v2039_v54 = vsel %vm2895_vm5, %v2034_v30, %v2038_v25  ;;  %v1493_v47 = vshrl.u32 %v3695_v3, 16 }
  0xbb   :  { %v1496_v48 = vshll.u32 %v3695_v3, 16  ;;  %v2402_v59 = vmax.bf16 %v2039_v54, %v1281_v40  ;;  %v2403_v14 = vmax.bf16 %v2044_v19, %v1282_v28  ;;  %v774_v7 = vrot.slane %v3655_v38, 7 }
  0xbc   :  { %v1503_v4 = vrot.slane %v1501_v42, 7  ;;  %v1495_v37 = vrot.slane %v1493_v47, 7  ;;  %v904_v8 = vmax.bf16 %v772_v43, %v3560_v63  ;;  %v979_v58 = vshrl.u32 %v36_v6, 16  ;;  %v3754_v42 = vld [vmem:[%s4649_s0 + $0x78] sm:$0xf] }
  0xbd   :  { %v982_v13 = vshll.u32 %v36_v6, 16  ;;  %v2640_v61 = vmax.bf16 %v3644_v1, %v2402_v59  ;;  %v2641_v22 = vmax.bf16 %v3661_v16, %v2403_v14  ;;  %v775_v39 = vsel %vm2889_vm4, %v773_v52, %v774_v7 }
  0xbe   :  { %v1506_v40 = vor.u32 %v1504_v29, %v1503_v4  ;;  %v1498_v46 = vor.u32 %v1496_v48, %v1495_v37  ;;  %v1499_v11 = vrot.slane %v1495_v37, 4  ;;  %v905_v38 = vmax.bf16 %v775_v39, %v3579_v20  ;;  %v3768_v37 = vld [vmem:[%s4649_s0 + $0x7c] sm:$0xf] }
  0xbf   :  { %v981_v2 = vrot.slane %v979_v58, 4  ;;  %2716 = vst.msk [vmem:[%s4650_s1 + $0x50] sm:$0xf] %vm2672_vm14, %v2640_v61  ;;  %v2718_v63 = vsel %vm3019_vm15, %v2641_v22, %v2717_v10  ;;  %v984_v1 = vrot.slane %v982_v13, 5  ;;  %v988_v50 = vshll.u32 %v37_v31, 16 }
  0xc0   :  { %v992_v16 = vshrl.u32 %v37_v31, 16  ;;  %2719 = vst [vmem:[%s4650_s1 + $0x54] sm:$0x7] %v2718_v63  ;;  %v1507_v55 = vsel %vm2957_vm11, %v1499_v11, %v1506_v40  ;;  %v1806_v20 = vmax.bf16 %v1498_v46, %v3625_v9  ;;  %v2796_v36 = vrot.slane %v904_v8, 9  ;;  %v3776_v22 = vld [vmem:[%s4649_s0 + $0x80] sm:$0xf] }
  0xc1   :  { %v3743_v32 = vrot.slane %v905_v38, 5  ;;  %v1807_v44 = vmax.bf16 %v1507_v55, %v3618_v0  ;;  %v985_v5 = vor.u32 %v984_v1, %v981_v2  ;;  %v990_v41 = vrot.slane %v988_v50, 5  ;;  %v3789_v55 = vld [vmem:[%s4649_s0 + $0x84] sm:$0xf] }
  0xc2   :  { %v994_v24 = vrot.slane %v992_v16, 4  ;;  %v2046_v25 = vshrl.u32 %v1806_v20, 16  ;;  %v2049_v33 = vshll.u32 %v1806_v20, 16  ;;  %v2822_v15 = vrot.slane %v36_v6, 9  ;;  %v3794_v20 = vld [vmem:[%s4649_s0 + $0x88] sm:$0xf] }
  0xc3   :  { %v3749_v12 = vsel %vm2917_vm8, %v2796_v36, %v3743_v32  ;;  %v2055_v18 = vshll.u32 %v1807_v44, 16  ;;  %v2059_v28 = vshrl.u32 %v1807_v44, 16  ;;  %v986_v56 = vrot.slane %v985_v5, 4 }
  0xc4   :  { %v995_v49 = vor.u32 %v994_v24, %v990_v41  ;;  %v2048_v60 = vrot.slane %v2046_v25, 4  ;;  %v2051_v43 = vrot.slane %v2049_v33, 5  ;;  %v2497_v30 = vrot.slane %v2495_v23, 4 }
  0xc5   :  { %v2500_v19 = vrot.slane %v37_v31, 5  ;;  %v2057_v29 = vrot.slane %v2055_v18, 5  ;;  %v2061_v54 = vrot.slane %v2059_v28, 4  ;;  %v991_v47 = vsel %vm2895_vm5, %v986_v56, %v990_v41 }
  0xc6   :  { %v996_v48 = vrot.slane %v995_v49, 4  ;;  %v2052_v52 = vor.u32 %v2051_v43, %v2048_v60  ;;  %v1020_v59 = vmax.bf16 %v991_v47, %v36_v6  ;;  %v1285_v14 = vmax.bf16 %v3749_v12, %v3625_v9 }
  0xc7   :  { %v3762_v23 = vsel %vm2917_vm8, %v2822_v15, %v2500_v19  ;;  %v2062_v4 = vor.u32 %v2061_v54, %v2057_v29  ;;  %v1143_v10 = vrot.slane %v3743_v32, 4  ;;  %v319_v8 = vshrl.u32 %v3754_v42, 16 }
  0xc8   :  { %v1021_v7 = vmax.bf16 %v996_v48, %v37_v31  ;;  %v2053_v58 = vrot.slane %v2052_v52, 4  ;;  %v1509_v6 = vshrl.u32 %v1020_v59, 16  ;;  %v1512_v13 = vshll.u32 %v1020_v59, 16 }
  0xc9   :  { %v3771_v61 = vrot.slane %v2500_v19, 4  ;;  %v2063_v31 = vrot.slane %v2062_v4, 4  ;;  %v321_v46 = vrot.slane %v319_v8, 4  ;;  %v322_v2 = vshll.u32 %v3754_v42, 16 }
  0xca   :  { %v1517_v40 = vshrl.u32 %v1021_v7, 16  ;;  %v1520_v39 = vshll.u32 %v1021_v7, 16  ;;  %v2058_v11 = vsel %vm2895_vm5, %v2053_v58, %v2057_v29  ;;  %v1511_v38 = vrot.slane %v1509_v6, 7  ;;  %v3823_v29 = vld [vmem:[%s4649_s0 + $0x8c] sm:$0xf] }
  0xcb   :  { %v328_v63 = vshll.u32 %v3768_v37, 16  ;;  %v2404_v1 = vmax.bf16 %v2058_v11, %v1283_v45  ;;  %v2405_v50 = vmax.bf16 %v2063_v31, %v3706_v62  ;;  %v338_v36 = vshrl.u32 %v3776_v22, 16 }
  0xcc   :  { %v1519_v16 = vrot.slane %v1517_v40, 7  ;;  %v1514_v21 = vor.u32 %v1512_v13, %v1511_v38  ;;  %v1515_v45 = vrot.slane %v1511_v38, 4  ;;  %v324_v62 = vrot.slane %v322_v2, 5 }
  0xcd   :  { %v3800_v44 = vrot.slane %v328_v63, 5  ;;  %v2642_v5 = vmax.bf16 %v3701_v51, %v2404_v1  ;;  %v2643_v41 = vmax.bf16 %v2497_v30, %v2405_v50  ;;  %v340_v25 = vrot.slane %v338_v36, 4 }
  0xce   :  { %v1522_v24 = vor.u32 %v1520_v39, %v1519_v16  ;;  %v1808_v33 = vmax.bf16 %v1514_v21, %v3695_v3  ;;  %v325_v15 = vor.u32 %v324_v62, %v321_v46  ;;  %v341_v18 = vshll.u32 %v3776_v22, 16 }
  0xcf   :  { %v347_v28 = vshll.u32 %v3789_v55, 16  ;;  %2720 = vst.msk [vmem:[%s4650_s1 + $0x58] sm:$0xf] %vm2672_vm14, %v2642_v5  ;;  %v2722_v56 = vsel %vm3019_vm15, %v2643_v41, %v2721_v27  ;;  %v351_v49 = vshrl.u32 %v3789_v55, 16  ;;  %v357_v3 = vshrl.u32 %v3794_v20, 16 }
  0xd0   :  { %v1523_v51 = vsel %vm2957_vm11, %v1515_v45, %v1522_v24  ;;  %2723 = vst [vmem:[%s4650_s1 + $0x5c] sm:$0x7] %v2722_v56  ;;  %v2065_v43 = vshrl.u32 %v1808_v33, 16  ;;  %v2068_v30 = vshll.u32 %v1808_v33, 16  ;;  %v326_v19 = vrot.slane %v325_v15, 4 }
  0xd1   :  { %v1809_v60 = vmax.bf16 %v1523_v51, %v3691_v26  ;;  %v343_v54 = vrot.slane %v341_v18, 5  ;;  %v349_v47 = vrot.slane %v347_v28, 5  ;;  %v353_v48 = vrot.slane %v351_v49, 4  ;;  %v2725_v49 = vld [vmem:[%s4650_s1 + $0x64] sm:$0x7] }
  0xd2   :  { %v359_v52 = vrot.slane %v357_v3, 4  ;;  %v2067_v59 = vrot.slane %v2065_v43, 4  ;;  %v2070_v4 = vrot.slane %v2068_v30, 5  ;;  %v331_v26 = vsel %vm2895_vm5, %v326_v19, %v3800_v44 }
  0xd3   :  { %v2074_v7 = vshll.u32 %v1809_v60, 16  ;;  %v2078_v8 = vshrl.u32 %v1809_v60, 16  ;;  %v344_v58 = vor.u32 %v343_v54, %v340_v25  ;;  %v354_v6 = vor.u32 %v353_v48, %v349_v47  ;;  %v3879_v54 = vld [vmem:[%s4649_s0 + $0x90] sm:$0xf] }
  0xd4   :  { %v360_v13 = vshll.u32 %v3794_v20, 16  ;;  %v2071_v31 = vor.u32 %v2070_v4, %v2067_v59  ;;  %v366_v46 = vshll.u32 %v3823_v29, 16  ;;  %v370_v63 = vshrl.u32 %v3823_v29, 16 }
  0xd5   :  { %v2076_v40 = vrot.slane %v2074_v7, 5  ;;  %v2080_v39 = vrot.slane %v2078_v8, 4  ;;  %v345_v11 = vrot.slane %v344_v58, 4  ;;  %v355_v38 = vrot.slane %v354_v6, 4 }
  0xd6   :  { %v362_v2 = vrot.slane %v360_v13, 5  ;;  %v2072_v1 = vrot.slane %v2071_v31, 4  ;;  %v1286_v50 = vmax.bf16 %v1143_v10, %v3618_v0  ;;  %v368_v36 = vrot.slane %v366_v46, 5 }
  0xd7   :  { %v2081_v16 = vor.u32 %v2080_v39, %v2076_v40  ;;  %v350_v27 = vsel %vm2895_vm5, %v345_v11, %v349_v47  ;;  %v372_v45 = vrot.slane %v370_v63, 4  ;;  %v3837_v62 = vmax.bf16 %v331_v26, %v3754_v42  ;;  %v3884_v47 = vld [vmem:[%s4649_s0 + $0x94] sm:$0xf] }
  0xd8   :  { %v363_v21 = vor.u32 %v362_v2, %v359_v52  ;;  %v2077_v5 = vsel %vm2895_vm5, %v2072_v1, %v2076_v40  ;;  %v3842_v24 = vmax.bf16 %v355_v38, %v3789_v55  ;;  %v776_v32 = vrot.slane %v3776_v22, 7 }
  0xd9   :  { %v2082_v41 = vrot.slane %v2081_v16, 4  ;;  %v2406_v0 = vmax.bf16 %v2077_v5, %v1285_v14  ;;  %v373_v25 = vor.u32 %v372_v45, %v368_v36  ;;  %v778_v33 = vrot.slane %v3789_v55, 7 }
  0xda   :  { %v364_v10 = vrot.slane %v363_v21, 4  ;;  %v777_v18 = vrot.slane %v776_v32, 4  ;;  %v906_v28 = vmax.bf16 %v776_v32, %v3754_v42  ;;  %v2823_v56 = vrot.slane %v3794_v20, 9 }
  0xdb   :  { %v2407_v15 = vmax.bf16 %v2082_v41, %v1286_v50  ;;  %v2644_v51 = vmax.bf16 %v3762_v23, %v2406_v0  ;;  %v374_v12 = vrot.slane %v373_v25, 4  ;;  %v3858_v14 = vmax.bf16 %v350_v27, %v3776_v22 }
  0xdc   :  { %v369_v9 = vsel %vm2895_vm5, %v364_v10, %v368_v36  ;;  %v779_v42 = vsel %vm2889_vm4, %v777_v18, %v778_v33  ;;  %v2505_v23 = vrot.slane %v3823_v29, 5  ;;  %v2797_v19 = vrot.slane %v906_v28, 9 }
  0xdd   :  { %v2645_v3 = vmax.bf16 %v3771_v61, %v2407_v15  ;;  %v3862_v60 = vmax.bf16 %v369_v9, %v3794_v20  ;;  %2724 = vst.msk [vmem:[%s4650_s1 + $0x60] sm:$0xf] %vm2672_vm14, %v2644_v51  ;;  %v3872_v43 = vmax.bf16 %v374_v12, %v3823_v29  ;;  %v907_v30 = vmax.bf16 %v779_v42, %v3768_v37 }
  0xde   :  { %v332_v61 = vshrl.u32 %v3768_v37, 16  ;;  %v3894_v4 = vsel %vm2917_vm8, %v2823_v56, %v2505_v23  ;;  %v376_v13 = vshrl.u32 %v3879_v54, 16  ;;  %v379_v31 = vshll.u32 %v3879_v54, 16 }
  0xdf   :  { %v2726_v48 = vsel %vm3019_vm15, %v2645_v3, %v2725_v49  ;;  %v1525_v52 = vshrl.u32 %v3862_v60, 16  ;;  %v1528_v59 = vshll.u32 %v3862_v60, 16  ;;  %v1146_v7 = vrot.slane %v907_v30, 5 }
  0xe0   :  { %2727 = vst [vmem:[%s4650_s1 + $0x64] sm:$0x7] %v2726_v48  ;;  %v1533_v8 = vshrl.u32 %v3872_v43, 16  ;;  %v1536_v26 = vshll.u32 %v3872_v43, 16  ;;  %v334_v58 = vrot.slane %v332_v61, 4  ;;  %v385_v40 = vshll.u32 %v3884_v47, 16 }
  0xe1   :  { %v1527_v6 = vrot.slane %v1525_v52, 7  ;;  %v1147_v39 = vsel %vm2917_vm8, %v2797_v19, %v1146_v7  ;;  %v1148_v38 = vrot.slane %v1146_v7, 4  ;;  %v378_v50 = vrot.slane %v376_v13, 4 }
  0xe2   :  { %v1535_v46 = vrot.slane %v1533_v8, 7  ;;  %v335_v11 = vor.u32 %v334_v58, %v3800_v44  ;;  %v1287_v2 = vmax.bf16 %v1147_v39, %v3837_v62  ;;  %v381_v27 = vrot.slane %v379_v31, 5 }
  0xe3   :  { %v1530_v63 = vor.u32 %v1528_v59, %v1527_v6  ;;  %v1531_v1 = vrot.slane %v1527_v6, 4  ;;  %v387_v21 = vrot.slane %v385_v40, 5  ;;  %v389_v5 = vshrl.u32 %v3884_v47, 16 }
  0xe4   :  { %v1538_v16 = vor.u32 %v1536_v26, %v1535_v46  ;;  %v336_v36 = vrot.slane %v335_v11, 4  ;;  %v780_v41 = vrot.slane %v3794_v20, 7  ;;  %v782_v32 = vrot.slane %v3823_v29, 7 }
  0xe5   :  { %v1810_v45 = vmax.bf16 %v1530_v63, %v3858_v14  ;;  %v382_v0 = vor.u32 %v381_v27, %v378_v50  ;;  %v2824_v10 = vrot.slane %v3879_v54, 9  ;;  %v391_v18 = vrot.slane %v389_v5, 4 }
  0xe6   :  { %v1539_v44 = vsel %vm2957_vm11, %v1531_v1, %v1538_v16  ;;  %v644_v62 = vmax.bf16 %v336_v36, %v3768_v37  ;;  %v781_v51 = vrot.slane %v780_v41, 4  ;;  %v908_v49 = vmax.bf16 %v780_v41, %v3776_v22  ;;  %v3921_v37 = vld [vmem:[%s4649_s0 + $0x98] sm:$0xf] }
  0xe7   :  { %v1811_v25 = vmax.bf16 %v1539_v44, %v3842_v24  ;;  %v2084_v33 = vshrl.u32 %v1810_v45, 16  ;;  %v2087_v15 = vshll.u32 %v1810_v45, 16  ;;  %v383_v56 = vrot.slane %v382_v0, 4  ;;  %v3955_v45 = vld [vmem:[%s4649_s0 + $0x9c] sm:$0xf] }
  0xe8   :  { %v1288_v28 = vmax.bf16 %v1148_v38, %v644_v62  ;;  %v392_v19 = vor.u32 %v391_v18, %v387_v21  ;;  %v783_v61 = vsel %vm2889_vm4, %v781_v51, %v782_v32  ;;  %v2798_v48 = vrot.slane %v908_v49, 9 }
  0xe9   :  { %v2086_v9 = vrot.slane %v2084_v33, 4  ;;  %v2089_v12 = vrot.slane %v2087_v15, 5  ;;  %v2093_v3 = vshll.u32 %v1811_v25, 16  ;;  %v2097_v42 = vshrl.u32 %v1811_v25, 16 }
  0xea   :  { %v388_v30 = vsel %vm2895_vm5, %v383_v56, %v387_v21  ;;  %v393_v8 = vrot.slane %v392_v19, 4  ;;  %v909_v26 = vmax.bf16 %v783_v61, %v3789_v55  ;;  %v2510_v58 = vrot.slane %v3884_v47, 5 }
  0xeb   :  { %v2090_v52 = vor.u32 %v2089_v12, %v2086_v9  ;;  %v2095_v59 = vrot.slane %v2093_v3, 5  ;;  %v2099_v22 = vrot.slane %v2097_v42, 4  ;;  %v3928_v7 = vmax.bf16 %v388_v30, %v3879_v54 }
  0xec   :  { %v395_v6 = vshrl.u32 %v3921_v37, 16  ;;  %v2507_v46 = vrot.slane %v2505_v23, 4  ;;  %v3938_v11 = vmax.bf16 %v393_v8, %v3884_v47  ;;  %v1151_v38 = vrot.slane %v909_v26, 5 }
  0xed   :  { %v2091_v13 = vrot.slane %v2090_v52, 4  ;;  %v2100_v31 = vor.u32 %v2099_v22, %v2095_v59  ;;  %v1541_v40 = vshrl.u32 %v3928_v7, 16  ;;  %v1544_v39 = vshll.u32 %v3928_v7, 16 }
  0xee   :  { %v3944_v55 = vsel %vm2917_vm8, %v2824_v10, %v2510_v58  ;;  %v397_v16 = vrot.slane %v395_v6, 4  ;;  %v1152_v23 = vsel %vm2917_vm8, %v2798_v48, %v1151_v38  ;;  %v1549_v27 = vshrl.u32 %v3938_v11, 16 }
  0xef   :  { %v2096_v63 = vsel %vm2895_vm5, %v2091_v13, %v2095_v59  ;;  %v2101_v1 = vrot.slane %v2100_v31, 4  ;;  %v1543_v50 = vrot.slane %v1541_v40, 7  ;;  %v1552_v21 = vshll.u32 %v3938_v11, 16 }
  0xf0   :  { %v2408_v36 = vmax.bf16 %v2096_v63, %v1287_v2  ;;  %v1289_v41 = vmax.bf16 %v1152_v23, %v3858_v14  ;;  %v2729_v2 = vld [vmem:[%s4650_s1 + $0x6c] sm:$0x7]  ;;  %v1551_v0 = vrot.slane %v1549_v27, 7  ;;  %v1153_v10 = vrot.slane %v1151_v38, 4 }
  0xf1   :  { %v2409_v5 = vmax.bf16 %v2101_v1, %v1288_v28  ;;  %v1546_v32 = vor.u32 %v1544_v39, %v1543_v50  ;;  %v1547_v44 = vrot.slane %v1543_v50, 4  ;;  %v398_v25 = vshll.u32 %v3921_v37, 16 }
  0xf2   :  { %v2646_v62 = vmax.bf16 %v3894_v4, %v2408_v36  ;;  %v404_v18 = vshll.u32 %v3955_v45, 16  ;;  %v408_v28 = vshrl.u32 %v3955_v45, 16  ;;  %v1554_v14 = vor.u32 %v1552_v21, %v1551_v0 }
  0xf3   :  { %v2647_v33 = vmax.bf16 %v2507_v46, %v2409_v5  ;;  %v1812_v15 = vmax.bf16 %v1546_v32, %v3862_v60  ;;  %v3971_v4 = vmax.bf16 %v1153_v10, %v3842_v24  ;;  %v400_v56 = vrot.slane %v398_v25, 5  ;;  %v3990_v46 = vld [vmem:[%s4649_s0 + $0xa0] sm:$0xf] }
  0xf4   :  { %2728 = vst.msk [vmem:[%s4650_s1 + $0x68] sm:$0xf] %vm2672_vm14, %v2646_v62  ;;  %v784_v51 = vrot.slane %v3879_v54, 7  ;;  %v406_v3 = vrot.slane %v404_v18, 5  ;;  %v1555_v42 = vsel %vm2957_vm11, %v1547_v44, %v1554_v14  ;;  %v410_v19 = vrot.slane %v408_v28, 4 }
  0xf5   :  { %v2730_v49 = vsel %vm3019_vm15, %v2647_v33, %v2729_v2  ;;  %v2103_v9 = vshrl.u32 %v1812_v15, 16  ;;  %v2106_v12 = vshll.u32 %v1812_v15, 16  ;;  %v401_v30 = vor.u32 %v400_v56, %v397_v16  ;;  %v4018_v14 = vld [vmem:[%s4649_s0 + $0xa4] sm:$0xf] }
  0xf6   :  { %2731 = vst [vmem:[%s4650_s1 + $0x6c] sm:$0x7] %v2730_v49  ;;  %v785_v24 = vrot.slane %v784_v51, 4  ;;  %v1813_v61 = vmax.bf16 %v1555_v42, %v3872_v43  ;;  %v786_v59 = vrot.slane %v3884_v47, 7  ;;  %v411_v8 = vor.u32 %v410_v19, %v406_v3 }
  0xf7   :  { %v2105_v48 = vrot.slane %v2103_v9, 4  ;;  %v2108_v52 = vrot.slane %v2106_v12, 5  ;;  %v402_v22 = vrot.slane %v401_v30, 4  ;;  %v910_v26 = vmax.bf16 %v784_v51, %v3794_v20 }
  0xf8   :  { %v2825_v6 = vrot.slane %v3921_v37, 9  ;;  %v2112_v31 = vshll.u32 %v1813_v61, 16  ;;  %v2116_v40 = vshrl.u32 %v1813_v61, 16  ;;  %v787_v39 = vsel %vm2889_vm4, %v785_v24, %v786_v59 }
  0xf9   :  { %v2109_v13 = vor.u32 %v2108_v52, %v2105_v48  ;;  %v407_v38 = vsel %vm2895_vm5, %v402_v22, %v406_v3  ;;  %v412_v63 = vrot.slane %v411_v8, 4  ;;  %v911_v1 = vmax.bf16 %v787_v39, %v3823_v29 }
  0xfa   :  { %v2799_v20 = vrot.slane %v910_v26, 9  ;;  %v2114_v16 = vrot.slane %v2112_v31, 5  ;;  %v2118_v36 = vrot.slane %v2116_v40, 4  ;;  %v3996_v23 = vmax.bf16 %v407_v38, %v3921_v37 }
  0xfb   :  { %v2110_v50 = vrot.slane %v2109_v13, 4  ;;  %v3999_v27 = vmax.bf16 %v412_v63, %v3955_v45  ;;  %v1156_v21 = vrot.slane %v911_v1, 5  ;;  %v2515_v5 = vrot.slane %v3955_v45, 5 }
  0xfc   :  { %v414_v32 = vshrl.u32 %v3990_v46, 16  ;;  %v2119_v62 = vor.u32 %v2118_v36, %v2114_v16  ;;  %v1557_v29 = vshrl.u32 %v3996_v23, 16  ;;  %v1560_v2 = vshll.u32 %v3996_v23, 16 }
  0xfd   :  { %v2115_v44 = vsel %vm2895_vm5, %v2110_v50, %v2114_v16  ;;  %v4009_v10 = vsel %vm2917_vm8, %v2799_v20, %v1156_v21  ;;  %v1565_v25 = vshrl.u32 %v3999_v27, 16  ;;  %v1568_v33 = vshll.u32 %v3999_v27, 16 }
  0xfe   :  { %v2410_v0 = vmax.bf16 %v2115_v44, %v1289_v41  ;;  %v2120_v15 = vrot.slane %v2119_v62, 4  ;;  %v2512_v18 = vrot.slane %v2510_v58, 4  ;;  %v1559_v28 = vrot.slane %v1557_v29, 7 }
  0xff   :  { %v1291_v56 = vmax.bf16 %v4009_v10, %v3862_v60  ;;  %v1567_v51 = vrot.slane %v1565_v25, 7  ;;  %v4027_v49 = vsel %vm2917_vm8, %v2825_v6, %v2515_v5  ;;  %v1158_v3 = vrot.slane %v1156_v21, 4  ;;  %v2733_v60 = vld [vmem:[%s4650_s1 + $0x74] sm:$0x7]  ;;  %v4058_v10 = vld [vmem:[%s4649_s0 + $0xa8] sm:$0xf] }
 0x100   :  { %v2648_v41 = vmax.bf16 %v3944_v55, %v2410_v0  ;;  %v2411_v58 = vmax.bf16 %v2120_v15, %v3971_v4  ;;  %v1562_v9 = vor.u32 %v1560_v2, %v1559_v28  ;;  %v1563_v12 = vrot.slane %v1559_v28, 4 }
 0x101   :  { %v1570_v55 = vor.u32 %v1568_v33, %v1567_v51  ;;  %v416_v42 = vrot.slane %v414_v32, 4  ;;  %v417_v30 = vshll.u32 %v3990_v46, 16  ;;  %v423_v19 = vshll.u32 %v4018_v14, 16 }
 0x102   :  { %2732 = vst.msk [vmem:[%s4650_s1 + $0x70] sm:$0xf] %vm2672_vm14, %v2648_v41  ;;  %v2649_v24 = vmax.bf16 %v2512_v18, %v2411_v58  ;;  %v1814_v4 = vmax.bf16 %v1562_v9, %v3928_v7  ;;  %v427_v61 = vshrl.u32 %v4018_v14, 16  ;;  %v788_v48 = vrot.slane %v3921_v37, 7 }
 0x103   :  { %v1571_v52 = vsel %vm2957_vm11, %v1563_v12, %v1570_v55  ;;  %v419_v59 = vrot.slane %v417_v30, 5  ;;  %v425_v22 = vrot.slane %v423_v19, 5  ;;  %v790_v8 = vrot.slane %v3955_v45, 7 }
 0x104   :  { %v2734_v26 = vsel %vm3019_vm15, %v2649_v24, %v2733_v60  ;;  %v1815_v6 = vmax.bf16 %v1571_v52, %v3938_v11  ;;  %v2122_v13 = vshrl.u32 %v1814_v4, 16  ;;  %v2125_v31 = vshll.u32 %v1814_v4, 16 }
 0x105   :  { %2735 = vst [vmem:[%s4650_s1 + $0x74] sm:$0x7] %v2734_v26  ;;  %v420_v40 = vor.u32 %v419_v59, %v416_v42  ;;  %v429_v39 = vrot.slane %v427_v61, 4  ;;  %v789_v38 = vrot.slane %v788_v48, 4  ;;  %v912_v63 = vmax.bf16 %v788_v48, %v3879_v54  ;;  %v2737_v59 = vld [vmem:[%s4650_s1 + $0x7c] sm:$0x7] }
 0x106   :  { %v2124_v1 = vrot.slane %v2122_v13, 4  ;;  %v2127_v20 = vrot.slane %v2125_v31, 5  ;;  %v2131_v50 = vshll.u32 %v1815_v6, 16  ;;  %v2135_v16 = vshrl.u32 %v1815_v6, 16 }
 0x107   :  { %v421_v36 = vrot.slane %v420_v40, 4  ;;  %v430_v21 = vor.u32 %v429_v39, %v425_v22  ;;  %v791_v32 = vsel %vm2889_vm4, %v789_v38, %v790_v8  ;;  %v2800_v44 = vrot.slane %v912_v63, 9 }
 0x108   :  { %v2128_v62 = vor.u32 %v2127_v20, %v2124_v1  ;;  %v2133_v29 = vrot.slane %v2131_v50, 5  ;;  %v2137_v2 = vrot.slane %v2135_v16, 4  ;;  %v913_v0 = vmax.bf16 %v791_v32, %v3884_v47 }
 0x109   :  { %v1292_v54 = vmax.bf16 %v1158_v3, %v3872_v43  ;;  %v426_v25 = vsel %vm2895_vm5, %v421_v36, %v425_v22  ;;  %v431_v33 = vrot.slane %v430_v21, 4  ;;  %v2826_v15 = vrot.slane %v3990_v46, 9 }
 0x10a   :  { %v2129_v18 = vrot.slane %v2128_v62, 4  ;;  %v2138_v28 = vor.u32 %v2137_v2, %v2133_v29  ;;  %v4065_v41 = vmax.bf16 %v426_v25, %v3990_v46  ;;  %v1161_v51 = vrot.slane %v913_v0, 5 }
 0x10b   :  { %v2517_v47 = vrot.slane %v2515_v5, 4  ;;  %v4070_v58 = vmax.bf16 %v431_v33, %v4018_v14  ;;  %v2520_v43 = vrot.slane %v4018_v14, 5  ;;  %v433_v9 = vshrl.u32 %v4058_v10, 16 }
 0x10c   :  { %v2134_v12 = vsel %vm2895_vm5, %v2129_v18, %v2133_v29  ;;  %v2139_v3 = vrot.slane %v2138_v28, 4  ;;  %v4078_v60 = vsel %vm2917_vm8, %v2800_v44, %v1161_v51  ;;  %v1573_v55 = vshrl.u32 %v4065_v41, 16 }
 0x10d   :  { %v2412_v42 = vmax.bf16 %v2134_v12, %v1291_v56  ;;  %v1576_v5 = vshll.u32 %v4065_v41, 16  ;;  %v1581_v30 = vshrl.u32 %v4070_v58, 16  ;;  %v4087_v19 = vsel %vm2917_vm8, %v2826_v15, %v2520_v43  ;;  %v4095_v56 = vld [vmem:[%s4649_s0 + $0xac] sm:$0xf] }
 0x10e   :  { %v2413_v24 = vmax.bf16 %v2139_v3, %v1292_v54  ;;  %v1293_v4 = vmax.bf16 %v4078_v60, %v3928_v7  ;;  %v1575_v61 = vrot.slane %v1573_v55, 7  ;;  %v1584_v48 = vshll.u32 %v4070_v58, 16  ;;  %v2741_v7 = vld [vmem:[%s4650_s1 + $0x84] sm:$0x7] }
 0x10f   :  { %v2650_v52 = vmax.bf16 %v4027_v49, %v2412_v42  ;;  %v1583_v22 = vrot.slane %v1581_v30, 7  ;;  %v435_v8 = vrot.slane %v433_v9, 4  ;;  %v436_v26 = vshll.u32 %v4058_v10, 16 }
 0x110   :  { %v2651_v6 = vmax.bf16 %v2517_v47, %v2413_v24  ;;  %v1578_v13 = vor.u32 %v1576_v5, %v1575_v61  ;;  %v1579_v31 = vrot.slane %v1575_v61, 4  ;;  %v1163_v40 = vrot.slane %v1161_v51, 4 }
 0x111   :  { %2736 = vst.msk [vmem:[%s4650_s1 + $0x78] sm:$0xf] %vm2672_vm14, %v2650_v52  ;;  %v1586_v39 = vor.u32 %v1584_v48, %v1583_v22  ;;  %v438_v38 = vrot.slane %v436_v26, 5  ;;  %v442_v49 = vshll.u32 %v4095_v56, 16  ;;  %v446_v63 = vshrl.u32 %v4095_v56, 16 }
 0x112   :  { %v2738_v1 = vsel %vm3019_vm15, %v2651_v6, %v2737_v59  ;;  %v1816_v20 = vmax.bf16 %v1578_v13, %v3996_v23  ;;  %v792_v50 = vrot.slane %v3990_v46, 7  ;;  %v794_v16 = vrot.slane %v4018_v14, 7 }
 0x113   :  { %2739 = vst [vmem:[%s4650_s1 + $0x7c] sm:$0x7] %v2738_v1  ;;  %v1587_v36 = vsel %vm2957_vm11, %v1579_v31, %v1586_v39  ;;  %v439_v21 = vor.u32 %v438_v38, %v435_v8  ;;  %v444_v32 = vrot.slane %v442_v49, 5  ;;  %v448_v44 = vrot.slane %v446_v63, 4 }
 0x114   :  { %v1817_v62 = vmax.bf16 %v1587_v36, %v3999_v27  ;;  %v2141_v29 = vshrl.u32 %v1816_v20, 16  ;;  %v2144_v2 = vshll.u32 %v1816_v20, 16  ;;  %v793_v0 = vrot.slane %v792_v50, 4 }
 0x115   :  { %v1294_v54 = vmax.bf16 %v1163_v40, %v3938_v11  ;;  %v440_v25 = vrot.slane %v439_v21, 4  ;;  %v449_v33 = vor.u32 %v448_v44, %v444_v32  ;;  %v914_v15 = vmax.bf16 %v792_v50, %v3921_v37  ;;  %v4132_v37 = vld [vmem:[%s4649_s0 + $0xb0] sm:$0xf]  ;;  %v4158_v50 = vld [vmem:[%s4649_s0 + $0xb4] sm:$0xf] }
 0x116   :  { %v2143_v18 = vrot.slane %v2141_v29, 4  ;;  %v2146_v28 = vrot.slane %v2144_v2, 5  ;;  %v2150_v51 = vshll.u32 %v1817_v62, 16  ;;  %v2154_v47 = vshrl.u32 %v1817_v62, 16 }
 0x117   :  { %v445_v9 = vsel %vm2895_vm5, %v440_v25, %v444_v32  ;;  %v450_v12 = vrot.slane %v449_v33, 4  ;;  %v795_v3 = vsel %vm2889_vm4, %v793_v0, %v794_v16  ;;  %v2827_v55 = vrot.slane %v4058_v10, 9 }
 0x118   :  { %v2147_v42 = vor.u32 %v2146_v28, %v2143_v18  ;;  %v2152_v5 = vrot.slane %v2150_v51, 5  ;;  %v2156_v11 = vrot.slane %v2154_v47, 4  ;;  %v4127_v30 = vmax.bf16 %v445_v9, %v4058_v10 }
 0x119   :  { %v4135_v24 = vmax.bf16 %v450_v12, %v4095_v56  ;;  %v915_v61 = vmax.bf16 %v795_v3, %v3955_v45  ;;  %v2801_v48 = vrot.slane %v914_v15, 9  ;;  %v2525_v52 = vrot.slane %v4095_v56, 5 }
 0x11a   :  { %v2148_v59 = vrot.slane %v2147_v42, 4  ;;  %v2157_v22 = vor.u32 %v2156_v11, %v2152_v5  ;;  %v1589_v8 = vshrl.u32 %v4127_v30, 16  ;;  %v1592_v26 = vshll.u32 %v4127_v30, 16 }
 0x11b   :  { %v1166_v6 = vrot.slane %v915_v61, 5  ;;  %v1597_v13 = vshrl.u32 %v4135_v24, 16  ;;  %v1600_v31 = vshll.u32 %v4135_v24, 16  ;;  %v452_v40 = vshrl.u32 %v4132_v37, 16 }
 0x11c   :  { %v2153_v39 = vsel %vm2895_vm5, %v2148_v59, %v2152_v5  ;;  %v2158_v45 = vrot.slane %v2157_v22, 4  ;;  %v2522_v38 = vrot.slane %v2520_v43, 4  ;;  %v1591_v49 = vrot.slane %v1589_v8, 7 }
 0x11d   :  { %v2414_v63 = vmax.bf16 %v2153_v39, %v1293_v4  ;;  %v1599_v1 = vrot.slane %v1597_v13, 7  ;;  %v4153_v20 = vsel %vm2917_vm8, %v2827_v55, %v2525_v52  ;;  %v1167_v36 = vsel %vm2917_vm8, %v2801_v48, %v1166_v6 }
 0x11e   :  { %v2415_v16 = vmax.bf16 %v2158_v45, %v1294_v54  ;;  %v1594_v43 = vor.u32 %v1592_v26, %v1591_v49  ;;  %v1595_v21 = vrot.slane %v1591_v49, 4  ;;  %v1168_v4 = vrot.slane %v1166_v6, 4 }
 0x11f   :  { %v2652_v32 = vmax.bf16 %v4087_v19, %v2414_v63  ;;  %v1602_v60 = vor.u32 %v1600_v31, %v1599_v1  ;;  %v454_v44 = vrot.slane %v452_v40, 4  ;;  %v455_v2 = vshll.u32 %v4132_v37, 16  ;;  %v4191_v31 = vld [vmem:[%s4649_s0 + $0xb8] sm:$0xf] }
 0x120   :  { %v2653_v62 = vmax.bf16 %v2522_v38, %v2415_v16  ;;  %v1818_v29 = vmax.bf16 %v1594_v43, %v4065_v41  ;;  %v461_v0 = vshll.u32 %v4158_v50, 16  ;;  %v465_v54 = vshrl.u32 %v4158_v50, 16 }
 0x121   :  { %2740 = vst.msk [vmem:[%s4650_s1 + $0x80] sm:$0xf] %vm2672_vm14, %v2652_v32  ;;  %v1603_v19 = vsel %vm2957_vm11, %v1595_v21, %v1602_v60  ;;  %v796_v25 = vrot.slane %v4058_v10, 7  ;;  %v798_v33 = vrot.slane %v4095_v56, 7  ;;  %v457_v47 = vrot.slane %v455_v2, 5 }
 0x122   :  { %v2742_v15 = vsel %vm3019_vm15, %v2653_v62, %v2741_v7  ;;  %v1819_v18 = vmax.bf16 %v1603_v19, %v4070_v58  ;;  %v2160_v28 = vshrl.u32 %v1818_v29, 16  ;;  %v2163_v51 = vshll.u32 %v1818_v29, 16  ;;  %v4218_v2 = vld [vmem:[%s4649_s0 + $0xbc] sm:$0xf]  ;;  %v2745_v19 = vld [vmem:[%s4650_s1 + $0x8c] sm:$0x7] }
 0x123   :  { %2743 = vst [vmem:[%s4650_s1 + $0x84] sm:$0x7] %v2742_v15  ;;  %v463_v9 = vrot.slane %v461_v0, 5  ;;  %v467_v12 = vrot.slane %v465_v54, 4  ;;  %v797_v3 = vrot.slane %v796_v25, 4  ;;  %v458_v61 = vor.u32 %v457_v47, %v454_v44 }
 0x124   :  { %v2162_v55 = vrot.slane %v2160_v28, 4  ;;  %v2165_v42 = vrot.slane %v2163_v51, 5  ;;  %v2169_v5 = vshll.u32 %v1819_v18, 16  ;;  %v2173_v11 = vshrl.u32 %v1819_v18, 16 }
 0x125   :  { %v468_v48 = vor.u32 %v467_v12, %v463_v9  ;;  %v799_v59 = vsel %vm2889_vm4, %v797_v3, %v798_v33  ;;  %v916_v22 = vmax.bf16 %v796_v25, %v3990_v46  ;;  %v1295_v40 = vmax.bf16 %v1167_v36, %v3996_v23 }
 0x126   :  { %v2166_v8 = vor.u32 %v2165_v42, %v2162_v55  ;;  %v2171_v26 = vrot.slane %v2169_v5, 5  ;;  %v2175_v6 = vrot.slane %v2173_v11, 4  ;;  %v917_v13 = vmax.bf16 %v799_v59, %v4018_v14 }
 0x127   :  { %v2527_v39 = vrot.slane %v2525_v52, 4  ;;  %v459_v45 = vrot.slane %v458_v61, 4  ;;  %v469_v38 = vrot.slane %v468_v48, 4  ;;  %v1296_v63 = vmax.bf16 %v1168_v4, %v3999_v27 }
 0x128   :  { %v2167_v49 = vrot.slane %v2166_v8, 4  ;;  %v2176_v1 = vor.u32 %v2175_v6, %v2171_v26  ;;  %v2802_v46 = vrot.slane %v916_v22, 9  ;;  %v1171_v43 = vrot.slane %v917_v13, 5 }
 0x129   :  { %v464_v16 = vsel %vm2895_vm5, %v459_v45, %v463_v9  ;;  %v4198_v14 = vmax.bf16 %v469_v38, %v4158_v50  ;;  %v471_v21 = vshrl.u32 %v4191_v31, 16  ;;  %v474_v27 = vshll.u32 %v4191_v31, 16 }
 0x12a   :  { %v2172_v23 = vsel %vm2895_vm5, %v2167_v49, %v2171_v26  ;;  %v2177_v52 = vrot.slane %v2176_v1, 4  ;;  %v4204_v36 = vmax.bf16 %v464_v16, %v4132_v37  ;;  %v4211_v44 = vsel %vm2917_vm8, %v2802_v46, %v1171_v43 }
 0x12b   :  { %v2416_v32 = vmax.bf16 %v2172_v23, %v1295_v40  ;;  %v1613_v7 = vshrl.u32 %v4198_v14, 16  ;;  %v1616_v60 = vshll.u32 %v4198_v14, 16  ;;  %v2828_v25 = vrot.slane %v4132_v37, 9 }
 0x12c   :  { %v2417_v4 = vmax.bf16 %v2177_v52, %v1296_v63  ;;  %v1605_v62 = vshrl.u32 %v4204_v36, 16  ;;  %v1608_v29 = vshll.u32 %v4204_v36, 16  ;;  %v2530_v33 = vrot.slane %v4158_v50, 5 }
 0x12d   :  { %v2654_v0 = vmax.bf16 %v4153_v20, %v2416_v32  ;;  %v1615_v54 = vrot.slane %v1613_v7, 7  ;;  %v473_v28 = vrot.slane %v471_v21, 4  ;;  %v476_v51 = vrot.slane %v474_v27, 5 }
 0x12e   :  { %v2655_v15 = vmax.bf16 %v2527_v39, %v2417_v4  ;;  %v1607_v18 = vrot.slane %v1605_v62, 7  ;;  %v1297_v20 = vmax.bf16 %v4211_v44, %v4065_v41  ;;  %v480_v9 = vshll.u32 %v4218_v2, 16  ;;  %v4263_v4 = vld [vmem:[%s4649_s0 + $0xc0] sm:$0xf] }
 0x12f   :  { %2744 = vst.msk [vmem:[%s4650_s1 + $0x88] sm:$0xf] %vm2672_vm14, %v2654_v0  ;;  %v1618_v47 = vor.u32 %v1616_v60, %v1615_v54  ;;  %v484_v12 = vshrl.u32 %v4218_v2, 16  ;;  %v477_v5 = vor.u32 %v476_v51, %v473_v28  ;;  %v1173_v11 = vrot.slane %v1171_v43, 4 }
 0x130   :  { %v2746_v3 = vsel %vm3019_vm15, %v2655_v15, %v2745_v19  ;;  %v1610_v55 = vor.u32 %v1608_v29, %v1607_v18  ;;  %v1611_v42 = vrot.slane %v1607_v18, 4  ;;  %v482_v61 = vrot.slane %v480_v9, 5 }
 0x131   :  { %2747 = vst [vmem:[%s4650_s1 + $0x8c] sm:$0x7] %v2746_v3  ;;  %v486_v48 = vrot.slane %v484_v12, 4  ;;  %v800_v41 = vrot.slane %v4132_v37, 7  ;;  %v478_v8 = vrot.slane %v477_v5, 4  ;;  %v802_v26 = vrot.slane %v4158_v50, 7 }
 0x132   :  { %v1619_v59 = vsel %vm2957_vm11, %v1611_v42, %v1618_v47  ;;  %v1820_v22 = vmax.bf16 %v1610_v55, %v4127_v30  ;;  %v2531_v13 = vsel %vm2917_vm8, %v2828_v25, %v2530_v33  ;;  %v1298_v52 = vmax.bf16 %v1173_v11, %v4070_v58  ;;  %v4275_v3 = vld [vmem:[%s4649_s0 + $0xc4] sm:$0xf] }
 0x133   :  { %v1821_v6 = vmax.bf16 %v1619_v59, %v4135_v24  ;;  %v487_v40 = vor.u32 %v486_v48, %v482_v61  ;;  %v801_v39 = vrot.slane %v800_v41, 4  ;;  %v483_v49 = vsel %vm2895_vm5, %v478_v8, %v482_v61  ;;  %v2749_v59 = vld [vmem:[%s4650_s1 + $0x94] sm:$0x7] }
 0x134   :  { %v2179_v45 = vshrl.u32 %v1820_v22, 16  ;;  %v2182_v38 = vshll.u32 %v1820_v22, 16  ;;  %v918_v63 = vmax.bf16 %v800_v41, %v4058_v10  ;;  %v4251_v43 = vmax.bf16 %v483_v49, %v4191_v31 }
 0x135   :  { %v2188_v1 = vshll.u32 %v1821_v6, 16  ;;  %v2192_v46 = vshrl.u32 %v1821_v6, 16  ;;  %v488_v16 = vrot.slane %v487_v40, 4  ;;  %v803_v27 = vsel %vm2889_vm4, %v801_v39, %v802_v26 }
 0x136   :  { %v2181_v21 = vrot.slane %v2179_v45, 4  ;;  %v2184_v23 = vrot.slane %v2182_v38, 5  ;;  %v919_v10 = vmax.bf16 %v803_v27, %v4095_v56  ;;  %v2803_v62 = vrot.slane %v918_v63, 9 }
 0x137   :  { %v2190_v32 = vrot.slane %v2188_v1, 5  ;;  %v2194_v7 = vrot.slane %v2192_v46, 4  ;;  %v4257_v60 = vmax.bf16 %v488_v16, %v4218_v2  ;;  %v1621_v29 = vshrl.u32 %v4251_v43, 16 }
 0x138   :  { %v2185_v44 = vor.u32 %v2184_v23, %v2181_v21  ;;  %v1624_v58 = vshll.u32 %v4251_v43, 16  ;;  %v1176_v19 = vrot.slane %v919_v10, 5  ;;  %v2532_v18 = vrot.slane %v2530_v33, 4 }
 0x139   :  { %v2195_v0 = vor.u32 %v2194_v7, %v2190_v32  ;;  %v1629_v54 = vshrl.u32 %v4257_v60, 16  ;;  %v1632_v25 = vshll.u32 %v4257_v60, 16  ;;  %v1623_v56 = vrot.slane %v1621_v29, 7 }
 0x13a   :  { %v2186_v15 = vrot.slane %v2185_v44, 4  ;;  %v490_v28 = vshrl.u32 %v4263_v4, 16  ;;  %v2829_v9 = vrot.slane %v4191_v31, 9  ;;  %v2535_v12 = vrot.slane %v4218_v2, 5 }
 0x13b   :  { %v2196_v51 = vrot.slane %v2195_v0, 4  ;;  %v1631_v47 = vrot.slane %v1629_v54, 7  ;;  %v1177_v33 = vsel %vm2917_vm8, %v2803_v62, %v1176_v19  ;;  %v1626_v42 = vor.u32 %v1624_v58, %v1623_v56 }
 0x13c   :  { %v2191_v55 = vsel %vm2895_vm5, %v2186_v15, %v2190_v32  ;;  %v1627_v5 = vrot.slane %v1623_v56, 4  ;;  %v1178_v41 = vrot.slane %v1176_v19, 4  ;;  %v492_v8 = vrot.slane %v490_v28, 4 }
 0x13d   :  { %v2418_v11 = vmax.bf16 %v2191_v55, %v1297_v20  ;;  %v2419_v61 = vmax.bf16 %v2196_v51, %v1298_v52  ;;  %v1634_v48 = vor.u32 %v1632_v25, %v1631_v47  ;;  %v1822_v22 = vmax.bf16 %v1626_v42, %v4204_v36  ;;  %v4311_v55 = vld [vmem:[%s4649_s0 + $0xc8] sm:$0xf] }
 0x13e   :  { %v493_v26 = vshll.u32 %v4263_v4, 16  ;;  %v499_v6 = vshll.u32 %v4275_v3, 16  ;;  %v503_v20 = vshrl.u32 %v4275_v3, 16  ;;  %v804_v21 = vrot.slane %v4191_v31, 7 }
 0x13f   :  { %v2656_v40 = vmax.bf16 %v2531_v13, %v2418_v11  ;;  %v2657_v39 = vmax.bf16 %v2532_v18, %v2419_v61  ;;  %v1635_v45 = vsel %vm2957_vm11, %v1627_v5, %v1634_v48  ;;  %v2198_v49 = vshrl.u32 %v1822_v22, 16 }
 0x140   :  { %v1823_v38 = vmax.bf16 %v1635_v45, %v4198_v14  ;;  %v2201_v63 = vshll.u32 %v1822_v22, 16  ;;  %v495_v1 = vrot.slane %v493_v26, 5  ;;  %v501_v13 = vrot.slane %v499_v6, 5  ;;  %v4333_v26 = vld [vmem:[%s4649_s0 + $0xcc] sm:$0xf] }
 0x141   :  { %2748 = vst.msk [vmem:[%s4650_s1 + $0x90] sm:$0xf] %vm2672_vm14, %v2656_v40  ;;  %v2750_v46 = vsel %vm3019_vm15, %v2657_v39, %v2749_v59  ;;  %v505_v16 = vrot.slane %v503_v20, 4  ;;  %v2200_v23 = vrot.slane %v2198_v49, 4  ;;  %v805_v44 = vrot.slane %v804_v21, 4 }
 0x142   :  { %2751 = vst [vmem:[%s4650_s1 + $0x94] sm:$0x7] %v2750_v46  ;;  %v2203_v52 = vrot.slane %v2201_v63, 5  ;;  %v2207_v27 = vshll.u32 %v1823_v38, 16  ;;  %v2211_v32 = vshrl.u32 %v1823_v38, 16  ;;  %v496_v7 = vor.u32 %v495_v1, %v492_v8 }
 0x143   :  { %v506_v10 = vor.u32 %v505_v16, %v501_v13  ;;  %v806_v62 = vrot.slane %v4218_v2, 7  ;;  %v920_v19 = vmax.bf16 %v804_v21, %v4132_v37  ;;  %v1299_v54 = vmax.bf16 %v1177_v33, %v4127_v30  ;;  %v2753_v40 = vld [vmem:[%s4650_s1 + $0x9c] sm:$0x7] }
 0x144   :  { %v2204_v29 = vor.u32 %v2203_v52, %v2200_v23  ;;  %v2209_v58 = vrot.slane %v2207_v27, 5  ;;  %v2213_v0 = vrot.slane %v2211_v32, 4  ;;  %v497_v25 = vrot.slane %v496_v7, 4 }
 0x145   :  { %v507_v15 = vrot.slane %v506_v10, 4  ;;  %v807_v18 = vsel %vm2889_vm4, %v805_v44, %v806_v62  ;;  %v1300_v28 = vmax.bf16 %v1178_v41, %v4135_v24  ;;  %v2536_v37 = vsel %vm2917_vm8, %v2829_v9, %v2535_v12 }
 0x146   :  { %v2205_v56 = vrot.slane %v2204_v29, 4  ;;  %v2214_v51 = vor.u32 %v2213_v0, %v2209_v58  ;;  %v921_v47 = vmax.bf16 %v807_v18, %v4158_v50  ;;  %v2537_v30 = vrot.slane %v2535_v12, 4 }
 0x147   :  { %v502_v33 = vsel %vm2895_vm5, %v497_v25, %v501_v13  ;;  %v4318_v42 = vmax.bf16 %v507_v15, %v4275_v3  ;;  %v2804_v11 = vrot.slane %v920_v19, 9  ;;  %v509_v12 = vshrl.u32 %v4311_v55, 16 }
 0x148   :  { %v2210_v24 = vsel %vm2895_vm5, %v2205_v56, %v2209_v58  ;;  %v2215_v5 = vrot.slane %v2214_v51, 4  ;;  %v4323_v50 = vmax.bf16 %v502_v33, %v4263_v4  ;;  %v1181_v59 = vrot.slane %v921_v47, 5 }
 0x149   :  { %v2420_v61 = vmax.bf16 %v2210_v24, %v1299_v54  ;;  %v1645_v48 = vshrl.u32 %v4318_v42, 16  ;;  %v1648_v9 = vshll.u32 %v4318_v42, 16  ;;  %v2830_v45 = vrot.slane %v4263_v4, 9 }
 0x14a   :  { %v2421_v41 = vmax.bf16 %v2215_v5, %v1300_v28  ;;  %v1637_v22 = vshrl.u32 %v4323_v50, 16  ;;  %v1640_v8 = vshll.u32 %v4323_v50, 16  ;;  %v4341_v38 = vsel %vm2917_vm8, %v2804_v11, %v1181_v59 }
 0x14b   :  { %v2658_v6 = vmax.bf16 %v2536_v37, %v2420_v61  ;;  %v1647_v39 = vrot.slane %v1645_v48, 7  ;;  %v2540_v63 = vrot.slane %v4275_v3, 5  ;;  %v511_v46 = vrot.slane %v509_v12, 4 }
 0x14c   :  { %v2659_v20 = vmax.bf16 %v2537_v30, %v2421_v41  ;;  %v1639_v49 = vrot.slane %v1637_v22, 7  ;;  %v512_v13 = vshll.u32 %v4311_v55, 16  ;;  %v518_v16 = vshll.u32 %v4333_v26, 16 }
 0x14d   :  { %2752 = vst.msk [vmem:[%s4650_s1 + $0x98] sm:$0xf] %vm2672_vm14, %v2658_v6  ;;  %v1650_v1 = vor.u32 %v1648_v9, %v1647_v39  ;;  %v522_v27 = vshrl.u32 %v4333_v26, 16  ;;  %v808_v10 = vrot.slane %v4263_v4, 7  ;;  %v810_v44 = vrot.slane %v4275_v3, 7 }
 0x14e   :  { %v2754_v21 = vsel %vm3019_vm15, %v2659_v20, %v2753_v40  ;;  %v1642_v23 = vor.u32 %v1640_v8, %v1639_v49  ;;  %v1643_v52 = vrot.slane %v1639_v49, 4  ;;  %v514_v32 = vrot.slane %v512_v13, 5 }
 0x14f   :  { %2755 = vst [vmem:[%s4650_s1 + $0x9c] sm:$0x7] %v2754_v21  ;;  %v520_v7 = vrot.slane %v518_v16, 5  ;;  %v2541_v58 = vsel %vm2917_vm8, %v2830_v45, %v2540_v63  ;;  %v524_v0 = vrot.slane %v522_v27, 4  ;;  %v1301_v19 = vmax.bf16 %v4341_v38, %v4204_v36  ;;  %v4372_v36 = vld [vmem:[%s4649_s0 + $0xd0] sm:$0xf] }
 0x150   :  { %v1651_v62 = vsel %vm2957_vm11, %v1643_v52, %v1650_v1  ;;  %v1824_v29 = vmax.bf16 %v1642_v23, %v4251_v43  ;;  %v515_v25 = vor.u32 %v514_v32, %v511_v46  ;;  %v809_v15 = vrot.slane %v808_v10, 4 }
 0x151   :  { %v1825_v54 = vmax.bf16 %v1651_v62, %v4257_v60  ;;  %v1183_v28 = vrot.slane %v1181_v59, 4  ;;  %v525_v51 = vor.u32 %v524_v0, %v520_v7  ;;  %v922_v61 = vmax.bf16 %v808_v10, %v4191_v31 }
 0x152   :  { %v2217_v18 = vshrl.u32 %v1824_v29, 16  ;;  %v2220_v56 = vshll.u32 %v1824_v29, 16  ;;  %v516_v30 = vrot.slane %v515_v25, 4  ;;  %v811_v33 = vsel %vm2889_vm4, %v809_v15, %v810_v44  ;;  %v2757_v44 = vld [vmem:[%s4650_s1 + $0xa4] sm:$0x7] }
 0x153   :  { %v2226_v47 = vshll.u32 %v1825_v54, 16  ;;  %v2230_v37 = vshrl.u32 %v1825_v54, 16  ;;  %v526_v11 = vrot.slane %v525_v51, 4  ;;  %v2542_v12 = vrot.slane %v2540_v63, 4 }
 0x154   :  { %v2219_v24 = vrot.slane %v2217_v18, 4  ;;  %v2222_v5 = vrot.slane %v2220_v56, 5  ;;  %v521_v41 = vsel %vm2895_vm5, %v516_v30, %v520_v7  ;;  %v923_v31 = vmax.bf16 %v811_v33, %v4218_v2 }
 0x155   :  { %v2228_v48 = vrot.slane %v2226_v47, 5  ;;  %v2232_v9 = vrot.slane %v2230_v37, 4  ;;  %v4377_v22 = vmax.bf16 %v521_v41, %v4311_v55  ;;  %v4380_v8 = vmax.bf16 %v526_v11, %v4333_v26 }
 0x156   :  { %v2223_v59 = vor.u32 %v2222_v5, %v2219_v24  ;;  %v1302_v6 = vmax.bf16 %v1183_v28, %v4198_v14  ;;  %v2831_v39 = vrot.slane %v4311_v55, 9  ;;  %v528_v45 = vshrl.u32 %v4372_v36, 16  ;;  %v4394_v14 = vld [vmem:[%s4649_s0 + $0xd4] sm:$0xf] }
 0x157   :  { %v2233_v40 = vor.u32 %v2232_v9, %v2228_v48  ;;  %v2805_v38 = vrot.slane %v922_v61, 9  ;;  %v1653_v49 = vshrl.u32 %v4377_v22, 16  ;;  %v1656_v63 = vshll.u32 %v4377_v22, 16 }
 0x158   :  { %v2224_v20 = vrot.slane %v2223_v59, 4  ;;  %v1661_v46 = vshrl.u32 %v4380_v8, 16  ;;  %v1664_v13 = vshll.u32 %v4380_v8, 16  ;;  %v2545_v2 = vrot.slane %v4333_v26, 5 }
 0x159   :  { %v2234_v1 = vrot.slane %v2233_v40, 4  ;;  %v1186_v21 = vrot.slane %v923_v31, 5  ;;  %v1655_v23 = vrot.slane %v1653_v49, 7  ;;  %v530_v52 = vrot.slane %v528_v45, 4  ;;  %v4425_v45 = vld [vmem:[%s4649_s0 + $0xd8] sm:$0xf] }
 0x15a   :  { %v2229_v16 = vsel %vm2895_vm5, %v2224_v20, %v2228_v48  ;;  %v1663_v7 = vrot.slane %v1661_v46, 7  ;;  %v531_v10 = vshll.u32 %v4372_v36, 16  ;;  %v537_v54 = vshll.u32 %v4394_v14, 16 }
 0x15b   :  { %v2422_v27 = vmax.bf16 %v2229_v16, %v1301_v19  ;;  %v2423_v32 = vmax.bf16 %v2234_v1, %v1302_v6  ;;  %v1187_v62 = vsel %vm2917_vm8, %v2805_v38, %v1186_v21  ;;  %v1658_v29 = vor.u32 %v1656_v63, %v1655_v23 }
 0x15c   :  { %v1659_v0 = vrot.slane %v1655_v23, 4  ;;  %v1666_v18 = vor.u32 %v1664_v13, %v1663_v7  ;;  %v533_v56 = vrot.slane %v531_v10, 5  ;;  %v539_v28 = vrot.slane %v537_v54, 5 }
 0x15d   :  { %v2660_v25 = vmax.bf16 %v2541_v58, %v2422_v27  ;;  %v2661_v15 = vmax.bf16 %v2542_v12, %v2423_v32  ;;  %v1826_v19 = vmax.bf16 %v1658_v29, %v4323_v50  ;;  %v541_v51 = vshrl.u32 %v4394_v14, 16 }
 0x15e   :  { %v812_v47 = vrot.slane %v4311_v55, 7  ;;  %v1667_v58 = vsel %vm2957_vm11, %v1659_v0, %v1666_v18  ;;  %v534_v30 = vor.u32 %v533_v56, %v530_v52  ;;  %v814_v33 = vrot.slane %v4333_v26, 7 }
 0x15f   :  { %2756 = vst.msk [vmem:[%s4650_s1 + $0xa0] sm:$0xf] %vm2672_vm14, %v2660_v25  ;;  %v2758_v37 = vsel %vm3019_vm15, %v2661_v15, %v2757_v44  ;;  %v1827_v24 = vmax.bf16 %v1667_v58, %v4318_v42  ;;  %v2236_v5 = vshrl.u32 %v1826_v19, 16  ;;  %v2239_v11 = vshll.u32 %v1826_v19, 16 }
 0x160   :  { %2759 = vst [vmem:[%s4650_s1 + $0xa4] sm:$0x7] %v2758_v37  ;;  %v543_v61 = vrot.slane %v541_v51, 4  ;;  %v1303_v48 = vmax.bf16 %v1187_v62, %v4251_v43  ;;  %v1188_v9 = vrot.slane %v1186_v21, 4  ;;  %v535_v12 = vrot.slane %v534_v30, 4 }
 0x161   :  { %v813_v41 = vrot.slane %v812_v47, 4  ;;  %v2238_v59 = vrot.slane %v2236_v5, 4  ;;  %v2241_v31 = vrot.slane %v2239_v11, 5  ;;  %v2245_v6 = vshll.u32 %v1827_v24, 16  ;;  %v2761_v37 = vld [vmem:[%s4650_s1 + $0xac] sm:$0x7] }
 0x162   :  { %v2249_v40 = vshrl.u32 %v1827_v24, 16  ;;  %v540_v20 = vsel %vm2895_vm5, %v535_v12, %v539_v28  ;;  %v544_v38 = vor.u32 %v543_v61, %v539_v28  ;;  %v924_v43 = vmax.bf16 %v812_v47, %v4263_v4 }
 0x163   :  { %v815_v49 = vsel %vm2889_vm4, %v813_v41, %v814_v33  ;;  %v2242_v63 = vor.u32 %v2241_v31, %v2238_v59  ;;  %v2247_v1 = vrot.slane %v2245_v6, 5  ;;  %v4433_v13 = vmax.bf16 %v540_v20, %v4372_v36 }
 0x164   :  { %v2251_v46 = vrot.slane %v2249_v40, 4  ;;  %v1304_v16 = vmax.bf16 %v1188_v9, %v4257_v60  ;;  %v545_v21 = vrot.slane %v544_v38, 4  ;;  %v925_v23 = vmax.bf16 %v815_v49, %v4275_v3 }
 0x165   :  { %v547_v52 = vshrl.u32 %v4425_v45, 16  ;;  %v2243_v27 = vrot.slane %v2242_v63, 4  ;;  %v1669_v7 = vshrl.u32 %v4433_v13, 16  ;;  %v1672_v10 = vshll.u32 %v4433_v13, 16 }
 0x166   :  { %v2252_v32 = vor.u32 %v2251_v46, %v2247_v1  ;;  %v2546_v4 = vsel %vm2917_vm8, %v2831_v39, %v2545_v2  ;;  %v2547_v44 = vrot.slane %v2545_v2, 4  ;;  %v4445_v62 = vmax.bf16 %v545_v21, %v4394_v14  ;;  %v4456_v39 = vld [vmem:[%s4649_s0 + $0xdc] sm:$0xf] }
 0x167   :  { %v2832_v60 = vrot.slane %v4372_v36, 9  ;;  %v2248_v3 = vsel %vm2895_vm5, %v2243_v27, %v2247_v1  ;;  %v2806_v0 = vrot.slane %v924_v43, 9  ;;  %v1671_v54 = vrot.slane %v1669_v7, 7 }
 0x168   :  { %v2253_v29 = vrot.slane %v2252_v32, 4  ;;  %v2424_v25 = vmax.bf16 %v2248_v3, %v1303_v48  ;;  %v1677_v15 = vshrl.u32 %v4445_v62, 16  ;;  %v1680_v18 = vshll.u32 %v4445_v62, 16 }
 0x169   :  { %v2550_v56 = vrot.slane %v4394_v14, 5  ;;  %v1191_v19 = vrot.slane %v925_v23, 5  ;;  %v1674_v28 = vor.u32 %v1672_v10, %v1671_v54  ;;  %v549_v51 = vrot.slane %v547_v52, 4 }
 0x16a   :  { %v2425_v2 = vmax.bf16 %v2253_v29, %v1304_v16  ;;  %v2662_v47 = vmax.bf16 %v2546_v4, %v2424_v25  ;;  %v1675_v58 = vrot.slane %v1671_v54, 4  ;;  %v1679_v30 = vrot.slane %v1677_v15, 7 }
 0x16b   :  { %v550_v33 = vshll.u32 %v4425_v45, 16  ;;  %v1828_v5 = vmax.bf16 %v1674_v28, %v4377_v22  ;;  %v556_v11 = vshll.u32 %v4456_v39, 16  ;;  %v560_v61 = vshrl.u32 %v4456_v39, 16 }
 0x16c   :  { %v2663_v24 = vmax.bf16 %v2547_v44, %v2425_v2  ;;  %2760 = vst.msk [vmem:[%s4650_s1 + $0xa8] sm:$0xf] %vm2672_vm14, %v2662_v47  ;;  %v1192_v48 = vsel %vm2917_vm8, %v2806_v0, %v1191_v19  ;;  %v1682_v9 = vor.u32 %v1680_v18, %v1679_v30  ;;  %v816_v41 = vrot.slane %v4372_v36, 7 }
 0x16d   :  { %v552_v12 = vrot.slane %v550_v33, 5  ;;  %v2255_v31 = vshrl.u32 %v1828_v5, 16  ;;  %v2258_v6 = vshll.u32 %v1828_v5, 16  ;;  %v558_v40 = vrot.slane %v556_v11, 5 }
 0x16e   :  { %v2762_v59 = vsel %vm3019_vm15, %v2663_v24, %v2761_v37  ;;  %v1683_v20 = vsel %vm2957_vm11, %v1675_v58, %v1682_v9  ;;  %v562_v49 = vrot.slane %v560_v61, 4  ;;  %v817_v43 = vrot.slane %v816_v41, 4  ;;  %v4506_v61 = vld [vmem:[%s4649_s0 + $0xe0] sm:$0xf] }
 0x16f   :  { %2763 = vst [vmem:[%s4650_s1 + $0xac] sm:$0x7] %v2762_v59  ;;  %v553_v38 = vor.u32 %v552_v12, %v549_v51  ;;  %v1829_v63 = vmax.bf16 %v1683_v20, %v4380_v8  ;;  %v2257_v1 = vrot.slane %v2255_v31, 4  ;;  %v2260_v46 = vrot.slane %v2258_v6, 5  ;;  %v4512_v59 = vld [vmem:[%s4649_s0 + $0xe4] sm:$0xf] }
 0x170   :  { %v818_v16 = vrot.slane %v4394_v14, 7  ;;  %v1193_v21 = vrot.slane %v1191_v19, 4  ;;  %v563_v52 = vor.u32 %v562_v49, %v558_v40  ;;  %v926_v27 = vmax.bf16 %v816_v41, %v4311_v55 }
 0x171   :  { %v554_v23 = vrot.slane %v553_v38, 4  ;;  %v2261_v32 = vor.u32 %v2260_v46, %v2257_v1  ;;  %v2264_v7 = vshll.u32 %v1829_v63, 16  ;;  %v2268_v10 = vshrl.u32 %v1829_v63, 16 }
 0x172   :  { %v819_v4 = vsel %vm2889_vm4, %v817_v43, %v818_v16  ;;  %v1305_v44 = vmax.bf16 %v1192_v48, %v4323_v50  ;;  %v564_v29 = vrot.slane %v563_v52, 4  ;;  %v2551_v55 = vsel %vm2917_vm8, %v2832_v60, %v2550_v56 }
 0x173   :  { %v559_v3 = vsel %vm2895_vm5, %v554_v23, %v558_v40  ;;  %v927_v0 = vmax.bf16 %v819_v4, %v4333_v26  ;;  %v2262_v54 = vrot.slane %v2261_v32, 4  ;;  %v2266_v25 = vrot.slane %v2264_v7, 5 }
 0x174   :  { %v2270_v15 = vrot.slane %v2268_v10, 4  ;;  %v4489_v18 = vmax.bf16 %v559_v3, %v4425_v45  ;;  %v1306_v2 = vmax.bf16 %v1193_v21, %v4318_v42  ;;  %v4495_v19 = vmax.bf16 %v564_v29, %v4456_v39 }
 0x175   :  { %v2807_v50 = vrot.slane %v926_v27, 9  ;;  %v2267_v28 = vsel %vm2895_vm5, %v2262_v54, %v2266_v25  ;;  %v1196_v58 = vrot.slane %v927_v0, 5  ;;  %v2552_v42 = vrot.slane %v2550_v56, 4  ;;  %v2765_v56 = vld [vmem:[%s4650_s1 + $0xb4] sm:$0x7] }
 0x176   :  { %v2271_v51 = vor.u32 %v2270_v15, %v2266_v25  ;;  %v1685_v26 = vshrl.u32 %v4489_v18, 16  ;;  %v1688_v47 = vshll.u32 %v4489_v18, 16  ;;  %v2426_v37 = vmax.bf16 %v2267_v28, %v1305_v44 }
 0x177   :  { %v1693_v30 = vshrl.u32 %v4495_v19, 16  ;;  %v1696_v60 = vshll.u32 %v4495_v19, 16  ;;  %v820_v48 = vrot.slane %v4425_v45, 7  ;;  %v1197_v31 = vsel %vm2917_vm8, %v2807_v50, %v1196_v58 }
 0x178   :  { %v2272_v33 = vrot.slane %v2271_v51, 4  ;;  %v1687_v24 = vrot.slane %v1685_v26, 7  ;;  %v2664_v5 = vmax.bf16 %v2551_v55, %v2426_v37  ;;  %v1198_v40 = vrot.slane %v1196_v58, 4 }
 0x179   :  { %v1695_v11 = vrot.slane %v1693_v30, 7  ;;  %v952_v49 = vshrl.u32 %v4506_v61, 16  ;;  %v955_v43 = vshll.u32 %v4506_v61, 16  ;;  %v821_v1 = vrot.slane %v820_v48, 4 }
 0x17a   :  { %v2427_v9 = vmax.bf16 %v2272_v33, %v1306_v2  ;;  %v1690_v12 = vor.u32 %v1688_v47, %v1687_v24  ;;  %v1691_v41 = vrot.slane %v1687_v24, 4  ;;  %2764 = vst.msk [vmem:[%s4650_s1 + $0xb0] sm:$0xf] %vm2672_vm14, %v2664_v5  ;;  %v961_v46 = vshll.u32 %v4512_v59, 16 }
 0x17b   :  { %v1698_v6 = vor.u32 %v1696_v60, %v1695_v11  ;;  %v965_v16 = vshrl.u32 %v4512_v59, 16  ;;  %v822_v32 = vrot.slane %v4456_v39, 7  ;;  %v954_v7 = vrot.slane %v952_v49, 4 }
 0x17c   :  { %v2665_v20 = vmax.bf16 %v2552_v42, %v2427_v9  ;;  %v1830_v38 = vmax.bf16 %v1690_v12, %v4433_v13  ;;  %v957_v10 = vrot.slane %v955_v43, 5  ;;  %v963_v4 = vrot.slane %v961_v46, 5 }
 0x17d   :  { %v1699_v63 = vsel %vm2957_vm11, %v1691_v41, %v1698_v6  ;;  %v2833_v54 = vrot.slane %v4425_v45, 9  ;;  %v2555_v25 = vrot.slane %v4456_v39, 5  ;;  %v967_v55 = vrot.slane %v965_v16, 4 }
 0x17e   :  { %v2766_v21 = vsel %vm3019_vm15, %v2665_v20, %v2765_v56  ;;  %v1831_v23 = vmax.bf16 %v1699_v63, %v4445_v62  ;;  %v2274_v52 = vshrl.u32 %v1830_v38, 16  ;;  %v2277_v27 = vshll.u32 %v1830_v38, 16  ;;  %v4567_v38 = vld [vmem:[%s4649_s0 + $0xec] sm:$0xf] }
 0x17f   :  { %2767 = vst [vmem:[%s4650_s1 + $0xb4] sm:$0x7] %v2766_v21  ;;  %v958_v15 = vor.u32 %v957_v10, %v954_v7  ;;  %v1307_v51 = vmax.bf16 %v1197_v31, %v4377_v22  ;;  %v968_v47 = vor.u32 %v967_v55, %v963_v4  ;;  %v1308_v58 = vmax.bf16 %v1198_v40, %v4380_v8  ;;  %v4550_v22 = vld [vmem:[%s4649_s0 + $0xe8] sm:$0xf] }
 0x180   :  { %v2276_v44 = vrot.slane %v2274_v52, 4  ;;  %v2279_v3 = vrot.slane %v2277_v27, 5  ;;  %v2283_v29 = vshll.u32 %v1831_v23, 16  ;;  %v2287_v0 = vshrl.u32 %v1831_v23, 16 }
 0x181   :  { %v959_v26 = vrot.slane %v958_v15, 4  ;;  %v823_v60 = vsel %vm2889_vm4, %v821_v1, %v822_v32  ;;  %v2556_v33 = vsel %vm2917_vm8, %v2833_v54, %v2555_v25  ;;  %v2557_v42 = vrot.slane %v2555_v25, 4 }
 0x182   :  { %v2280_v2 = vor.u32 %v2279_v3, %v2276_v44  ;;  %v2285_v50 = vrot.slane %v2283_v29, 5  ;;  %v2289_v28 = vrot.slane %v2287_v0, 4  ;;  %v969_v5 = vrot.slane %v968_v47, 4 }
 0x183   :  { %v964_v24 = vsel %vm2895_vm5, %v959_v26, %v963_v4  ;;  %v928_v9 = vmax.bf16 %v820_v48, %v4372_v36  ;;  %v929_v56 = vmax.bf16 %v823_v60, %v4394_v14  ;;  %v998_v36 = vshrl.u32 %v4550_v22, 16  ;;  %v2769_v14 = vld [vmem:[%s4650_s1 + $0xbc] sm:$0x7] }
 0x184   :  { %v2281_v37 = vrot.slane %v2280_v2, 4  ;;  %v2290_v30 = vor.u32 %v2289_v28, %v2285_v50  ;;  %v4556_v12 = vmax.bf16 %v964_v24, %v4506_v61  ;;  %v4560_v31 = vmax.bf16 %v969_v5, %v4512_v59 }
 0x185   :  { %v2808_v1 = vrot.slane %v928_v9, 9  ;;  %v824_v16 = vrot.slane %v4506_v61, 7  ;;  %v1000_v23 = vrot.slane %v998_v36, 4  ;;  %v1001_v52 = vshll.u32 %v4550_v22, 16 }
 0x186   :  { %v2286_v8 = vsel %vm2895_vm5, %v2281_v37, %v2285_v50  ;;  %v2291_v11 = vrot.slane %v2290_v30, 4  ;;  %v1701_v40 = vshrl.u32 %v4556_v12, 16  ;;  %v1704_v20 = vshll.u32 %v4556_v12, 16 }
 0x187   :  { %v2428_v41 = vmax.bf16 %v2286_v8, %v1307_v51  ;;  %v1709_v49 = vshrl.u32 %v4560_v31, 16  ;;  %v1712_v43 = vshll.u32 %v4560_v31, 16  ;;  %v1007_v27 = vshll.u32 %v4567_v38, 16 }
 0x188   :  { %v2429_v6 = vmax.bf16 %v2291_v11, %v1308_v58  ;;  %v1703_v46 = vrot.slane %v1701_v40, 7  ;;  %v1201_v7 = vrot.slane %v929_v56, 5  ;;  %v1003_v3 = vrot.slane %v1001_v52, 5 }
 0x189   :  { %v2666_v48 = vmax.bf16 %v2556_v33, %v2428_v41  ;;  %v1711_v21 = vrot.slane %v1709_v49, 7  ;;  %v1009_v29 = vrot.slane %v1007_v27, 5  ;;  %v1011_v0 = vshrl.u32 %v4567_v38, 16 }
 0x18a   :  { %v2667_v63 = vmax.bf16 %v2557_v42, %v2429_v6  ;;  %v1706_v10 = vor.u32 %v1704_v20, %v1703_v46  ;;  %v1707_v4 = vrot.slane %v1703_v46, 4  ;;  %v826_v25 = vrot.slane %v4512_v59, 7 }
 0x18b   :  { %2768 = vst.msk [vmem:[%s4650_s1 + $0xb8] sm:$0xf] %vm2672_vm14, %v2666_v48  ;;  %v1714_v44 = vor.u32 %v1712_v43, %v1711_v21  ;;  %v825_v55 = vrot.slane %v824_v16, 4  ;;  %v1004_v2 = vor.u32 %v1003_v3, %v1000_v23  ;;  %v1013_v50 = vrot.slane %v1011_v0, 4 }
 0x18c   :  { %v2770_v32 = vsel %vm3019_vm15, %v2667_v63, %v2769_v14  ;;  %v1832_v54 = vmax.bf16 %v1706_v10, %v4489_v18  ;;  %v2834_v47 = vrot.slane %v4506_v61, 9  ;;  %v1202_v37 = vsel %vm2917_vm8, %v2808_v1, %v1201_v7 }
 0x18d   :  { %2771 = vst [vmem:[%s4650_s1 + $0xbc] sm:$0x7] %v2770_v32  ;;  %v1715_v15 = vsel %vm2957_vm11, %v1707_v4, %v1714_v44  ;;  %v1203_v58 = vrot.slane %v1201_v7, 4  ;;  %v1005_v30 = vrot.slane %v1004_v2, 4  ;;  %v1014_v60 = vor.u32 %v1013_v50, %v1009_v29 }
 0x18e   :  { %v1833_v28 = vmax.bf16 %v1715_v15, %v4495_v19  ;;  %v2293_v51 = vshrl.u32 %v1832_v54, 16  ;;  %v2296_v26 = vshll.u32 %v1832_v54, 16  ;;  %v2560_v8 = vrot.slane %v4512_v59, 5 }
 0x18f   :  { %v827_v11 = vsel %vm2889_vm4, %v825_v55, %v826_v25  ;;  %v1010_v9 = vsel %vm2895_vm5, %v1005_v30, %v1009_v29  ;;  %v1015_v41 = vrot.slane %v1014_v60, 4  ;;  %v1309_v20 = vmax.bf16 %v1202_v37, %v4433_v13 }
 0x190   :  { %v2295_v33 = vrot.slane %v2293_v51, 4  ;;  %v2298_v42 = vrot.slane %v2296_v26, 5  ;;  %v2302_v24 = vshll.u32 %v1833_v28, 16  ;;  %v2306_v5 = vshrl.u32 %v1833_v28, 16 }
 0x191   :  { %v1022_v40 = vmax.bf16 %v1010_v9, %v4550_v22  ;;  %v2561_v36 = vsel %vm2917_vm8, %v2834_v47, %v2560_v8  ;;  %v1310_v48 = vmax.bf16 %v1203_v58, %v4445_v62  ;;  %v1023_v59 = vmax.bf16 %v1015_v41, %v4567_v38 }
 0x192   :  { %v2299_v61 = vor.u32 %v2298_v42, %v2295_v33  ;;  %v2304_v56 = vrot.slane %v2302_v24, 5  ;;  %v2308_v6 = vrot.slane %v2306_v5, 4  ;;  %v930_v63 = vmax.bf16 %v824_v16, %v4425_v45  ;;  %v2773_v45 = vld [vmem:[%s4650_s1 + $0xc4] sm:$0x7] }
 0x193   :  { %v1717_v49 = vshrl.u32 %v1022_v40, 16  ;;  %v1720_v43 = vshll.u32 %v1022_v40, 16  ;;  %v931_v1 = vmax.bf16 %v827_v11, %v4456_v39  ;;  %v1725_v46 = vshrl.u32 %v1023_v59, 16 }
 0x194   :  { %v2300_v34 = vrot.slane %v2299_v61, 4  ;;  %v2309_v14 = vor.u32 %v2308_v6, %v2304_v56  ;;  %v1728_v21 = vshll.u32 %v1023_v59, 16  ;;  %v2562_v52 = vrot.slane %v2560_v8, 4 }
 0x195   :  { %v1719_v27 = vrot.slane %v1717_v49, 7  ;;  %v1727_v62 = vrot.slane %v1725_v46, 7  ;;  %v2809_v16 = vrot.slane %v930_v63, 9  ;;  %v1206_v39 = vrot.slane %v931_v1, 5 }
 0x196   :  { %v2305_v13 = vsel %vm2895_vm5, %v2300_v34, %v2304_v56  ;;  %v2310_v23 = vrot.slane %v2309_v14, 4  ;;  %v2835_v47 = vrot.slane %v4550_v22, 9 }
 0x197   :  { %v2430_v32 = vmax.bf16 %v2305_v13, %v1309_v20  ;;  %v1722_v10 = vor.u32 %v1720_v43, %v1719_v27  ;;  %v1723_v4 = vrot.slane %v1719_v27, 4  ;;  %v1730_v3 = vor.u32 %v1728_v21, %v1727_v62 }
 0x198   :  { %v2431_v7 = vmax.bf16 %v2310_v23, %v1310_v48  ;;  %v1208_v50 = vrot.slane %v1206_v39, 4 }
 0x199   :  { %v2668_v44 = vmax.bf16 %v2561_v36, %v2430_v32  ;;  %v1834_v0 = vmax.bf16 %v1722_v10, %v4556_v12  ;;  %v1731_v54 = vsel %vm2957_vm11, %v1723_v4, %v1730_v3  ;;  %v1207_v12 = vsel %vm2917_vm8, %v2809_v16, %v1206_v39 }
 0x19a   :  { %v2669_v29 = vmax.bf16 %v2562_v52, %v2431_v7  ;;  %v1835_v15 = vmax.bf16 %v1731_v54, %v4560_v31  ;;  %v2565_v31 = vrot.slane %v4567_v38, 5  ;;  %v1311_v60 = vmax.bf16 %v1207_v12, %v4489_v18  ;;  %v2777_v38 = vld [vmem:[%s4650_s1 + $0xcc] sm:$0x7] }
 0x19b   :  { %2772 = vst.msk [vmem:[%s4650_s1 + $0xc0] sm:$0xf] %vm2672_vm14, %v2668_v44  ;;  %v2312_v55 = vshrl.u32 %v1834_v0, 16  ;;  %v2315_v2 = vshll.u32 %v1834_v0, 16  ;;  %v1312_v42 = vmax.bf16 %v1208_v50, %v4495_v19 }
 0x19c   :  { %v2774_v25 = vsel %vm3019_vm15, %v2669_v29, %v2773_v45  ;;  %v2321_v26 = vshll.u32 %v1835_v15, 16  ;;  %v2325_v17 = vshrl.u32 %v1835_v15, 16  ;;  %v2566_v8 = vsel %vm2917_vm8, %v2835_v47, %v2565_v31 }
 0x19d   :  { %2775 = vst [vmem:[%s4650_s1 + $0xc4] sm:$0x7] %v2774_v25  ;;  %v2314_v28 = vrot.slane %v2312_v55, 4  ;;  %v2317_v51 = vrot.slane %v2315_v2, 5  ;;  %v2567_v9 = vrot.slane %v2565_v31, 4 }
 0x19e   :  { %v2323_v58 = vrot.slane %v2321_v26, 5  ;;  %v2327_v30 = vrot.slane %v2325_v17, 4 }
 0x19f   :  { %v2318_v37 = vor.u32 %v2317_v51, %v2314_v28 }
 0x1a0   :  { %v2328_v24 = vor.u32 %v2327_v30, %v2323_v58 }
 0x1a1   :  { %v2319_v33 = vrot.slane %v2318_v37, 4 }
 0x1a2   :  { %v2329_v11 = vrot.slane %v2328_v24, 4 }
 0x1a3   :  { %v2324_v5 = vsel %vm2895_vm5, %v2319_v33, %v2323_v58 }
 0x1a4   :  { %v2432_v22 = vmax.bf16 %v2324_v5, %v1311_v60  ;;  %v2433_v41 = vmax.bf16 %v2329_v11, %v1312_v42 }
 0x1a6   :  { %v2670_v61 = vmax.bf16 %v2566_v8, %v2432_v22  ;;  %v2671_v18 = vmax.bf16 %v2567_v9, %v2433_v41 }
 0x1a8   :  { %2776 = vst.msk [vmem:[%s4650_s1 + $0xc8] sm:$0xf] %vm2672_vm14, %v2670_v61  ;;  %v2778_v35 = vsel %vm3019_vm15, %v2671_v18, %v2777_v38 }
 0x1a9   :  { %2779 = vst [vmem:[%s4650_s1 + $0xcc] sm:$0x7] %v2778_v35 }

// kernel: nin_forward.11
= control target key start
LH: loop header
LB: loop body
LE: loop exit
PB: predicated region body
PF: predicated region fallthrough
CT: control target
= control target key end

     0   :  { %vm508_vm0 = vcmask 1042432   ;;  %vm509_vm1 = vsmask.f32 2304  ;;  %vm511_vm2 = vcmask 1046532   ;;  %vm512_vm3 = vsmask.f32 6400  ;;  %s862_s0 = inlined_call_operand.vmem [shape: bf16[2,7,7,256], index: 0, kind: input, shape index: {}]   ;;  %s863_s1 = inlined_call_operand.vmem [shape: bf16[2,5,5,256], index: 1, kind: output, shape index: {}]  }
   0x1   :  { %v582_v0 = vld [vmem:[%s862_s0] sm:$0xff]  ;;  %v9_v1 = vld [vmem:[%s862_s0 + $0x8] sm:$0xff]  ;;  %v590_v2 = vld [vmem:[%s862_s0 + $0x10] sm:$0xff] }
   0x2   :  { %v23_v3 = vshrl.u32 %v582_v0, 16  ;;  %v26_v4 = vshll.u32 %v582_v0, 16  ;;  %v32_v5 = vshrl.u32 %v9_v1, 16  ;;  %v35_v6 = vshll.u32 %v9_v1, 16  ;;  %v599_v10 = vld [vmem:[%s862_s0 + $0x18] sm:$0xff]  ;;  %v606_v20 = vld [vmem:[%s862_s0 + $0x20] sm:$0xff]  ;;  %vm657_vm4 = vmand %vm508_vm0, %vm509_vm1 }
   0x3   :  { %v41_v7 = vshrl.u32 %v590_v2, 16  ;;  %v44_v8 = vshll.u32 %v590_v2, 16  ;;  %v142_v9 = vrot.slane %v9_v1, 7  ;;  %v50_v17 = vshrl.u32 %v599_v10, 16  ;;  %v617_v37 = vld [vmem:[%s862_s0 + $0x28] sm:$0xff]  ;;  %v631_v54 = vld [vmem:[%s862_s0 + $0x30] sm:$0xff]  ;;  %vm513_vm5 = vmand %vm511_vm2, %vm512_vm3 }
   0x4   :  { %v25_v11 = vrot.slane %v23_v3, 4  ;;  %v28_v12 = vrot.slane %v26_v4, 5  ;;  %v34_v13 = vrot.slane %v32_v5, 4  ;;  %v37_v14 = vrot.slane %v35_v6, 5  ;;  %vm680_vm6 = vmor %vm513_vm5, %vm657_vm4 }
   0x5   :  { %v43_v15 = vrot.slane %v41_v7, 4  ;;  %v46_v16 = vrot.slane %v44_v8, 5  ;;  %v53_v19 = vshll.u32 %v599_v10, 16  ;;  %v52_v23 = vrot.slane %v50_v17, 4 }
   0x6   :  { %v29_v18 = vor.u32 %v28_v12, %v25_v11  ;;  %v38_v21 = vor.u32 %v37_v14, %v34_v13  ;;  %v162_v24 = vmax.bf16 %v142_v9, %v582_v0  ;;  %v143_v26 = vrot.slane %v590_v2, 7 }
   0x7   :  { %v47_v22 = vor.u32 %v46_v16, %v43_v15  ;;  %v55_v25 = vrot.slane %v53_v19, 5  ;;  %v59_v29 = vshrl.u32 %v606_v20, 16  ;;  %v62_v30 = vshll.u32 %v606_v20, 16 }
   0x8   :  { %v30_v27 = vrot.slane %v29_v18, 4  ;;  %v144_v32 = vrot.slane %v599_v10, 7  ;;  %v39_v33 = vrot.slane %v38_v21, 4  ;;  %v549_v38 = vrot.slane %v162_v24, 9 }
   0x9   :  { %v48_v28 = vrot.slane %v47_v22, 4  ;;  %v56_v31 = vor.u32 %v55_v25, %v52_v23  ;;  %v61_v35 = vrot.slane %v59_v29, 4  ;;  %v64_v36 = vrot.slane %v62_v30, 5 }
   0xa   :  { %v559_v39 = vrot.slane %v590_v2, 9  ;;  %v163_v41 = vmax.bf16 %v143_v26, %v9_v1  ;;  %v122_v42 = vmax.bf16 %v30_v27, %v582_v0  ;;  %v164_v47 = vmax.bf16 %v144_v32, %v590_v2 }
   0xb   :  { %v124_v34 = vmax.bf16 %v48_v28, %v590_v2  ;;  %v57_v40 = vrot.slane %v56_v31, 4  ;;  %v65_v45 = vor.u32 %v64_v36, %v61_v35  ;;  %v173_v48 = vshrl.u32 %v617_v37, 16  ;;  %v518_v2 = vld [vmem:[%s863_s1 + $0x8] sm:$0x77] }
   0xc   :  { %v176_v49 = vshll.u32 %v617_v37, 16  ;;  %v123_v50 = vmax.bf16 %v39_v33, %v9_v1  ;;  %v560_v52 = vrot.slane %v599_v10, 9  ;;  %v550_v55 = vrot.slane %v163_v41, 9 }
   0xd   :  { %v267_v43 = vshrl.u32 %v124_v34, 16  ;;  %v270_v44 = vshll.u32 %v124_v34, 16  ;;  %v622_v46 = vmax.bf16 %v57_v40, %v599_v10  ;;  %v66_v53 = vrot.slane %v65_v45, 4 }
   0xe   :  { %v175_v58 = vrot.slane %v173_v48, 4  ;;  %v635_v59 = vmax.bf16 %v549_v38, %v122_v42  ;;  %v178_v62 = vrot.slane %v176_v49, 5  ;;  %v551_v0 = vrot.slane %v164_v47, 9 }
   0xf   :  { %v269_v51 = vrot.slane %v267_v43, 7  ;;  %v274_v56 = vshrl.u32 %v622_v46, 16  ;;  %v277_v57 = vshll.u32 %v622_v46, 16  ;;  %v638_v61 = vmax.bf16 %v66_v53, %v606_v20 }
  0x10   :  { %v195_v1 = vshrl.u32 %v631_v54, 16  ;;  %v198_v3 = vshll.u32 %v631_v54, 16  ;;  %v179_v7 = vor.u32 %v178_v62, %v175_v58  ;;  %v644_v8 = vmax.bf16 %v550_v55, %v123_v50 }
  0x11   :  { %v272_v60 = vor.u32 %v270_v44, %v269_v51  ;;  %v276_v63 = vrot.slane %v274_v56, 7  ;;  %v281_v5 = vshrl.u32 %v638_v61, 16  ;;  %v284_v6 = vshll.u32 %v638_v61, 16 }
  0x12   :  { %v145_v11 = vrot.slane %v606_v20, 7  ;;  %v197_v12 = vrot.slane %v195_v1, 4  ;;  %v180_v16 = vrot.slane %v179_v7, 4  ;;  %v647_v18 = vmax.bf16 %v551_v0, %v124_v34 }
  0x13   :  { %v346_v4 = vmax.bf16 %v272_v60, %v123_v50  ;;  %v279_v9 = vor.u32 %v277_v57, %v276_v63  ;;  %v283_v15 = vrot.slane %v281_v5, 7  ;;  %v561_v19 = vrot.slane %v606_v20, 9  ;;  %v670_v50 = vld [vmem:[%s862_s0 + $0x40] sm:$0xff]  ;;  %v676_v57 = vld [vmem:[%s862_s0 + $0x38] sm:$0xff] }
  0x14   :  { %v200_v21 = vrot.slane %v198_v3, 5  ;;  %v192_v25 = vmax.bf16 %v180_v16, %v617_v37  ;;  %v652_v28 = vmax.bf16 %v145_v11, %v599_v10  ;;  %v146_v38 = vrot.slane %v617_v37, 7  ;;  %v515_v60 = vld [vmem:[%s863_s1] sm:$0x77] }
  0x15   :  { %v357_v13 = vshrl.u32 %v346_v4, 16  ;;  %v360_v14 = vshll.u32 %v346_v4, 16  ;;  %v347_v17 = vmax.bf16 %v279_v9, %v124_v34  ;;  %v286_v24 = vor.u32 %v284_v6, %v283_v15  ;;  %v703_v15 = vld [vmem:[%s862_s0 + $0x48] sm:$0xff] }
  0x16   :  { %v201_v29 = vor.u32 %v200_v21, %v197_v12  ;;  %v288_v32 = vshrl.u32 %v192_v25, 16  ;;  %v291_v33 = vshll.u32 %v192_v25, 16  ;;  %v552_v47 = vrot.slane %v652_v28, 9  ;;  %v521_v28 = vld [vmem:[%s863_s1 + $0x10] sm:$0x77] }
  0x17   :  { %v359_v22 = vrot.slane %v357_v13, 4  ;;  %v362_v23 = vrot.slane %v360_v14, 5  ;;  %v366_v26 = vshrl.u32 %v347_v17, 16  ;;  %v369_v27 = vshll.u32 %v347_v17, 16 }
  0x18   :  { %v348_v31 = vmax.bf16 %v286_v24, %v622_v46  ;;  %v202_v40 = vrot.slane %v201_v29, 4  ;;  %v290_v44 = vrot.slane %v288_v32, 7  ;;  %v562_v48 = vrot.slane %v617_v37, 9 }
  0x19   :  { %v363_v30 = vor.u32 %v362_v23, %v359_v22  ;;  %v368_v35 = vrot.slane %v366_v26, 4  ;;  %v371_v36 = vrot.slane %v369_v27, 5  ;;  %v77_v5 = vshrl.u32 %v670_v50, 16 }
  0x1a   :  { %v375_v42 = vshrl.u32 %v348_v31, 16  ;;  %v378_v43 = vshll.u32 %v348_v31, 16  ;;  %v214_v49 = vmax.bf16 %v202_v40, %v631_v54  ;;  %v293_v56 = vor.u32 %v291_v33, %v290_v44 }
  0x1b   :  { %v364_v41 = vrot.slane %v363_v30, 4  ;;  %v372_v45 = vor.u32 %v371_v36, %v368_v35  ;;  %v68_v9 = vshrl.u32 %v676_v57, 16  ;;  %v80_v11 = vshll.u32 %v670_v50, 16 }
  0x1c   :  { %v377_v53 = vrot.slane %v375_v42, 4  ;;  %v380_v55 = vrot.slane %v378_v43, 5  ;;  %v295_v63 = vshrl.u32 %v214_v49, 16  ;;  %v298_v0 = vshll.u32 %v214_v49, 16  ;;  %v524_v49 = vld [vmem:[%s863_s1 + $0x18] sm:$0x77] }
  0x1d   :  { %v456_v51 = vmax.bf16 %v364_v41, %v635_v59  ;;  %v373_v62 = vrot.slane %v372_v45, 4  ;;  %v166_v59 = vmax.bf16 %v146_v38, %v606_v20  ;;  %v349_v4 = vmax.bf16 %v293_v56, %v638_v61 }
  0x1e   :  { %v381_v3 = vor.u32 %v380_v55, %v377_v53  ;;  %v297_v7 = vrot.slane %v295_v63, 7  ;;  %v71_v17 = vshll.u32 %v676_v57, 16  ;;  %v79_v21 = vrot.slane %v77_v5, 4 }
  0x1f   :  { %v498_v1 = vmax.bf16 %v559_v39, %v456_v51  ;;  %v457_v6 = vmax.bf16 %v373_v62, %v644_v8  ;;  %v384_v13 = vshrl.u32 %v349_v4, 16  ;;  %v387_v14 = vshll.u32 %v349_v4, 16 }
  0x20   :  { %v382_v39 = vrot.slane %v381_v3, 4  ;;  %v300_v16 = vor.u32 %v298_v0, %v297_v7  ;;  %v82_v26 = vrot.slane %v80_v11, 5  ;;  %v86_v10 = vshrl.u32 %v703_v15, 16  ;;  %v527_v11 = vld [vmem:[%s863_s1 + $0x20] sm:$0x77] }
  0x21   :  { %v516_v12 = vsel %vm680_vm6, %v498_v1, %v515_v60  ;;  %v499_v8 = vmax.bf16 %v560_v52, %v457_v6  ;;  %v386_v23 = vrot.slane %v384_v13, 4  ;;  %v389_v24 = vrot.slane %v387_v14, 5  ;;  %v745_v60 = vld [vmem:[%s862_s0 + $0x58] sm:$0xff]  ;;  %v769_v14 = vld [vmem:[%s862_s0 + $0x60] sm:$0xff] }
  0x22   :  { %517 = vst [vmem:[%s863_s1] sm:$0x77] %v516_v12  ;;  %v458_v22 = vmax.bf16 %v382_v39, %v647_v18  ;;  %v350_v29 = vmax.bf16 %v300_v16, %v192_v25  ;;  %v89_v52 = vshll.u32 %v703_v15, 16  ;;  %v259_v30 = vmax.bf16 %v552_v47, %v622_v46  ;;  %v728_v25 = vld [vmem:[%s862_s0 + $0x50] sm:$0xff] }
  0x23   :  { %v519_v27 = vsel %vm680_vm6, %v499_v8, %v518_v2  ;;  %v390_v31 = vor.u32 %v389_v24, %v386_v23  ;;  %v553_v32 = vrot.slane %v166_v59, 9  ;;  %v88_v35 = vrot.slane %v86_v10, 4 }
  0x24   :  { %520 = vst [vmem:[%s863_s1 + $0x8] sm:$0x77] %v519_v27  ;;  %v500_v18 = vmax.bf16 %v561_v19, %v458_v22  ;;  %v393_v33 = vshrl.u32 %v350_v29, 16  ;;  %v396_v34 = vshll.u32 %v350_v29, 16  ;;  %v91_v36 = vrot.slane %v89_v52, 5 }
  0x25   :  { %v391_v40 = vrot.slane %v390_v31, 4  ;;  %v70_v41 = vrot.slane %v68_v9, 4  ;;  %v73_v20 = vrot.slane %v71_v17, 5  ;;  %v83_v42 = vor.u32 %v82_v26, %v79_v21 }
  0x26   :  { %v522_v38 = vsel %vm680_vm6, %v500_v18, %v521_v28  ;;  %v395_v46 = vrot.slane %v393_v33, 4  ;;  %v398_v19 = vrot.slane %v396_v34, 5  ;;  %v92_v43 = vor.u32 %v91_v36, %v88_v35 }
  0x27   :  { %523 = vst [vmem:[%s863_s1 + $0x10] sm:$0x77] %v522_v38  ;;  %v459_v44 = vmax.bf16 %v391_v40, %v259_v30  ;;  %v563_v45 = vrot.slane %v631_v54, 9  ;;  %v95_v47 = vshrl.u32 %v728_v25, 16  ;;  %v260_v51 = vmax.bf16 %v553_v32, %v638_v61 }
  0x28   :  { %v399_v53 = vor.u32 %v398_v19, %v395_v46  ;;  %v93_v55 = vrot.slane %v92_v43, 4  ;;  %v98_v56 = vshll.u32 %v728_v25, 16  ;;  %v74_v62 = vor.u32 %v73_v20, %v70_v41  ;;  %v798_v46 = vld [vmem:[%s862_s0 + $0x68] sm:$0xff] }
  0x29   :  { %v501_v54 = vmax.bf16 %v562_v48, %v459_v44  ;;  %v147_v59 = vrot.slane %v670_v50, 7  ;;  %v97_v63 = vrot.slane %v95_v47, 4  ;;  %v84_v1 = vrot.slane %v83_v42, 4 }
  0x2a   :  { %v400_v0 = vrot.slane %v399_v53, 4  ;;  %v751_v61 = vmax.bf16 %v93_v55, %v703_v15  ;;  %v100_v3 = vrot.slane %v98_v56, 5  ;;  %v104_v5 = vshrl.u32 %v745_v60, 16 }
  0x2b   :  { %v525_v4 = vsel %vm680_vm6, %v501_v54, %v524_v49  ;;  %v107_v6 = vshll.u32 %v745_v60, 16  ;;  %v75_v12 = vrot.slane %v74_v62, 4  ;;  %v167_v2 = vmax.bf16 %v147_v59, %v676_v57 }
  0x2c   :  { %526 = vst [vmem:[%s863_s1 + $0x18] sm:$0x77] %v525_v4  ;;  %v460_v37 = vmax.bf16 %v400_v0, %v260_v51  ;;  %v302_v48 = vshrl.u32 %v751_v61, 16  ;;  %v305_v7 = vshll.u32 %v751_v61, 16  ;;  %v101_v9 = vor.u32 %v100_v3, %v97_v63 }
  0x2d   :  { %v106_v39 = vrot.slane %v104_v5, 4  ;;  %v109_v13 = vrot.slane %v107_v6, 5  ;;  %v772_v16 = vmax.bf16 %v84_v1, %v670_v50  ;;  %v148_v22 = vrot.slane %v703_v15, 7 }
  0x2e   :  { %v502_v8 = vmax.bf16 %v563_v45, %v460_v37  ;;  %v304_v17 = vrot.slane %v302_v48, 7  ;;  %v102_v21 = vrot.slane %v101_v9, 4  ;;  %v182_v28 = vshrl.u32 %v769_v14, 16 }
  0x2f   :  { %v110_v23 = vor.u32 %v109_v13, %v106_v39  ;;  %v127_v29 = vmax.bf16 %v75_v12, %v676_v57  ;;  %v554_v10 = vrot.slane %v167_v2, 9  ;;  %v185_v18 = vshll.u32 %v769_v14, 16 }
  0x30   :  { %v528_v24 = vsel %vm680_vm6, %v502_v8, %v527_v11  ;;  %v307_v26 = vor.u32 %v305_v7, %v304_v17  ;;  %v778_v27 = vmax.bf16 %v102_v21, %v728_v25  ;;  %v184_v33 = vrot.slane %v182_v28, 4 }
  0x31   :  { %529 = vst [vmem:[%s863_s1 + $0x20] sm:$0x77] %v528_v24  ;;  %v111_v52 = vrot.slane %v110_v23, 4  ;;  %v564_v34 = vrot.slane %v703_v15, 9  ;;  %v168_v35 = vmax.bf16 %v148_v22, %v670_v50  ;;  %v187_v38 = vrot.slane %v185_v18, 5 }
  0x32   :  { %v351_v30 = vmax.bf16 %v307_v26, %v772_v16  ;;  %v309_v31 = vshrl.u32 %v778_v27, 16  ;;  %v312_v32 = vshll.u32 %v778_v27, 16  ;;  %v149_v20 = vrot.slane %v728_v25, 7 }
  0x33   :  { %v792_v36 = vmax.bf16 %v111_v52, %v745_v60  ;;  %v565_v19 = vrot.slane %v728_v25, 9  ;;  %v188_v43 = vor.u32 %v187_v38, %v184_v33  ;;  %v261_v44 = vmax.bf16 %v554_v10, %v127_v29 }
  0x34   :  { %v402_v57 = vshrl.u32 %v351_v30, 16  ;;  %v405_v40 = vshll.u32 %v351_v30, 16  ;;  %v311_v41 = vrot.slane %v309_v31, 7  ;;  %v204_v55 = vshrl.u32 %v798_v46, 16 }
  0x35   :  { %v316_v42 = vshrl.u32 %v792_v36, 16  ;;  %v319_v50 = vshll.u32 %v792_v36, 16  ;;  %v189_v53 = vrot.slane %v188_v43, 4  ;;  %v207_v56 = vshll.u32 %v798_v46, 16 }
  0x36   :  { %v404_v45 = vrot.slane %v402_v57, 4  ;;  %v407_v47 = vrot.slane %v405_v40, 5  ;;  %v314_v49 = vor.u32 %v312_v32, %v311_v41  ;;  %v555_v62 = vrot.slane %v168_v35, 9 }
  0x37   :  { %v318_v51 = vrot.slane %v316_v42, 7  ;;  %v169_v63 = vmax.bf16 %v149_v20, %v703_v15  ;;  %v193_v1 = vmax.bf16 %v189_v53, %v769_v14  ;;  %v206_v3 = vrot.slane %v204_v55, 4  ;;  %v530_v15 = vld [vmem:[%s863_s1 + $0x28] sm:$0x77]  ;;  %v533_v20 = vld [vmem:[%s863_s1 + $0x30] sm:$0x77] }
  0x38   :  { %v408_v54 = vor.u32 %v407_v47, %v404_v45  ;;  %v352_v59 = vmax.bf16 %v314_v49, %v751_v61  ;;  %v209_v4 = vrot.slane %v207_v56, 5  ;;  %v150_v48 = vrot.slane %v745_v60, 7  ;;  %v536_v56 = vld [vmem:[%s863_s1 + $0x38] sm:$0x77] }
  0x39   :  { %v321_v0 = vor.u32 %v319_v50, %v318_v51  ;;  %v323_v9 = vshrl.u32 %v193_v1, 16  ;;  %v326_v11 = vshll.u32 %v193_v1, 16  ;;  %v556_v8 = vrot.slane %v169_v63, 9 }
  0x3a   :  { %v409_v5 = vrot.slane %v408_v54, 4  ;;  %v411_v6 = vshrl.u32 %v352_v59, 16  ;;  %v414_v37 = vshll.u32 %v352_v59, 16  ;;  %v210_v12 = vor.u32 %v209_v4, %v206_v3 }
  0x3b   :  { %v353_v7 = vmax.bf16 %v321_v0, %v778_v27  ;;  %v325_v22 = vrot.slane %v323_v9, 7  ;;  %v262_v26 = vmax.bf16 %v555_v62, %v772_v16  ;;  %v170_v29 = vmax.bf16 %v150_v48, %v728_v25 }
  0x3c   :  { %v461_v2 = vmax.bf16 %v409_v5, %v261_v44  ;;  %v413_v39 = vrot.slane %v411_v6, 4  ;;  %v416_v13 = vrot.slane %v414_v37, 5  ;;  %v211_v23 = vrot.slane %v210_v12, 4 }
  0x3d   :  { %v420_v17 = vshrl.u32 %v353_v7, 16  ;;  %v423_v21 = vshll.u32 %v353_v7, 16  ;;  %v328_v18 = vor.u32 %v326_v11, %v325_v22  ;;  %v263_v33 = vmax.bf16 %v556_v8, %v751_v61 }
  0x3e   :  { %v503_v24 = vmax.bf16 %v564_v34, %v461_v2  ;;  %v417_v28 = vor.u32 %v416_v13, %v413_v39  ;;  %v215_v30 = vmax.bf16 %v211_v23, %v798_v46  ;;  %v151_v35 = vrot.slane %v769_v14, 7  ;;  %v542_v39 = vld [vmem:[%s863_s1 + $0x48] sm:$0x77] }
  0x3f   :  { %v422_v10 = vrot.slane %v420_v17, 4  ;;  %v425_v52 = vrot.slane %v423_v21, 5  ;;  %v354_v25 = vmax.bf16 %v328_v18, %v792_v36  ;;  %v566_v40 = vrot.slane %v745_v60, 9 }
  0x40   :  { %v531_v31 = vsel %vm680_vm6, %v503_v24, %v530_v15  ;;  %v418_v32 = vrot.slane %v417_v28, 4  ;;  %v330_v34 = vshrl.u32 %v215_v30, 16  ;;  %v333_v38 = vshll.u32 %v215_v30, 16 }
  0x41   :  { %532 = vst [vmem:[%s863_s1 + $0x28] sm:$0x77] %v531_v31  ;;  %v426_v16 = vor.u32 %v425_v52, %v422_v10  ;;  %v557_v41 = vrot.slane %v170_v29, 9  ;;  %v429_v42 = vshrl.u32 %v354_v25, 16  ;;  %v432_v50 = vshll.u32 %v354_v25, 16 }
  0x42   :  { %v462_v57 = vmax.bf16 %v418_v32, %v262_v26  ;;  %v332_v43 = vrot.slane %v330_v34, 7  ;;  %v171_v45 = vmax.bf16 %v151_v35, %v745_v60  ;;  %v567_v59 = vrot.slane %v769_v14, 9 }
  0x43   :  { %v427_v61 = vrot.slane %v426_v16, 4  ;;  %v431_v49 = vrot.slane %v429_v42, 4  ;;  %v434_v51 = vrot.slane %v432_v50, 5  ;;  %v568_v12 = vrot.slane %v798_v46, 9 }
  0x44   :  { %v504_v44 = vmax.bf16 %v565_v19, %v462_v57  ;;  %v335_v53 = vor.u32 %v333_v38, %v332_v43  ;;  %v264_v19 = vmax.bf16 %v557_v41, %v778_v27  ;;  %v558_v63 = vrot.slane %v171_v45, 9  ;;  %v539_v27 = vld [vmem:[%s863_s1 + $0x40] sm:$0x77] }
  0x45   :  { %v463_v47 = vmax.bf16 %v427_v61, %v263_v33  ;;  %v435_v62 = vor.u32 %v434_v51, %v431_v49 }
  0x46   :  { %v534_v55 = vsel %vm680_vm6, %v504_v44, %v533_v20  ;;  %v355_v60 = vmax.bf16 %v335_v53, %v193_v1  ;;  %v265_v14 = vmax.bf16 %v558_v63, %v792_v36 }
  0x47   :  { %535 = vst [vmem:[%s863_s1 + $0x30] sm:$0x77] %v534_v55  ;;  %v505_v54 = vmax.bf16 %v566_v40, %v463_v47  ;;  %v436_v3 = vrot.slane %v435_v62, 4 }
  0x48   :  { %v438_v4 = vshrl.u32 %v355_v60, 16  ;;  %v441_v5 = vshll.u32 %v355_v60, 16 }
  0x49   :  { %v537_v0 = vsel %vm680_vm6, %v505_v54, %v536_v56  ;;  %v464_v6 = vmax.bf16 %v436_v3, %v264_v19 }
  0x4a   :  { %538 = vst [vmem:[%s863_s1 + $0x38] sm:$0x77] %v537_v0  ;;  %v440_v37 = vrot.slane %v438_v4, 4  ;;  %v443_v48 = vrot.slane %v441_v5, 5 }
  0x4b   :  { %v506_v1 = vmax.bf16 %v567_v59, %v464_v6 }
  0x4c   :  { %v444_v7 = vor.u32 %v443_v48, %v440_v37 }
  0x4d   :  { %v540_v9 = vsel %vm680_vm6, %v506_v1, %v539_v27 }
  0x4e   :  { %v445_v11 = vrot.slane %v444_v7, 4  ;;  %541 = vst [vmem:[%s863_s1 + $0x40] sm:$0x77] %v540_v9 }
  0x50   :  { %v465_v2 = vmax.bf16 %v445_v11, %v265_v14 }
  0x52   :  { %v507_v13 = vmax.bf16 %v568_v12, %v465_v2 }
  0x54   :  { %v543_v36 = vsel %vm680_vm6, %v507_v13, %v542_v39 }
  0x55   :  { %544 = vst [vmem:[%s863_s1 + $0x48] sm:$0x77] %v543_v36 }

// kernel: nin_forward.10
= control target key start
LH: loop header
LB: loop body
LE: loop exit
PB: predicated region body
PF: predicated region fallthrough
CT: control target
= control target key end

     0   :  { %s2842_s24 = smov 0   ;;  %s2844_s25 = smov 0   ;;  %s3414_s0 = inlined_call_operand.vmem [shape: bf16[112,2560], index: 0, kind: input, shape index: {}]   ;;  %s3415_s1 = inlined_call_operand.vmem [shape: bf16[2560,256], index: 1, kind: input, shape index: {}]   ;;  %s3416_s2 = inlined_call_operand.vmem [shape: f32[1,256], index: 2, kind: input, shape index: {}]   ;;  %s3417_s3 = inlined_call_operand.vmem [shape: bf16[256,256], index: 3, kind: input, shape index: {}]   ;;  %s3418_s4 = inlined_call_operand.vmem [shape: f32[1,256], index: 4, kind: input, shape index: {}]   ;;  %s3419_s5 = inlined_call_operand.vmem [shape: bf16[256,256], index: 5, kind: input, shape index: {}]   ;;  %s3420_s6 = inlined_call_operand.vmem [shape: f32[1,256], index: 6, kind: input, shape index: {}]   ;;  %s3421_s7 = inlined_call_operand.vmem [shape: bf16[112,256], index: 7, kind: output, shape index: {}]  }
   0x1   :  { %s2846_s26 = smov 0   ;;  %s2848_s27 = smov 0  }
   0x2   :  { %s2850_s28 = smov 0  }
   0x3 LB: > { %s26_s29 = sadd.s32 1, %s2795_s27  ;;  %p45_p1 = scmp.ne.s32.totalorder %s2787_s25, %s2783_s24  ;;  %s2799_s28 = sphi %s2850_s28, %s17_s28   ;;  %s2795_s27 = sphi %s2848_s27, %s3425_s27   ;;  %s2791_s26 = sphi %s2846_s26, %s3424_s26   ;;  %s2787_s25 = sphi %s2844_s25, %s3423_s25   ;;  %s2783_s24 = sphi %s2842_s24, %s3422_s24  }
   0x4   : > { %p27_p0 = scmp.ge.s32.totalorder %s26_s29, 5  ;;  %p46_p2 = scmp.eq.s32.totalorder %s2799_s28, 0 }
   0x5   : > { %s38_s8 = sadd.s32 1, %s2787_s25  ;;  %p2257_p5 = scmp.ge.s32.totalorder %s2799_s28, 5 }
   0x6   : > { %s3427_s29 = smov (%p27_p0, %s26_s29), 0  ;;  %p47_p3 = por %p46_p2, %p45_p1 }
   0x7   : > { %s34_s30 = ssub.s32 %s2795_s27, %s3427_s29  ;;  %243 = sbr.rel (%p2257_p5) target bundleno = 33 (0x21), region = 36 }
   0x8   : > { %p36_p4 = scmp.eq.s32.totalorder %s34_s30, 0 }
   0xa   : > { %s2877_s9 = scalar_select %p36_p4, %s2787_s25, %s38_s8  }
   0xe   : > { %246 = sbr.rel (!%p47_p3) target bundleno = 33 (0x21), region = 40  ;;  %s248_s10 = sand.u32 (%p47_p3), 1, %s2787_s25  }
   0xf   : > { %s2440_s11 = sshll.u32 (%p47_p3), %s2795_s27, 4  ;;  %s2484_s12 = smul.u32 (%p47_p3), 224, %s248_s10 }
  0x10   : > { %s2885_s15 = scalar_lea.vmem (%p47_p3), %s3414_s0, %s2440_s11 }
  0x11   : > { %v269_v0 = vld [vmem:[%s2885_s15] sm:$0xff] (%p47_p3)  ;;  %v271_v1 = vld [vmem:[%s2885_s15 + $0x8] sm:$0xff] (%p47_p3)  ;;  %v273_v2 = vld [vmem:[%s2885_s15 + $0x50] sm:$0xff] (%p47_p3)  ;;  %s2893_s16 = scalar_lea.vmem (%p47_p3), [#allocation3], %s2484_s12 }
  0x12   : > { %v275_v3 = vld [vmem:[%s2885_s15 + $0x58] sm:$0xff] (%p47_p3)  ;;  %v277_v4 = vld [vmem:[%s2885_s15 + $0xa0] sm:$0xff] (%p47_p3)  ;;  %v279_v5 = vld [vmem:[%s2885_s15 + $0xa8] sm:$0xff] (%p47_p3)  ;;  %270 = vst [vmem:[%s2893_s16] sm:$0xff] (%p47_p3), %v269_v0 }
  0x13   : > { %272 = vst [vmem:[%s2893_s16 + $0x8] sm:$0xff] (%p47_p3), %v271_v1  ;;  %274 = vst [vmem:[%s2893_s16 + $0x10] sm:$0xff] (%p47_p3), %v273_v2  ;;  %v281_v6 = vld [vmem:[%s2885_s15 + $0xf0] sm:$0xff] (%p47_p3)  ;;  %v283_v7 = vld [vmem:[%s2885_s15 + $0xf8] sm:$0xff] (%p47_p3) }
  0x14   : > { %276 = vst [vmem:[%s2893_s16 + $0x18] sm:$0xff] (%p47_p3), %v275_v3  ;;  %278 = vst [vmem:[%s2893_s16 + $0x20] sm:$0xff] (%p47_p3), %v277_v4  ;;  %v285_v8 = vld [vmem:[%s2885_s15 + $0x140] sm:$0xff] (%p47_p3)  ;;  %v287_v9 = vld [vmem:[%s2885_s15 + $0x148] sm:$0xff] (%p47_p3) }
  0x15   : > { %280 = vst [vmem:[%s2893_s16 + $0x28] sm:$0xff] %v279_v5  ;;  %282 = vst [vmem:[%s2893_s16 + $0x30] sm:$0xff] %v281_v6  ;;  %v289_v10 = vld [vmem:[%s2885_s15 + $0x190] sm:$0xff]  ;;  %v291_v11 = vld [vmem:[%s2885_s15 + $0x198] sm:$0xff] }
  0x16   : > { %284 = vst [vmem:[%s2893_s16 + $0x38] sm:$0xff] %v283_v7  ;;  %286 = vst [vmem:[%s2893_s16 + $0x40] sm:$0xff] %v285_v8  ;;  %v293_v12 = vld [vmem:[%s2885_s15 + $0x1e0] sm:$0xff]  ;;  %v295_v13 = vld [vmem:[%s2885_s15 + $0x1e8] sm:$0xff] }
  0x17   : > { %288 = vst [vmem:[%s2893_s16 + $0x48] sm:$0xff] %v287_v9  ;;  %290 = vst [vmem:[%s2893_s16 + $0x50] sm:$0xff] %v289_v10  ;;  %v297_v14 = vld [vmem:[%s2885_s15 + $0x230] sm:$0xff]  ;;  %v299_v15 = vld [vmem:[%s2885_s15 + $0x238] sm:$0xff] }
  0x18   : > { %292 = vst [vmem:[%s2893_s16 + $0x58] sm:$0xff] %v291_v11  ;;  %294 = vst [vmem:[%s2893_s16 + $0x60] sm:$0xff] %v293_v12  ;;  %v301_v16 = vld [vmem:[%s2885_s15 + $0x280] sm:$0xff]  ;;  %v303_v17 = vld [vmem:[%s2885_s15 + $0x288] sm:$0xff] }
  0x19   : > { %296 = vst [vmem:[%s2893_s16 + $0x68] sm:$0xff] %v295_v13  ;;  %298 = vst [vmem:[%s2893_s16 + $0x70] sm:$0xff] %v297_v14  ;;  %v305_v18 = vld [vmem:[%s2885_s15 + $0x2d0] sm:$0xff]  ;;  %v307_v19 = vld [vmem:[%s2885_s15 + $0x2d8] sm:$0xff] }
  0x1a   : > { %300 = vst [vmem:[%s2893_s16 + $0x78] sm:$0xff] %v299_v15  ;;  %302 = vst [vmem:[%s2893_s16 + $0x80] sm:$0xff] %v301_v16  ;;  %v309_v20 = vld [vmem:[%s2885_s15 + $0x320] sm:$0xff]  ;;  %v311_v21 = vld [vmem:[%s2885_s15 + $0x328] sm:$0xff] }
  0x1b   : > { %304 = vst [vmem:[%s2893_s16 + $0x88] sm:$0xff] %v303_v17  ;;  %306 = vst [vmem:[%s2893_s16 + $0x90] sm:$0xff] %v305_v18  ;;  %v313_v22 = vld [vmem:[%s2885_s15 + $0x370] sm:$0xff]  ;;  %v315_v23 = vld [vmem:[%s2885_s15 + $0x378] sm:$0xff] }
  0x1c   : > { %308 = vst [vmem:[%s2893_s16 + $0x98] sm:$0xff] %v307_v19  ;;  %310 = vst [vmem:[%s2893_s16 + $0xa0] sm:$0xff] %v309_v20  ;;  %v317_v24 = vld [vmem:[%s2885_s15 + $0x3c0] sm:$0xff]  ;;  %v319_v25 = vld [vmem:[%s2885_s15 + $0x3c8] sm:$0xff] }
  0x1d   : > { %312 = vst [vmem:[%s2893_s16 + $0xa8] sm:$0xff] %v311_v21  ;;  %314 = vst [vmem:[%s2893_s16 + $0xb0] sm:$0xff] %v313_v22  ;;  %v321_v26 = vld [vmem:[%s2885_s15 + $0x410] sm:$0xff]  ;;  %v323_v27 = vld [vmem:[%s2885_s15 + $0x418] sm:$0xff] }
  0x1e   : > { %316 = vst [vmem:[%s2893_s16 + $0xb8] sm:$0xff] %v315_v23  ;;  %318 = vst [vmem:[%s2893_s16 + $0xc0] sm:$0xff] %v317_v24 }
  0x1f   : > { %320 = vst [vmem:[%s2893_s16 + $0xc8] sm:$0xff] %v319_v25  ;;  %322 = vst [vmem:[%s2893_s16 + $0xd0] sm:$0xff] %v321_v26 }
  0x20   : > { %324 = vst [vmem:[%s2893_s16 + $0xd8] sm:$0xff] %v323_v27 }
  0x21 PF: > { %p2260_p6 = scmp.ge.s32.totalorder %s2799_s28, 1  ;;  %p339_p7 = scmp.lt.s32.totalorder %s2799_s28, 6 }
  0x23   : > { %p340_p8 = pnand %p2260_p6, %p339_p7 }
  0x24   : > { %s346_s17 = sand.u32 (!%p340_p8), 1, %s2783_s24   ;;  %s2261_s18 = sshll.u32 (!%p340_p8), %s2791_s26, 6 }
  0x25   : > { %343 = sbr.rel (%p340_p8) target bundleno = 924 (0x39c), region = 67  ;;  %p387_p9 = scmp.lt.s32.totalorder (!%p340_p8), %s2261_s18, 319 }
  0x26   : > { %s2485_s19 = smul.u32 (!%p340_p8), 224, %s346_s17  ;;  %p2264_p10 = scmp.ne.s32.totalorder (!%p340_p8), %s2791_s26, 0 }
  0x28   : > { %s2954_s30 = scalar_lea.vmem (!%p340_p8), [#allocation3], %s2485_s19 }
  0x2c   : > { %s3429_s18 = smov (!%p387_p9, %s2261_s18), 319  ;;  %403 = sbr.rel (%p2264_p10) target bundleno = 60 (0x3c), region = 75 }
  0x2d   : > { %s2441_s20 = sshll.u32 %s3429_s18, 3  ;;  %v2801_v28 = vmov (!%p2264_p10), 0.0  }
  0x2e   : > { %s2952_s23 = scalar_lea.vmem %s3415_s1, %s2441_s20  ;;  %404 = vst [vmem:[#allocation2] sm:$0xff] (!%p2264_p10), %v2801_v28  ;;  %405 = vst [vmem:[#allocation2 + $0x8] sm:$0xff] (!%p2264_p10), %v2801_v28 }
  0x2f   : > { %406 = vst [vmem:[#allocation2 + $0x10] sm:$0xff] (!%p2264_p10), %v2801_v28  ;;  %407 = vst [vmem:[#allocation2 + $0x18] sm:$0xff] (!%p2264_p10), %v2801_v28 }
  0x30   : > { %408 = vst [vmem:[#allocation2 + $0x20] sm:$0xff] (!%p2264_p10), %v2801_v28  ;;  %409 = vst [vmem:[#allocation2 + $0x28] sm:$0xff] (!%p2264_p10), %v2801_v28 }
  0x31   : > { %410 = vst [vmem:[#allocation2 + $0x30] sm:$0xff] (!%p2264_p10), %v2801_v28  ;;  %411 = vst [vmem:[#allocation2 + $0x38] sm:$0xff] (!%p2264_p10), %v2801_v28 }
  0x32   : > { %412 = vst [vmem:[#allocation2 + $0x40] sm:$0xff] (!%p2264_p10), %v2801_v28  ;;  %413 = vst [vmem:[#allocation2 + $0x48] sm:$0xff] (!%p2264_p10), %v2801_v28 }
  0x33   : > { %414 = vst [vmem:[#allocation2 + $0x50] sm:$0xff] %v2801_v28  ;;  %415 = vst [vmem:[#allocation2 + $0x58] sm:$0xff] %v2801_v28 }
  0x34   : > { %416 = vst [vmem:[#allocation2 + $0x60] sm:$0xff] %v2801_v28  ;;  %417 = vst [vmem:[#allocation2 + $0x68] sm:$0xff] %v2801_v28 }
  0x35   : > { %418 = vst [vmem:[#allocation2 + $0x70] sm:$0xff] %v2801_v28  ;;  %419 = vst [vmem:[#allocation2 + $0x78] sm:$0xff] %v2801_v28 }
  0x36   : > { %420 = vst [vmem:[#allocation2 + $0x80] sm:$0xff] %v2801_v28  ;;  %421 = vst [vmem:[#allocation2 + $0x88] sm:$0xff] %v2801_v28 }
  0x37   : > { %422 = vst [vmem:[#allocation2 + $0x90] sm:$0xff] %v2801_v28  ;;  %423 = vst [vmem:[#allocation2 + $0x98] sm:$0xff] %v2801_v28 }
  0x38   : > { %424 = vst [vmem:[#allocation2 + $0xa0] sm:$0xff] %v2801_v28  ;;  %425 = vst [vmem:[#allocation2 + $0xa8] sm:$0xff] %v2801_v28 }
  0x39   : > { %426 = vst [vmem:[#allocation2 + $0xb0] sm:$0xff] %v2801_v28  ;;  %427 = vst [vmem:[#allocation2 + $0xb8] sm:$0xff] %v2801_v28 }
  0x3a   : > { %428 = vst [vmem:[#allocation2 + $0xc0] sm:$0xff] %v2801_v28  ;;  %429 = vst [vmem:[#allocation2 + $0xc8] sm:$0xff] %v2801_v28 }
  0x3b   : > { %430 = vst [vmem:[#allocation2 + $0xd0] sm:$0xff] %v2801_v28  ;;  %431 = vst [vmem:[#allocation2 + $0xd8] sm:$0xff] %v2801_v28 }
  0x3c PF: > { %v2527_v29 = vld [vmem:[%s2952_s23 + $0x4] ss:$8 sps:$4 sm:$0xff]   ;;  %v2531_v31 = vld [vmem:[%s2952_s23] ss:$8 sps:$4 sm:$0xff]   ;;  %v2533_v33 = vld [vmem:[%s2952_s23 + $0x14] ss:$8 sps:$4 sm:$0xff]  }
  0x3d   : > { %v2529_v30 = vld [vmem:[%s2952_s23 + $0x104] ss:$8 sps:$4 sm:$0xff]   ;;  %1012 = vmatprep.subr.bf16.mxu1 %v2527_v29  ;;  %v2532_v32 = vld [vmem:[%s2952_s23 + $0x100] ss:$8 sps:$4 sm:$0xff]   ;;  %v2535_v34 = vld [vmem:[%s2952_s23 + $0x114] ss:$8 sps:$4 sm:$0xff]  }
  0x3e   : > { %1115 = vmatprep.subr.bf16.mxu0 %v2529_v30  ;;  %1013 = vmatpush1.bf16.msra.mxu1 %v2531_v31  ;;  %v2537_v35 = vld [vmem:[%s2952_s23 + $0x10] ss:$8 sps:$4 sm:$0xff]   ;;  %v2539_v37 = vld [vmem:[%s2952_s23 + $0x24] ss:$8 sps:$4 sm:$0xff]   ;;  %v2543_v39 = vld [vmem:[%s2952_s23 + $0x20] ss:$8 sps:$4 sm:$0xff]  }
  0x3f   : > { %1116 = vmatpush1.bf16.msra.mxu0 %v2532_v32  ;;  %1014 = vmatprep.subr.bf16.mxu1 %v2533_v33  ;;  %v2538_v36 = vld [vmem:[%s2952_s23 + $0x110] ss:$8 sps:$4 sm:$0xff]   ;;  %v2541_v38 = vld [vmem:[%s2952_s23 + $0x124] ss:$8 sps:$4 sm:$0xff]   ;;  %v2544_v40 = vld [vmem:[%s2952_s23 + $0x120] ss:$8 sps:$4 sm:$0xff]  }
  0x40   : > { %1117 = vmatprep.subr.bf16.mxu0 %v2535_v34  ;;  %v2545_v41 = vld [vmem:[%s2952_s23 + $0x34] ss:$8 sps:$4 sm:$0xff]   ;;  %v2549_v43 = vld [vmem:[%s2952_s23 + $0x30] ss:$8 sps:$4 sm:$0xff]   ;;  %v2551_v45 = vld [vmem:[%s2952_s23 + $0x44] ss:$8 sps:$4 sm:$0xff]  }
  0x41   : > { %v2547_v42 = vld [vmem:[%s2952_s23 + $0x134] ss:$8 sps:$4 sm:$0xff]   ;;  %v2550_v44 = vld [vmem:[%s2952_s23 + $0x130] ss:$8 sps:$4 sm:$0xff]   ;;  %v2553_v46 = vld [vmem:[%s2952_s23 + $0x144] ss:$8 sps:$4 sm:$0xff]  }
  0x42   : > { %1015 = vmatpush1.bf16.msra.mxu1 %v2537_v35  ;;  %v2555_v47 = vld [vmem:[%s2952_s23 + $0x40] ss:$8 sps:$4 sm:$0xff]   ;;  %v2557_v49 = vld [vmem:[%s2952_s23 + $0x54] ss:$8 sps:$4 sm:$0xff]   ;;  %v2561_v51 = vld [vmem:[%s2952_s23 + $0x50] ss:$8 sps:$4 sm:$0xff]  }
  0x43   : > { %1118 = vmatpush1.bf16.msra.mxu0 %v2538_v36  ;;  %1016 = vmatprep.subr.bf16.mxu1 %v2539_v37  ;;  %v2556_v48 = vld [vmem:[%s2952_s23 + $0x140] ss:$8 sps:$4 sm:$0xff]   ;;  %v2559_v50 = vld [vmem:[%s2952_s23 + $0x154] ss:$8 sps:$4 sm:$0xff]   ;;  %v2562_v52 = vld [vmem:[%s2952_s23 + $0x150] ss:$8 sps:$4 sm:$0xff]  }
  0x44   : > { %1119 = vmatprep.subr.bf16.mxu0 %v2541_v38  ;;  %v2563_v53 = vld [vmem:[%s2952_s23 + $0x64] ss:$8 sps:$4 sm:$0xff]   ;;  %v2567_v55 = vld [vmem:[%s2952_s23 + $0x60] ss:$8 sps:$4 sm:$0xff]   ;;  %v2569_v57 = vld [vmem:[%s2952_s23 + $0x74] ss:$8 sps:$4 sm:$0xff]  }
  0x45   : > { %v2565_v54 = vld [vmem:[%s2952_s23 + $0x164] ss:$8 sps:$4 sm:$0xff]   ;;  %v2568_v56 = vld [vmem:[%s2952_s23 + $0x160] ss:$8 sps:$4 sm:$0xff]   ;;  %v2571_v58 = vld [vmem:[%s2952_s23 + $0x174] ss:$8 sps:$4 sm:$0xff]  }
  0x46   : > { %1017 = vmatpush1.bf16.msra.mxu1 %v2543_v39  ;;  %v2573_v59 = vld [vmem:[%s2952_s23 + $0x70] ss:$8 sps:$4 sm:$0xff]   ;;  %v2575_v61 = vld [vmem:[%s2952_s23 + $0x84] ss:$8 sps:$4 sm:$0xff]   ;;  %v2579_v63 = vld [vmem:[%s2952_s23 + $0x80] ss:$8 sps:$4 sm:$0xff]  }
  0x47   : > { %1120 = vmatpush1.bf16.msra.mxu0 %v2544_v40  ;;  %1018 = vmatprep.subr.bf16.mxu1 %v2545_v41  ;;  %v2574_v60 = vld [vmem:[%s2952_s23 + $0x170] ss:$8 sps:$4 sm:$0xff]   ;;  %v2577_v62 = vld [vmem:[%s2952_s23 + $0x184] ss:$8 sps:$4 sm:$0xff]   ;;  %v2580_v0 = vld [vmem:[%s2952_s23 + $0x180] ss:$8 sps:$4 sm:$0xff]  }
  0x48   : > { %1121 = vmatprep.subr.bf16.mxu0 %v2547_v42  ;;  %v2581_v1 = vld [vmem:[%s2952_s23 + $0x94] ss:$8 sps:$4 sm:$0xff]   ;;  %v2585_v3 = vld [vmem:[%s2952_s23 + $0x90] ss:$8 sps:$4 sm:$0xff]   ;;  %v2587_v5 = vld [vmem:[%s2952_s23 + $0xa4] ss:$8 sps:$4 sm:$0xff]  }
  0x49   : > { %v2583_v2 = vld [vmem:[%s2952_s23 + $0x194] ss:$8 sps:$4 sm:$0xff]   ;;  %v2586_v4 = vld [vmem:[%s2952_s23 + $0x190] ss:$8 sps:$4 sm:$0xff]   ;;  %v2589_v6 = vld [vmem:[%s2952_s23 + $0x1a4] ss:$8 sps:$4 sm:$0xff]  }
  0x4a   : > { %1019 = vmatpush1.bf16.msra.mxu1 %v2549_v43  ;;  %v2591_v7 = vld [vmem:[%s2952_s23 + $0xa0] ss:$8 sps:$4 sm:$0xff]   ;;  %v2593_v9 = vld [vmem:[%s2952_s23 + $0xb4] ss:$8 sps:$4 sm:$0xff]   ;;  %v2597_v11 = vld [vmem:[%s2952_s23 + $0xb0] ss:$8 sps:$4 sm:$0xff]  }
  0x4b   : > { %1122 = vmatpush1.bf16.msra.mxu0 %v2550_v44  ;;  %1020 = vmatprep.subr.bf16.mxu1 %v2551_v45  ;;  %v2592_v8 = vld [vmem:[%s2952_s23 + $0x1a0] ss:$8 sps:$4 sm:$0xff]   ;;  %v2595_v10 = vld [vmem:[%s2952_s23 + $0x1b4] ss:$8 sps:$4 sm:$0xff]   ;;  %v2598_v12 = vld [vmem:[%s2952_s23 + $0x1b0] ss:$8 sps:$4 sm:$0xff]  }
  0x4c   : > { %1123 = vmatprep.subr.bf16.mxu0 %v2553_v46  ;;  %v2599_v13 = vld [vmem:[%s2952_s23 + $0xc4] ss:$8 sps:$4 sm:$0xff]   ;;  %v2603_v17 = vld [vmem:[%s2952_s23 + $0xc0] ss:$8 sps:$4 sm:$0xff]   ;;  %v2605_v19 = vld [vmem:[%s2952_s23 + $0xd4] ss:$8 sps:$4 sm:$0xff]  }
  0x4d   : > { %v2625_v14 = vld [vmem:[%s2954_s30 + $0x4] ss:$16 sps:$4 sm:$0xff]   ;;  %v2628_v16 = vld [vmem:[%s2954_s30 + $0xc] ss:$16 sps:$4 sm:$0xff]   ;;  %v2604_v18 = vld [vmem:[%s2952_s23 + $0x1c0] ss:$8 sps:$4 sm:$0xff]  }
  0x4e   : > { %1021 = vmatpush1.bf16.msra.mxu1 %v2555_v47  ;;  %v2601_v15 = vld [vmem:[%s2952_s23 + $0x1c4] ss:$8 sps:$4 sm:$0xff]   ;;  %1044 = vmatprep.mubr.bf16.mxu1 %v2625_v14  ;;  %v2607_v20 = vld [vmem:[%s2952_s23 + $0x1d4] ss:$8 sps:$4 sm:$0xff]   ;;  %v2609_v21 = vld [vmem:[%s2952_s23 + $0xd0] ss:$8 sps:$4 sm:$0xff]  }
  0x4f   : > { %1124 = vmatpush1.bf16.msra.mxu0 %v2556_v48  ;;  %1022 = vmatprep.subr.bf16.mxu1 %v2557_v49  ;;  %v2610_v22 = vld [vmem:[%s2952_s23 + $0x1d0] ss:$8 sps:$4 sm:$0xff]   ;;  %v2611_v23 = vld [vmem:[%s2952_s23 + $0xe4] ss:$8 sps:$4 sm:$0xff]   ;;  %v2615_v25 = vld [vmem:[%s2952_s23 + $0xe0] ss:$8 sps:$4 sm:$0xff]  }
  0x50   : > { %1125 = vmatprep.subr.bf16.mxu0 %v2559_v50  ;;  %1147 = vmatprep.mubr.bf16.mxu0 %v2628_v16  ;;  %v2613_v24 = vld [vmem:[%s2952_s23 + $0x1e4] ss:$8 sps:$4 sm:$0xff]   ;;  %v2616_v26 = vld [vmem:[%s2952_s23 + $0x1e0] ss:$8 sps:$4 sm:$0xff]   ;;  %v2617_v27 = vld [vmem:[%s2952_s23 + $0xf4] ss:$8 sps:$4 sm:$0xff]  }
  0x51   : > { %v2619_v28 = vld [vmem:[%s2952_s23 + $0x1f4] ss:$8 sps:$4 sm:$0xff]   ;;  %v2621_v29 = vld [vmem:[%s2952_s23 + $0xf0] ss:$8 sps:$4 sm:$0xff]   ;;  %v436_v14 = vld [vmem:[#allocation2 + $0x20] sm:$0xff]  ;;  %p2357_p11 = scmp.ne.s32.totalorder %s2791_s26, 4 }
  0x52   : > { %1023 = vmatpush1.bf16.msra.mxu1 %v2561_v51  ;;  %v2622_v30 = vld [vmem:[%s2952_s23 + $0x1f0] ss:$8 sps:$4 sm:$0xff]   ;;  %v2629_v33 = vld [vmem:[%s2954_s30 + $0x24] ss:$16 sps:$4 sm:$0xff]   ;;  %v2631_v34 = vld [vmem:[%s2954_s30 + $0x2c] ss:$16 sps:$4 sm:$0xff]  }
  0x53   : > { %1126 = vmatpush1.bf16.msra.mxu0 %v2562_v52  ;;  %1024 = vmatprep.subr.bf16.mxu1 %v2563_v53  ;;  %v2623_v31 = vld [vmem:[%s2954_s30] ss:$16 sps:$4 sm:$0xff]   ;;  %v2626_v32 = vld [vmem:[%s2954_s30 + $0x8] ss:$16 sps:$4 sm:$0xff]   ;;  %v2635_v37 = vld [vmem:[%s2954_s30 + $0x44] ss:$16 sps:$4 sm:$0xff]  }
  0x54   : > { %1127 = vmatprep.subr.bf16.mxu0 %v2565_v54  ;;  %v2633_v35 = vld [vmem:[%s2954_s30 + $0x20] ss:$16 sps:$4 sm:$0xff]   ;;  %v2634_v36 = vld [vmem:[%s2954_s30 + $0x28] ss:$16 sps:$4 sm:$0xff]   ;;  %v2637_v38 = vld [vmem:[%s2954_s30 + $0x4c] ss:$16 sps:$4 sm:$0xff]  }
  0x55   : > { %v2639_v39 = vld [vmem:[%s2954_s30 + $0x40] ss:$16 sps:$4 sm:$0xff]   ;;  %v2640_v40 = vld [vmem:[%s2954_s30 + $0x48] ss:$16 sps:$4 sm:$0xff]   ;;  %v2641_v41 = vld [vmem:[%s2954_s30 + $0x64] ss:$16 sps:$4 sm:$0xff]  }
  0x56   : > { %1025 = vmatpush1.bf16.msra.mxu1 %v2567_v55  ;;  %v2643_v42 = vld [vmem:[%s2954_s30 + $0x6c] ss:$16 sps:$4 sm:$0xff]   ;;  %v2645_v43 = vld [vmem:[%s2954_s30 + $0x60] ss:$16 sps:$4 sm:$0xff]   ;;  %v2646_v44 = vld [vmem:[%s2954_s30 + $0x68] ss:$16 sps:$4 sm:$0xff]  }
  0x57   : > { %1128 = vmatpush1.bf16.msra.mxu0 %v2568_v56  ;;  %1026 = vmatprep.subr.bf16.mxu1 %v2569_v57  ;;  %v2647_v45 = vld [vmem:[%s2954_s30 + $0x84] ss:$16 sps:$4 sm:$0xff]   ;;  %v2649_v46 = vld [vmem:[%s2954_s30 + $0x8c] ss:$16 sps:$4 sm:$0xff]   ;;  %v2651_v47 = vld [vmem:[%s2954_s30 + $0x80] ss:$16 sps:$4 sm:$0xff]  }
  0x58   : > { %1129 = vmatprep.subr.bf16.mxu0 %v2571_v58  ;;  %v2652_v48 = vld [vmem:[%s2954_s30 + $0x88] ss:$16 sps:$4 sm:$0xff]   ;;  %v2653_v49 = vld [vmem:[%s2954_s30 + $0xa4] ss:$16 sps:$4 sm:$0xff]   ;;  %v2655_v50 = vld [vmem:[%s2954_s30 + $0xac] ss:$16 sps:$4 sm:$0xff]  }
  0x59   : > { %v2657_v51 = vld [vmem:[%s2954_s30 + $0xa0] ss:$16 sps:$4 sm:$0xff]   ;;  %v2658_v52 = vld [vmem:[%s2954_s30 + $0xa8] ss:$16 sps:$4 sm:$0xff]   ;;  %v2659_v53 = vld [vmem:[%s2954_s30 + $0xc4] ss:$16 sps:$4 sm:$0xff]  }
  0x5a   : > { %1027 = vmatpush1.bf16.msra.mxu1 %v2573_v59  ;;  %v2661_v54 = vld [vmem:[%s2954_s30 + $0xcc] ss:$16 sps:$4 sm:$0xff]   ;;  %v2663_v55 = vld [vmem:[%s2954_s30 + $0xc0] ss:$16 sps:$4 sm:$0xff]   ;;  %v2664_v56 = vld [vmem:[%s2954_s30 + $0xc8] ss:$16 sps:$4 sm:$0xff]  }
  0x5b   : > { %1130 = vmatpush1.bf16.msra.mxu0 %v2574_v60  ;;  %1028 = vmatprep.subr.bf16.mxu1 %v2575_v61  ;;  %v432_v58 = vld [vmem:[#allocation2] sm:$0xff] }
  0x5c   : > { %1131 = vmatprep.subr.bf16.mxu0 %v2577_v62  ;;  %v433_v62 = vld [vmem:[#allocation2 + $0x8] sm:$0xff] }
  0x5e   : > { %1029 = vmatpush1.bf16.msra.mxu1 %v2579_v63 }
  0x5f   : > { %1132 = vmatpush1.bf16.msra.mxu0 %v2580_v0  ;;  %1030 = vmatprep.subr.bf16.mxu1 %v2581_v1 }
  0x60   : > { %1133 = vmatprep.subr.bf16.mxu0 %v2583_v2  ;;  %v434_v2 = vld [vmem:[#allocation2 + $0x10] sm:$0xff] }
  0x62   : > { %1031 = vmatpush1.bf16.msra.mxu1 %v2585_v3 }
  0x63   : > { %1134 = vmatpush1.bf16.msra.mxu0 %v2586_v4  ;;  %1032 = vmatprep.subr.bf16.mxu1 %v2587_v5 }
  0x64   : > { %1135 = vmatprep.subr.bf16.mxu0 %v2589_v6 }
  0x66   : > { %1033 = vmatpush1.bf16.msra.mxu1 %v2591_v7  ;;  %v435_v7 = vld [vmem:[#allocation2 + $0x18] sm:$0xff] }
  0x67   : > { %1136 = vmatpush1.bf16.msra.mxu0 %v2592_v8  ;;  %1034 = vmatprep.subr.bf16.mxu1 %v2593_v9 }
  0x68   : > { %1137 = vmatprep.subr.bf16.mxu0 %v2595_v10 }
  0x6a   : > { %1035 = vmatpush1.bf16.msra.mxu1 %v2597_v11 }
  0x6b   : > { %1138 = vmatpush1.bf16.msra.mxu0 %v2598_v12  ;;  %1036 = vmatprep.subr.bf16.mxu1 %v2599_v13 }
  0x6c   : > { %1139 = vmatprep.subr.bf16.mxu0 %v2601_v15 }
  0x6e   : > { %1037 = vmatpush1.bf16.msra.mxu1 %v2603_v17 }
  0x6f   : > { %1140 = vmatpush1.bf16.msra.mxu0 %v2604_v18  ;;  %1038 = vmatprep.subr.bf16.mxu1 %v2605_v19  ;;  %v437_v18 = vld [vmem:[#allocation2 + $0x28] sm:$0xff] }
  0x70   : > { %1141 = vmatprep.subr.bf16.mxu0 %v2607_v20 }
  0x72   : > { %1039 = vmatpush1.bf16.msra.mxu1 %v2609_v21 }
  0x73   : > { %1142 = vmatpush1.bf16.msra.mxu0 %v2610_v22  ;;  %1040 = vmatprep.subr.bf16.mxu1 %v2611_v23  ;;  %v438_v22 = vld [vmem:[#allocation2 + $0x30] sm:$0xff] }
  0x74   : > { %1143 = vmatprep.subr.bf16.mxu0 %v2613_v24 }
  0x76   : > { %1041 = vmatpush1.bf16.msra.mxu1 %v2615_v25 }
  0x77   : > { %1144 = vmatpush1.bf16.msra.mxu0 %v2616_v26  ;;  %1042 = vmatprep.subr.bf16.mxu1 %v2617_v27  ;;  %v439_v27 = vld [vmem:[#allocation2 + $0x38] sm:$0xff] }
  0x78   : > { %1145 = vmatprep.subr.bf16.mxu0 %v2619_v28 }
  0x7a   : > { %1043 = vmatpush1.bf16.msra.mxu1 %v2621_v29 }
  0x7b   : > { %1146 = vmatpush1.bf16.msra.mxu0 %v2622_v30 }
  0x7d   : > { %1045 = vmatmul.mubr.bf16.vlgmr.msra.gmra.mrb[0].mxu1 %v2623_v31 }
  0x7e   : > { %1148 = vmatmul.mubr.bf16.vlgmr.msra.gmra.mrb[0].mxu0 %v2626_v32  ;;  %1054 = vmatprep.mubr.bf16.mxu1 %v2629_v33 }
  0x7f   : > { %1157 = vmatprep.mubr.bf16.mxu0 %v2631_v34  ;;  %v440_v34 = vld [vmem:[#allocation2 + $0x40] sm:$0xff] }
  0x85   : > { %1055 = vmatmul.mubr.bf16.gmra.mrb[4].mxu1 %v2633_v35 }
  0x86   : > { %1158 = vmatmul.mubr.bf16.gmra.mrb[4].mxu0 %v2634_v36  ;;  %1064 = vmatprep.mubr.bf16.mxu1 %v2635_v37 }
  0x87   : > { %1167 = vmatprep.mubr.bf16.mxu0 %v2637_v38  ;;  %v441_v38 = vld [vmem:[#allocation2 + $0x48] sm:$0xff] }
  0x8d   : > { %1065 = vmatmul.mubr.bf16.gmra.mrb[8].mxu1 %v2639_v39 }
  0x8e   : > { %1168 = vmatmul.mubr.bf16.gmra.mrb[8].mxu0 %v2640_v40  ;;  %1074 = vmatprep.mubr.bf16.mxu1 %v2641_v41 }
  0x8f   : > { %1177 = vmatprep.mubr.bf16.mxu0 %v2643_v42  ;;  %v442_v42 = vld [vmem:[#allocation2 + $0x50] sm:$0xff] }
  0x95   : > { %1075 = vmatmul.mubr.bf16.gmra.mrb[12].mxu1 %v2645_v43 }
  0x96   : > { %1178 = vmatmul.mubr.bf16.gmra.mrb[12].mxu0 %v2646_v44  ;;  %1084 = vmatprep.mubr.bf16.mxu1 %v2647_v45 }
  0x97   : > { %1187 = vmatprep.mubr.bf16.mxu0 %v2649_v46 }
  0x9d   : > { %1085 = vmatmul.mubr.bf16.gmra.mrb[16].mxu1 %v2651_v47  ;;  %v443_v47 = vld [vmem:[#allocation2 + $0x58] sm:$0xff] }
  0x9e   : > { %1188 = vmatmul.mubr.bf16.gmra.mrb[16].mxu0 %v2652_v48  ;;  %1094 = vmatprep.mubr.bf16.mxu1 %v2653_v49 }
  0x9f   : > { %1197 = vmatprep.mubr.bf16.mxu0 %v2655_v50 }
  0xa5   : > { %1095 = vmatmul.mubr.bf16.gmra.mrb[20].mxu1 %v2657_v51 }
  0xa6   : > { %1198 = vmatmul.mubr.bf16.gmra.mrb[20].mxu0 %v2658_v52  ;;  %1104 = vmatprep.mubr.bf16.mxu1 %v2659_v53 }
  0xa7   : > { %1207 = vmatprep.mubr.bf16.mxu0 %v2661_v54  ;;  %v444_v54 = vld [vmem:[#allocation2 + $0x60] sm:$0xff] }
  0xad   : > { %1105 = vmatmul.mubr.bf16.gmra.mrb[24].mxu1 %v2663_v55 }
  0xae   : > { %1208 = vmatmul.mubr.bf16.gmra.mrb[24].mxu0 %v2664_v56 }
 0x150   : > { %v1046_v57 = vpop.f32.mrb[0].mxu1 }
 0x151   : > { %v1149_v59 = vpop.f32.mrb[0].mxu0  ;;  %v1048_v61 = vpop.f32.mrb[1].mxu1 }
 0x152   : > { %v1150_v60 = vadd.f32 %v1149_v59, %v1046_v57  ;;  %v1151_v63 = vpop.f32.mrb[1].mxu0  ;;  %v1050_v1 = vpop.f32.mrb[2].mxu1 }
 0x153   : > { %v1152_v0 = vadd.f32 %v1151_v63, %v1048_v61  ;;  %v1153_v3 = vpop.f32.mrb[2].mxu0  ;;  %v1052_v6 = vpop.f32.mrb[3].mxu1 }
 0x154   : > { %v1218_v4 = vadd.f32 %v1150_v60, %v432_v58  ;;  %v1154_v5 = vadd.f32 %v1153_v3, %v1050_v1  ;;  %v1155_v8 = vpop.f32.mrb[3].mxu0  ;;  %v445_v58 = vld [vmem:[#allocation2 + $0x68] sm:$0xff]  ;;  %v447_v3 = vld [vmem:[#allocation2 + $0x78] sm:$0xff] }
 0x155   : > { %v1219_v9 = vadd.f32 %v1152_v0, %v433_v62  ;;  %v1156_v10 = vadd.f32 %v1155_v8, %v1052_v6  ;;  %v446_v62 = vld [vmem:[#allocation2 + $0x70] sm:$0xff] }
 0x156   : > { %1246 = vst [vmem:[#allocation2] sm:$0xff] %v1218_v4  ;;  %v1220_v11 = vadd.f32 %v1154_v5, %v434_v2 }
 0x157   : > { %1247 = vst [vmem:[#allocation2 + $0x8] sm:$0xff] %v1219_v9  ;;  %v1221_v12 = vadd.f32 %v1156_v10, %v435_v7  ;;  %v448_v10 = vld [vmem:[#allocation2 + $0x80] sm:$0xff] }
 0x158   : > { %1248 = vst [vmem:[#allocation2 + $0x10] sm:$0xff] %v1220_v11  ;;  %v1056_v13 = vpop.f32.mrb[4].mxu1 }
 0x159   : > { %1249 = vst [vmem:[#allocation2 + $0x18] sm:$0xff] %v1221_v12  ;;  %v1159_v15 = vpop.f32.mrb[4].mxu0  ;;  %v1058_v17 = vpop.f32.mrb[5].mxu1 }
 0x15a   : > { %v1160_v16 = vadd.f32 %v1159_v15, %v1056_v13  ;;  %v1161_v19 = vpop.f32.mrb[5].mxu0  ;;  %v1060_v21 = vpop.f32.mrb[6].mxu1 }
 0x15b   : > { %v1162_v20 = vadd.f32 %v1161_v19, %v1058_v17  ;;  %v1163_v23 = vpop.f32.mrb[6].mxu0  ;;  %v1062_v26 = vpop.f32.mrb[7].mxu1 }
 0x15c   : > { %v1222_v24 = vadd.f32 %v1160_v16, %v436_v14  ;;  %v1164_v25 = vadd.f32 %v1163_v23, %v1060_v21  ;;  %v1165_v28 = vpop.f32.mrb[7].mxu0  ;;  %v449_v14 = vld [vmem:[#allocation2 + $0x88] sm:$0xff]  ;;  %v451_v23 = vld [vmem:[#allocation2 + $0x98] sm:$0xff] }
 0x15d   : > { %v1223_v29 = vadd.f32 %v1162_v20, %v437_v18  ;;  %v1166_v30 = vadd.f32 %v1165_v28, %v1062_v26  ;;  %v450_v18 = vld [vmem:[#allocation2 + $0x90] sm:$0xff] }
 0x15e   : > { %1250 = vst [vmem:[#allocation2 + $0x20] sm:$0xff] %v1222_v24  ;;  %v1224_v31 = vadd.f32 %v1164_v25, %v438_v22 }
 0x15f   : > { %1251 = vst [vmem:[#allocation2 + $0x28] sm:$0xff] %v1223_v29  ;;  %v1225_v32 = vadd.f32 %v1166_v30, %v439_v27  ;;  %v452_v30 = vld [vmem:[#allocation2 + $0xa0] sm:$0xff] }
 0x160   : > { %1252 = vst [vmem:[#allocation2 + $0x30] sm:$0xff] %v1224_v31  ;;  %v1066_v33 = vpop.f32.mrb[8].mxu1 }
 0x161   : > { %1253 = vst [vmem:[#allocation2 + $0x38] sm:$0xff] %v1225_v32  ;;  %v1169_v35 = vpop.f32.mrb[8].mxu0  ;;  %v1068_v37 = vpop.f32.mrb[9].mxu1 }
 0x162   : > { %v1170_v36 = vadd.f32 %v1169_v35, %v1066_v33  ;;  %v1171_v39 = vpop.f32.mrb[9].mxu0  ;;  %v1070_v41 = vpop.f32.mrb[10].mxu1 }
 0x163   : > { %v1172_v40 = vadd.f32 %v1171_v39, %v1068_v37  ;;  %v1173_v43 = vpop.f32.mrb[10].mxu0  ;;  %v1072_v46 = vpop.f32.mrb[11].mxu1 }
 0x164   : > { %v1226_v44 = vadd.f32 %v1170_v36, %v440_v34  ;;  %v1174_v45 = vadd.f32 %v1173_v43, %v1070_v41  ;;  %v1175_v48 = vpop.f32.mrb[11].mxu0  ;;  %v453_v34 = vld [vmem:[#allocation2 + $0xa8] sm:$0xff]  ;;  %v455_v43 = vld [vmem:[#allocation2 + $0xb8] sm:$0xff] }
 0x165   : > { %v1227_v49 = vadd.f32 %v1172_v40, %v441_v38  ;;  %v1176_v50 = vadd.f32 %v1175_v48, %v1072_v46  ;;  %v454_v38 = vld [vmem:[#allocation2 + $0xb0] sm:$0xff] }
 0x166   : > { %1254 = vst [vmem:[#allocation2 + $0x40] sm:$0xff] %v1226_v44  ;;  %v1228_v51 = vadd.f32 %v1174_v45, %v442_v42 }
 0x167   : > { %1255 = vst [vmem:[#allocation2 + $0x48] sm:$0xff] %v1227_v49  ;;  %v1229_v52 = vadd.f32 %v1176_v50, %v443_v47  ;;  %v456_v50 = vld [vmem:[#allocation2 + $0xc0] sm:$0xff] }
 0x168   : > { %1256 = vst [vmem:[#allocation2 + $0x50] sm:$0xff] %v1228_v51  ;;  %v1076_v53 = vpop.f32.mrb[12].mxu1 }
 0x169   : > { %1257 = vst [vmem:[#allocation2 + $0x58] sm:$0xff] %v1229_v52  ;;  %v1179_v55 = vpop.f32.mrb[12].mxu0  ;;  %v1078_v57 = vpop.f32.mrb[13].mxu1 }
 0x16a   : > { %v1180_v56 = vadd.f32 %v1179_v55, %v1076_v53  ;;  %v1181_v59 = vpop.f32.mrb[13].mxu0  ;;  %v1080_v61 = vpop.f32.mrb[14].mxu1 }
 0x16b   : > { %v1182_v60 = vadd.f32 %v1181_v59, %v1078_v57  ;;  %v1183_v63 = vpop.f32.mrb[14].mxu0  ;;  %v1082_v2 = vpop.f32.mrb[15].mxu1 }
 0x16c   : > { %v1230_v0 = vadd.f32 %v1180_v56, %v444_v54  ;;  %v1184_v1 = vadd.f32 %v1183_v63, %v1080_v61  ;;  %v1185_v4 = vpop.f32.mrb[15].mxu0  ;;  %v457_v54 = vld [vmem:[#allocation2 + $0xc8] sm:$0xff]  ;;  %v459_v63 = vld [vmem:[#allocation2 + $0xd8] sm:$0xff] }
 0x16d   : > { %v1231_v5 = vadd.f32 %v1182_v60, %v445_v58  ;;  %v1186_v6 = vadd.f32 %v1185_v4, %v1082_v2  ;;  %v458_v58 = vld [vmem:[#allocation2 + $0xd0] sm:$0xff] }
 0x16e   : > { %1258 = vst [vmem:[#allocation2 + $0x60] sm:$0xff] %v1230_v0  ;;  %v1232_v7 = vadd.f32 %v1184_v1, %v446_v62 }
 0x16f   : > { %1259 = vst [vmem:[#allocation2 + $0x68] sm:$0xff] %v1231_v5  ;;  %v1233_v8 = vadd.f32 %v1186_v6, %v447_v3  ;;  %v2665_v5 = vld [vmem:[%s3417_s3 + $0x4] ss:$8 sps:$4 sm:$0xff] (!%p2357_p11)   ;;  %v2667_v6 = vld [vmem:[%s3417_s3] ss:$8 sps:$4 sm:$0xff] (!%p2357_p11)  }
 0x170   : > { %1260 = vst [vmem:[#allocation2 + $0x70] sm:$0xff] %v1232_v7  ;;  %v1086_v9 = vpop.f32.mrb[16].mxu1  ;;  %1592 = vmatprep.subr.bf16.mxu0 (!%p2357_p11), %v2665_v5  ;;  %v2668_v7 = vld [vmem:[%s3417_s3 + $0x14] ss:$8 sps:$4 sm:$0xff] (!%p2357_p11)  }
 0x171   : > { %1261 = vst [vmem:[#allocation2 + $0x78] sm:$0xff] %v1233_v8  ;;  %v1189_v11 = vpop.f32.mrb[16].mxu0  ;;  %v1088_v13 = vpop.f32.mrb[17].mxu1  ;;  %1593 = vmatpush1.bf16.msra.mxu0 (!%p2357_p11), %v2667_v6  ;;  %v2670_v8 = vld [vmem:[%s3417_s3 + $0x10] ss:$8 sps:$4 sm:$0xff] (!%p2357_p11)  }
 0x172   : > { %v1190_v12 = vadd.f32 %v1189_v11, %v1086_v9  ;;  %v1191_v15 = vpop.f32.mrb[17].mxu0  ;;  %v1090_v17 = vpop.f32.mrb[18].mxu1  ;;  %1594 = vmatprep.subr.bf16.mxu0 (!%p2357_p11), %v2668_v7  ;;  %v2671_v9 = vld [vmem:[%s3417_s3 + $0x24] ss:$8 sps:$4 sm:$0xff] (!%p2357_p11)   ;;  %v2674_v11 = vld [vmem:[%s3417_s3 + $0x34] ss:$8 sps:$4 sm:$0xff] (!%p2357_p11)  }
 0x173   : > { %v1192_v16 = vadd.f32 %v1191_v15, %v1088_v13  ;;  %v1193_v19 = vpop.f32.mrb[18].mxu0  ;;  %v1092_v22 = vpop.f32.mrb[19].mxu1  ;;  %v1308_v13 = vlaneseq (!%p2357_p11)  ;;  %v2679_v15 = vld [vmem:[%s3417_s3 + $0x40] ss:$8 sps:$4 sm:$0xff] (!%p2357_p11)   ;;  %v2710_v7 = vld [vmem:[%s3417_s3 + $0xf4] ss:$8 sps:$4 sm:$0xff] (!%p2357_p11)  }
 0x174   : > { %v1234_v20 = vadd.f32 %v1190_v12, %v448_v10  ;;  %v1194_v21 = vadd.f32 %v1193_v19, %v1090_v17  ;;  %v1195_v24 = vpop.f32.mrb[19].mxu0  ;;  %v2673_v10 = vld [vmem:[%s3417_s3 + $0x20] ss:$8 sps:$4 sm:$0xff] (!%p2357_p11)   ;;  %v2676_v12 = vld [vmem:[%s3417_s3 + $0x30] ss:$8 sps:$4 sm:$0xff] (!%p2357_p11)  }
 0x175   : > { %v1235_v25 = vadd.f32 %v1192_v16, %v449_v14  ;;  %v1196_v26 = vadd.f32 %v1195_v24, %v1092_v22  ;;  %1595 = vmatpush1.bf16.msra.mxu0 (!%p2357_p11), %v2670_v8  ;;  %v2677_v14 = vld [vmem:[%s3417_s3 + $0x44] ss:$8 sps:$4 sm:$0xff] (!%p2357_p11)   ;;  %v1309_v16 = vshrl.u32 (!%p2357_p11), %v1308_v13, 7  ;;  %v2680_v17 = vld [vmem:[%s3417_s3 + $0x54] ss:$8 sps:$4 sm:$0xff] (!%p2357_p11)  }
 0x176   : > { %1262 = vst [vmem:[#allocation2 + $0x80] sm:$0xff] %v1234_v20  ;;  %v1236_v27 = vadd.f32 %v1194_v21, %v450_v18  ;;  %1596 = vmatprep.subr.bf16.mxu0 (!%p2357_p11), %v2671_v9  ;;  %v2682_v18 = vld [vmem:[%s3417_s3 + $0x50] ss:$8 sps:$4 sm:$0xff] (!%p2357_p11)   ;;  %v2683_v20 = vld [vmem:[%s3417_s3 + $0x64] ss:$8 sps:$4 sm:$0xff] (!%p2357_p11)  }
 0x177   : > { %1263 = vst [vmem:[#allocation2 + $0x88] sm:$0xff] %v1235_v25  ;;  %v1237_v28 = vadd.f32 %v1196_v26, %v451_v23  ;;  %v3086_v19 = vsub.s32 (!%p2357_p11), 1, %v1309_v16  ;;  %v1279_v21 = vld [vmem:[#allocation2 + $0x8] sm:$0xff] (!%p2357_p11)  ;;  %v1281_v22 = vld [vmem:[#allocation2 + $0x18] sm:$0xff] (!%p2357_p11)  ;;  %v1306_v23 = vld [vmem:[%s3416_s2] sm:$0x3] (!%p2357_p11) }
 0x178   : > { %1264 = vst [vmem:[#allocation2 + $0x90] sm:$0xff] %v1236_v27  ;;  %v1096_v29 = vpop.f32.mrb[20].mxu1  ;;  %v2685_v24 = vld [vmem:[%s3417_s3 + $0x60] ss:$8 sps:$4 sm:$0xff] (!%p2357_p11)   ;;  %v2686_v26 = vld [vmem:[%s3417_s3 + $0x74] ss:$8 sps:$4 sm:$0xff] (!%p2357_p11)  }
 0x179   : > { %1265 = vst [vmem:[#allocation2 + $0x98] sm:$0xff] %v1237_v28  ;;  %v1199_v31 = vpop.f32.mrb[20].mxu0  ;;  %v1098_v33 = vpop.f32.mrb[21].mxu1  ;;  %1597 = vmatpush1.bf16.msra.mxu0 (!%p2357_p11), %v2673_v10  ;;  %v3098_v25 = vrot.slane (!%p2357_p11), %v1306_v23, %v3086_v19  ;;  %v2733_v6 = vld [vmem:[%s3419_s5 + $0x60] ss:$8 sps:$4 sm:$0xff] (!%p2357_p11)  }
 0x17a   : > { %v1200_v32 = vadd.f32 %v1199_v31, %v1096_v29  ;;  %v1201_v35 = vpop.f32.mrb[21].mxu0  ;;  %v1100_v37 = vpop.f32.mrb[22].mxu1  ;;  %1598 = vmatprep.subr.bf16.mxu0 (!%p2357_p11), %v2674_v11  ;;  %v2688_v29 = vld [vmem:[%s3417_s3 + $0x70] ss:$8 sps:$4 sm:$0xff] (!%p2357_p11)   ;;  %v2734_v8 = vld [vmem:[%s3419_s5 + $0x74] ss:$8 sps:$4 sm:$0xff] (!%p2357_p11)  }
 0x17b   : > { %v1202_v36 = vadd.f32 %v1201_v35, %v1098_v33  ;;  %v1203_v39 = vpop.f32.mrb[22].mxu0  ;;  %v1102_v42 = vpop.f32.mrb[23].mxu1  ;;  %v1319_v27 = vadd.f32 (!%p2357_p11), %v3098_v25, %v1279_v21  ;;  %v1321_v28 = vadd.f32 (!%p2357_p11), %v3098_v25, %v1281_v22  ;;  %v2692_v35 = vld [vmem:[%s3417_s3 + $0x94] ss:$8 sps:$4 sm:$0xff] (!%p2357_p11)   ;;  %v2712_v9 = vld [vmem:[%s3417_s3 + $0xf0] ss:$8 sps:$4 sm:$0xff] (!%p2357_p11)  }
 0x17c   : > { %v1238_v40 = vadd.f32 %v1200_v32, %v452_v30  ;;  %v1204_v41 = vadd.f32 %v1203_v39, %v1100_v37  ;;  %v1205_v44 = vpop.f32.mrb[23].mxu0  ;;  %v2689_v32 = vld [vmem:[%s3417_s3 + $0x84] ss:$8 sps:$4 sm:$0xff] (!%p2357_p11)   ;;  %v2715_v37 = vld [vmem:[%s3419_s5] ss:$8 sps:$4 sm:$0xff] (!%p2357_p11)  }
 0x17d   : > { %v1239_v45 = vadd.f32 %v1202_v36, %v453_v34  ;;  %v1206_v46 = vadd.f32 %v1205_v44, %v1102_v42  ;;  %1599 = vmatpush1.bf16.msra.mxu0 (!%p2357_p11), %v2676_v12  ;;  %v1347_v30 = vmax.f32 (!%p2357_p11), %v1319_v27, 0.0  ;;  %v1349_v31 = vmax.f32 (!%p2357_p11), %v1321_v28, 0.0  ;;  %v2691_v34 = vld [vmem:[%s3417_s3 + $0x80] ss:$8 sps:$4 sm:$0xff] (!%p2357_p11)   ;;  %v2713_v36 = vld [vmem:[%s3419_s5 + $0x4] ss:$8 sps:$4 sm:$0xff] (!%p2357_p11)  }
 0x17e   : > { %1266 = vst [vmem:[#allocation2 + $0xa0] sm:$0xff] %v1238_v40  ;;  %v1240_v47 = vadd.f32 %v1204_v41, %v454_v38  ;;  %1600 = vmatprep.subr.bf16.mxu0 (!%p2357_p11), %v2677_v14  ;;  %v2694_v38 = vld [vmem:[%s3417_s3 + $0x90] ss:$8 sps:$4 sm:$0xff] (!%p2357_p11)   ;;  %1941 = vmatprep.subr.bf16.mxu1 (!%p2357_p11), %v2713_v36  ;;  %v2716_v39 = vld [vmem:[%s3419_s5 + $0x14] ss:$8 sps:$4 sm:$0xff] (!%p2357_p11)   ;;  %v1282_v14 = vld [vmem:[#allocation2 + $0x20] sm:$0xff] (!%p2357_p11) }
 0x17f   : > { %1267 = vst [vmem:[#allocation2 + $0xa8] sm:$0xff] %v1239_v45  ;;  %v1241_v48 = vadd.f32 %v1206_v46, %v455_v43  ;;  %v1375_v33 = vpack.c.bf16 (!%p2357_p11), %v1349_v31, %v1347_v30  ;;  %v2695_v40 = vld [vmem:[%s3417_s3 + $0xa4] ss:$8 sps:$4 sm:$0xff] (!%p2357_p11)   ;;  %1942 = vmatpush1.bf16.msra.mxu1 (!%p2357_p11), %v2715_v37  ;;  %v2718_v41 = vld [vmem:[%s3419_s5 + $0x10] ss:$8 sps:$4 sm:$0xff] (!%p2357_p11)  }
 0x180   : > { %1268 = vst [vmem:[#allocation2 + $0xb0] sm:$0xff] %v1240_v47  ;;  %v1106_v49 = vpop.f32.mrb[24].mxu1  ;;  %1943 = vmatprep.subr.bf16.mxu1 (!%p2357_p11), %v2716_v39  ;;  %v2719_v42 = vld [vmem:[%s3419_s5 + $0x24] ss:$8 sps:$4 sm:$0xff] (!%p2357_p11)   ;;  %v2697_v43 = vld [vmem:[%s3417_s3 + $0xa0] ss:$8 sps:$4 sm:$0xff] (!%p2357_p11)  }
 0x181   : > { %1269 = vst [vmem:[#allocation2 + $0xb8] sm:$0xff] %v1241_v48  ;;  %v1209_v51 = vpop.f32.mrb[24].mxu0  ;;  %v1108_v53 = vpop.f32.mrb[25].mxu1  ;;  %1601 = vmatpush1.bf16.msra.mxu0 (!%p2357_p11), %v2679_v15  ;;  %1624 = vmatprep.mubr.bf16.mxu0 (!%p2357_p11), %v1375_v33  ;;  %v2698_v44 = vld [vmem:[%s3417_s3 + $0xb4] ss:$8 sps:$4 sm:$0xff] (!%p2357_p11)   ;;  %v1291_v37 = vld [vmem:[#allocation2 + $0x68] sm:$0xff] (!%p2357_p11) }
 0x182   : > { %v1210_v52 = vadd.f32 %v1209_v51, %v1106_v49  ;;  %v1211_v55 = vpop.f32.mrb[25].mxu0  ;;  %v1110_v57 = vpop.f32.mrb[26].mxu1  ;;  %1602 = vmatprep.subr.bf16.mxu0 (!%p2357_p11), %v2680_v17  ;;  %v2721_v45 = vld [vmem:[%s3419_s5 + $0x20] ss:$8 sps:$4 sm:$0xff] (!%p2357_p11)   ;;  %v2722_v46 = vld [vmem:[%s3419_s5 + $0x34] ss:$8 sps:$4 sm:$0xff] (!%p2357_p11)  }
 0x183   : > { %v1212_v56 = vadd.f32 %v1211_v55, %v1108_v53  ;;  %v1213_v59 = vpop.f32.mrb[26].mxu0  ;;  %v1112_v62 = vpop.f32.mrb[27].mxu1  ;;  %1277 = sbr.rel (%p2357_p11) target bundleno = 924 (0x39c), region = 79  ;;  %1944 = vmatpush1.bf16.msra.mxu1 (!%p2357_p11), %v2718_v41  ;;  %v2700_v47 = vld [vmem:[%s3417_s3 + $0xb0] ss:$8 sps:$4 sm:$0xff] (!%p2357_p11)   ;;  %v3168_v53 = vsub.s32 (!%p2357_p11), 0, %v1309_v16 }
 0x184   : > { %v1242_v60 = vadd.f32 %v1210_v52, %v456_v50  ;;  %v1214_v61 = vadd.f32 %v1213_v59, %v1110_v57  ;;  %v1215_v0 = vpop.f32.mrb[27].mxu0  ;;  %1945 = vmatprep.subr.bf16.mxu1 (!%p2357_p11), %v2719_v42  ;;  %v2701_v48 = vld [vmem:[%s3417_s3 + $0xc4] ss:$8 sps:$4 sm:$0xff] (!%p2357_p11)   ;;  %v2724_v49 = vld [vmem:[%s3419_s5 + $0x30] ss:$8 sps:$4 sm:$0xff] (!%p2357_p11)  }
 0x185   : > { %v1243_v1 = vadd.f32 %v1212_v56, %v457_v54  ;;  %v1216_v2 = vadd.f32 %v1215_v0, %v1112_v62  ;;  %1603 = vmatpush1.bf16.msra.mxu0 (!%p2357_p11), %v2682_v18  ;;  %v2725_v50 = vld [vmem:[%s3419_s5 + $0x44] ss:$8 sps:$4 sm:$0xff] (!%p2357_p11)   ;;  %v2703_v51 = vld [vmem:[%s3417_s3 + $0xc0] ss:$8 sps:$4 sm:$0xff] (!%p2357_p11)   ;;  %v2704_v52 = vld [vmem:[%s3417_s3 + $0xd4] ss:$8 sps:$4 sm:$0xff] (!%p2357_p11)  }
 0x186   : > { %1270 = vst [vmem:[#allocation2 + $0xc0] sm:$0xff] %v1242_v60  ;;  %v1244_v3 = vadd.f32 %v1214_v61, %v458_v58  ;;  %1604 = vmatprep.subr.bf16.mxu0 (!%p2357_p11), %v2683_v20  ;;  %v2727_v54 = vld [vmem:[%s3419_s5 + $0x40] ss:$8 sps:$4 sm:$0xff] (!%p2357_p11)   ;;  %v2728_v55 = vld [vmem:[%s3419_s5 + $0x54] ss:$8 sps:$4 sm:$0xff] (!%p2357_p11)   ;;  %v3183_v60 = vrot.slane (!%p2357_p11), %v1306_v23, %v3168_v53 }
 0x187   : > { %1271 = vst [vmem:[#allocation2 + $0xc8] sm:$0xff] %v1243_v1  ;;  %v1245_v4 = vadd.f32 %v1216_v2, %v459_v63  ;;  %1946 = vmatpush1.bf16.msra.mxu1 (!%p2357_p11), %v2721_v45  ;;  %v2706_v56 = vld [vmem:[%s3417_s3 + $0xd0] ss:$8 sps:$4 sm:$0xff] (!%p2357_p11)   ;;  %v1278_v57 = vld [vmem:[#allocation2] sm:$0xff] (!%p2357_p11)  ;;  %v1283_v61 = vld [vmem:[#allocation2 + $0x28] sm:$0xff] (!%p2357_p11) }
 0x188   : > { %1272 = vst [vmem:[#allocation2 + $0xd0] sm:$0xff] %v1244_v3  ;;  %1947 = vmatprep.subr.bf16.mxu1 (!%p2357_p11), %v2722_v46  ;;  %v1280_v58 = vld [vmem:[#allocation2 + $0x10] sm:$0xff] (!%p2357_p11)  ;;  %v2707_v59 = vld [vmem:[%s3417_s3 + $0xe4] ss:$8 sps:$4 sm:$0xff] (!%p2357_p11)   ;;  %v1285_v63 = vld [vmem:[#allocation2 + $0x38] sm:$0xff] (!%p2357_p11)  ;;  %v1318_v1 = vadd.f32 (!%p2357_p11), %v3183_v60, %v1278_v57  ;;  %v1322_v22 = vadd.f32 (!%p2357_p11), %v3183_v60, %v1282_v14 }
 0x189   : > { %1273 = vst [vmem:[#allocation2 + $0xd8] sm:$0xff] %v1245_v4  ;;  %1605 = vmatpush1.bf16.msra.mxu0 (!%p2357_p11), %v2685_v24  ;;  %v2730_v62 = vld [vmem:[%s3419_s5 + $0x50] ss:$8 sps:$4 sm:$0xff] (!%p2357_p11)   ;;  %v2731_v0 = vld [vmem:[%s3419_s5 + $0x64] ss:$8 sps:$4 sm:$0xff] (!%p2357_p11)   ;;  %v1320_v2 = vadd.f32 (!%p2357_p11), %v3183_v60, %v1280_v58  ;;  %v1323_v4 = vadd.f32 (!%p2357_p11), %v3098_v25, %v1283_v61  ;;  %v1325_v5 = vadd.f32 (!%p2357_p11), %v3098_v25, %v1285_v63 }
 0x18a   : > { %1606 = vmatprep.subr.bf16.mxu0 %v2686_v26  ;;  %v2709_v3 = vld [vmem:[%s3417_s3 + $0xe0] ss:$8 sps:$4 sm:$0xff]   ;;  %v1346_v10 = vmax.f32 %v1318_v1, 0.0  ;;  %v1284_v15 = vld [vmem:[#allocation2 + $0x30] sm:$0xff]  ;;  %v1289_v18 = vld [vmem:[#allocation2 + $0x58] sm:$0xff]  ;;  %v1350_v30 = vmax.f32 %v1322_v22, 0.0 }
 0x18b   : > { %1948 = vmatpush1.bf16.msra.mxu1 %v2724_v49  ;;  %v1348_v11 = vmax.f32 %v1320_v2, 0.0  ;;  %v1351_v12 = vmax.f32 %v1323_v4, 0.0  ;;  %v1353_v13 = vmax.f32 %v1325_v5, 0.0  ;;  %v2736_v16 = vld [vmem:[%s3419_s5 + $0x70] ss:$8 sps:$4 sm:$0xff]   ;;  %v1287_v17 = vld [vmem:[#allocation2 + $0x48] sm:$0xff]  ;;  %v1324_v23 = vadd.f32 %v3183_v60, %v1284_v15 }
 0x18c   : > { %1949 = vmatprep.subr.bf16.mxu1 %v2725_v50  ;;  %v2737_v20 = vld [vmem:[%s3419_s5 + $0x84] ss:$8 sps:$4 sm:$0xff]   ;;  %v1327_v26 = vadd.f32 %v3098_v25, %v1287_v17  ;;  %v1329_v27 = vadd.f32 %v3098_v25, %v1289_v18  ;;  %v2739_v28 = vld [vmem:[%s3419_s5 + $0x80] ss:$8 sps:$4 sm:$0xff]   ;;  %v2742_v36 = vld [vmem:[%s3419_s5 + $0x90] ss:$8 sps:$4 sm:$0xff]  }
 0x18d   : > { %1607 = vmatpush1.bf16.msra.mxu0 %v2688_v29  ;;  %v1374_v21 = vpack.c.bf16 %v1348_v11, %v1346_v10  ;;  %v1377_v24 = vpack.c.bf16 %v1353_v13, %v1351_v12  ;;  %v2740_v29 = vld [vmem:[%s3419_s5 + $0x94] ss:$8 sps:$4 sm:$0xff]   ;;  %v1352_v31 = vmax.f32 %v1324_v23, 0.0  ;;  %v2743_v39 = vld [vmem:[%s3419_s5 + $0xa4] ss:$8 sps:$4 sm:$0xff]  }
 0x18e   : > { %1608 = vmatprep.subr.bf16.mxu0 %v2689_v32  ;;  %v1355_v32 = vmax.f32 %v1327_v26, 0.0  ;;  %v1357_v33 = vmax.f32 %v1329_v27, 0.0  ;;  %v2745_v46 = vld [vmem:[%s3419_s5 + $0xa0] ss:$8 sps:$4 sm:$0xff]   ;;  %v1297_v57 = vld [vmem:[#allocation2 + $0x98] sm:$0xff] }
 0x18f   : > { %1950 = vmatpush1.bf16.msra.mxu1 %v2727_v54  ;;  %v1292_v54 = vld [vmem:[#allocation2 + $0x70] sm:$0xff]  ;;  %v2749_v58 = vld [vmem:[%s3419_s5 + $0xc4] ss:$8 sps:$4 sm:$0xff]   ;;  %v1337_v1 = vadd.f32 %v3098_v25, %v1297_v57  ;;  %v2751_v2 = vld [vmem:[%s3419_s5 + $0xc0] ss:$8 sps:$4 sm:$0xff]  }
 0x190   : > { %1951 = vmatprep.subr.bf16.mxu1 %v2728_v55  ;;  %v2748_v55 = vld [vmem:[%s3419_s5 + $0xb0] ss:$8 sps:$4 sm:$0xff]   ;;  %v1299_v10 = vld [vmem:[#allocation2 + $0xa8] sm:$0xff]  ;;  %v1298_v23 = vld [vmem:[#allocation2 + $0xa0] sm:$0xff] }
 0x191   : > { %1609 = vmatpush1.bf16.msra.mxu0 %v2691_v34  ;;  %v1286_v34 = vld [vmem:[#allocation2 + $0x40] sm:$0xff]  ;;  %v1301_v11 = vld [vmem:[#allocation2 + $0xb8] sm:$0xff]  ;;  %v1303_v26 = vld [vmem:[#allocation2 + $0xc8] sm:$0xff] }
 0x192   : > { %1610 = vmatprep.subr.bf16.mxu0 %v2692_v35  ;;  %v1288_v35 = vld [vmem:[#allocation2 + $0x50] sm:$0xff]  ;;  %v1326_v41 = vadd.f32 %v3183_v60, %v1286_v34  ;;  %v1341_v17 = vadd.f32 %v3098_v25, %v1301_v11  ;;  %v1305_v27 = vld [vmem:[#allocation2 + $0xd8] sm:$0xff] }
 0x193   : > { %1952 = vmatpush1.bf16.msra.mxu1 %v2730_v62  ;;  %v1328_v42 = vadd.f32 %v3183_v60, %v1288_v35  ;;  %v1332_v62 = vadd.f32 %v3183_v60, %v1292_v54 }
 0x194   : > { %1953 = vmatprep.subr.bf16.mxu1 %v2731_v0  ;;  %v1369_v22 = vmax.f32 %v1341_v17, 0.0 }
 0x195   : > { %1611 = vmatpush1.bf16.msra.mxu0 %v2694_v38  ;;  %v1293_v38 = vld [vmem:[#allocation2 + $0x78] sm:$0xff]  ;;  %v1356_v49 = vmax.f32 %v1328_v42, 0.0  ;;  %v1360_v5 = vmax.f32 %v1332_v62, 0.0 }
 0x196   : > { %1612 = vmatprep.subr.bf16.mxu0 %v2695_v40  ;;  %v1376_v40 = vpack.c.bf16 %v1352_v31, %v1350_v30  ;;  %v1333_v45 = vadd.f32 %v3098_v25, %v1293_v38  ;;  %v1302_v38 = vld [vmem:[#allocation2 + $0xc0] sm:$0xff] }
 0x197   : > { %1954 = vmatpush1.bf16.msra.mxu1 %v2733_v6 }
 0x198   : > { %1955 = vmatprep.subr.bf16.mxu1 %v2734_v8  ;;  %v1294_v8 = vld [vmem:[#allocation2 + $0x80] sm:$0xff] }
 0x199   : > { %1613 = vmatpush1.bf16.msra.mxu0 %v2697_v43  ;;  %v1379_v43 = vpack.c.bf16 %v1357_v33, %v1355_v32  ;;  %v1334_v13 = vadd.f32 %v3183_v60, %v1294_v8  ;;  %v1343_v32 = vadd.f32 %v3098_v25, %v1303_v26  ;;  %v1345_v33 = vadd.f32 %v3098_v25, %v1305_v27 }
 0x19a   : > { %1614 = vmatprep.subr.bf16.mxu0 %v2698_v44  ;;  %v1331_v44 = vadd.f32 %v3098_v25, %v1291_v37 }
 0x19b   : > { %1956 = vmatpush1.bf16.msra.mxu1 %v2736_v16  ;;  %v1339_v16 = vadd.f32 %v3098_v25, %v1299_v10  ;;  %v1362_v18 = vmax.f32 %v1334_v13, 0.0  ;;  %v1373_v37 = vmax.f32 %v1345_v33, 0.0 }
 0x19c   : > { %1957 = vmatprep.subr.bf16.mxu1 %v2737_v20  ;;  %v1359_v50 = vmax.f32 %v1331_v44, 0.0 }
 0x19d   : > { %1615 = vmatpush1.bf16.msra.mxu0 %v2700_v47  ;;  %v2746_v47 = vld [vmem:[%s3419_s5 + $0xb4] ss:$8 sps:$4 sm:$0xff]  }
 0x19e   : > { %1616 = vmatprep.subr.bf16.mxu0 %v2701_v48  ;;  %v1354_v48 = vmax.f32 %v1326_v41, 0.0  ;;  %v1342_v41 = vadd.f32 %v3183_v60, %v1302_v38 }
 0x19f   : > { %1958 = vmatpush1.bf16.msra.mxu1 %v2739_v28 }
 0x1a0   : > { %1959 = vmatprep.subr.bf16.mxu1 %v2740_v29  ;;  %v1338_v29 = vadd.f32 %v3183_v60, %v1298_v23  ;;  %v1370_v44 = vmax.f32 %v1342_v41, 0.0 }
 0x1a1   : > { %1617 = vmatpush1.bf16.msra.mxu0 %v2703_v51  ;;  %v1361_v51 = vmax.f32 %v1333_v45, 0.0 }
 0x1a2   : > { %1618 = vmatprep.subr.bf16.mxu0 %v2704_v52  ;;  %v1290_v52 = vld [vmem:[#allocation2 + $0x60] sm:$0xff]  ;;  %v1366_v34 = vmax.f32 %v1338_v29, 0.0 }
 0x1a3   : > { %1960 = vmatpush1.bf16.msra.mxu1 %v2742_v36  ;;  %v1330_v61 = vadd.f32 %v3183_v60, %v1290_v52  ;;  %v1381_v63 = vpack.c.bf16 %v1361_v51, %v1359_v50  ;;  %v1371_v36 = vmax.f32 %v1343_v32, 0.0  ;;  %v1420_v50 = vld [vmem:[%s3418_s4] sm:$0x3] }
 0x1a4   : > { %1961 = vmatprep.subr.bf16.mxu1 %v2743_v39  ;;  %v1304_v39 = vld [vmem:[#allocation2 + $0xd0] sm:$0xff]  ;;  %v3287_v51 = vrot.slane %v1420_v50, %v3168_v53  ;;  %v3290_v52 = vrot.slane %v1420_v50, %v3086_v19 }
 0x1a5   : > { %1619 = vmatpush1.bf16.msra.mxu0 %v2706_v56  ;;  %v1295_v56 = vld [vmem:[#allocation2 + $0x88] sm:$0xff]  ;;  %v1358_v4 = vmax.f32 %v1330_v61, 0.0  ;;  %v1344_v42 = vadd.f32 %v3183_v60, %v1304_v39 }
 0x1a6   : > { %1620 = vmatprep.subr.bf16.mxu0 %v2707_v59  ;;  %v1378_v59 = vpack.c.bf16 %v1356_v49, %v1354_v48  ;;  %v1335_v0 = vadd.f32 %v3098_v25, %v1295_v56  ;;  %v2754_v25 = vld [vmem:[%s3419_s5 + $0xd0] ss:$8 sps:$4 sm:$0xff]   ;;  %v2758_v48 = vld [vmem:[%s3419_s5 + $0xf4] ss:$8 sps:$4 sm:$0xff]  }
 0x1a7   : > { %1962 = vmatpush1.bf16.msra.mxu1 %v2745_v46  ;;  %v1380_v12 = vpack.c.bf16 %v1360_v5, %v1358_v4  ;;  %v1372_v45 = vmax.f32 %v1344_v42, 0.0  ;;  %v2760_v49 = vld [vmem:[%s3419_s5 + $0xf0] ss:$8 sps:$4 sm:$0xff]  }
 0x1a8   : > { %1963 = vmatprep.subr.bf16.mxu1 %v2746_v47  ;;  %v1363_v6 = vmax.f32 %v1335_v0, 0.0  ;;  %v2755_v47 = vld [vmem:[%s3419_s5 + $0xe4] ss:$8 sps:$4 sm:$0xff]  }
 0x1a9   : > { %1621 = vmatpush1.bf16.msra.mxu0 %v2709_v3  ;;  %v2752_v3 = vld [vmem:[%s3419_s5 + $0xd4] ss:$8 sps:$4 sm:$0xff]   ;;  %v1386_v46 = vpack.c.bf16 %v1372_v45, %v1370_v44 }
 0x1aa   : > { %1622 = vmatprep.subr.bf16.mxu0 %v2710_v7  ;;  %v1365_v7 = vmax.f32 %v1337_v1, 0.0 }
 0x1ab   : > { %1964 = vmatpush1.bf16.msra.mxu1 %v2748_v55 }
 0x1ac   : > { %1965 = vmatprep.subr.bf16.mxu1 %v2749_v58  ;;  %v1383_v15 = vpack.c.bf16 %v1365_v7, %v1363_v6 }
 0x1ad   : > { %1623 = vmatpush1.bf16.msra.mxu0 %v2712_v9  ;;  %v1296_v9 = vld [vmem:[#allocation2 + $0x90] sm:$0xff] }
 0x1ae   : > { %v1336_v14 = vadd.f32 %v3183_v60, %v1296_v9 }
 0x1af   : > { %1966 = vmatpush1.bf16.msra.mxu1 %v2751_v2 }
 0x1b0   : > { %1625 = vmatmul.mubr.bf16.vlgmr.msra.gmra.mrb[0].mxu0 %v1374_v21  ;;  %1967 = vmatprep.subr.bf16.mxu1 %v2752_v3  ;;  %v1364_v20 = vmax.f32 %v1336_v14, 0.0  ;;  %v1367_v21 = vmax.f32 %v1339_v16, 0.0 }
 0x1b1   : > { %1634 = vmatprep.mubr.bf16.mxu0 %v1377_v24  ;;  %v1300_v24 = vld [vmem:[#allocation2 + $0xb0] sm:$0xff] }
 0x1b2   : > { %v1382_v28 = vpack.c.bf16 %v1364_v20, %v1362_v18  ;;  %v1340_v30 = vadd.f32 %v3183_v60, %v1300_v24  ;;  %v1385_v31 = vpack.c.bf16 %v1369_v22, %v1367_v21  ;;  %v2757_v60 = vld [vmem:[%s3419_s5 + $0xe0] ss:$8 sps:$4 sm:$0xff]  }
 0x1b3   : > { %1968 = vmatpush1.bf16.msra.mxu1 %v2754_v25 }
 0x1b4   : > { %v1368_v35 = vmax.f32 %v1340_v30, 0.0  ;;  %1969 = vmatprep.subr.bf16.mxu1 %v2755_v47 }
 0x1b7   : > { %1970 = vmatpush1.bf16.msra.mxu1 %v2757_v60 }
 0x1b8   : > { %1635 = vmatmul.mubr.bf16.gmra.mrb[4].mxu0 %v1376_v40  ;;  %v1384_v40 = vpack.c.bf16 %v1368_v35, %v1366_v34  ;;  %1971 = vmatprep.subr.bf16.mxu1 %v2758_v48 }
 0x1b9   : > { %1644 = vmatprep.mubr.bf16.mxu0 %v1379_v43  ;;  %v1387_v43 = vpack.c.bf16 %v1373_v37, %v1371_v36 }
 0x1bb   : > { %1972 = vmatpush1.bf16.msra.mxu1 %v2760_v49 }
 0x1c0   : > { %1645 = vmatmul.mubr.bf16.gmra.mrb[8].mxu0 %v1378_v59 }
 0x1c1   : > { %1654 = vmatprep.mubr.bf16.mxu0 %v1381_v63 }
 0x1c8   : > { %1655 = vmatmul.mubr.bf16.gmra.mrb[12].mxu0 %v1380_v12 }
 0x1c9   : > { %1664 = vmatprep.mubr.bf16.mxu0 %v1383_v15 }
 0x1d0   : > { %1665 = vmatmul.mubr.bf16.gmra.mrb[16].mxu0 %v1382_v28 }
 0x1d1   : > { %1674 = vmatprep.mubr.bf16.mxu0 %v1385_v31 }
 0x1d8   : > { %1675 = vmatmul.mubr.bf16.gmra.mrb[20].mxu0 %v1384_v40 }
 0x1d9   : > { %1684 = vmatprep.mubr.bf16.mxu0 %v1387_v43 }
 0x1e0   : > { %1685 = vmatmul.mubr.bf16.gmra.mrb[24].mxu0 %v1386_v46 }
 0x283   : > { %v1626_v54 = vpop.f32.mrb[0].mxu0 }
 0x284   : > { %v1627_v55 = vadd.f32 %v1626_v54, %v3287_v51  ;;  %v1628_v56 = vpop.f32.mrb[1].mxu0 }
 0x285   : > { %v1629_v57 = vadd.f32 %v1628_v56, %v3290_v52  ;;  %v1630_v58 = vpop.f32.mrb[2].mxu0 }
 0x286   : > { %v1631_v59 = vadd.f32 %v1630_v58, %v3287_v51  ;;  %v1632_v61 = vpop.f32.mrb[3].mxu0  ;;  %v1695_v63 = vmax.f32 %v1627_v55, 0.0 }
 0x287   : > { %v1633_v62 = vadd.f32 %v1632_v61, %v3290_v52  ;;  %v1696_v1 = vmax.f32 %v1629_v57, 0.0 }
 0x288   : > { %v1697_v0 = vmax.f32 %v1631_v59, 0.0 }
 0x289   : > { %v1698_v2 = vmax.f32 %v1633_v62, 0.0 }
 0x28a   : > { %v1723_v3 = vpack.c.bf16 %v1697_v0, %v1695_v63 }
 0x28b   : > { %v1636_v4 = vpop.f32.mrb[4].mxu0  ;;  %v1724_v5 = vpack.c.bf16 %v1698_v2, %v1696_v1 }
 0x28c   : > { %v1637_v6 = vadd.f32 %v1636_v4, %v3287_v51  ;;  %v1638_v7 = vpop.f32.mrb[5].mxu0 }
 0x28d   : > { %v1639_v8 = vadd.f32 %v1638_v7, %v3290_v52  ;;  %v1640_v9 = vpop.f32.mrb[6].mxu0  ;;  %1973 = vmatprep.mubr.bf16.mxu1 %v1724_v5 }
 0x28e   : > { %v1641_v10 = vadd.f32 %v1640_v9, %v3287_v51  ;;  %v1642_v11 = vpop.f32.mrb[7].mxu0  ;;  %1974 = vmatmul.mubr.bf16.vlgmr.msra.gmra.mrb[0].mxu1 %v1723_v3  ;;  %v1699_v13 = vmax.f32 %v1637_v6, 0.0 }
 0x28f   : > { %v1643_v12 = vadd.f32 %v1642_v11, %v3290_v52  ;;  %v1700_v15 = vmax.f32 %v1639_v8, 0.0 }
 0x290   : > { %v1701_v14 = vmax.f32 %v1641_v10, 0.0 }
 0x291   : > { %v1702_v16 = vmax.f32 %v1643_v12, 0.0 }
 0x292   : > { %v1725_v17 = vpack.c.bf16 %v1701_v14, %v1699_v13 }
 0x293   : > { %v1726_v18 = vpack.c.bf16 %v1702_v16, %v1700_v15  ;;  %v1646_v20 = vpop.f32.mrb[8].mxu0 }
 0x294   : > { %v1647_v21 = vadd.f32 %v1646_v20, %v3287_v51  ;;  %v1648_v22 = vpop.f32.mrb[9].mxu0 }
 0x295   : > { %v1649_v23 = vadd.f32 %v1648_v22, %v3290_v52  ;;  %v1650_v24 = vpop.f32.mrb[10].mxu0  ;;  %1983 = vmatprep.mubr.bf16.mxu1 %v1726_v18 }
 0x296   : > { %v1651_v26 = vadd.f32 %v1650_v24, %v3287_v51  ;;  %v1652_v27 = vpop.f32.mrb[11].mxu0  ;;  %1984 = vmatmul.mubr.bf16.gmra.mrb[4].mxu1 %v1725_v17  ;;  %v1703_v29 = vmax.f32 %v1647_v21, 0.0 }
 0x297   : > { %v1653_v28 = vadd.f32 %v1652_v27, %v3290_v52  ;;  %v1704_v31 = vmax.f32 %v1649_v23, 0.0 }
 0x298   : > { %v1705_v30 = vmax.f32 %v1651_v26, 0.0 }
 0x299   : > { %v1706_v32 = vmax.f32 %v1653_v28, 0.0 }
 0x29a   : > { %v1727_v33 = vpack.c.bf16 %v1705_v30, %v1703_v29 }
 0x29b   : > { %v1728_v34 = vpack.c.bf16 %v1706_v32, %v1704_v31  ;;  %v1656_v35 = vpop.f32.mrb[12].mxu0  ;;  %v1769_v31 = vld [vmem:[%s3420_s6] sm:$0x3] }
 0x29c   : > { %v1657_v36 = vadd.f32 %v1656_v35, %v3287_v51  ;;  %v1658_v37 = vpop.f32.mrb[13].mxu0  ;;  %v3324_v32 = vrot.slane %v1769_v31, %v3168_v53 }
 0x29d   : > { %v1659_v38 = vadd.f32 %v1658_v37, %v3290_v52  ;;  %v1660_v39 = vpop.f32.mrb[14].mxu0  ;;  %1993 = vmatprep.mubr.bf16.mxu1 %v1728_v34 }
 0x29e   : > { %v1661_v40 = vadd.f32 %v1660_v39, %v3287_v51  ;;  %v1662_v41 = vpop.f32.mrb[15].mxu0  ;;  %1994 = vmatmul.mubr.bf16.gmra.mrb[8].mxu1 %v1727_v33  ;;  %v1707_v43 = vmax.f32 %v1657_v36, 0.0 }
 0x29f   : > { %v1663_v42 = vadd.f32 %v1662_v41, %v3290_v52  ;;  %v1708_v45 = vmax.f32 %v1659_v38, 0.0 }
 0x2a0   : > { %v1709_v44 = vmax.f32 %v1661_v40, 0.0 }
 0x2a1   : > { %v1710_v46 = vmax.f32 %v1663_v42, 0.0 }
 0x2a2   : > { %v1729_v25 = vpack.c.bf16 %v1709_v44, %v1707_v43 }
 0x2a3   : > { %v1730_v47 = vpack.c.bf16 %v1710_v46, %v1708_v45  ;;  %v1666_v60 = vpop.f32.mrb[16].mxu0 }
 0x2a4   : > { %v1667_v48 = vadd.f32 %v1666_v60, %v3287_v51  ;;  %v1668_v49 = vpop.f32.mrb[17].mxu0 }
 0x2a5   : > { %v1669_v50 = vadd.f32 %v1668_v49, %v3290_v52  ;;  %v1670_v54 = vpop.f32.mrb[18].mxu0  ;;  %2003 = vmatprep.mubr.bf16.mxu1 %v1730_v47 }
 0x2a6   : > { %v1671_v55 = vadd.f32 %v1670_v54, %v3287_v51  ;;  %v1672_v56 = vpop.f32.mrb[19].mxu0  ;;  %2004 = vmatmul.mubr.bf16.gmra.mrb[12].mxu1 %v1729_v25  ;;  %v1711_v58 = vmax.f32 %v1667_v48, 0.0 }
 0x2a7   : > { %v1673_v57 = vadd.f32 %v1672_v56, %v3290_v52  ;;  %v1712_v61 = vmax.f32 %v1669_v50, 0.0 }
 0x2a8   : > { %v1713_v59 = vmax.f32 %v1671_v55, 0.0 }
 0x2a9   : > { %v1714_v62 = vmax.f32 %v1673_v57, 0.0 }
 0x2aa   : > { %v1731_v63 = vpack.c.bf16 %v1713_v59, %v1711_v58 }
 0x2ab   : > { %v1732_v0 = vpack.c.bf16 %v1714_v62, %v1712_v61  ;;  %v1676_v1 = vpop.f32.mrb[20].mxu0 }
 0x2ac   : > { %v1677_v2 = vadd.f32 %v1676_v1, %v3287_v51  ;;  %v1678_v3 = vpop.f32.mrb[21].mxu0 }
 0x2ad   : > { %v1679_v4 = vadd.f32 %v1678_v3, %v3290_v52  ;;  %v1680_v5 = vpop.f32.mrb[22].mxu0  ;;  %2013 = vmatprep.mubr.bf16.mxu1 %v1732_v0 }
 0x2ae   : > { %v1681_v6 = vadd.f32 %v1680_v5, %v3287_v51  ;;  %v1682_v7 = vpop.f32.mrb[23].mxu0  ;;  %2014 = vmatmul.mubr.bf16.gmra.mrb[16].mxu1 %v1731_v63  ;;  %v1715_v9 = vmax.f32 %v1677_v2, 0.0 }
 0x2af   : > { %v1683_v8 = vadd.f32 %v1682_v7, %v3290_v52  ;;  %v1716_v11 = vmax.f32 %v1679_v4, 0.0 }
 0x2b0   : > { %v1717_v10 = vmax.f32 %v1681_v6, 0.0 }
 0x2b1   : > { %v1718_v12 = vmax.f32 %v1683_v8, 0.0 }
 0x2b2   : > { %v1733_v13 = vpack.c.bf16 %v1717_v10, %v1715_v9 }
 0x2b3   : > { %v1734_v14 = vpack.c.bf16 %v1718_v12, %v1716_v11  ;;  %v1686_v15 = vpop.f32.mrb[24].mxu0 }
 0x2b4   : > { %v1687_v16 = vadd.f32 %v1686_v15, %v3287_v51  ;;  %v1688_v17 = vpop.f32.mrb[25].mxu0 }
 0x2b5   : > { %v1689_v18 = vadd.f32 %v1688_v17, %v3290_v52  ;;  %v1690_v20 = vpop.f32.mrb[26].mxu0  ;;  %2023 = vmatprep.mubr.bf16.mxu1 %v1734_v14 }
 0x2b6   : > { %v1691_v21 = vadd.f32 %v1690_v20, %v3287_v51  ;;  %v1692_v22 = vpop.f32.mrb[27].mxu0  ;;  %2024 = vmatmul.mubr.bf16.gmra.mrb[20].mxu1 %v1733_v13  ;;  %v1719_v24 = vmax.f32 %v1687_v16, 0.0  ;;  %v3327_v51 = vrot.slane %v1769_v31, %v3086_v19 }
 0x2b7   : > { %v1693_v23 = vadd.f32 %v1692_v22, %v3290_v52  ;;  %v1720_v27 = vmax.f32 %v1689_v18, 0.0 }
 0x2b8   : > { %v1721_v26 = vmax.f32 %v1691_v21, 0.0 }
 0x2b9   : > { %v1722_v28 = vmax.f32 %v1693_v23, 0.0 }
 0x2ba   : > { %v1735_v29 = vpack.c.bf16 %v1721_v26, %v1719_v24 }
 0x2bb   : > { %v1736_v30 = vpack.c.bf16 %v1722_v28, %v1720_v27 }
 0x2bd   : > { %2033 = vmatprep.mubr.bf16.mxu1 %v1736_v30 }
 0x2be   : > { %2034 = vmatmul.mubr.bf16.gmra.mrb[24].mxu1 %v1735_v29 }
 0x361   : > { %v1975_v33 = vpop.f32.mrb[0].mxu1 }
 0x362   : > { %v1976_v52 = vadd.f32 %v1975_v33, %v3324_v32  ;;  %v1977_v34 = vpop.f32.mrb[1].mxu1 }
 0x363   : > { %v1978_v35 = vadd.f32 %v1977_v34, %v3327_v51  ;;  %v1979_v36 = vpop.f32.mrb[2].mxu1 }
 0x364   : > { %v2044_v37 = vmax.f32 %v1976_v52, 0.0  ;;  %v1980_v38 = vadd.f32 %v1979_v36, %v3324_v32  ;;  %v1981_v39 = vpop.f32.mrb[3].mxu1 }
 0x365   : > { %v2045_v40 = vmax.f32 %v1978_v35, 0.0  ;;  %v1982_v41 = vadd.f32 %v1981_v39, %v3327_v51 }
 0x366   : > { %v2046_v42 = vmax.f32 %v1980_v38, 0.0 }
 0x367   : > { %v2442_v53 = vpack.c.bf16 %v2045_v40, %v2044_v37  ;;  %v2047_v43 = vmax.f32 %v1982_v41, 0.0 }
 0x369   : > { %2156 = vst [vmem:[%s3421_s7] sm:$0xff] %v2442_v53  ;;  %v2443_v19 = vpack.c.bf16 %v2047_v43, %v2046_v42  ;;  %v1985_v44 = vpop.f32.mrb[4].mxu1 }
 0x36a   : > { %v1986_v45 = vadd.f32 %v1985_v44, %v3324_v32  ;;  %v1987_v46 = vpop.f32.mrb[5].mxu1 }
 0x36b   : > { %2157 = vst [vmem:[%s3421_s7 + $0x8] sm:$0xff] %v2443_v19  ;;  %v1988_v25 = vadd.f32 %v1987_v46, %v3327_v51  ;;  %v1989_v47 = vpop.f32.mrb[6].mxu1 }
 0x36c   : > { %v2048_v60 = vmax.f32 %v1986_v45, 0.0  ;;  %v1990_v48 = vadd.f32 %v1989_v47, %v3324_v32  ;;  %v1991_v49 = vpop.f32.mrb[7].mxu1 }
 0x36d   : > { %v2049_v50 = vmax.f32 %v1988_v25, 0.0  ;;  %v1992_v54 = vadd.f32 %v1991_v49, %v3327_v51 }
 0x36e   : > { %v2050_v55 = vmax.f32 %v1990_v48, 0.0 }
 0x36f   : > { %v2444_v56 = vpack.c.bf16 %v2049_v50, %v2048_v60  ;;  %v2051_v57 = vmax.f32 %v1992_v54, 0.0 }
 0x371   : > { %2158 = vst [vmem:[%s3421_s7 + $0x10] sm:$0xff] %v2444_v56  ;;  %v2445_v58 = vpack.c.bf16 %v2051_v57, %v2050_v55  ;;  %v1995_v59 = vpop.f32.mrb[8].mxu1 }
 0x372   : > { %v1996_v61 = vadd.f32 %v1995_v59, %v3324_v32  ;;  %v1997_v62 = vpop.f32.mrb[9].mxu1 }
 0x373   : > { %2159 = vst [vmem:[%s3421_s7 + $0x18] sm:$0xff] %v2445_v58  ;;  %v1998_v63 = vadd.f32 %v1997_v62, %v3327_v51  ;;  %v1999_v0 = vpop.f32.mrb[10].mxu1 }
 0x374   : > { %v2052_v1 = vmax.f32 %v1996_v61, 0.0  ;;  %v2000_v2 = vadd.f32 %v1999_v0, %v3324_v32  ;;  %v2001_v3 = vpop.f32.mrb[11].mxu1 }
 0x375   : > { %v2053_v4 = vmax.f32 %v1998_v63, 0.0  ;;  %v2002_v5 = vadd.f32 %v2001_v3, %v3327_v51 }
 0x376   : > { %v2054_v6 = vmax.f32 %v2000_v2, 0.0 }
 0x377   : > { %v2446_v7 = vpack.c.bf16 %v2053_v4, %v2052_v1  ;;  %v2055_v8 = vmax.f32 %v2002_v5, 0.0 }
 0x379   : > { %2160 = vst [vmem:[%s3421_s7 + $0x20] sm:$0xff] %v2446_v7  ;;  %v2447_v9 = vpack.c.bf16 %v2055_v8, %v2054_v6  ;;  %v2005_v10 = vpop.f32.mrb[12].mxu1 }
 0x37a   : > { %v2006_v11 = vadd.f32 %v2005_v10, %v3324_v32  ;;  %v2007_v12 = vpop.f32.mrb[13].mxu1 }
 0x37b   : > { %2161 = vst [vmem:[%s3421_s7 + $0x28] sm:$0xff] %v2447_v9  ;;  %v2008_v13 = vadd.f32 %v2007_v12, %v3327_v51  ;;  %v2009_v14 = vpop.f32.mrb[14].mxu1 }
 0x37c   : > { %v2056_v15 = vmax.f32 %v2006_v11, 0.0  ;;  %v2010_v16 = vadd.f32 %v2009_v14, %v3324_v32  ;;  %v2011_v17 = vpop.f32.mrb[15].mxu1 }
 0x37d   : > { %v2057_v18 = vmax.f32 %v2008_v13, 0.0  ;;  %v2012_v20 = vadd.f32 %v2011_v17, %v3327_v51 }
 0x37e   : > { %v2058_v21 = vmax.f32 %v2010_v16, 0.0 }
 0x37f   : > { %v2448_v22 = vpack.c.bf16 %v2057_v18, %v2056_v15  ;;  %v2059_v23 = vmax.f32 %v2012_v20, 0.0 }
 0x381   : > { %2162 = vst [vmem:[%s3421_s7 + $0x30] sm:$0xff] %v2448_v22  ;;  %v2449_v24 = vpack.c.bf16 %v2059_v23, %v2058_v21  ;;  %v2015_v26 = vpop.f32.mrb[16].mxu1 }
 0x382   : > { %v2016_v27 = vadd.f32 %v2015_v26, %v3324_v32  ;;  %v2017_v28 = vpop.f32.mrb[17].mxu1 }
 0x383   : > { %2163 = vst [vmem:[%s3421_s7 + $0x38] sm:$0xff] %v2449_v24  ;;  %v2018_v29 = vadd.f32 %v2017_v28, %v3327_v51  ;;  %v2019_v30 = vpop.f32.mrb[18].mxu1 }
 0x384   : > { %v2060_v31 = vmax.f32 %v2016_v27, 0.0  ;;  %v2020_v33 = vadd.f32 %v2019_v30, %v3324_v32  ;;  %v2021_v52 = vpop.f32.mrb[19].mxu1 }
 0x385   : > { %v2061_v34 = vmax.f32 %v2018_v29, 0.0  ;;  %v2022_v35 = vadd.f32 %v2021_v52, %v3327_v51 }
 0x386   : > { %v2062_v36 = vmax.f32 %v2020_v33, 0.0 }
 0x387   : > { %v2450_v37 = vpack.c.bf16 %v2061_v34, %v2060_v31  ;;  %v2063_v38 = vmax.f32 %v2022_v35, 0.0 }
 0x389   : > { %2164 = vst [vmem:[%s3421_s7 + $0x40] sm:$0xff] %v2450_v37  ;;  %v2451_v39 = vpack.c.bf16 %v2063_v38, %v2062_v36  ;;  %v2025_v40 = vpop.f32.mrb[20].mxu1 }
 0x38a   : > { %v2026_v41 = vadd.f32 %v2025_v40, %v3324_v32  ;;  %v2027_v42 = vpop.f32.mrb[21].mxu1 }
 0x38b   : > { %2165 = vst [vmem:[%s3421_s7 + $0x48] sm:$0xff] %v2451_v39  ;;  %v2028_v53 = vadd.f32 %v2027_v42, %v3327_v51  ;;  %v2029_v43 = vpop.f32.mrb[22].mxu1 }
 0x38c   : > { %v2064_v19 = vmax.f32 %v2026_v41, 0.0  ;;  %v2030_v44 = vadd.f32 %v2029_v43, %v3324_v32  ;;  %v2031_v45 = vpop.f32.mrb[23].mxu1 }
 0x38d   : > { %v2065_v46 = vmax.f32 %v2028_v53, 0.0  ;;  %v2032_v25 = vadd.f32 %v2031_v45, %v3327_v51 }
 0x38e   : > { %v2066_v47 = vmax.f32 %v2030_v44, 0.0 }
 0x38f   : > { %v2452_v60 = vpack.c.bf16 %v2065_v46, %v2064_v19  ;;  %v2067_v48 = vmax.f32 %v2032_v25, 0.0 }
 0x391   : > { %2166 = vst [vmem:[%s3421_s7 + $0x50] sm:$0xff] %v2452_v60  ;;  %v2453_v49 = vpack.c.bf16 %v2067_v48, %v2066_v47  ;;  %v2035_v50 = vpop.f32.mrb[24].mxu1 }
 0x392   : > { %v2036_v54 = vadd.f32 %v2035_v50, %v3324_v32  ;;  %v2037_v55 = vpop.f32.mrb[25].mxu1 }
 0x393   : > { %2167 = vst [vmem:[%s3421_s7 + $0x58] sm:$0xff] %v2453_v49  ;;  %v2038_v56 = vadd.f32 %v2037_v55, %v3327_v51  ;;  %v2039_v57 = vpop.f32.mrb[26].mxu1 }
 0x394   : > { %v2068_v58 = vmax.f32 %v2036_v54, 0.0  ;;  %v2040_v59 = vadd.f32 %v2039_v57, %v3324_v32  ;;  %v2041_v61 = vpop.f32.mrb[27].mxu1 }
 0x395   : > { %v2069_v62 = vmax.f32 %v2038_v56, 0.0  ;;  %v2042_v63 = vadd.f32 %v2041_v61, %v3327_v51 }
 0x396   : > { %v2070_v0 = vmax.f32 %v2040_v59, 0.0 }
 0x397   : > { %v2454_v1 = vpack.c.bf16 %v2069_v62, %v2068_v58  ;;  %v2071_v2 = vmax.f32 %v2042_v63, 0.0 }
 0x399   : > { %2168 = vst [vmem:[%s3421_s7 + $0x60] sm:$0xff] %v2454_v1  ;;  %v2455_v3 = vpack.c.bf16 %v2071_v2, %v2070_v0 }
 0x39b   : > { %2169 = vst [vmem:[%s3421_s7 + $0x68] sm:$0xff] %v2455_v3 }
 0x39c PF: > { %s17_s28 = sadd.s32 1, %s2799_s28   ;;  %s3422_s24 = smov %s2787_s25 }
 0x39d   : > { %p14_p12 = scmp.ge.s32.totalorder %s17_s28, 7   ;;  %s3423_s25 = smov %s2877_s9 }
 0x39e   : > { %s3424_s26 = smov %s2795_s27  ;;  %s3425_s27 = smov %s3427_s29 }
 0x39f   :  { %16 = sbr.rel (!%p14_p12) target bundleno = 3 (0x3), region = 117 }

// kernel: nin_forward.13
= control target key start
LH: loop header
LB: loop body
LE: loop exit
PB: predicated region body
PF: predicated region fallthrough
CT: control target
= control target key end

     0   :  { %v160_v3 = vmov 1966171168   ;;  %v113_v9 = vlaneseq  ;;  %vm126_vm0 = vcmask 1040384   ;;  %vm127_vm1 = vsmask.f32 256  ;;  %s216_s0 = inlined_call_operand.vmem [shape: bf16[2,3,3,384], index: 0, kind: input, shape index: {}]   ;;  %s217_s1 = inlined_call_operand.vmem [shape: bf16[2,1,1,384], index: 1, kind: output, shape index: {}]  }
   0x1   :  { %v8_v0 = vld [vmem:[%s216_s0] sm:$0x3f]  ;;  %v9_v1 = vld [vmem:[%s216_s0 + $0x6] sm:$0x3f]  ;;  %v10_v2 = vld [vmem:[%s216_s0 + $0xc] sm:$0x3f]  ;;  %v111_v4 = vunpack.c.l.s4 %v160_v3 }
   0x2   :  { %v15_v5 = vshrl.u32 %v8_v0, 16  ;;  %v30_v6 = vrot.slane %v9_v1, 7  ;;  %v37_v7 = vshll.u32 %v9_v1, 16  ;;  %v51_v8 = vshrl.u32 %v10_v2, 16  ;;  %v11_v10 = vld [vmem:[%s216_s0 + $0x12] sm:$0x3f]  ;;  %vm191_vm4 = vmand %vm126_vm0, %vm127_vm1 }
   0x3   :  { %v12_v15 = vld [vmem:[%s216_s0 + $0x18] sm:$0x3f]  ;;  %v13_v16 = vld [vmem:[%s216_s0 + $0x1e] sm:$0x3f]  ;;  %v112_v17 = vunpack.c.0.s8 %v111_v4  ;;  %vm129_vm2 = vcmask 1041409   ;;  %v20_v21 = vshrl.u32 %v11_v10, 16 }
   0x4   :  { %v26_v11 = vmax.bf16 %v15_v5, %v8_v0  ;;  %v34_v12 = vmax.bf16 %v30_v6, %v8_v0  ;;  %v149_v13 = vrot.slane %v37_v7, 9  ;;  %v62_v14 = vmax.bf16 %v51_v8, %v10_v2  ;;  %v137_v44 = vld [vmem:[%s217_s1] sm:$0x7]  ;;  %v140_v51 = vld [vmem:[%s217_s1 + $0x3] sm:$0x7] }
   0x5   :  { %vm130_vm3 = vsmask.f32 1280  ;;  %v114_v22 = vshrl.u32 %v113_v9, 7  ;;  %v31_v24 = vrot.slane %v12_v15, 7  ;;  %v42_v25 = vshll.u32 %v12_v15, 16 }
   0x6   :  { %v48_v18 = vmax.bf16 %v149_v13, %v9_v1  ;;  %v153_v19 = vrot.slane %v34_v12, 9  ;;  %v75_v20 = vshll.u32 %v62_v14, 16  ;;  %v56_v26 = vshrl.u32 %v13_v16, 16  ;;  %vm195_vm5 = vmand %vm129_vm2, %vm130_vm3 }
   0x7   :  { %vm133_vm6 = vcmask 1042434   ;;  %vm134_vm7 = vsmask.f32 2304  ;;  %v27_v30 = vmax.bf16 %v20_v21, %v11_v10  ;;  %v35_v31 = vmax.bf16 %v31_v24, %v11_v10  ;;  %vm132_vm8 = vmor %vm195_vm5, %vm191_vm4 }
   0x8   :  { %v72_v27 = vmax.bf16 %v153_v19, %v26_v11  ;;  %v82_v28 = vmax.bf16 %v75_v20, %v48_v18  ;;  %v150_v32 = vrot.slane %v42_v25, 9  ;;  %v63_v33 = vmax.bf16 %v56_v26, %v13_v16  ;;  %vm135_vm9 = vmand %vm133_vm6, %vm134_vm7 }
   0x9   :  { %v157_v35 = vrot.slane %v10_v2, 9  ;;  %v154_v37 = vrot.slane %v35_v31, 9  ;;  %v115_v40 = vsub.s32 %v112_v17, %v114_v22  ;;  %vm136_vm10 = vmor %vm135_vm9, %vm132_vm8  ;;  %v158_v46 = vrot.slane %v13_v16, 9 }
   0xa   :  { %v85_v34 = vshrl.u32 %v82_v28, 16  ;;  %v49_v36 = vmax.bf16 %v150_v32, %v12_v15  ;;  %v78_v38 = vshll.u32 %v63_v33, 16 }
   0xb   :  { %v73_v41 = vmax.bf16 %v154_v37, %v27_v30 }
   0xc   :  { %v96_v39 = vmax.bf16 %v85_v34, %v72_v27  ;;  %v83_v42 = vmax.bf16 %v78_v38, %v49_v36 }
   0xe   :  { %v106_v43 = vmax.bf16 %v157_v35, %v96_v39  ;;  %v90_v45 = vshrl.u32 %v83_v42, 16 }
  0x10   :  { %v116_v47 = vrot.slane %v106_v43, %v115_v40  ;;  %v97_v48 = vmax.bf16 %v90_v45, %v73_v41 }
  0x12   :  { %v138_v49 = vsel %vm136_vm10, %v116_v47, %v137_v44  ;;  %v107_v50 = vmax.bf16 %v158_v46, %v97_v48 }
  0x13   :  { %139 = vst [vmem:[%s217_s1] sm:$0x7] %v138_v49 }
  0x14   :  { %v123_v52 = vrot.slane %v107_v50, %v115_v40 }
  0x16   :  { %v141_v53 = vsel %vm136_vm10, %v123_v52, %v140_v51 }
  0x17   :  { %142 = vst [vmem:[%s217_s1 + $0x3] sm:$0x7] %v141_v53 }

// kernel: nin_forward.14
= control target key start
LH: loop header
LB: loop body
LE: loop exit
PB: predicated region body
PF: predicated region fallthrough
CT: control target
= control target key end

     0   :  { %s1425_s24 = smov 0   ;;  %s1427_s25 = smov 0   ;;  %s1592_s0 = inlined_call_operand.vmem [shape: bf16[16,3584], index: 0, kind: input, shape index: {}]   ;;  %s1593_s1 = inlined_call_operand.vmem [shape: bf16[3584,128], index: 1, kind: input, shape index: {}]   ;;  %s1594_s2 = inlined_call_operand.vmem [shape: f32[1,128], index: 2, kind: input, shape index: {}]   ;;  %s1595_s3 = inlined_call_operand.vmem [shape: bf16[128,128], index: 3, kind: input, shape index: {}]   ;;  %s1596_s4 = inlined_call_operand.vmem [shape: f32[1,128], index: 4, kind: input, shape index: {}]   ;;  %s1597_s5 = inlined_call_operand.vmem [shape: bf16[128,128], index: 5, kind: input, shape index: {}]   ;;  %s1598_s6 = inlined_call_operand.vmem [shape: f32[1,128], index: 6, kind: input, shape index: {}]   ;;  %s1599_s7 = inlined_call_operand.vmem [shape: bf16[16,128], index: 7, kind: output, shape index: {}]  }
   0x1   :  { %s1429_s26 = smov 0   ;;  %s1431_s27 = smov 0  }
   0x2   :  { %s1433_s28 = smov 0  }
   0x3 LB: > { %s26_s29 = sadd.s32 1, %s1376_s27  ;;  %p45_p1 = scmp.ne.s32.totalorder %s1368_s25, %s1364_s24  ;;  %s1380_s28 = sphi %s1433_s28, %s17_s28   ;;  %s1376_s27 = sphi %s1431_s27, %s1603_s27   ;;  %s1372_s26 = sphi %s1429_s26, %s1602_s26   ;;  %s1368_s25 = sphi %s1427_s25, %s1601_s25   ;;  %s1364_s24 = sphi %s1425_s24, %s1600_s24  }
   0x4   : > { %p27_p0 = scmp.ge.s32.totalorder %s26_s29, 7  ;;  %p46_p2 = scmp.eq.s32.totalorder %s1380_s28, 0 }
   0x5   : > { %s38_s8 = sadd.s32 1, %s1368_s25  ;;  %p1064_p5 = scmp.ge.s32.totalorder %s1380_s28, 7 }
   0x6   : > { %s1605_s29 = smov (%p27_p0, %s26_s29), 0  ;;  %p47_p3 = por %p46_p2, %p45_p1 }
   0x7   : > { %s34_s30 = ssub.s32 %s1376_s27, %s1605_s29  ;;  %243 = sbr.rel (%p1064_p5) target bundleno = 21 (0x15), region = 36 }
   0x8   : > { %p36_p4 = scmp.eq.s32.totalorder %s34_s30, 0 }
   0xa   : > { %s1460_s9 = scalar_select %p36_p4, %s1368_s25, %s38_s8  }
   0xe   : > { %246 = sbr.rel (!%p47_p3) target bundleno = 21 (0x15), region = 40  ;;  %s248_s10 = sand.u32 (%p47_p3), 1, %s1368_s25  }
   0xf   : > { %s1135_s11 = sshll.u32 (%p47_p3), %s1376_s27, 4  ;;  %s1065_s12 = sshll.u32 (%p47_p3), %s248_s10, 5 }
  0x10   : > { %s256_s15 = scalar_lea.vmem (%p47_p3), %s1592_s0, %s1135_s11  ;;  %s250_s16 = scalar_lea.vmem (%p47_p3), [#allocation3], %s1065_s12 }
  0x11   : > { %v269_v0 = vld [vmem:[%s256_s15] sm:$0xff] (%p47_p3)  ;;  %v271_v1 = vld [vmem:[%s256_s15 + $0x8] sm:$0xff] (%p47_p3)  ;;  %v273_v2 = vld [vmem:[%s256_s15 + $0x70] sm:$0xff] (%p47_p3) }
  0x12   : > { %270 = vst [vmem:[%s250_s16] sm:$0xff] (%p47_p3), %v269_v0  ;;  %272 = vst [vmem:[%s250_s16 + $0x8] sm:$0xff] (%p47_p3), %v271_v1  ;;  %v275_v3 = vld [vmem:[%s256_s15 + $0x78] sm:$0xff] (%p47_p3) }
  0x13   : > { %274 = vst [vmem:[%s250_s16 + $0x10] sm:$0xff] (%p47_p3), %v273_v2  ;;  %276 = vst [vmem:[%s250_s16 + $0x18] sm:$0xff] (%p47_p3), %v275_v3 }
  0x15 PF: > { %p1068_p6 = scmp.ge.s32.totalorder %s1380_s28, 1  ;;  %p290_p7 = scmp.lt.s32.totalorder %s1380_s28, 8 }
  0x17   : > { %p291_p8 = pnand %p1068_p6, %p290_p7 }
  0x18   : > { %s297_s17 = sand.u32 (!%p291_p8), 1, %s1364_s24   ;;  %s1070_s18 = sshll.u32 (!%p291_p8), %s1372_s26, 6 }
  0x19   : > { %294 = sbr.rel (%p291_p8) target bundleno = 750 (0x2ee), region = 67  ;;  %s1069_s19 = sshll.u32 (!%p291_p8), %s297_s17, 5 }
  0x1a   : > { %p336_p9 = scmp.lt.s32.totalorder (!%p291_p8), %s1070_s18, 447  ;;  %s1477_s30 = scalar_lea.vmem (!%p291_p8), [#allocation3], %s1069_s19 }
  0x1b   : > { %p1072_p10 = scmp.ne.s32.totalorder (!%p291_p8), %s1372_s26, 0 }
  0x20   : > { %s1607_s18 = smov (!%p336_p9, %s1070_s18), 447  ;;  %351 = sbr.rel (%p1072_p10) target bundleno = 39 (0x27), region = 75 }
  0x21   : > { %s1071_s20 = sshll.u32 %s1607_s18, 2  ;;  %v1382_v4 = vmov (!%p1072_p10), 0.0  }
  0x22   : > { %s1475_s23 = scalar_lea.vmem %s1593_s1, %s1071_s20  ;;  %352 = vst [vmem:[#allocation2] sm:$0xff] (!%p1072_p10), %v1382_v4  ;;  %353 = vst [vmem:[#allocation2 + $0x8] sm:$0xff] (!%p1072_p10), %v1382_v4 }
  0x27 PF: > { %v1288_v5 = vld [vmem:[%s1475_s23 + $0x40] sm:$0xff]   ;;  %v1292_v9 = vld [vmem:[%s1475_s23 + $0x48] sm:$0xff]   ;;  %v1296_v13 = vld [vmem:[%s1475_s23 + $0x50] sm:$0xff]   ;;  %p1109_p11 = scmp.ne.s32.totalorder %s1372_s26, 6 }
  0x28   : > { %v1289_v6 = vld [vmem:[%s1475_s23 + $0xc0] sm:$0xff]   ;;  %1143 = vmatprep.subr.bf16.mxu0 %v1288_v5  ;;  %v1293_v10 = vld [vmem:[%s1475_s23 + $0xc8] sm:$0xff]   ;;  %v1297_v14 = vld [vmem:[%s1475_s23 + $0xd0] sm:$0xff]   ;;  %v1383_v60 = vmov (!%p1109_p11), 0.0   ;;  %vm1384_vm0 = vmmov (!%p1109_p11), 0  }
  0x29   : > { %v1290_v7 = vld [vmem:[%s1475_s23] sm:$0xff]   ;;  %1165 = vmatprep.subr.bf16.mxu1 %v1289_v6  ;;  %v1294_v11 = vld [vmem:[%s1475_s23 + $0x8] sm:$0xff]   ;;  %v1298_v15 = vld [vmem:[%s1475_s23 + $0x10] sm:$0xff]  }
  0x2a   : > { %v1291_v8 = vld [vmem:[%s1475_s23 + $0x80] sm:$0xff]   ;;  %1144 = vmatpush3.bf16.msra.mxu0 %v1290_v7  ;;  %v1295_v12 = vld [vmem:[%s1475_s23 + $0x88] sm:$0xff]   ;;  %v1299_v16 = vld [vmem:[%s1475_s23 + $0x90] sm:$0xff]  }
  0x2b   : > { %1166 = vmatpush3.bf16.msra.mxu1 %v1291_v8  ;;  %1145 = vmatprep.subr.bf16.mxu0 %v1292_v9  ;;  %v1300_v17 = vld [vmem:[%s1475_s23 + $0x58] sm:$0xff]   ;;  %v1304_v21 = vld [vmem:[%s1475_s23 + $0x60] sm:$0xff]   ;;  %v1308_v25 = vld [vmem:[%s1475_s23 + $0x68] sm:$0xff]  }
  0x2c   : > { %1167 = vmatprep.subr.bf16.mxu1 %v1293_v10  ;;  %v1301_v18 = vld [vmem:[%s1475_s23 + $0xd8] sm:$0xff]   ;;  %v1305_v22 = vld [vmem:[%s1475_s23 + $0xe0] sm:$0xff]   ;;  %v1309_v26 = vld [vmem:[%s1475_s23 + $0xe8] sm:$0xff]  }
  0x2d   : > { %v1302_v19 = vld [vmem:[%s1475_s23 + $0x18] sm:$0xff]   ;;  %v1306_v23 = vld [vmem:[%s1475_s23 + $0x20] sm:$0xff]   ;;  %v1310_v27 = vld [vmem:[%s1475_s23 + $0x28] sm:$0xff]  }
  0x2e   : > { %1146 = vmatpush3.bf16.msra.mxu0 %v1294_v11  ;;  %v1303_v20 = vld [vmem:[%s1475_s23 + $0x98] sm:$0xff]   ;;  %v1307_v24 = vld [vmem:[%s1475_s23 + $0xa0] sm:$0xff]   ;;  %v1311_v28 = vld [vmem:[%s1475_s23 + $0xa8] sm:$0xff]  }
  0x2f   : > { %1168 = vmatpush3.bf16.msra.mxu1 %v1295_v12  ;;  %1147 = vmatprep.subr.bf16.mxu0 %v1296_v13  ;;  %v1312_v29 = vld [vmem:[%s1475_s23 + $0x70] sm:$0xff]   ;;  %v1316_v33 = vld [vmem:[%s1475_s23 + $0x78] sm:$0xff]   ;;  %v354_v50 = vld [vmem:[#allocation2] sm:$0xff] }
  0x30   : > { %1169 = vmatprep.subr.bf16.mxu1 %v1297_v14  ;;  %v1313_v30 = vld [vmem:[%s1475_s23 + $0xf0] sm:$0xff]   ;;  %v1317_v34 = vld [vmem:[%s1475_s23 + $0xf8] sm:$0xff]   ;;  %v355_v55 = vld [vmem:[#allocation2 + $0x8] sm:$0xff] }
  0x31   : > { %v1314_v31 = vld [vmem:[%s1475_s23 + $0x30] sm:$0xff]   ;;  %v1318_v35 = vld [vmem:[%s1475_s23 + $0x38] sm:$0xff]   ;;  %v1326_v59 = vld [vmem:[%s1595_s3] sm:$0xff] (!%p1109_p11)  }
  0x32   : > { %1148 = vmatpush3.bf16.msra.mxu0 %v1298_v15  ;;  %v1315_v32 = vld [vmem:[%s1475_s23 + $0xb0] sm:$0xff]   ;;  %v1319_v36 = vld [vmem:[%s1475_s23 + $0xb8] sm:$0xff]   ;;  %v1327_v61 = vld [vmem:[%s1595_s3 + $0x8] sm:$0xff] (!%p1109_p11)  }
  0x33   : > { %1170 = vmatpush3.bf16.msra.mxu1 %v1299_v16  ;;  %1149 = vmatprep.subr.bf16.mxu0 %v1300_v17  ;;  %v1320_v37 = vld [vmem:[%s1477_s30] ss:$16 sps:$4 sm:$0xff]   ;;  %v1322_v38 = vld [vmem:[%s1477_s30 + $0x4] ss:$16 sps:$4 sm:$0xff]   ;;  %v1323_v39 = vld [vmem:[%s1477_s30 + $0x8] ss:$16 sps:$4 sm:$0xff]  }
  0x34   : > { %1171 = vmatprep.subr.bf16.mxu1 %v1301_v18  ;;  %v1325_v40 = vld [vmem:[%s1477_s30 + $0xc] ss:$16 sps:$4 sm:$0xff]   ;;  %668 = vmatprep.mubr.bf16.mxu0 %v1322_v38  ;;  %v1328_v62 = vld [vmem:[%s1595_s3 + $0x10] sm:$0xff] (!%p1109_p11)   ;;  %v1334_v63 = vld [vmem:[%s1597_s5] sm:$0xff] (!%p1109_p11)  }
  0x35   : > { %709 = vmatprep.mubr.bf16.mxu1 %v1325_v40  ;;  %v1329_v0 = vld [vmem:[%s1595_s3 + $0x18] sm:$0xff] (!%p1109_p11)   ;;  %v1335_v1 = vld [vmem:[%s1597_s5 + $0x8] sm:$0xff] (!%p1109_p11)   ;;  %v1330_v2 = vld [vmem:[%s1595_s3 + $0x20] sm:$0xff] (!%p1109_p11)  }
  0x36   : > { %1150 = vmatpush3.bf16.msra.mxu0 %v1302_v19  ;;  %v1336_v3 = vld [vmem:[%s1597_s5 + $0x10] sm:$0xff] (!%p1109_p11)   ;;  %v1331_v4 = vld [vmem:[%s1595_s3 + $0x28] sm:$0xff] (!%p1109_p11)   ;;  %v1110_v7 = vld [vmem:[%s1594_s2] ss:$0 sm:$0xff] (!%p1109_p11) }
  0x37   : > { %1172 = vmatpush3.bf16.msra.mxu1 %v1303_v20  ;;  %1151 = vmatprep.subr.bf16.mxu0 %v1304_v21  ;;  %v1337_v8 = vld [vmem:[%s1597_s5 + $0x18] sm:$0xff] (!%p1109_p11)   ;;  %v1332_v11 = vld [vmem:[%s1595_s3 + $0x30] sm:$0xff] (!%p1109_p11)   ;;  %v1338_v12 = vld [vmem:[%s1597_s5 + $0x20] sm:$0xff] (!%p1109_p11)  }
  0x38   : > { %1173 = vmatprep.subr.bf16.mxu1 %v1305_v22  ;;  %v1333_v15 = vld [vmem:[%s1595_s3 + $0x38] sm:$0xff] (!%p1109_p11)   ;;  %v1339_v16 = vld [vmem:[%s1597_s5 + $0x28] sm:$0xff] (!%p1109_p11)   ;;  %v1340_v18 = vld [vmem:[%s1597_s5 + $0x30] sm:$0xff] (!%p1109_p11)  }
  0x39   : > { %v1341_v19 = vld [vmem:[%s1597_s5 + $0x38] sm:$0xff] (!%p1109_p11)   ;;  %v1111_v20 = vld [vmem:[%s1596_s4] ss:$0 sm:$0xff] (!%p1109_p11) }
  0x3a   : > { %1152 = vmatpush3.bf16.msra.mxu0 %v1306_v23 }
  0x3b   : > { %1174 = vmatpush3.bf16.msra.mxu1 %v1307_v24  ;;  %1153 = vmatprep.subr.bf16.mxu0 %v1308_v25 }
  0x3c   : > { %1175 = vmatprep.subr.bf16.mxu1 %v1309_v26 }
  0x3e   : > { %1154 = vmatpush3.bf16.msra.mxu0 %v1310_v27 }
  0x3f   : > { %1176 = vmatpush3.bf16.msra.mxu1 %v1311_v28  ;;  %1155 = vmatprep.subr.bf16.mxu0 %v1312_v29 }
  0x40   : > { %1177 = vmatprep.subr.bf16.mxu1 %v1313_v30  ;;  %v1120_v30 = vld [vmem:[%s1598_s6] ss:$0 sm:$0xff] (!%p1109_p11) }
  0x42   : > { %1156 = vmatpush3.bf16.msra.mxu0 %v1314_v31 }
  0x43   : > { %1178 = vmatpush3.bf16.msra.mxu1 %v1315_v32  ;;  %1157 = vmatprep.subr.bf16.mxu0 %v1316_v33 }
  0x44   : > { %1179 = vmatprep.subr.bf16.mxu1 %v1317_v34 }
  0x46   : > { %1158 = vmatpush3.bf16.msra.mxu0 %v1318_v35 }
  0x47   : > { %1180 = vmatpush3.bf16.msra.mxu1 %v1319_v36  ;;  %1205 = vmatprep.subr.bf16.mxu0 (!%p1109_p11), %v1383_v60 }
  0x48   : > { %1225 = vmatprep.subr.bf16.mxu1 (!%p1109_p11), %v1383_v60 }
  0x49   : > { %669 = vmatmul.mubr.bf16.vlgmr.msra.gmra.mrb[0].mxu0 %v1320_v37 }
  0x4a   : > { %710 = vmatmul.mubr.bf16.vlgmr.msra.gmra.mrb[0].mxu1 %v1323_v39  ;;  %1206 = vmatpush3.bf16.msra.mxu0 (!%p1109_p11), %v1326_v59 }
  0x4b   : > { %1221 = vmatprep.mubr.msk.bf16.mxu0 (!%p1109_p11), %vm1384_vm0, %v1383_v60  ;;  %1207 = vmatprep.subr.bf16.mxu0 (!%p1109_p11), %v1383_v60 }
  0x4c   : > { %1241 = vmatprep.mubr.msk.bf16.mxu1 (!%p1109_p11), %vm1384_vm0, %v1383_v60  ;;  %1226 = vmatpush3.bf16.msra.mxu1 (!%p1109_p11), %v1334_v63 }
  0x4d   : > { %1227 = vmatprep.subr.bf16.mxu1 (!%p1109_p11), %v1383_v60 }
  0x4e   : > { %1208 = vmatpush3.bf16.msra.mxu0 (!%p1109_p11), %v1327_v61 }
  0x4f   : > { %1209 = vmatprep.subr.bf16.mxu0 (!%p1109_p11), %v1383_v60 }
  0x50   : > { %1228 = vmatpush3.bf16.msra.mxu1 (!%p1109_p11), %v1335_v1 }
  0x51   : > { %1229 = vmatprep.subr.bf16.mxu1 (!%p1109_p11), %v1383_v60 }
  0x52   : > { %1210 = vmatpush3.bf16.msra.mxu0 (!%p1109_p11), %v1328_v62 }
  0x53   : > { %1211 = vmatprep.subr.bf16.mxu0 (!%p1109_p11), %v1383_v60 }
  0x54   : > { %1230 = vmatpush3.bf16.msra.mxu1 (!%p1109_p11), %v1336_v3 }
  0x55   : > { %1231 = vmatprep.subr.bf16.mxu1 (!%p1109_p11), %v1383_v60 }
  0x56   : > { %1212 = vmatpush3.bf16.msra.mxu0 (!%p1109_p11), %v1329_v0 }
  0x57   : > { %1213 = vmatprep.subr.bf16.mxu0 (!%p1109_p11), %v1383_v60 }
  0x58   : > { %1232 = vmatpush3.bf16.msra.mxu1 (!%p1109_p11), %v1337_v8 }
  0x59   : > { %1233 = vmatprep.subr.bf16.mxu1 (!%p1109_p11), %v1383_v60 }
  0x5a   : > { %1214 = vmatpush3.bf16.msra.mxu0 (!%p1109_p11), %v1330_v2 }
  0x5b   : > { %1215 = vmatprep.subr.bf16.mxu0 (!%p1109_p11), %v1383_v60 }
  0x5c   : > { %1234 = vmatpush3.bf16.msra.mxu1 (!%p1109_p11), %v1338_v12 }
  0x5d   : > { %1235 = vmatprep.subr.bf16.mxu1 (!%p1109_p11), %v1383_v60 }
  0x5e   : > { %1216 = vmatpush3.bf16.msra.mxu0 (!%p1109_p11), %v1331_v4 }
  0x5f   : > { %1217 = vmatprep.subr.bf16.mxu0 (!%p1109_p11), %v1383_v60 }
  0x60   : > { %1236 = vmatpush3.bf16.msra.mxu1 (!%p1109_p11), %v1339_v16 }
  0x61   : > { %1237 = vmatprep.subr.bf16.mxu1 (!%p1109_p11), %v1383_v60 }
  0x62   : > { %1218 = vmatpush3.bf16.msra.mxu0 (!%p1109_p11), %v1332_v11 }
  0x63   : > { %1219 = vmatprep.subr.bf16.mxu0 (!%p1109_p11), %v1383_v60 }
  0x64   : > { %1238 = vmatpush3.bf16.msra.mxu1 (!%p1109_p11), %v1340_v18 }
  0x65   : > { %1239 = vmatprep.subr.bf16.mxu1 (!%p1109_p11), %v1383_v60 }
  0x66   : > { %1220 = vmatpush3.bf16.msra.mxu0 (!%p1109_p11), %v1333_v15 }
  0x68   : > { %1240 = vmatpush3.bf16.msra.mxu1 (!%p1109_p11), %v1341_v19 }
 0x11c   : > { %v1159_v41 = vpop.f32.mrb[0].mxu0 }
 0x11d   : > { %v1181_v42 = vpop.f32.mrb[0].mxu1  ;;  %v1160_v43 = vpop.f32.mrb[1].mxu0 }
 0x11e   : > { %v1161_v44 = vadd.f32 %v1160_v43, %v1159_v41  ;;  %v1182_v45 = vpop.f32.mrb[1].mxu1  ;;  %v1162_v46 = vpop.f32.mrb[2].mxu0 }
 0x11f   : > { %v1183_v47 = vadd.f32 %v1182_v45, %v1181_v42  ;;  %v1184_v48 = vpop.f32.mrb[2].mxu1  ;;  %v1163_v49 = vpop.f32.mrb[3].mxu0 }
 0x120   : > { %v1164_v51 = vadd.f32 %v1163_v49, %v1162_v46  ;;  %v1185_v52 = vpop.f32.mrb[3].mxu1 }
 0x121   : > { %v712_v53 = vadd.f32 %v1183_v47, %v1161_v44  ;;  %v1186_v54 = vadd.f32 %v1185_v52, %v1184_v48  ;;  %725 = sbr.rel (%p1109_p11) target bundleno = 750 (0x2ee), region = 79 }
 0x123   : > { %v718_v56 = vadd.f32 %v712_v53, %v354_v50  ;;  %v715_v57 = vadd.f32 %v1186_v54, %v1164_v51 }
 0x125   : > { %720 = vst [vmem:[#allocation2] sm:$0xff] %v718_v56  ;;  %v719_v58 = vadd.f32 %v715_v57, %v355_v55 }
 0x127   : > { %721 = vst [vmem:[#allocation2 + $0x8] sm:$0xff] %v719_v58 }
 0x12c   : > { %v726_v5 = vld [vmem:[#allocation2] sm:$0xff] }
 0x12d   : > { %v735_v9 = vadd.f32 %v1110_v7, %v726_v5 }
 0x12e   : > { %v727_v6 = vld [vmem:[#allocation2 + $0x8] sm:$0xff] }
 0x12f   : > { %v736_v10 = vadd.f32 %v1110_v7, %v727_v6  ;;  %v737_v13 = vmax.f32 %v735_v9, 0.0 }
 0x131   : > { %v738_v14 = vmax.f32 %v736_v10, 0.0 }
 0x133   : > { %v739_v17 = vpack.c.bf16 %v738_v14, %v737_v13 }
 0x135   : > { %1222 = vmatmul.mubr.bf16.vlgmr.msra.gmra.mrb[0].mxu0 %v739_v17 }
 0x208   : > { %v845_v21 = vpop.f32.mrb[0].mxu0 }
 0x209   : > { %v846_v22 = vadd.f32 %v1111_v20, %v845_v21  ;;  %v1223_v23 = vpop.f32.mrb[1].mxu0 }
 0x20a   : > { %v848_v24 = vpop.f32.mrb[2].mxu0 }
 0x20b   : > { %v849_v25 = vadd.f32 %v1111_v20, %v848_v24  ;;  %v1224_v26 = vpop.f32.mrb[3].mxu0  ;;  %v852_v27 = vmax.f32 %v846_v22, 0.0 }
 0x20d   : > { %v853_v28 = vmax.f32 %v849_v25, 0.0 }
 0x20f   : > { %v854_v29 = vpack.c.bf16 %v853_v28, %v852_v27 }
 0x211   : > { %1242 = vmatmul.mubr.bf16.vlgmr.msra.gmra.mrb[0].mxu1 %v854_v29 }
 0x2e4   : > { %v960_v31 = vpop.f32.mrb[0].mxu1 }
 0x2e5   : > { %v961_v32 = vadd.f32 %v1120_v30, %v960_v31  ;;  %v1243_v33 = vpop.f32.mrb[1].mxu1 }
 0x2e6   : > { %v963_v34 = vpop.f32.mrb[2].mxu1 }
 0x2e7   : > { %v964_v35 = vadd.f32 %v1120_v30, %v963_v34  ;;  %v1244_v36 = vpop.f32.mrb[3].mxu1  ;;  %v967_v37 = vmax.f32 %v961_v32, 0.0 }
 0x2e9   : > { %v968_v38 = vmax.f32 %v964_v35, 0.0 }
 0x2eb   : > { %v1141_v39 = vpack.c.bf16 %v968_v38, %v967_v37 }
 0x2ed   : > { %1142 = vst [vmem:[%s1599_s7] sm:$0xff] %v1141_v39  }
 0x2ee PF: > { %s17_s28 = sadd.s32 1, %s1380_s28   ;;  %s1600_s24 = smov %s1368_s25 }
 0x2ef   : > { %p14_p12 = scmp.ge.s32.totalorder %s17_s28, 9   ;;  %s1601_s25 = smov %s1460_s9 }
 0x2f0   : > { %s1602_s26 = smov %s1376_s27  ;;  %s1603_s27 = smov %s1605_s29 }
 0x2f1   :  { %16 = sbr.rel (!%p14_p12) target bundleno = 3 (0x3), region = 117 }

// kernel: nin_forward.12
= control target key start
LH: loop header
LB: loop body
LE: loop exit
PB: predicated region body
PF: predicated region fallthrough
CT: control target
= control target key end

     0   :  { %s3883_s24 = smov 0   ;;  %s3885_s25 = smov 0   ;;  %s4563_s0 = inlined_call_operand.vmem [shape: bf16[32,2560], index: 0, kind: input, shape index: {}]   ;;  %s4564_s1 = inlined_call_operand.vmem [shape: bf16[2560,384], index: 1, kind: input, shape index: {}]   ;;  %s4565_s2 = inlined_call_operand.vmem [shape: f32[1,384], index: 2, kind: input, shape index: {}]   ;;  %s4566_s3 = inlined_call_operand.vmem [shape: bf16[384,384], index: 3, kind: input, shape index: {}]   ;;  %s4567_s4 = inlined_call_operand.vmem [shape: f32[1,384], index: 4, kind: input, shape index: {}]   ;;  %s4568_s5 = inlined_call_operand.vmem [shape: bf16[384,384], index: 5, kind: input, shape index: {}]   ;;  %s4569_s6 = inlined_call_operand.vmem [shape: f32[1,384], index: 6, kind: input, shape index: {}]   ;;  %s4570_s7 = inlined_call_operand.vmem [shape: bf16[32,384], index: 7, kind: output, shape index: {}]  }
   0x1   :  { %s3887_s26 = smov 0   ;;  %s3889_s27 = smov 0  }
   0x2   :  { %s3891_s28 = smov 0  }
   0x3 LB: > { %s26_s29 = sadd.s32 1, %s3835_s27  ;;  %p45_p1 = scmp.ne.s32.totalorder %s3827_s25, %s3823_s24  ;;  %s3839_s28 = sphi %s3891_s28, %s17_s28   ;;  %s3835_s27 = sphi %s3889_s27, %s4574_s27   ;;  %s3831_s26 = sphi %s3887_s26, %s4573_s26   ;;  %s3827_s25 = sphi %s3885_s25, %s4572_s25   ;;  %s3823_s24 = sphi %s3883_s24, %s4571_s24  }
   0x4   : > { %p27_p0 = scmp.ge.s32.totalorder %s26_s29, 5  ;;  %p46_p2 = scmp.eq.s32.totalorder %s3839_s28, 0 }
   0x5   : > { %s38_s8 = sadd.s32 1, %s3827_s25  ;;  %p2935_p5 = scmp.ge.s32.totalorder %s3839_s28, 5 }
   0x6   : > { %s4576_s29 = smov (%p27_p0, %s26_s29), 0  ;;  %p47_p3 = por %p46_p2, %p45_p1 }
   0x7   : > { %s34_s30 = ssub.s32 %s3835_s27, %s4576_s29  ;;  %243 = sbr.rel (%p2935_p5) target bundleno = 22 (0x16), region = 36 }
   0x8   : > { %p36_p4 = scmp.eq.s32.totalorder %s34_s30, 0 }
   0xa   : > { %s3918_s9 = scalar_select %p36_p4, %s3827_s25, %s38_s8  }
   0xe   : > { %246 = sbr.rel (!%p47_p3) target bundleno = 22 (0x16), region = 40  ;;  %s248_s10 = sand.u32 (%p47_p3), 1, %s3827_s25  }
   0xf   : > { %s3205_s11 = sshll.u32 (%p47_p3), %s3835_s27, 4  ;;  %s2936_s12 = sshll.u32 (%p47_p3), %s248_s10, 6 }
  0x10   : > { %s256_s15 = scalar_lea.vmem (%p47_p3), %s4563_s0, %s3205_s11  ;;  %s250_s16 = scalar_lea.vmem (%p47_p3), [#allocation3], %s2936_s12 }
  0x11   : > { %v269_v0 = vld [vmem:[%s256_s15] sm:$0xff] (%p47_p3)  ;;  %v271_v1 = vld [vmem:[%s256_s15 + $0x8] sm:$0xff] (%p47_p3)  ;;  %v273_v2 = vld [vmem:[%s256_s15 + $0x50] sm:$0xff] (%p47_p3) }
  0x12   : > { %270 = vst [vmem:[%s250_s16] sm:$0xff] (%p47_p3), %v269_v0  ;;  %272 = vst [vmem:[%s250_s16 + $0x8] sm:$0xff] (%p47_p3), %v271_v1  ;;  %v275_v3 = vld [vmem:[%s256_s15 + $0x58] sm:$0xff] (%p47_p3)  ;;  %v277_v4 = vld [vmem:[%s256_s15 + $0xa0] sm:$0xff] (%p47_p3) }
  0x13   : > { %274 = vst [vmem:[%s250_s16 + $0x10] sm:$0xff] (%p47_p3), %v273_v2  ;;  %v279_v5 = vld [vmem:[%s256_s15 + $0xa8] sm:$0xff] (%p47_p3)  ;;  %276 = vst [vmem:[%s250_s16 + $0x18] sm:$0xff] (%p47_p3), %v275_v3  ;;  %v281_v6 = vld [vmem:[%s256_s15 + $0xf0] sm:$0xff] (%p47_p3) }
  0x14   : > { %278 = vst [vmem:[%s250_s16 + $0x20] sm:$0xff] (%p47_p3), %v277_v4  ;;  %280 = vst [vmem:[%s250_s16 + $0x28] sm:$0xff] (%p47_p3), %v279_v5  ;;  %v283_v7 = vld [vmem:[%s256_s15 + $0xf8] sm:$0xff] (%p47_p3) }
  0x15   : > { %282 = vst [vmem:[%s250_s16 + $0x30] sm:$0xff] %v281_v6  ;;  %284 = vst [vmem:[%s250_s16 + $0x38] sm:$0xff] %v283_v7 }
  0x16 PF: > { %p2939_p6 = scmp.ge.s32.totalorder %s3839_s28, 1  ;;  %p299_p7 = scmp.lt.s32.totalorder %s3839_s28, 6 }
  0x18   : > { %p300_p8 = pnand %p2939_p6, %p299_p7 }
  0x19   : > { %s306_s17 = sand.u32 (!%p300_p8), 1, %s3823_s24   ;;  %s2941_s18 = sshll.u32 (!%p300_p8), %s3831_s26, 6 }
  0x1a   : > { %303 = sbr.rel (%p300_p8) target bundleno = 929 (0x3a1), region = 67  ;;  %s2940_s19 = sshll.u32 (!%p300_p8), %s306_s17, 6 }
  0x1b   : > { %p347_p9 = scmp.lt.s32.totalorder (!%p300_p8), %s2941_s18, 319  ;;  %s3935_s30 = scalar_lea.vmem (!%p300_p8), [#allocation3], %s2940_s19 }
  0x1c   : > { %p2943_p10 = scmp.ne.s32.totalorder (!%p300_p8), %s3831_s26, 0 }
  0x21   : > { %s4578_s18 = smov (!%p347_p9, %s2941_s18), 319  ;;  %364 = sbr.rel (%p2943_p10) target bundleno = 41 (0x29), region = 75 }
  0x22   : > { %s3426_s20 = smul.u32 12, %s4578_s18  ;;  %v3841_v8 = vmov (!%p2943_p10), 0.0  }
  0x23   : > { %365 = vst [vmem:[#allocation2] sm:$0xff] (!%p2943_p10), %v3841_v8  ;;  %366 = vst [vmem:[#allocation2 + $0x8] sm:$0xff] (!%p2943_p10), %v3841_v8 }
  0x24   : > { %s3933_s23 = scalar_lea.vmem %s4564_s1, %s3426_s20  ;;  %367 = vst [vmem:[#allocation2 + $0x10] sm:$0xff] (!%p2943_p10), %v3841_v8  ;;  %368 = vst [vmem:[#allocation2 + $0x18] sm:$0xff] (!%p2943_p10), %v3841_v8 }
  0x25   : > { %369 = vst [vmem:[#allocation2 + $0x20] sm:$0xff] (!%p2943_p10), %v3841_v8  ;;  %370 = vst [vmem:[#allocation2 + $0x28] sm:$0xff] (!%p2943_p10), %v3841_v8 }
  0x26   : > { %371 = vst [vmem:[#allocation2 + $0x30] sm:$0xff] (!%p2943_p10), %v3841_v8  ;;  %372 = vst [vmem:[#allocation2 + $0x38] sm:$0xff] (!%p2943_p10), %v3841_v8 }
  0x27   : > { %373 = vst [vmem:[#allocation2 + $0x40] sm:$0xff] (!%p2943_p10), %v3841_v8  ;;  %374 = vst [vmem:[#allocation2 + $0x48] sm:$0xff] (!%p2943_p10), %v3841_v8 }
  0x28   : > { %375 = vst [vmem:[#allocation2 + $0x50] sm:$0xff] %v3841_v8  ;;  %376 = vst [vmem:[#allocation2 + $0x58] sm:$0xff] %v3841_v8 }
  0x29 PF: > { %v3469_v9 = vld [vmem:[%s3933_s23 + $0x4] ss:$12 sps:$4 sm:$0xff]   ;;  %v3471_v10 = vld [vmem:[%s3933_s23] ss:$12 sps:$4 sm:$0xff]   ;;  %v3472_v11 = vld [vmem:[%s3933_s23 + $0x1c] ss:$12 sps:$4 sm:$0xff]  }
  0x2a   : > { %1077 = vmatprep.subr.bf16.mxu0 %v3469_v9  ;;  %v3474_v12 = vld [vmem:[%s3933_s23 + $0x18] ss:$12 sps:$4 sm:$0xff]   ;;  %v3475_v13 = vld [vmem:[%s3933_s23 + $0x34] ss:$12 sps:$4 sm:$0xff]   ;;  %v3477_v14 = vld [vmem:[%s3933_s23 + $0x30] ss:$12 sps:$4 sm:$0xff]  }
  0x2b   : > { %1078 = vmatpush1.bf16.msra.mxu0 %v3471_v10  ;;  %v3478_v15 = vld [vmem:[%s3933_s23 + $0x4c] ss:$12 sps:$4 sm:$0xff]   ;;  %v3480_v16 = vld [vmem:[%s3933_s23 + $0x48] ss:$12 sps:$4 sm:$0xff]   ;;  %v3481_v19 = vld [vmem:[%s3933_s23 + $0x64] ss:$12 sps:$4 sm:$0xff]  }
  0x2c   : > { %1079 = vmatprep.subr.bf16.mxu0 %v3472_v11  ;;  %v3490_v17 = vld [vmem:[%s3933_s23 + $0xc8] ss:$12 sps:$4 sm:$0xff]   ;;  %v3495_v20 = vld [vmem:[%s3933_s23 + $0xe0] ss:$12 sps:$4 sm:$0xff]   ;;  %v3500_v24 = vld [vmem:[%s3933_s23 + $0xf8] ss:$12 sps:$4 sm:$0xff]  }
  0x2d   : > { %v3491_v18 = vld [vmem:[%s3933_s23 + $0x8] ss:$12 sps:$4 sm:$0xff]   ;;  %3214 = vmatprep.subr.bf16.mxu1 %v3490_v17  ;;  %v3496_v21 = vld [vmem:[%s3933_s23 + $0x20] ss:$12 sps:$4 sm:$0xff]   ;;  %v3501_v25 = vld [vmem:[%s3933_s23 + $0x38] ss:$12 sps:$4 sm:$0xff]  }
  0x2e   : > { %3215 = vmatpush3.bf16.msra.mxu1 %v3491_v18  ;;  %v3483_v22 = vld [vmem:[%s3933_s23 + $0x60] ss:$12 sps:$4 sm:$0xff]   ;;  %v3484_v23 = vld [vmem:[%s3933_s23 + $0x7c] ss:$12 sps:$4 sm:$0xff]   ;;  %v3486_v26 = vld [vmem:[%s3933_s23 + $0x78] ss:$12 sps:$4 sm:$0xff]  }
  0x2f   : > { %1080 = vmatpush1.bf16.msra.mxu0 %v3474_v12  ;;  %3216 = vmatprep.subr.bf16.mxu1 %v3495_v20  ;;  %v3487_v27 = vld [vmem:[%s3933_s23 + $0x94] ss:$12 sps:$4 sm:$0xff]   ;;  %v3505_v28 = vld [vmem:[%s3933_s23 + $0x110] ss:$12 sps:$4 sm:$0xff]   ;;  %v3492_v32 = vld [vmem:[%s3933_s23 + $0xac] ss:$12 sps:$4 sm:$0xff]  }
  0x30   : > { %1081 = vmatprep.subr.bf16.mxu0 %v3475_v13  ;;  %v3506_v29 = vld [vmem:[%s3933_s23 + $0x50] ss:$12 sps:$4 sm:$0xff]   ;;  %v3510_v31 = vld [vmem:[%s3933_s23 + $0x128] ss:$12 sps:$4 sm:$0xff]   ;;  %v3515_v34 = vld [vmem:[%s3933_s23 + $0x140] ss:$12 sps:$4 sm:$0xff]  }
  0x31   : > { %v3489_v30 = vld [vmem:[%s3933_s23 + $0x90] ss:$12 sps:$4 sm:$0xff]   ;;  %v3511_v33 = vld [vmem:[%s3933_s23 + $0x68] ss:$12 sps:$4 sm:$0xff]   ;;  %v3516_v37 = vld [vmem:[%s3933_s23 + $0x80] ss:$12 sps:$4 sm:$0xff]  }
  0x32   : > { %3217 = vmatpush3.bf16.msra.mxu1 %v3496_v21  ;;  %v3494_v35 = vld [vmem:[%s3933_s23 + $0xa8] ss:$12 sps:$4 sm:$0xff]   ;;  %v3497_v36 = vld [vmem:[%s3933_s23 + $0xc4] ss:$12 sps:$4 sm:$0xff]   ;;  %v3499_v39 = vld [vmem:[%s3933_s23 + $0xc0] ss:$12 sps:$4 sm:$0xff]  }
  0x33   : > { %1082 = vmatpush1.bf16.msra.mxu0 %v3477_v14  ;;  %3218 = vmatprep.subr.bf16.mxu1 %v3500_v24  ;;  %v3520_v38 = vld [vmem:[%s3933_s23 + $0x158] ss:$12 sps:$4 sm:$0xff]   ;;  %v3502_v40 = vld [vmem:[%s3933_s23 + $0xdc] ss:$12 sps:$4 sm:$0xff]   ;;  %v3507_v44 = vld [vmem:[%s3933_s23 + $0xf4] ss:$12 sps:$4 sm:$0xff]  }
  0x34   : > { %1083 = vmatprep.subr.bf16.mxu0 %v3478_v15  ;;  %v3521_v41 = vld [vmem:[%s3933_s23 + $0x98] ss:$12 sps:$4 sm:$0xff]   ;;  %v3525_v42 = vld [vmem:[%s3933_s23 + $0x170] ss:$12 sps:$4 sm:$0xff]   ;;  %v3533_v47 = vld [vmem:[%s3933_s23 + $0x248] ss:$12 sps:$4 sm:$0xff]  }
  0x35   : > { %v3504_v43 = vld [vmem:[%s3933_s23 + $0xd8] ss:$12 sps:$4 sm:$0xff]   ;;  %v3526_v45 = vld [vmem:[%s3933_s23 + $0xb0] ss:$12 sps:$4 sm:$0xff]   ;;  %v3534_v51 = vld [vmem:[%s3933_s23 + $0x188] ss:$12 sps:$4 sm:$0xff]  }
  0x36   : > { %3219 = vmatpush3.bf16.msra.mxu1 %v3501_v25  ;;  %v3532_v46 = vld [vmem:[%s3935_s30 + $0x4] ss:$16 sps:$4 sm:$0xff]   ;;  %v3509_v48 = vld [vmem:[%s3933_s23 + $0xf0] ss:$12 sps:$4 sm:$0xff]   ;;  %v3512_v49 = vld [vmem:[%s3933_s23 + $0x10c] ss:$12 sps:$4 sm:$0xff]  }
  0x37   : > { %1084 = vmatpush1.bf16.msra.mxu0 %v3480_v16  ;;  %3220 = vmatprep.subr.bf16.mxu1 %v3505_v28  ;;  %v3530_v50 = vld [vmem:[%s3935_s30] ss:$16 sps:$4 sm:$0xff]   ;;  %v3514_v53 = vld [vmem:[%s3933_s23 + $0x108] ss:$12 sps:$4 sm:$0xff]   ;;  %v3543_v56 = vld [vmem:[%s3933_s23 + $0x278] ss:$12 sps:$4 sm:$0xff]  }
  0x38   : > { %1085 = vmatprep.subr.bf16.mxu0 %v3481_v19  ;;  %1215 = vmatprep.mubr.bf16.mxu1 %v3532_v46  ;;  %v3538_v52 = vld [vmem:[%s3933_s23 + $0x260] ss:$12 sps:$4 sm:$0xff]   ;;  %v3517_v54 = vld [vmem:[%s3933_s23 + $0x124] ss:$12 sps:$4 sm:$0xff]   ;;  %v3522_v58 = vld [vmem:[%s3933_s23 + $0x13c] ss:$12 sps:$4 sm:$0xff]  }
  0x39   : > { %1109 = vmatprep.mubr.bf16.mxu0 %v3532_v46  ;;  %v3539_v55 = vld [vmem:[%s3933_s23 + $0x1a0] ss:$12 sps:$4 sm:$0xff]   ;;  %v3544_v59 = vld [vmem:[%s3933_s23 + $0x1b8] ss:$12 sps:$4 sm:$0xff]   ;;  %v3548_v60 = vld [vmem:[%s3933_s23 + $0x290] ss:$12 sps:$4 sm:$0xff]  }
  0x3a   : > { %3221 = vmatpush3.bf16.msra.mxu1 %v3506_v29  ;;  %v3519_v57 = vld [vmem:[%s3933_s23 + $0x120] ss:$12 sps:$4 sm:$0xff]   ;;  %v3524_v61 = vld [vmem:[%s3933_s23 + $0x138] ss:$12 sps:$4 sm:$0xff]   ;;  %v3529_v63 = vld [vmem:[%s3933_s23 + $0x150] ss:$12 sps:$4 sm:$0xff]  }
  0x3b   : > { %1086 = vmatpush1.bf16.msra.mxu0 %v3483_v22  ;;  %3222 = vmatprep.subr.bf16.mxu1 %v3510_v31  ;;  %v3527_v62 = vld [vmem:[%s3933_s23 + $0x154] ss:$12 sps:$4 sm:$0xff]   ;;  %v3549_v0 = vld [vmem:[%s3933_s23 + $0x1d0] ss:$12 sps:$4 sm:$0xff]   ;;  %v3535_v2 = vld [vmem:[%s3933_s23 + $0x16c] ss:$12 sps:$4 sm:$0xff]  }
  0x3c   : > { %1087 = vmatprep.subr.bf16.mxu0 %v3484_v23  ;;  %v3553_v1 = vld [vmem:[%s3933_s23 + $0x2a8] ss:$12 sps:$4 sm:$0xff]   ;;  %v3558_v4 = vld [vmem:[%s3933_s23 + $0x2c0] ss:$12 sps:$4 sm:$0xff]   ;;  %v3542_v8 = vld [vmem:[%s3933_s23 + $0x184] ss:$12 sps:$4 sm:$0xff]  }
  0x3d   : > { %v3554_v3 = vld [vmem:[%s3933_s23 + $0x1e8] ss:$12 sps:$4 sm:$0xff]   ;;  %v3565_v6 = vld [vmem:[%s3935_s30 + $0x20] ss:$16 sps:$4 sm:$0xff]   ;;  %v3566_v10 = vld [vmem:[%s3933_s23 + $0x2d8] ss:$12 sps:$4 sm:$0xff]  }
  0x3e   : > { %3223 = vmatpush3.bf16.msra.mxu1 %v3511_v33  ;;  %v3563_v5 = vld [vmem:[%s3935_s30 + $0x24] ss:$16 sps:$4 sm:$0xff]   ;;  %v3559_v9 = vld [vmem:[%s3933_s23 + $0x200] ss:$12 sps:$4 sm:$0xff]   ;;  %v3547_v12 = vld [vmem:[%s3933_s23 + $0x19c] ss:$12 sps:$4 sm:$0xff]  }
  0x3f   : > { %1088 = vmatpush1.bf16.msra.mxu0 %v3486_v26  ;;  %3224 = vmatprep.subr.bf16.mxu1 %v3515_v34  ;;  %v3537_v7 = vld [vmem:[%s3933_s23 + $0x168] ss:$12 sps:$4 sm:$0xff]   ;;  %v3540_v11 = vld [vmem:[%s3933_s23 + $0x180] ss:$12 sps:$4 sm:$0xff]   ;;  %v3567_v13 = vld [vmem:[%s3933_s23 + $0x218] ss:$12 sps:$4 sm:$0xff]  }
  0x40   : > { %1089 = vmatprep.subr.bf16.mxu0 %v3487_v27  ;;  %v3571_v14 = vld [vmem:[%s3933_s23 + $0x2f0] ss:$12 sps:$4 sm:$0xff]   ;;  %v3545_v16 = vld [vmem:[%s3933_s23 + $0x198] ss:$12 sps:$4 sm:$0xff]   ;;  %v3552_v17 = vld [vmem:[%s3933_s23 + $0x1b4] ss:$12 sps:$4 sm:$0xff]  }
  0x41   : > { %v3578_v15 = vld [vmem:[%s3935_s30 + $0xc] ss:$16 sps:$4 sm:$0xff]   ;;  %v3576_v21 = vld [vmem:[%s3935_s30 + $0x8] ss:$16 sps:$4 sm:$0xff]   ;;  %v3562_v24 = vld [vmem:[%s3933_s23 + $0x1e4] ss:$12 sps:$4 sm:$0xff]  }
  0x42   : > { %3225 = vmatpush3.bf16.msra.mxu1 %v3516_v37  ;;  %v3572_v18 = vld [vmem:[%s3933_s23 + $0x230] ss:$12 sps:$4 sm:$0xff]   ;;  %v3557_v20 = vld [vmem:[%s3933_s23 + $0x1cc] ss:$12 sps:$4 sm:$0xff]   ;;  %v3555_v22 = vld [vmem:[%s3933_s23 + $0x1c8] ss:$12 sps:$4 sm:$0xff]  }
  0x43   : > { %1090 = vmatpush1.bf16.msra.mxu0 %v3489_v30  ;;  %3226 = vmatprep.subr.bf16.mxu1 %v3520_v38  ;;  %v3550_v19 = vld [vmem:[%s3933_s23 + $0x1b0] ss:$12 sps:$4 sm:$0xff]   ;;  %v3560_v25 = vld [vmem:[%s3933_s23 + $0x1e0] ss:$12 sps:$4 sm:$0xff]   ;;  %v3599_v27 = vld [vmem:[%s3935_s30 + $0x28] ss:$16 sps:$4 sm:$0xff]  }
  0x44   : > { %1091 = vmatprep.subr.bf16.mxu0 %v3492_v32  ;;  %v3597_v23 = vld [vmem:[%s3935_s30 + $0x2c] ss:$16 sps:$4 sm:$0xff]   ;;  %v3568_v28 = vld [vmem:[%s3933_s23 + $0x1f8] ss:$12 sps:$4 sm:$0xff]   ;;  %v3575_v29 = vld [vmem:[%s3933_s23 + $0x214] ss:$12 sps:$4 sm:$0xff]  }
  0x45   : > { %v3570_v26 = vld [vmem:[%s3933_s23 + $0x1fc] ss:$12 sps:$4 sm:$0xff]   ;;  %v3581_v31 = vld [vmem:[%s3933_s23 + $0x22c] ss:$12 sps:$4 sm:$0xff]   ;;  %v3584_v33 = vld [vmem:[%s3933_s23 + $0x244] ss:$12 sps:$4 sm:$0xff]  }
  0x46   : > { %3227 = vmatpush3.bf16.msra.mxu1 %v3521_v41  ;;  %v3573_v30 = vld [vmem:[%s3933_s23 + $0x210] ss:$12 sps:$4 sm:$0xff]   ;;  %v3579_v32 = vld [vmem:[%s3933_s23 + $0x228] ss:$12 sps:$4 sm:$0xff]   ;;  %v3582_v34 = vld [vmem:[%s3933_s23 + $0x240] ss:$12 sps:$4 sm:$0xff]  }
  0x47   : > { %1092 = vmatpush1.bf16.msra.mxu0 %v3494_v35  ;;  %3228 = vmatprep.subr.bf16.mxu1 %v3525_v42  ;;  %v3587_v35 = vld [vmem:[%s3933_s23 + $0x25c] ss:$12 sps:$4 sm:$0xff]   ;;  %v3590_v37 = vld [vmem:[%s3933_s23 + $0x274] ss:$12 sps:$4 sm:$0xff]   ;;  %v3596_v41 = vld [vmem:[%s3933_s23 + $0x2a4] ss:$12 sps:$4 sm:$0xff]  }
  0x48   : > { %1093 = vmatprep.subr.bf16.mxu0 %v3497_v36  ;;  %v3585_v36 = vld [vmem:[%s3933_s23 + $0x258] ss:$12 sps:$4 sm:$0xff]   ;;  %v3588_v38 = vld [vmem:[%s3933_s23 + $0x270] ss:$12 sps:$4 sm:$0xff]   ;;  %v3594_v42 = vld [vmem:[%s3933_s23 + $0x2a0] ss:$12 sps:$4 sm:$0xff]  }
  0x49   : > { %v3603_v46 = vld [vmem:[%s3933_s23 + $0x2d0] ss:$12 sps:$4 sm:$0xff]   ;;  %p3048_p11 = scmp.ne.s32.totalorder %s3831_s26, 4 }
  0x4a   : > { %3229 = vmatpush3.bf16.msra.mxu1 %v3526_v45  ;;  %v3605_v45 = vld [vmem:[%s3933_s23 + $0x2d4] ss:$12 sps:$4 sm:$0xff]  }
  0x4b   : > { %1094 = vmatpush1.bf16.msra.mxu0 %v3499_v39  ;;  %3242 = vmatprep.subr.bf16.mxu1 %v3533_v47  ;;  %v3593_v39 = vld [vmem:[%s3933_s23 + $0x28c] ss:$12 sps:$4 sm:$0xff]  }
  0x4c   : > { %1095 = vmatprep.subr.bf16.mxu0 %v3502_v40  ;;  %v3591_v40 = vld [vmem:[%s3933_s23 + $0x288] ss:$12 sps:$4 sm:$0xff]   ;;  %v3608_v47 = vld [vmem:[%s3933_s23 + $0x2ec] ss:$12 sps:$4 sm:$0xff]  }
  0x4d   : > { %1216 = vmatmul.mubr.bf16.vlgmr.msra.gmra.mrb[0].mxu1 %v3530_v50 }
  0x4e   : > { %3243 = vmatpush3.bf16.msra.mxu1 %v3534_v51  ;;  %1223 = vmatprep.mubr.bf16.mxu1 %v3563_v5 }
  0x4f   : > { %1096 = vmatpush1.bf16.msra.mxu0 %v3504_v43  ;;  %3244 = vmatprep.subr.bf16.mxu1 %v3538_v52  ;;  %v3602_v43 = vld [vmem:[%s3933_s23 + $0x2bc] ss:$12 sps:$4 sm:$0xff]  }
  0x50   : > { %1097 = vmatprep.subr.bf16.mxu0 %v3507_v44  ;;  %v3600_v44 = vld [vmem:[%s3933_s23 + $0x2b8] ss:$12 sps:$4 sm:$0xff]  }
  0x52   : > { %3245 = vmatpush3.bf16.msra.mxu1 %v3539_v55 }
  0x53   : > { %1098 = vmatpush1.bf16.msra.mxu0 %v3509_v48  ;;  %3246 = vmatprep.subr.bf16.mxu1 %v3543_v56  ;;  %v3606_v48 = vld [vmem:[%s3933_s23 + $0x2e8] ss:$12 sps:$4 sm:$0xff]  }
  0x54   : > { %1099 = vmatprep.subr.bf16.mxu0 %v3512_v49 }
  0x55   : > { %1224 = vmatmul.mubr.bf16.gmra.mrb[4].mxu1 %v3565_v6 }
  0x56   : > { %3247 = vmatpush3.bf16.msra.mxu1 %v3544_v59  ;;  %1264 = vmatprep.mubr.bf16.mxu1 %v3578_v15 }
  0x57   : > { %1100 = vmatpush1.bf16.msra.mxu0 %v3514_v53  ;;  %3248 = vmatprep.subr.bf16.mxu1 %v3548_v60 }
  0x58   : > { %1101 = vmatprep.subr.bf16.mxu0 %v3517_v54 }
  0x5a   : > { %3249 = vmatpush3.bf16.msra.mxu1 %v3549_v0 }
  0x5b   : > { %1102 = vmatpush1.bf16.msra.mxu0 %v3519_v57  ;;  %3250 = vmatprep.subr.bf16.mxu1 %v3553_v1  ;;  %v379_v1 = vld [vmem:[#allocation2 + $0x10] sm:$0xff] }
  0x5c   : > { %1103 = vmatprep.subr.bf16.mxu0 %v3522_v58 }
  0x5e   : > { %3251 = vmatpush3.bf16.msra.mxu1 %v3554_v3 }
  0x5f   : > { %1104 = vmatpush1.bf16.msra.mxu0 %v3524_v61  ;;  %3252 = vmatprep.subr.bf16.mxu1 %v3558_v4 }
  0x60   : > { %1105 = vmatprep.subr.bf16.mxu0 %v3527_v62 }
  0x62   : > { %3253 = vmatpush3.bf16.msra.mxu1 %v3559_v9 }
  0x63   : > { %1106 = vmatpush1.bf16.msra.mxu0 %v3529_v63  ;;  %3254 = vmatprep.subr.bf16.mxu1 %v3566_v10 }
  0x64   : > { %1107 = vmatprep.subr.bf16.mxu0 %v3535_v2 }
  0x66   : > { %3255 = vmatpush3.bf16.msra.mxu1 %v3567_v13  ;;  %v385_v13 = vld [vmem:[#allocation2 + $0x40] sm:$0xff] }
  0x67   : > { %1108 = vmatpush1.bf16.msra.mxu0 %v3537_v7  ;;  %3256 = vmatprep.subr.bf16.mxu1 %v3571_v14 }
  0x68   : > { %1130 = vmatprep.subr.bf16.mxu0 %v3542_v8 }
  0x6a   : > { %1110 = vmatmul.mubr.bf16.vlgmr.msra.gmra.mrb[0].mxu0 %v3530_v50  ;;  %3257 = vmatpush3.bf16.msra.mxu1 %v3572_v18 }
  0x6b   : > { %1131 = vmatpush1.bf16.msra.mxu0 %v3540_v11  ;;  %1119 = vmatprep.mubr.bf16.mxu0 %v3563_v5  ;;  %v382_v5 = vld [vmem:[#allocation2 + $0x28] sm:$0xff] }
  0x6c   : > { %1132 = vmatprep.subr.bf16.mxu0 %v3547_v12 }
  0x6d   : > { %1265 = vmatmul.mubr.bf16.vlgmr.msra.gmra.mrb[8].mxu1 %v3576_v21 }
  0x6e   : > { %1272 = vmatprep.mubr.bf16.mxu1 %v3597_v23 }
  0x6f   : > { %1133 = vmatpush1.bf16.msra.mxu0 %v3545_v16 }
  0x70   : > { %1134 = vmatprep.subr.bf16.mxu0 %v3552_v17  ;;  %v388_v17 = vld [vmem:[#allocation2 + $0x58] sm:$0xff] }
  0x72   : > { %1120 = vmatmul.mubr.bf16.gmra.mrb[4].mxu0 %v3565_v6 }
  0x73   : > { %1135 = vmatpush1.bf16.msra.mxu0 %v3550_v19  ;;  %1162 = vmatprep.mubr.bf16.mxu0 %v3578_v15 }
  0x74   : > { %1136 = vmatprep.subr.bf16.mxu0 %v3557_v20 }
  0x75   : > { %1273 = vmatmul.mubr.bf16.gmra.mrb[12].mxu1 %v3599_v27 }
  0x77   : > { %1137 = vmatpush1.bf16.msra.mxu0 %v3555_v22  ;;  %v378_v22 = vld [vmem:[#allocation2 + $0x8] sm:$0xff] }
  0x78   : > { %1138 = vmatprep.subr.bf16.mxu0 %v3562_v24  ;;  %v380_v24 = vld [vmem:[#allocation2 + $0x18] sm:$0xff] }
  0x7b   : > { %1139 = vmatpush1.bf16.msra.mxu0 %v3560_v25 }
  0x7c   : > { %1140 = vmatprep.subr.bf16.mxu0 %v3570_v26 }
  0x7f   : > { %1141 = vmatpush1.bf16.msra.mxu0 %v3568_v28 }
  0x80   : > { %1142 = vmatprep.subr.bf16.mxu0 %v3575_v29 }
  0x83   : > { %1143 = vmatpush1.bf16.msra.mxu0 %v3573_v30 }
  0x84   : > { %1144 = vmatprep.subr.bf16.mxu0 %v3581_v31 }
  0x87   : > { %1145 = vmatpush1.bf16.msra.mxu0 %v3579_v32 }
  0x88   : > { %1146 = vmatprep.subr.bf16.mxu0 %v3584_v33  ;;  %v383_v33 = vld [vmem:[#allocation2 + $0x30] sm:$0xff] }
  0x8b   : > { %1147 = vmatpush1.bf16.msra.mxu0 %v3582_v34  ;;  %v384_v34 = vld [vmem:[#allocation2 + $0x38] sm:$0xff] }
  0x8c   : > { %1148 = vmatprep.subr.bf16.mxu0 %v3587_v35 }
  0x8f   : > { %1149 = vmatpush1.bf16.msra.mxu0 %v3585_v36  ;;  %v386_v36 = vld [vmem:[#allocation2 + $0x48] sm:$0xff] }
  0x90   : > { %1150 = vmatprep.subr.bf16.mxu0 %v3590_v37 }
  0x93   : > { %1151 = vmatpush1.bf16.msra.mxu0 %v3588_v38 }
  0x94   : > { %1152 = vmatprep.subr.bf16.mxu0 %v3593_v39  ;;  %v387_v39 = vld [vmem:[#allocation2 + $0x50] sm:$0xff] }
  0x97   : > { %1153 = vmatpush1.bf16.msra.mxu0 %v3591_v40 }
  0x98   : > { %1154 = vmatprep.subr.bf16.mxu0 %v3596_v41 }
  0x9b   : > { %1155 = vmatpush1.bf16.msra.mxu0 %v3594_v42 }
  0x9c   : > { %1156 = vmatprep.subr.bf16.mxu0 %v3602_v43 }
  0x9f   : > { %1157 = vmatpush1.bf16.msra.mxu0 %v3600_v44 }
  0xa0   : > { %1158 = vmatprep.subr.bf16.mxu0 %v3605_v45  ;;  %v3609_v45 = vld [vmem:[%s4566_s3 + $0x4] ss:$12 sps:$4 sm:$0xff] (!%p3048_p11)  }
  0xa3   : > { %1159 = vmatpush1.bf16.msra.mxu0 %v3603_v46  ;;  %v3611_v46 = vld [vmem:[%s4566_s3] ss:$12 sps:$4 sm:$0xff] (!%p3048_p11)  }
  0xa4   : > { %1160 = vmatprep.subr.bf16.mxu0 %v3608_v47  ;;  %v3612_v47 = vld [vmem:[%s4566_s3 + $0x1c] ss:$12 sps:$4 sm:$0xff] (!%p3048_p11)  }
  0xa7   : > { %1161 = vmatpush1.bf16.msra.mxu0 %v3606_v48  ;;  %v3614_v48 = vld [vmem:[%s4566_s3 + $0x18] ss:$12 sps:$4 sm:$0xff] (!%p3048_p11)  }
  0xa8   : > { %1865 = vmatprep.subr.bf16.mxu0 (!%p3048_p11), %v3609_v45  ;;  %v3680_v45 = vld [vmem:[%s4566_s3 + $0x1a0] ss:$12 sps:$4 sm:$0xff] (!%p3048_p11)  }
  0xaa   : > { %1163 = vmatmul.mubr.bf16.vlgmr.msra.gmra.mrb[0].mxu0 %v3576_v21  ;;  %v377_v21 = vld [vmem:[#allocation2] sm:$0xff] }
  0xab   : > { %1172 = vmatprep.mubr.bf16.mxu0 %v3597_v23  ;;  %1866 = vmatpush1.bf16.msra.mxu0 (!%p3048_p11), %v3611_v46  ;;  %v3658_v46 = vld [vmem:[%s4566_s3 + $0x13c] ss:$12 sps:$4 sm:$0xff] (!%p3048_p11)  }
  0xac   : > { %1867 = vmatprep.subr.bf16.mxu0 (!%p3048_p11), %v3612_v47  ;;  %v3660_v47 = vld [vmem:[%s4566_s3 + $0x138] ss:$12 sps:$4 sm:$0xff] (!%p3048_p11)  }
  0xaf   : > { %1868 = vmatpush1.bf16.msra.mxu0 (!%p3048_p11), %v3614_v48  ;;  %v3684_v48 = vld [vmem:[%s4566_s3 + $0x1b8] ss:$12 sps:$4 sm:$0xff] (!%p3048_p11)  }
  0xb2   : > { %1173 = vmatmul.mubr.bf16.gmra.mrb[4].mxu0 %v3599_v27  ;;  %v381_v27 = vld [vmem:[#allocation2 + $0x20] sm:$0xff] }
 0x120   : > { %v3230_v49 = vpop.f32.mrb[0].mxu1 }
 0x121   : > { %v3231_v50 = vpop.f32.mrb[1].mxu1 }
 0x122   : > { %v3232_v51 = vadd.f32 %v3231_v50, %v3230_v49  ;;  %v3233_v52 = vpop.f32.mrb[2].mxu1  ;;  %v3615_v49 = vld [vmem:[%s4566_s3 + $0x34] ss:$12 sps:$4 sm:$0xff] (!%p3048_p11)   ;;  %v3617_v50 = vld [vmem:[%s4566_s3 + $0x30] ss:$12 sps:$4 sm:$0xff] (!%p3048_p11)  }
 0x123   : > { %v3234_v53 = vpop.f32.mrb[3].mxu1  ;;  %1869 = vmatprep.subr.bf16.mxu0 (!%p3048_p11), %v3615_v49  ;;  %v3663_v49 = vld [vmem:[%s4566_s3 + $0x154] ss:$12 sps:$4 sm:$0xff] (!%p3048_p11)  }
 0x124   : > { %v3235_v54 = vadd.f32 %v3234_v53, %v3233_v52  ;;  %1870 = vmatpush1.bf16.msra.mxu0 (!%p3048_p11), %v3617_v50  ;;  %v3620_v52 = vld [vmem:[%s4566_s3 + $0x48] ss:$12 sps:$4 sm:$0xff] (!%p3048_p11)   ;;  %v3621_v53 = vld [vmem:[%s4566_s3 + $0x64] ss:$12 sps:$4 sm:$0xff] (!%p3048_p11)  }
 0x125   : > { %v3665_v50 = vld [vmem:[%s4566_s3 + $0x150] ss:$12 sps:$4 sm:$0xff] (!%p3048_p11)  }
 0x128   : > { %v3236_v55 = vpop.f32.mrb[4].mxu1 }
 0x129   : > { %v3237_v56 = vpop.f32.mrb[5].mxu1 }
 0x12a   : > { %v3238_v57 = vadd.f32 %v3237_v56, %v3236_v55  ;;  %v3239_v58 = vpop.f32.mrb[6].mxu1  ;;  %v3637_v55 = vld [vmem:[%s4566_s3 + $0x8] ss:$12 sps:$4 sm:$0xff] (!%p3048_p11)   ;;  %v3623_v56 = vld [vmem:[%s4566_s3 + $0x60] ss:$12 sps:$4 sm:$0xff] (!%p3048_p11)  }
 0x12b   : > { %v3240_v59 = vpop.f32.mrb[7].mxu1 }
 0x12c   : > { %v3241_v60 = vadd.f32 %v3240_v59, %v3239_v58  ;;  %v3641_v58 = vld [vmem:[%s4566_s3 + $0xe0] ss:$12 sps:$4 sm:$0xff] (!%p3048_p11)  }
 0x12d   : > { %v3642_v59 = vld [vmem:[%s4566_s3 + $0x20] ss:$12 sps:$4 sm:$0xff] (!%p3048_p11)  }
 0x140   : > { %v3258_v61 = vpop.f32.mrb[8].mxu1 }
 0x141   : > { %v3259_v62 = vpop.f32.mrb[9].mxu1 }
 0x142   : > { %v3260_v63 = vadd.f32 %v3259_v62, %v3258_v61  ;;  %v3261_v0 = vpop.f32.mrb[10].mxu1  ;;  %v3627_v61 = vld [vmem:[%s4566_s3 + $0x94] ss:$12 sps:$4 sm:$0xff] (!%p3048_p11)   ;;  %v3646_v62 = vld [vmem:[%s4566_s3 + $0xf8] ss:$12 sps:$4 sm:$0xff] (!%p3048_p11)  }
 0x143   : > { %v3262_v2 = vpop.f32.mrb[11].mxu1 }
 0x144   : > { %v1267_v3 = vadd.f32 %v3260_v63, %v3232_v51  ;;  %v3263_v4 = vadd.f32 %v3262_v2, %v3261_v0  ;;  %v3618_v51 = vld [vmem:[%s4566_s3 + $0x4c] ss:$12 sps:$4 sm:$0xff] (!%p3048_p11)   ;;  %v3629_v0 = vld [vmem:[%s4566_s3 + $0x90] ss:$12 sps:$4 sm:$0xff] (!%p3048_p11)  }
 0x145   : > { %1871 = vmatprep.subr.bf16.mxu0 (!%p3048_p11), %v3618_v51  ;;  %v3647_v63 = vld [vmem:[%s4566_s3 + $0x38] ss:$12 sps:$4 sm:$0xff] (!%p3048_p11)   ;;  %v3652_v2 = vld [vmem:[%s4566_s3 + $0x50] ss:$12 sps:$4 sm:$0xff] (!%p3048_p11)  }
 0x146   : > { %v1283_v6 = vadd.f32 %v1267_v3, %v379_v1  ;;  %v1270_v7 = vadd.f32 %v3263_v4, %v3235_v54  ;;  %v3636_v54 = vld [vmem:[%s4566_s3 + $0xc8] ss:$12 sps:$4 sm:$0xff] (!%p3048_p11)   ;;  %1872 = vmatpush1.bf16.msra.mxu0 (!%p3048_p11), %v3620_v52  ;;  %v3651_v1 = vld [vmem:[%s4566_s3 + $0x110] ss:$12 sps:$4 sm:$0xff] (!%p3048_p11)   ;;  %v3630_v3 = vld [vmem:[%s4566_s3 + $0xac] ss:$12 sps:$4 sm:$0xff] (!%p3048_p11)  }
 0x147   : > { %3270 = vmatprep.subr.bf16.mxu1 (!%p3048_p11), %v3636_v54  ;;  %1873 = vmatprep.subr.bf16.mxu0 (!%p3048_p11), %v3621_v53  ;;  %v3632_v4 = vld [vmem:[%s4566_s3 + $0xa8] ss:$12 sps:$4 sm:$0xff] (!%p3048_p11)  }
 0x148   : > { %1295 = vst [vmem:[#allocation2 + $0x10] sm:$0xff] %v1283_v6  ;;  %v1286_v8 = vadd.f32 %v1270_v7, %v382_v5  ;;  %v3264_v9 = vpop.f32.mrb[12].mxu1  ;;  %3271 = vmatpush3.bf16.msra.mxu1 (!%p3048_p11), %v3637_v55  ;;  %v3656_v5 = vld [vmem:[%s4566_s3 + $0x128] ss:$12 sps:$4 sm:$0xff] (!%p3048_p11)   ;;  %v1323_v6 = vlaneseq (!%p3048_p11) }
 0x149   : > { %v3265_v10 = vpop.f32.mrb[13].mxu1  ;;  %3272 = vmatprep.subr.bf16.mxu1 (!%p3048_p11), %v3641_v58  ;;  %v3657_v7 = vld [vmem:[%s4566_s3 + $0x68] ss:$12 sps:$4 sm:$0xff] (!%p3048_p11)  }
 0x14a   : > { %1298 = vst [vmem:[#allocation2 + $0x28] sm:$0xff] %v1286_v8  ;;  %v3266_v11 = vadd.f32 %v3265_v10, %v3264_v9  ;;  %v3267_v12 = vpop.f32.mrb[14].mxu1  ;;  %1874 = vmatpush1.bf16.msra.mxu0 (!%p3048_p11), %v3623_v56  ;;  %v3633_v8 = vld [vmem:[%s4566_s3 + $0xc4] ss:$12 sps:$4 sm:$0xff] (!%p3048_p11)   ;;  %v3661_v9 = vld [vmem:[%s4566_s3 + $0x140] ss:$12 sps:$4 sm:$0xff] (!%p3048_p11)  }
 0x14b   : > { %v3268_v14 = vpop.f32.mrb[15].mxu1  ;;  %v3635_v10 = vld [vmem:[%s4566_s3 + $0xc0] ss:$12 sps:$4 sm:$0xff] (!%p3048_p11)  }
 0x14c   : > { %v1275_v15 = vadd.f32 %v3266_v11, %v3238_v57  ;;  %v3269_v16 = vadd.f32 %v3268_v14, %v3267_v12  ;;  %v3624_v57 = vld [vmem:[%s4566_s3 + $0x7c] ss:$12 sps:$4 sm:$0xff] (!%p3048_p11)   ;;  %3273 = vmatpush3.bf16.msra.mxu1 (!%p3048_p11), %v3642_v59  ;;  %v4130_v11 = vshrl.u32 (!%p3048_p11), %v1323_v6, 7  ;;  %v3666_v14 = vld [vmem:[%s4566_s3 + $0x158] ss:$12 sps:$4 sm:$0xff] (!%p3048_p11)  }
 0x14d   : > { %1875 = vmatprep.subr.bf16.mxu0 (!%p3048_p11), %v3624_v57  ;;  %3274 = vmatprep.subr.bf16.mxu1 (!%p3048_p11), %v3646_v62  ;;  %v3638_v12 = vld [vmem:[%s4566_s3 + $0xdc] ss:$12 sps:$4 sm:$0xff] (!%p3048_p11)   ;;  %v3675_v6 = vld [vmem:[%s4566_s3 + $0x184] ss:$12 sps:$4 sm:$0xff] (!%p3048_p11)  }
 0x14e   : > { %v1289_v18 = vadd.f32 %v1275_v15, %v385_v13  ;;  %v1278_v19 = vadd.f32 %v3269_v16, %v3241_v60  ;;  %v3626_v60 = vld [vmem:[%s4566_s3 + $0x78] ss:$12 sps:$4 sm:$0xff] (!%p3048_p11)   ;;  %v3662_v13 = vld [vmem:[%s4566_s3 + $0x80] ss:$12 sps:$4 sm:$0xff] (!%p3048_p11)   ;;  %v4204_v51 = vsub.s32 (!%p3048_p11), 2, %v4130_v11 }
 0x14f   : > { %1876 = vmatpush1.bf16.msra.mxu0 (!%p3048_p11), %v3626_v60  ;;  %v3640_v15 = vld [vmem:[%s4566_s3 + $0xd8] ss:$12 sps:$4 sm:$0xff] (!%p3048_p11)   ;;  %v3643_v16 = vld [vmem:[%s4566_s3 + $0xf4] ss:$12 sps:$4 sm:$0xff] (!%p3048_p11)   ;;  %v3688_v57 = vld [vmem:[%s4566_s3 + $0x1d0] ss:$12 sps:$4 sm:$0xff] (!%p3048_p11)  }
 0x150   : > { %1301 = vst [vmem:[#allocation2 + $0x40] sm:$0xff] %v1289_v18  ;;  %v1292_v20 = vadd.f32 %v1278_v19, %v388_v17  ;;  %3275 = vmatpush3.bf16.msra.mxu1 (!%p3048_p11), %v3647_v63  ;;  %1877 = vmatprep.subr.bf16.mxu0 (!%p3048_p11), %v3627_v61  ;;  %v4148_v17 = vsub.s32 (!%p3048_p11), 1, %v4130_v11  ;;  %v4151_v18 = vsub.s32 (!%p3048_p11), 0, %v4130_v11  ;;  %v3667_v19 = vld [vmem:[%s4566_s3 + $0x98] ss:$12 sps:$4 sm:$0xff] (!%p3048_p11)  }
 0x151   : > { %3276 = vmatprep.subr.bf16.mxu1 (!%p3048_p11), %v3651_v1  ;;  %v3668_v61 = vld [vmem:[%s4566_s3 + $0x16c] ss:$12 sps:$4 sm:$0xff] (!%p3048_p11)   ;;  %v3670_v1 = vld [vmem:[%s4566_s3 + $0x168] ss:$12 sps:$4 sm:$0xff] (!%p3048_p11)  }
 0x152   : > { %1304 = vst [vmem:[#allocation2 + $0x58] sm:$0xff] %v1292_v20  ;;  %v3671_v20 = vld [vmem:[%s4566_s3 + $0x170] ss:$12 sps:$4 sm:$0xff] (!%p3048_p11)   ;;  %v3673_v11 = vld [vmem:[%s4566_s3 + $0x180] ss:$12 sps:$4 sm:$0xff] (!%p3048_p11)  }
 0x153   : > { %1878 = vmatpush1.bf16.msra.mxu0 (!%p3048_p11), %v3629_v0 }
 0x154   : > { %3277 = vmatpush3.bf16.msra.mxu1 (!%p3048_p11), %v3652_v2  ;;  %1879 = vmatprep.subr.bf16.mxu0 (!%p3048_p11), %v3630_v3 }
 0x155   : > { %3278 = vmatprep.subr.bf16.mxu1 (!%p3048_p11), %v3656_v5 }
 0x157   : > { %1880 = vmatpush1.bf16.msra.mxu0 (!%p3048_p11), %v3632_v4  ;;  %v3692_v4 = vld [vmem:[%s4566_s3 + $0x1e8] ss:$12 sps:$4 sm:$0xff] (!%p3048_p11)  }
 0x158   : > { %3279 = vmatpush3.bf16.msra.mxu1 (!%p3048_p11), %v3657_v7  ;;  %1881 = vmatprep.subr.bf16.mxu0 (!%p3048_p11), %v3633_v8  ;;  %v1311_v7 = vld [vmem:[#allocation2 + $0x10] sm:$0xff] (!%p3048_p11)  ;;  %v1314_v8 = vld [vmem:[#allocation2 + $0x28] sm:$0xff] (!%p3048_p11) }
 0x159   : > { %3280 = vmatprep.subr.bf16.mxu1 (!%p3048_p11), %v3661_v9 }
 0x15b   : > { %1882 = vmatpush1.bf16.msra.mxu0 (!%p3048_p11), %v3635_v10 }
 0x15c   : > { %3281 = vmatpush3.bf16.msra.mxu1 (!%p3048_p11), %v3662_v13  ;;  %1883 = vmatprep.subr.bf16.mxu0 (!%p3048_p11), %v3638_v12  ;;  %v3696_v13 = vld [vmem:[%s4566_s3 + $0x200] ss:$12 sps:$4 sm:$0xff] (!%p3048_p11)  }
 0x15d   : > { %3282 = vmatprep.subr.bf16.mxu1 (!%p3048_p11), %v3666_v14 }
 0x15f   : > { %1884 = vmatpush1.bf16.msra.mxu0 (!%p3048_p11), %v3640_v15 }
 0x160   : > { %3283 = vmatpush3.bf16.msra.mxu1 (!%p3048_p11), %v3667_v19  ;;  %1885 = vmatprep.subr.bf16.mxu0 (!%p3048_p11), %v3643_v16  ;;  %v3679_v16 = vld [vmem:[%s4566_s3 + $0x19c] ss:$12 sps:$4 sm:$0xff] (!%p3048_p11)   ;;  %v3677_v19 = vld [vmem:[%s4566_s3 + $0x198] ss:$12 sps:$4 sm:$0xff] (!%p3048_p11)  }
 0x161   : > { %3284 = vmatprep.subr.bf16.mxu1 (!%p3048_p11), %v3671_v20 }
 0x17d   : > { %v1164_v23 = vpop.f32.mrb[0].mxu0 }
 0x17e   : > { %v1281_v25 = vadd.f32 %v1164_v23, %v377_v21  ;;  %v1166_v26 = vpop.f32.mrb[1].mxu0  ;;  %v3645_v21 = vld [vmem:[%s4566_s3 + $0xf0] ss:$12 sps:$4 sm:$0xff] (!%p3048_p11)  }
 0x17f   : > { %v1282_v28 = vadd.f32 %v1166_v26, %v378_v22  ;;  %v1168_v29 = vpop.f32.mrb[2].mxu0  ;;  %v3672_v26 = vld [vmem:[%s4566_s3 + $0xb0] ss:$12 sps:$4 sm:$0xff] (!%p3048_p11)   ;;  %1886 = vmatpush1.bf16.msra.mxu0 (!%p3048_p11), %v3645_v21  ;;  %v1317_v21 = vld [vmem:[#allocation2 + $0x40] sm:$0xff] (!%p3048_p11) }
 0x180   : > { %1293 = vst [vmem:[#allocation2] sm:$0xff] %v1281_v25  ;;  %v1284_v30 = vadd.f32 %v1168_v29, %v380_v24  ;;  %v1170_v31 = vpop.f32.mrb[3].mxu0  ;;  %v1321_v24 = vld [vmem:[%s4565_s2] sm:$0x7] (!%p3048_p11)  ;;  %v3648_v25 = vld [vmem:[%s4566_s3 + $0x10c] ss:$12 sps:$4 sm:$0xff] (!%p3048_p11)   ;;  %3285 = vmatpush3.bf16.msra.mxu1 (!%p3048_p11), %v3672_v26 }
 0x181   : > { %1294 = vst [vmem:[#allocation2 + $0x8] sm:$0xff] %v1282_v28  ;;  %v1285_v32 = vadd.f32 %v1170_v31, %v381_v27  ;;  %v1330_v27 = vrot.slane (!%p3048_p11), %v1321_v24, %v4148_v17  ;;  %v1326_v29 = vrot.slane (!%p3048_p11), %v1321_v24, %v4151_v18  ;;  %1887 = vmatprep.subr.bf16.mxu0 (!%p3048_p11), %v3648_v25 }
 0x182   : > { %1296 = vst [vmem:[#allocation2 + $0x18] sm:$0xff] %v1284_v30  ;;  %v1334_v63 = vrot.slane (!%p3048_p11), %v1321_v24, %v4204_v51  ;;  %v3683_v24 = vld [vmem:[%s4566_s3 + $0x1b4] ss:$12 sps:$4 sm:$0xff] (!%p3048_p11)  }
 0x183   : > { %1297 = vst [vmem:[#allocation2 + $0x20] sm:$0xff] %v1285_v32 }
 0x184   : > { %v1340_v9 = vadd.f32 (!%p3048_p11), %v1334_v63, %v1311_v7  ;;  %v1343_v10 = vadd.f32 (!%p3048_p11), %v1334_v63, %v1314_v8  ;;  %v1346_v25 = vadd.f32 (!%p3048_p11), %v1334_v63, %v1317_v21  ;;  %v3734_v7 = vld [vmem:[%s4568_s5 + $0xd8] ss:$12 sps:$4 sm:$0xff] (!%p3048_p11)   ;;  %v3741_v8 = vld [vmem:[%s4568_s5 + $0xf4] ss:$12 sps:$4 sm:$0xff] (!%p3048_p11)  }
 0x185   : > { %v1174_v35 = vpop.f32.mrb[4].mxu0  ;;  %1308 = sbr.rel (%p3048_p11) target bundleno = 929 (0x3a1), region = 79  ;;  %v3758_v21 = vld [vmem:[%s4568_s5 + $0x80] ss:$12 sps:$4 sm:$0xff] (!%p3048_p11)  }
 0x186   : > { %v1287_v37 = vadd.f32 %v1174_v35, %v383_v33  ;;  %v1176_v38 = vpop.f32.mrb[5].mxu0  ;;  %v3676_v35 = vld [vmem:[%s4566_s3 + $0x188] ss:$12 sps:$4 sm:$0xff] (!%p3048_p11)   ;;  %v1352_v14 = vmax.f32 (!%p3048_p11), %v1340_v9, 0.0  ;;  %v1355_v15 = vmax.f32 (!%p3048_p11), %v1343_v10, 0.0 }
 0x187   : > { %v1288_v40 = vadd.f32 %v1176_v38, %v384_v34  ;;  %v1178_v41 = vpop.f32.mrb[6].mxu0  ;;  %v1309_v28 = vld [vmem:[#allocation2] sm:$0xff] (!%p3048_p11)  ;;  %3346 = vmatprep.subr.bf16.mxu1 (!%p3048_p11), %v3676_v35  ;;  %v3739_v9 = vld [vmem:[%s4568_s5 + $0xf0] ss:$12 sps:$4 sm:$0xff] (!%p3048_p11)   ;;  %v3746_v10 = vld [vmem:[%s4568_s5 + $0x10c] ss:$12 sps:$4 sm:$0xff] (!%p3048_p11)  }
 0x188   : > { %1299 = vst [vmem:[#allocation2 + $0x30] sm:$0xff] %v1287_v37  ;;  %v1290_v42 = vadd.f32 %v1178_v41, %v386_v36  ;;  %v1180_v43 = vpop.f32.mrb[7].mxu0  ;;  %v1310_v22 = vld [vmem:[#allocation2 + $0x8] sm:$0xff] (!%p3048_p11)  ;;  %v1338_v33 = vadd.f32 (!%p3048_p11), %v1326_v29, %v1309_v28  ;;  %v3653_v41 = vld [vmem:[%s4566_s3 + $0x124] ss:$12 sps:$4 sm:$0xff] (!%p3048_p11)   ;;  %v4234_v20 = vpack.c.bf16 (!%p3048_p11), %v1355_v15, %v1352_v14 }
 0x189   : > { %1300 = vst [vmem:[#allocation2 + $0x38] sm:$0xff] %v1288_v40  ;;  %v1291_v44 = vadd.f32 %v1180_v43, %v387_v39  ;;  %v1312_v30 = vld [vmem:[#allocation2 + $0x18] sm:$0xff] (!%p3048_p11)  ;;  %v1339_v31 = vadd.f32 (!%p3048_p11), %v1330_v27, %v1310_v22  ;;  %v3650_v36 = vld [vmem:[%s4566_s3 + $0x108] ss:$12 sps:$4 sm:$0xff] (!%p3048_p11)   ;;  %v3655_v43 = vld [vmem:[%s4566_s3 + $0x120] ss:$12 sps:$4 sm:$0xff] (!%p3048_p11)  }
 0x18a   : > { %1302 = vst [vmem:[#allocation2 + $0x48] sm:$0xff] %v1290_v42  ;;  %v1313_v23 = vld [vmem:[#allocation2 + $0x20] sm:$0xff] (!%p3048_p11)  ;;  %v1341_v34 = vadd.f32 (!%p3048_p11), %v1326_v29, %v1312_v30  ;;  %v1350_v39 = vmax.f32 (!%p3048_p11), %v1338_v33, 0.0  ;;  %1888 = vmatpush1.bf16.msra.mxu0 (!%p3048_p11), %v3650_v36  ;;  %v1320_v22 = vld [vmem:[#allocation2 + $0x58] sm:$0xff] (!%p3048_p11)  ;;  %v1358_v30 = vmax.f32 (!%p3048_p11), %v1346_v25, 0.0 }
 0x18b   : > { %1303 = vst [vmem:[#allocation2 + $0x50] sm:$0xff] %v1291_v44  ;;  %v1342_v32 = vadd.f32 (!%p3048_p11), %v1330_v27, %v1313_v23  ;;  %v1351_v37 = vmax.f32 (!%p3048_p11), %v1339_v31, 0.0  ;;  %1889 = vmatprep.subr.bf16.mxu0 (!%p3048_p11), %v3653_v41  ;;  %v3700_v23 = vld [vmem:[%s4566_s3 + $0x218] ss:$12 sps:$4 sm:$0xff] (!%p3048_p11)   ;;  %v1349_v26 = vadd.f32 (!%p3048_p11), %v1334_v63, %v1320_v22  ;;  %v3704_v28 = vld [vmem:[%s4566_s3 + $0x230] ss:$12 sps:$4 sm:$0xff] (!%p3048_p11)  }
 0x18c   : > { %v1353_v40 = vmax.f32 %v1341_v34, 0.0  ;;  %v3707_v33 = vld [vmem:[%s4568_s5 + $0x4] ss:$12 sps:$4 sm:$0xff]   ;;  %v3689_v36 = vld [vmem:[%s4566_s3 + $0x1e0] ss:$12 sps:$4 sm:$0xff]  }
 0x18d   : > { %v1354_v38 = vmax.f32 %v1342_v32, 0.0  ;;  %v1361_v31 = vmax.f32 %v1349_v26, 0.0  ;;  %v3685_v32 = vld [vmem:[%s4566_s3 + $0x1c8] ss:$12 sps:$4 sm:$0xff]   ;;  %v3691_v34 = vld [vmem:[%s4566_s3 + $0x1e4] ss:$12 sps:$4 sm:$0xff]  }
 0x18e   : > { %v1362_v44 = vpack.c.bf16 %v1353_v40, %v1350_v39  ;;  %1890 = vmatpush1.bf16.msra.mxu0 %v3655_v43  ;;  %v3710_v39 = vld [vmem:[%s4568_s5 + $0x1c] ss:$12 sps:$4 sm:$0xff]   ;;  %v3693_v41 = vld [vmem:[%s4566_s3 + $0x1f8] ss:$12 sps:$4 sm:$0xff]   ;;  %v3699_v43 = vld [vmem:[%s4566_s3 + $0x214] ss:$12 sps:$4 sm:$0xff]  }
 0x18f   : > { %v1363_v42 = vpack.c.bf16 %v1354_v38, %v1351_v37  ;;  %1891 = vmatprep.subr.bf16.mxu0 %v3658_v46  ;;  %v1315_v55 = vld [vmem:[#allocation2 + $0x30] sm:$0xff]  ;;  %v1367_v37 = vpack.c.bf16 %v1361_v31, %v1358_v30  ;;  %v3705_v38 = vld [vmem:[%s4568_s5] ss:$12 sps:$4 sm:$0xff]   ;;  %v3695_v40 = vld [vmem:[%s4566_s3 + $0x1fc] ss:$12 sps:$4 sm:$0xff]  }
 0x190   : > { %v1316_v52 = vld [vmem:[#allocation2 + $0x38] sm:$0xff]  ;;  %v1344_v59 = vadd.f32 %v1326_v29, %v1315_v55  ;;  %v3752_v14 = vld [vmem:[%s4568_s5 + $0x128] ss:$12 sps:$4 sm:$0xff]   ;;  %v3771_v30 = vld [vmem:[%s4568_s5 + $0x184] ss:$12 sps:$4 sm:$0xff]  }
 0x191   : > { %1897 = vmatprep.mubr.bf16.mxu0 %v1363_v42  ;;  %2003 = vmatprep.mubr.bf16.mxu1 %v1363_v42  ;;  %v1345_v54 = vadd.f32 %v1330_v27, %v1316_v52  ;;  %v1318_v56 = vld [vmem:[#allocation2 + $0x48] sm:$0xff]  ;;  %v3708_v42 = vld [vmem:[%s4568_s5 + $0x18] ss:$12 sps:$4 sm:$0xff]   ;;  %v3697_v46 = vld [vmem:[%s4566_s3 + $0x210] ss:$12 sps:$4 sm:$0xff]  }
 0x192   : > { %2004 = vmatmul.mubr.bf16.vlgmr.msra.gmra.mrb[0].mxu1 %v1362_v44  ;;  %v1319_v53 = vld [vmem:[#allocation2 + $0x50] sm:$0xff]  ;;  %1892 = vmatpush1.bf16.msra.mxu0 %v3660_v47  ;;  %v1347_v60 = vadd.f32 %v1326_v29, %v1318_v56  ;;  %v1356_v2 = vmax.f32 %v1344_v59, 0.0  ;;  %v3687_v29 = vld [vmem:[%s4566_s3 + $0x1cc] ss:$12 sps:$4 sm:$0xff]   ;;  %v3722_v55 = vld [vmem:[%s4568_s5 + $0x7c] ss:$12 sps:$4 sm:$0xff]  }
 0x193   : > { %3347 = vmatpush3.bf16.msra.mxu1 %v3676_v35  ;;  %v1348_v58 = vadd.f32 %v1330_v27, %v1319_v53  ;;  %1893 = vmatprep.subr.bf16.mxu0 %v3663_v49  ;;  %v1357_v62 = vmax.f32 %v1345_v54, 0.0  ;;  %v3681_v27 = vld [vmem:[%s4566_s3 + $0x1b0] ss:$12 sps:$4 sm:$0xff]   ;;  %v3842_v35 = vmov 0   ;;  %v3716_v47 = vld [vmem:[%s4568_s5 + $0x4c] ss:$12 sps:$4 sm:$0xff]  }
 0x194   : > { %3348 = vmatprep.subr.bf16.mxu1 %v3680_v45  ;;  %v1359_v3 = vmax.f32 %v1347_v60, 0.0  ;;  %v3714_v49 = vld [vmem:[%s4568_s5 + $0x48] ss:$12 sps:$4 sm:$0xff]   ;;  %v3719_v52 = vld [vmem:[%s4568_s5 + $0x64] ss:$12 sps:$4 sm:$0xff]  }
 0x195   : > { %v1360_v0 = vmax.f32 %v1348_v58, 0.0  ;;  %v3732_v53 = vld [vmem:[%s4568_s5 + $0xc8] ss:$12 sps:$4 sm:$0xff]   ;;  %v3717_v54 = vld [vmem:[%s4568_s5 + $0x60] ss:$12 sps:$4 sm:$0xff]  }
 0x196   : > { %1894 = vmatpush1.bf16.msra.mxu0 %v3665_v50  ;;  %v1365_v12 = vpack.c.bf16 %v1359_v3, %v1356_v2  ;;  %v3701_v50 = vld [vmem:[%s4566_s3 + $0x228] ss:$12 sps:$4 sm:$0xff]   ;;  %v3720_v58 = vld [vmem:[%s4568_s5 + $0x78] ss:$12 sps:$4 sm:$0xff]   ;;  %v3738_v60 = vld [vmem:[%s4568_s5 + $0x20] ss:$12 sps:$4 sm:$0xff]  }
 0x197   : > { %3349 = vmatpush3.bf16.msra.mxu1 %v3680_v45  ;;  %v1366_v5 = vpack.c.bf16 %v1360_v0, %v1357_v62  ;;  %1895 = vmatprep.subr.bf16.mxu0 %v3668_v61  ;;  %v3711_v45 = vld [vmem:[%s4568_s5 + $0x30] ss:$12 sps:$4 sm:$0xff]   ;;  %v3733_v56 = vld [vmem:[%s4568_s5 + $0x8] ss:$12 sps:$4 sm:$0xff]   ;;  %v3742_v61 = vld [vmem:[%s4568_s5 + $0xf8] ss:$12 sps:$4 sm:$0xff]  }
 0x198   : > { %3350 = vmatprep.subr.bf16.mxu1 %v3684_v48  ;;  %v3725_v59 = vld [vmem:[%s4568_s5 + $0x94] ss:$12 sps:$4 sm:$0xff]   ;;  %v3723_v62 = vld [vmem:[%s4568_s5 + $0x90] ss:$12 sps:$4 sm:$0xff]   ;;  %v3728_v63 = vld [vmem:[%s4568_s5 + $0xac] ss:$12 sps:$4 sm:$0xff]  }
 0x199   : > { %2011 = vmatprep.mubr.bf16.mxu1 %v1366_v5  ;;  %v3743_v0 = vld [vmem:[%s4568_s5 + $0x38] ss:$12 sps:$4 sm:$0xff]   ;;  %v3726_v2 = vld [vmem:[%s4568_s5 + $0xa8] ss:$12 sps:$4 sm:$0xff]  }
 0x19a   : > { %1896 = vmatpush1.bf16.msra.mxu0 %v3670_v1  ;;  %2012 = vmatmul.mubr.bf16.gmra.mrb[4].mxu1 %v1365_v12  ;;  %v3747_v1 = vld [vmem:[%s4568_s5 + $0x110] ss:$12 sps:$4 sm:$0xff]   ;;  %v3753_v15 = vld [vmem:[%s4568_s5 + $0x68] ss:$12 sps:$4 sm:$0xff]   ;;  %v3763_v25 = vld [vmem:[%s4568_s5 + $0x98] ss:$12 sps:$4 sm:$0xff]  }
 0x19b   : > { %3351 = vmatpush3.bf16.msra.mxu1 %v3684_v48  ;;  %1918 = vmatprep.subr.bf16.mxu0 %v3675_v6  ;;  %v3703_v48 = vld [vmem:[%s4566_s3 + $0x22c] ss:$12 sps:$4 sm:$0xff]   ;;  %v3731_v3 = vld [vmem:[%s4568_s5 + $0xc4] ss:$12 sps:$4 sm:$0xff]   ;;  %v3736_v6 = vld [vmem:[%s4568_s5 + $0xdc] ss:$12 sps:$4 sm:$0xff]  }
 0x19c   : > { %3352 = vmatprep.subr.bf16.mxu1 %v3688_v57  ;;  %3362 = vmatprep.mubr.bf16.mxu1 %v4234_v20  ;;  %v3761_v22 = vld [vmem:[%s4568_s5 + $0x154] ss:$12 sps:$4 sm:$0xff]   ;;  %v3766_v26 = vld [vmem:[%s4568_s5 + $0x16c] ss:$12 sps:$4 sm:$0xff]  }
 0x19d   : > { %1898 = vmatmul.mubr.bf16.vlgmr.msra.gmra.mrb[0].mxu0 %v1362_v44  ;;  %v3713_v44 = vld [vmem:[%s4568_s5 + $0x34] ss:$12 sps:$4 sm:$0xff]  }
 0x19e   : > { %1919 = vmatpush1.bf16.msra.mxu0 %v3673_v11  ;;  %1907 = vmatprep.mubr.bf16.mxu0 %v1366_v5  ;;  %v3729_v5 = vld [vmem:[%s4568_s5 + $0xc0] ss:$12 sps:$4 sm:$0xff]   ;;  %v3744_v11 = vld [vmem:[%s4568_s5 + $0x108] ss:$12 sps:$4 sm:$0xff]  }
 0x19f   : > { %3353 = vmatpush3.bf16.msra.mxu1 %v3688_v57  ;;  %1920 = vmatprep.subr.bf16.mxu0 %v3679_v16  ;;  %v3737_v57 = vld [vmem:[%s4568_s5 + $0xe0] ss:$12 sps:$4 sm:$0xff]   ;;  %v3754_v16 = vld [vmem:[%s4568_s5 + $0x138] ss:$12 sps:$4 sm:$0xff]   ;;  %v4432_v31 = vld [vmem:[%s4568_s5 + $0x188] ss:$12 sps:$4 sm:$0xff]  }
 0x1a0   : > { %3354 = vmatprep.subr.bf16.mxu1 %v3692_v4 }
 0x1a2   : > { %1921 = vmatpush1.bf16.msra.mxu0 %v3677_v19  ;;  %v3756_v19 = vld [vmem:[%s4568_s5 + $0x13c] ss:$12 sps:$4 sm:$0xff]  }
 0x1a3   : > { %3355 = vmatpush3.bf16.msra.mxu1 %v3692_v4  ;;  %1922 = vmatprep.subr.bf16.mxu0 %v3683_v24  ;;  %v3748_v4 = vld [vmem:[%s4568_s5 + $0x50] ss:$12 sps:$4 sm:$0xff]  }
 0x1a4   : > { %3356 = vmatprep.subr.bf16.mxu1 %v3696_v13  ;;  %v3759_v24 = vld [vmem:[%s4568_s5 + $0x150] ss:$12 sps:$4 sm:$0xff]  }
 0x1a5   : > { %1908 = vmatmul.mubr.bf16.gmra.mrb[4].mxu0 %v1365_v12  ;;  %v3749_v12 = vld [vmem:[%s4568_s5 + $0x120] ss:$12 sps:$4 sm:$0xff]  }
 0x1a6   : > { %1923 = vmatpush1.bf16.msra.mxu0 %v3681_v27  ;;  %1950 = vmatprep.mubr.bf16.mxu0 %v3842_v35  ;;  %v3767_v27 = vld [vmem:[%s4568_s5 + $0x170] ss:$12 sps:$4 sm:$0xff]  }
 0x1a7   : > { %3357 = vmatpush3.bf16.msra.mxu1 %v3696_v13  ;;  %1924 = vmatprep.subr.bf16.mxu0 %v3687_v29  ;;  %v3751_v13 = vld [vmem:[%s4568_s5 + $0x124] ss:$12 sps:$4 sm:$0xff]  }
 0x1a8   : > { %3358 = vmatprep.subr.bf16.mxu1 %v3700_v23  ;;  %v3768_v29 = vld [vmem:[%s4568_s5 + $0xb0] ss:$12 sps:$4 sm:$0xff]  }
 0x1aa   : > { %1925 = vmatpush1.bf16.msra.mxu0 %v3685_v32 }
 0x1ab   : > { %3359 = vmatpush3.bf16.msra.mxu1 %v3700_v23  ;;  %1926 = vmatprep.subr.bf16.mxu0 %v3691_v34  ;;  %v3762_v23 = vld [vmem:[%s4568_s5 + $0x158] ss:$12 sps:$4 sm:$0xff]  }
 0x1ac   : > { %3360 = vmatprep.subr.bf16.mxu1 %v3704_v28 }
 0x1ae   : > { %1927 = vmatpush1.bf16.msra.mxu0 %v3689_v36 }
 0x1af   : > { %3361 = vmatpush3.bf16.msra.mxu1 %v3704_v28  ;;  %1928 = vmatprep.subr.bf16.mxu0 %v3695_v40  ;;  %v3764_v28 = vld [vmem:[%s4568_s5 + $0x168] ss:$12 sps:$4 sm:$0xff]  }
 0x1b0   : > { %2584 = vmatprep.subr.bf16.mxu1 %v3707_v33 }
 0x1b2   : > { %3363 = vmatmul.mubr.bf16.vlgmr.msra.gmra.mrb[8].mxu1 %v1367_v37  ;;  %1929 = vmatpush1.bf16.msra.mxu0 %v3693_v41 }
 0x1b3   : > { %2585 = vmatpush1.bf16.msra.mxu1 %v3705_v38  ;;  %1930 = vmatprep.subr.bf16.mxu0 %v3699_v43 }
 0x1b4   : > { %2586 = vmatprep.subr.bf16.mxu1 %v3710_v39 }
 0x1b6   : > { %1931 = vmatpush1.bf16.msra.mxu0 %v3697_v46 }
 0x1b7   : > { %2587 = vmatpush1.bf16.msra.mxu1 %v3708_v42  ;;  %1932 = vmatprep.subr.bf16.mxu0 %v3703_v48 }
 0x1b8   : > { %2588 = vmatprep.subr.bf16.mxu1 %v3713_v44 }
 0x1ba   : > { %1933 = vmatpush1.bf16.msra.mxu0 %v3701_v50 }
 0x1bb   : > { %2589 = vmatpush1.bf16.msra.mxu1 %v3711_v45  ;;  %3308 = vmatprep.subr.bf16.mxu0 %v3732_v53  ;;  %v1464_v45 = vld [vmem:[%s4567_s4] sm:$0x7] }
 0x1bc   : > { %2590 = vmatprep.subr.bf16.mxu1 %v3716_v47  ;;  %v1477_v46 = vrot.slane %v1464_v45, %v4204_v51 }
 0x1bd   : > { %1951 = vmatmul.mubr.bf16.vlgmr.msra.gmra.mrb[0].mxu0 %v4234_v20  ;;  %v3757_v20 = vld [vmem:[%s4568_s5 + $0x140] ss:$12 sps:$4 sm:$0xff]  }
 0x1be   : > { %1960 = vmatprep.mubr.bf16.mxu0 %v3842_v35  ;;  %3309 = vmatpush3.bf16.msra.mxu0 %v3733_v56 }
 0x1bf   : > { %2591 = vmatpush1.bf16.msra.mxu1 %v3714_v49  ;;  %3310 = vmatprep.subr.bf16.mxu0 %v3737_v57 }
 0x1c0   : > { %2592 = vmatprep.subr.bf16.mxu1 %v3719_v52 }
 0x1c2   : > { %3311 = vmatpush3.bf16.msra.mxu0 %v3738_v60 }
 0x1c3   : > { %2593 = vmatpush1.bf16.msra.mxu1 %v3717_v54  ;;  %3312 = vmatprep.subr.bf16.mxu0 %v3742_v61 }
 0x1c4   : > { %2594 = vmatprep.subr.bf16.mxu1 %v3722_v55 }
 0x1c5   : > { %1961 = vmatmul.mubr.bf16.gmra.mrb[4].mxu0 %v1367_v37 }
 0x1c6   : > { %3313 = vmatpush3.bf16.msra.mxu0 %v3743_v0 }
 0x1c7   : > { %2595 = vmatpush1.bf16.msra.mxu1 %v3720_v58  ;;  %3314 = vmatprep.subr.bf16.mxu0 %v3747_v1 }
 0x1c8   : > { %2596 = vmatprep.subr.bf16.mxu1 %v3725_v59 }
 0x1ca   : > { %3315 = vmatpush3.bf16.msra.mxu0 %v3748_v4 }
 0x1cb   : > { %2597 = vmatpush1.bf16.msra.mxu1 %v3723_v62  ;;  %3316 = vmatprep.subr.bf16.mxu0 %v3752_v14 }
 0x1cc   : > { %2598 = vmatprep.subr.bf16.mxu1 %v3728_v63 }
 0x1ce   : > { %3317 = vmatpush3.bf16.msra.mxu0 %v3753_v15 }
 0x1cf   : > { %2599 = vmatpush1.bf16.msra.mxu1 %v3726_v2  ;;  %3318 = vmatprep.subr.bf16.mxu0 %v3757_v20  ;;  %v1469_v2 = vrot.slane %v1464_v45, %v4151_v18 }
 0x1d0   : > { %2600 = vmatprep.subr.bf16.mxu1 %v3731_v3  ;;  %v1473_v3 = vrot.slane %v1464_v45, %v4148_v17  ;;  %v3787_v45 = vld [vmem:[%s4568_s5 + $0x1e4] ss:$12 sps:$4 sm:$0xff]  }
 0x1d2   : > { %3319 = vmatpush3.bf16.msra.mxu0 %v3758_v21  ;;  %v3769_v21 = vld [vmem:[%s4568_s5 + $0x180] ss:$12 sps:$4 sm:$0xff]  }
 0x1d3   : > { %2601 = vmatpush1.bf16.msra.mxu1 %v3729_v5  ;;  %3320 = vmatprep.subr.bf16.mxu0 %v3762_v23 }
 0x1d4   : > { %2602 = vmatprep.subr.bf16.mxu1 %v3736_v6 }
 0x1d6   : > { %3321 = vmatpush3.bf16.msra.mxu0 %v3763_v25  ;;  %v3776_v25 = vld [vmem:[%s4568_s5 + $0x1a0] ss:$12 sps:$4 sm:$0xff]  }
 0x1d7   : > { %2603 = vmatpush1.bf16.msra.mxu1 %v3734_v7  ;;  %3322 = vmatprep.subr.bf16.mxu0 %v3767_v27 }
 0x1d8   : > { %2604 = vmatprep.subr.bf16.mxu1 %v3741_v8 }
 0x1da   : > { %3323 = vmatpush3.bf16.msra.mxu0 %v3768_v29 }
 0x1db   : > { %2605 = vmatpush1.bf16.msra.mxu1 %v3739_v9  ;;  %3366 = vmatprep.subr.bf16.mxu0 %v4432_v31 }
 0x1dc   : > { %2606 = vmatprep.subr.bf16.mxu1 %v3746_v10 }
 0x1df   : > { %2607 = vmatpush1.bf16.msra.mxu1 %v3744_v11 }
 0x1e0   : > { %2608 = vmatprep.subr.bf16.mxu1 %v3751_v13 }
 0x1e3   : > { %2609 = vmatpush1.bf16.msra.mxu1 %v3749_v12 }
 0x1e4   : > { %2610 = vmatprep.subr.bf16.mxu1 %v3756_v19 }
 0x1e7   : > { %2611 = vmatpush1.bf16.msra.mxu1 %v3754_v16 }
 0x1e8   : > { %2612 = vmatprep.subr.bf16.mxu1 %v3761_v22 }
 0x1eb   : > { %2613 = vmatpush1.bf16.msra.mxu1 %v3759_v24  ;;  %v3775_v24 = vld [vmem:[%s4568_s5 + $0x19c] ss:$12 sps:$4 sm:$0xff]  }
 0x1ec   : > { %2614 = vmatprep.subr.bf16.mxu1 %v3766_v26 }
 0x1ef   : > { %2615 = vmatpush1.bf16.msra.mxu1 %v3764_v28 }
 0x1f0   : > { %2637 = vmatprep.subr.bf16.mxu1 %v3771_v30 }
 0x265   : > { %v3286_v32 = vpop.f32.mrb[0].mxu1 }
 0x266   : > { %v3287_v33 = vpop.f32.mrb[1].mxu1 }
 0x267   : > { %v3288_v34 = vadd.f32 %v3287_v33, %v3286_v32  ;;  %v3289_v36 = vpop.f32.mrb[2].mxu1  ;;  %v3773_v32 = vld [vmem:[%s4568_s5 + $0x198] ss:$12 sps:$4 sm:$0xff]  }
 0x268   : > { %v3290_v37 = vpop.f32.mrb[3].mxu1 }
 0x269   : > { %v3291_v38 = vadd.f32 %v3290_v37, %v3289_v36  ;;  %v2006_v48 = vadd.f32 %v3288_v34, %v1477_v46  ;;  %v3779_v36 = vld [vmem:[%s4568_s5 + $0x1b4] ss:$12 sps:$4 sm:$0xff]   ;;  %v3780_v37 = vld [vmem:[%s4568_s5 + $0x1b8] ss:$12 sps:$4 sm:$0xff]  }
 0x26b   : > { %v2009_v52 = vadd.f32 %v3291_v38, %v1477_v46 }
 0x26d   : > { %v3292_v39 = vpop.f32.mrb[4].mxu1 }
 0x26e   : > { %v3293_v40 = vpop.f32.mrb[5].mxu1 }
 0x26f   : > { %v3294_v41 = vadd.f32 %v3293_v40, %v3292_v39  ;;  %v3295_v42 = vpop.f32.mrb[6].mxu1 }
 0x270   : > { %v3296_v43 = vpop.f32.mrb[7].mxu1 }
 0x271   : > { %v3297_v44 = vadd.f32 %v3296_v43, %v3295_v42  ;;  %v2014_v47 = vadd.f32 %v3294_v41, %v1477_v46  ;;  %v3777_v41 = vld [vmem:[%s4568_s5 + $0x1b0] ss:$12 sps:$4 sm:$0xff]   ;;  %v3783_v42 = vld [vmem:[%s4568_s5 + $0x1cc] ss:$12 sps:$4 sm:$0xff]  }
 0x272   : > { %v3784_v43 = vld [vmem:[%s4568_s5 + $0x1d0] ss:$12 sps:$4 sm:$0xff]  }
 0x273   : > { %v2017_v49 = vadd.f32 %v3297_v44, %v1477_v46  ;;  %v3781_v44 = vld [vmem:[%s4568_s5 + $0x1c8] ss:$12 sps:$4 sm:$0xff]  }
 0x274   : > { %v3788_v46 = vld [vmem:[%s4568_s5 + $0x1e8] ss:$12 sps:$4 sm:$0xff]  }
 0x285   : > { %v3364_v50 = vpop.f32.mrb[8].mxu1 }
 0x286   : > { %v2063_v53 = vadd.f32 %v3364_v50, %v2014_v47  ;;  %v2054_v54 = vpop.f32.mrb[9].mxu1  ;;  %v3785_v47 = vld [vmem:[%s4568_s5 + $0x1e0] ss:$12 sps:$4 sm:$0xff]   ;;  %v3789_v50 = vld [vmem:[%s4568_s5 + $0x1f8] ss:$12 sps:$4 sm:$0xff]  }
 0x287   : > { %v2055_v55 = vadd.f32 %v2054_v54, %v2006_v48  ;;  %v3365_v56 = vpop.f32.mrb[10].mxu1  ;;  %v3791_v48 = vld [vmem:[%s4568_s5 + $0x1fc] ss:$12 sps:$4 sm:$0xff]  }
 0x288   : > { %v2077_v57 = vmax.f32 %v2063_v53, 0.0  ;;  %v2066_v58 = vadd.f32 %v3365_v56, %v2017_v49  ;;  %v2057_v59 = vpop.f32.mrb[11].mxu1  ;;  %v3792_v49 = vld [vmem:[%s4568_s5 + $0x200] ss:$12 sps:$4 sm:$0xff]   ;;  %v3796_v53 = vld [vmem:[%s4568_s5 + $0x218] ss:$12 sps:$4 sm:$0xff]  }
 0x289   : > { %v2071_v60 = vmax.f32 %v2055_v55, 0.0  ;;  %v2058_v61 = vadd.f32 %v2057_v59, %v2009_v52  ;;  %v3795_v52 = vld [vmem:[%s4568_s5 + $0x214] ss:$12 sps:$4 sm:$0xff]   ;;  %v3793_v54 = vld [vmem:[%s4568_s5 + $0x210] ss:$12 sps:$4 sm:$0xff]  }
 0x28a   : > { %v2080_v62 = vmax.f32 %v2066_v58, 0.0  ;;  %v3799_v55 = vld [vmem:[%s4568_s5 + $0x22c] ss:$12 sps:$4 sm:$0xff]   ;;  %v3800_v56 = vld [vmem:[%s4568_s5 + $0x230] ss:$12 sps:$4 sm:$0xff]  }
 0x28b   : > { %v2074_v63 = vmax.f32 %v2058_v61, 0.0 }
 0x28c   : > { %v4439_v0 = vpack.c.bf16 %v2080_v62, %v2077_v57  ;;  %v3797_v57 = vld [vmem:[%s4568_s5 + $0x228] ss:$12 sps:$4 sm:$0xff]  }
 0x28d   : > { %v4441_v1 = vpack.c.bf16 %v2074_v63, %v2071_v60 }
 0x290   : > { %v1952_v4 = vpop.f32.mrb[0].mxu0 }
 0x291   : > { %v3394_v5 = vadd.f32 %v1952_v4, %v1469_v2  ;;  %v1954_v6 = vpop.f32.mrb[1].mxu0 }
 0x292   : > { %v3395_v7 = vadd.f32 %v1954_v6, %v1473_v3  ;;  %v1956_v8 = vpop.f32.mrb[2].mxu0 }
 0x293   : > { %v3396_v9 = vadd.f32 %v1956_v8, %v1469_v2  ;;  %v1958_v10 = vpop.f32.mrb[3].mxu0  ;;  %v2069_v12 = vmax.f32 %v3394_v5, 0.0 }
 0x294   : > { %v3397_v11 = vadd.f32 %v1958_v10, %v1473_v3  ;;  %v2070_v14 = vmax.f32 %v3395_v7, 0.0 }
 0x295   : > { %v2072_v13 = vmax.f32 %v3396_v9, 0.0 }
 0x296   : > { %v2073_v15 = vmax.f32 %v3397_v11, 0.0 }
 0x297   : > { %v2081_v16 = vpack.c.bf16 %v2072_v13, %v2069_v12 }
 0x298   : > { %v2082_v19 = vpack.c.bf16 %v2073_v15, %v2070_v14  ;;  %v1962_v20 = vpop.f32.mrb[4].mxu0 }
 0x299   : > { %v3398_v22 = vadd.f32 %v1962_v20, %v1469_v2  ;;  %v1964_v23 = vpop.f32.mrb[5].mxu0 }
 0x29a   : > { %v3399_v26 = vadd.f32 %v1964_v23, %v1473_v3  ;;  %v1966_v27 = vpop.f32.mrb[6].mxu0  ;;  %2616 = vmatprep.mubr.bf16.mxu1 %v2082_v19  ;;  %2722 = vmatprep.mubr.bf16.mxu0 %v2082_v19 }
 0x29b   : > { %v3400_v28 = vadd.f32 %v1966_v27, %v1469_v2  ;;  %v1968_v29 = vpop.f32.mrb[7].mxu0  ;;  %2617 = vmatmul.mubr.bf16.vlgmr.msra.gmra.mrb[12].mxu1 %v2081_v16  ;;  %2723 = vmatmul.mubr.bf16.vlgmr.msra.gmra.mrb[8].mxu0 %v2081_v16  ;;  %v2075_v33 = vmax.f32 %v3398_v22, 0.0 }
 0x29c   : > { %v3401_v30 = vadd.f32 %v1968_v29, %v1473_v3  ;;  %2638 = vmatpush1.bf16.msra.mxu1 %v3769_v21  ;;  %3367 = vmatpush3.bf16.msra.mxu0 %v4432_v31  ;;  %v2076_v38 = vmax.f32 %v3399_v26, 0.0 }
 0x29d   : > { %v2078_v34 = vmax.f32 %v3400_v28, 0.0  ;;  %2639 = vmatprep.subr.bf16.mxu1 %v3775_v24  ;;  %3368 = vmatprep.subr.bf16.mxu0 %v3776_v25 }
 0x29e   : > { %v2079_v39 = vmax.f32 %v3401_v30, 0.0 }
 0x29f   : > { %v2084_v40 = vpack.c.bf16 %v2078_v34, %v2075_v33 }
 0x2a0   : > { %v2085_v31 = vpack.c.bf16 %v2079_v39, %v2076_v38  ;;  %2640 = vmatpush1.bf16.msra.mxu1 %v3773_v32  ;;  %3369 = vmatpush3.bf16.msra.mxu0 %v3776_v25 }
 0x2a1   : > { %2641 = vmatprep.subr.bf16.mxu1 %v3779_v36  ;;  %3370 = vmatprep.subr.bf16.mxu0 %v3780_v37 }
 0x2a2   : > { %2626 = vmatprep.mubr.bf16.mxu1 %v2085_v31  ;;  %2730 = vmatprep.mubr.bf16.mxu0 %v2085_v31 }
 0x2a3   : > { %2627 = vmatmul.mubr.bf16.gmra.mrb[16].mxu1 %v2084_v40  ;;  %2731 = vmatmul.mubr.bf16.gmra.mrb[12].mxu0 %v2084_v40 }
 0x2a4   : > { %2642 = vmatpush1.bf16.msra.mxu1 %v3777_v41  ;;  %3371 = vmatpush3.bf16.msra.mxu0 %v3780_v37 }
 0x2a5   : > { %3382 = vmatprep.mubr.bf16.mxu0 %v4441_v1  ;;  %2643 = vmatprep.subr.bf16.mxu1 %v3783_v42 }
 0x2a6   : > { %3372 = vmatprep.subr.bf16.mxu0 %v3784_v43  ;;  %2669 = vmatprep.mubr.bf16.mxu1 %v3842_v35 }
 0x2a8   : > { %2644 = vmatpush1.bf16.msra.mxu1 %v3781_v44  ;;  %3373 = vmatpush3.bf16.msra.mxu0 %v3784_v43 }
 0x2a9   : > { %2645 = vmatprep.subr.bf16.mxu1 %v3787_v45  ;;  %3374 = vmatprep.subr.bf16.mxu0 %v3788_v46 }
 0x2ac   : > { %2646 = vmatpush1.bf16.msra.mxu1 %v3785_v47  ;;  %3375 = vmatpush3.bf16.msra.mxu0 %v3788_v46 }
 0x2ad   : > { %2647 = vmatprep.subr.bf16.mxu1 %v3791_v48  ;;  %3376 = vmatprep.subr.bf16.mxu0 %v3792_v49 }
 0x2b0   : > { %2648 = vmatpush1.bf16.msra.mxu1 %v3789_v50  ;;  %3377 = vmatpush3.bf16.msra.mxu0 %v3792_v49 }
 0x2b1   : > { %2649 = vmatprep.subr.bf16.mxu1 %v3795_v52  ;;  %3378 = vmatprep.subr.bf16.mxu0 %v3796_v53 }
 0x2b4   : > { %2650 = vmatpush1.bf16.msra.mxu1 %v3793_v54  ;;  %3379 = vmatpush3.bf16.msra.mxu0 %v3796_v53 }
 0x2b5   : > { %2651 = vmatprep.subr.bf16.mxu1 %v3799_v55  ;;  %3380 = vmatprep.subr.bf16.mxu0 %v3800_v56 }
 0x2b8   : > { %2652 = vmatpush1.bf16.msra.mxu1 %v3797_v57  ;;  %3381 = vmatpush3.bf16.msra.mxu0 %v3800_v56 }
 0x2bb   : > { %2670 = vmatmul.mubr.bf16.vlgmr.msra.gmra.mrb[12].mxu1 %v4441_v1  ;;  %3383 = vmatmul.mubr.bf16.vlgmr.msra.gmra.mrb[16].mxu0 %v4439_v0  ;;  %v2183_v1 = vld [vmem:[%s4569_s6] sm:$0x7] }
 0x2bc   : > { %2679 = vmatprep.mubr.bf16.mxu1 %v3842_v35  ;;  %v2196_v35 = vrot.slane %v2183_v1, %v4204_v51  ;;  %v2192_v8 = vrot.slane %v2183_v1, %v4148_v17 }
 0x2c3   : > { %2680 = vmatmul.mubr.bf16.gmra.mrb[16].mxu1 %v4439_v0  ;;  %v2188_v0 = vrot.slane %v2183_v1, %v4151_v18 }
 0x36e   : > { %v3324_v58 = vpop.f32.mrb[8].mxu0 }
 0x36f   : > { %v3325_v59 = vpop.f32.mrb[9].mxu0 }
 0x370   : > { %v3326_v60 = vadd.f32 %v3325_v59, %v3324_v58  ;;  %v3327_v61 = vpop.f32.mrb[10].mxu0 }
 0x371   : > { %v3328_v62 = vpop.f32.mrb[11].mxu0 }
 0x372   : > { %v3329_v63 = vadd.f32 %v3328_v62, %v3327_v61  ;;  %v2725_v12 = vadd.f32 %v3326_v60, %v2196_v35 }
 0x374   : > { %v2728_v24 = vadd.f32 %v3329_v63, %v2196_v35 }
 0x376   : > { %v3330_v2 = vpop.f32.mrb[12].mxu0 }
 0x377   : > { %v3331_v3 = vpop.f32.mrb[13].mxu0 }
 0x378   : > { %v3332_v4 = vadd.f32 %v3331_v3, %v3330_v2  ;;  %v3333_v5 = vpop.f32.mrb[14].mxu0 }
 0x379   : > { %v3334_v6 = vpop.f32.mrb[15].mxu0 }
 0x37a   : > { %v3335_v7 = vadd.f32 %v3334_v6, %v3333_v5  ;;  %v2733_v9 = vadd.f32 %v3332_v4, %v2196_v35 }
 0x37c   : > { %v2736_v19 = vadd.f32 %v3335_v7, %v2196_v35 }
 0x38e   : > { %v2671_v10 = vpop.f32.mrb[12].mxu1  ;;  %v3384_v11 = vpop.f32.mrb[16].mxu0 }
 0x38f   : > { %v3402_v13 = vadd.f32 %v2671_v10, %v2188_v0  ;;  %v2782_v14 = vadd.f32 %v3384_v11, %v2733_v9  ;;  %v2673_v15 = vpop.f32.mrb[13].mxu1  ;;  %v2773_v16 = vpop.f32.mrb[17].mxu0 }
 0x390   : > { %v3403_v20 = vadd.f32 %v2673_v15, %v2192_v8  ;;  %v2774_v21 = vadd.f32 %v2773_v16, %v2725_v12  ;;  %v2675_v22 = vpop.f32.mrb[14].mxu1  ;;  %v3385_v23 = vpop.f32.mrb[18].mxu0 }
 0x391   : > { %v2788_v25 = vmax.f32 %v3402_v13, 0.0  ;;  %v2796_v51 = vmax.f32 %v2782_v14, 0.0  ;;  %v3404_v26 = vadd.f32 %v2675_v22, %v2188_v0  ;;  %v2785_v18 = vadd.f32 %v3385_v23, %v2736_v19  ;;  %v2677_v27 = vpop.f32.mrb[15].mxu1  ;;  %v2776_v17 = vpop.f32.mrb[19].mxu0 }
 0x392   : > { %v2789_v28 = vmax.f32 %v3403_v20, 0.0  ;;  %v2790_v29 = vmax.f32 %v2774_v21, 0.0  ;;  %v3405_v30 = vadd.f32 %v2677_v27, %v2192_v8  ;;  %v2777_v32 = vadd.f32 %v2776_v17, %v2728_v24 }
 0x393   : > { %v3211_v33 = vpack.c.bf16 %v2796_v51, %v2796_v51  ;;  %v2791_v34 = vmax.f32 %v3404_v26, 0.0  ;;  %v2799_v36 = vmax.f32 %v2785_v18, 0.0 }
 0x394   : > { %v3206_v37 = vpack.c.bf16 %v2789_v28, %v2788_v25  ;;  %v3207_v38 = vpack.c.bf16 %v2790_v29, %v2790_v29  ;;  %v2792_v39 = vmax.f32 %v3405_v30, 0.0  ;;  %v2793_v40 = vmax.f32 %v2777_v32, 0.0 }
 0x395   : > { %2845 = vst [vmem:[%s4570_s7 + $0x20] sm:$0xf] %v3211_v33  ;;  %v3213_v31 = vpack.c.bf16 %v2799_v36, %v2799_v36 }
 0x396   : > { %2840 = vst [vmem:[%s4570_s7] sm:$0xff] %v3206_v37  ;;  %2841 = vst [vmem:[%s4570_s7 + $0x8] sm:$0xf] %v3207_v38  ;;  %v3208_v41 = vpack.c.bf16 %v2792_v39, %v2791_v34  ;;  %v3209_v42 = vpack.c.bf16 %v2793_v40, %v2793_v40  ;;  %v2681_v43 = vpop.f32.mrb[16].mxu1 }
 0x397   : > { %2847 = vst [vmem:[%s4570_s7 + $0x2c] sm:$0xf] %v3213_v31  ;;  %v3406_v44 = vadd.f32 %v2681_v43, %v2188_v0  ;;  %v2683_v45 = vpop.f32.mrb[17].mxu1 }
 0x398   : > { %2842 = vst [vmem:[%s4570_s7 + $0xc] sm:$0xff] %v3208_v41  ;;  %2843 = vst [vmem:[%s4570_s7 + $0x14] sm:$0xf] %v3209_v42  ;;  %v3407_v46 = vadd.f32 %v2683_v45, %v2192_v8  ;;  %v2685_v47 = vpop.f32.mrb[18].mxu1 }
 0x399   : > { %v2794_v48 = vmax.f32 %v3406_v44, 0.0  ;;  %v3408_v49 = vadd.f32 %v2685_v47, %v2188_v0  ;;  %v2687_v50 = vpop.f32.mrb[19].mxu1 }
 0x39a   : > { %v2795_v52 = vmax.f32 %v3407_v46, 0.0  ;;  %v3409_v53 = vadd.f32 %v2687_v50, %v2192_v8 }
 0x39b   : > { %v2797_v54 = vmax.f32 %v3408_v49, 0.0 }
 0x39c   : > { %v3210_v55 = vpack.c.bf16 %v2795_v52, %v2794_v48  ;;  %v2798_v56 = vmax.f32 %v3409_v53, 0.0 }
 0x39e   : > { %2844 = vst [vmem:[%s4570_s7 + $0x18] sm:$0xff] %v3210_v55  ;;  %v3212_v57 = vpack.c.bf16 %v2798_v56, %v2797_v54 }
 0x3a0   : > { %2846 = vst [vmem:[%s4570_s7 + $0x24] sm:$0xff] %v3212_v57 }
 0x3a1 PF: > { %s17_s28 = sadd.s32 1, %s3839_s28   ;;  %s4571_s24 = smov %s3827_s25 }
 0x3a2   : > { %p14_p12 = scmp.ge.s32.totalorder %s17_s28, 7   ;;  %s4572_s25 = smov %s3918_s9 }
 0x3a3   : > { %s4573_s26 = smov %s3835_s27  ;;  %s4574_s27 = smov %s4576_s29 }
 0x3a4   :  { %16 = sbr.rel (!%p14_p12) target bundleno = 3 (0x3), region = 117 }

// kernel: nin_forward.15
= control target key start
LH: loop header
LB: loop body
LE: loop exit
PB: predicated region body
PF: predicated region fallthrough
CT: control target
= control target key end

     0   :  { %v17_v2 = vlaneseq  ;;  %s98_s0 = inlined_call_operand.vmem [shape: bf16[2,1,10], index: 0, kind: input, shape index: {}]   ;;  %s99_s1 = inlined_call_operand.hbm [shape: f32[2,10], index: 1, kind: output, shape index: {}]  }
   0x1   :  { %v9_v0 = vld [vmem:[%s98_s0] sm:$0x1]  ;;  %v10_v1 = vld [vmem:[%s98_s0 + $0x1] sm:$0x1] }
   0x2   :  { %6 = vsyncpa [#allocation3], 0  ;;  %v11_v3 = vunpack.c.l.bf16 %v9_v0  ;;  %v12_v4 = vunpack.c.l.bf16 %v10_v1  ;;  %v18_v5 = vshrl.u32 %v17_v2, 7  ;;  %s69_s10 = smov [#allocation2]   ;;  %vm25_vm0 = vcmask 1041409  }
   0x3   :  { %s36_s11 = sshll.u32 %s69_s10, 4  ;;  %vm28_vm1 = vcmask 74752   ;;  %s37_s11 = int_to_ptr.vmem [resolvable:$true] %s36_s11 }
   0x4   :  { %v19_v6 = vsub.s32 0, %v18_v5  ;;  %s45_s12 = scalar_lea.vmem %s37_s11, 32  ;;  %p50_p1 = scmp.lt.s32.totalorder %s37_s11, %s37_s11 }
   0x5   :  { %p46_p0 = scmp.ne.s32.totalorder %s37_s11, %s45_s12  ;;  %p51_p2 = scmp.lt.s32.totalorder %s45_s12, %s45_s12 }
   0x6   :  { %v20_v7 = vrot.slane %v11_v3, %v19_v6  ;;  %v24_v8 = vrot.slane %v12_v4, %v19_v6 }
   0x7   :  { %p52_p3 = por %p51_p2, %p50_p1 }
   0x8   :  { %v26_v9 = vsel %vm25_vm0, %v24_v8, %v20_v7 }
   0x9   :  { %29 = vst.msk [vmem:[#allocation2] sm:$0x3] %vm28_vm1, %v26_v9  ;;  %p53_p4 = pnand %p52_p3, %p46_p0 }
   0xb   :  { %56 = shalt.err (!%p53_p4)
}
   0xc   :  { %s57_s14 = scalar_lea.hbm %s99_s1, 32 }
   0xd   :  { %p58_p5 = scmp.ne.s32.totalorder %s99_s1, %s57_s14  ;;  %p61_p6 = scmp.lt.u32.totalorder %s57_s14, %s99_s1 }
   0xf   :  { %p63_p7 = pnand %p61_p6, %p58_p5 }
  0x11   :  { %66 = shalt.err (!%p63_p7)
}
  0x12   :  { %39 = dma.vmem_to_hbm [thread:$0]  %s37_s11, 32, %s99_s1, [#allocation3]  }
  0x13   :  { %67 = dma.done.wait [#allocation3], 32  }
  0x14   :  { %68 = vsyncadd [#allocation3], 4294967264 }
  0x15   :  { %43 = vsyncpa [#allocation3], 1 }

</bundles_post_ra>
